<compile_context>
chip_gen: v6e
topology: v6e:2x2x1
jax: 0.10.0
libtpu: 0.0.40
codegen_flags: <defaults>
</compile_context>

<pallas_src>
import functools

import jax
import jax.numpy as jnp
from jax.experimental import pallas as pl
from jax.experimental.pallas import tpu as pltpu

BN_EPS = 1e-5


# --------------------------------------------------------------------------
# Fused ASPP kernel
# --------------------------------------------------------------------------
def _aspp_fused_kernel(x_ref, w0_ref, wdil_ref, bbr_ref, pool_ref, wproj_ref,
                       o_ref, *, H, W, pw, Cout, rates):
    """Fused ASPP forward for one batch element (whole image per grid step).

    x_ref     : (H, W + 2*pw, Cin) bf16  activation, zero-padded along W only
    w0_ref    : (Cin, Cout)        bf16  1x1 branch weight (BN folded)
    wdil_ref  : (R, 9, Cin, Cout)  bf16  dilated 3x3 weights, tap = ky*3+kx
    bbr_ref   : (1+R, 1, Cout)     f32   branch biases (BN folded)
    pool_ref  : (1, Cout)          f32   pooling branch already projected,
                                         plus the projection bias (per batch)
    wproj_ref : (1+R, Cout, Cout)  bf16  projection weight per conv branch
    o_ref     : (H*W, Cout)        f32   output pixels of this batch element
    """
    Cin = x_ref.shape[-1]
    R = len(rates)
    rows = H * W
    f32 = jnp.float32

    # Zero-shift window: shared by the 1x1 branch and the (ky,kx)=(1,1) tap of
    # every dilated branch -> materialized exactly once per grid step.
    # (Reshape merges H into the sublane dim; layout-free when W % 8 == 0.)
    center = x_ref[:, pw:pw + W, :].reshape(rows, Cin)

    # Pooling-branch contribution + projection bias (precomputed per batch).
    acc = jnp.broadcast_to(pool_ref[...], (rows, Cout))

    # ---- branch 0: 1x1 conv + BN + ReLU, projected immediately ----
    y = jnp.dot(center, w0_ref[...], preferred_element_type=f32) + bbr_ref[0]
    y = jnp.maximum(y, 0.0)
    acc = acc + jnp.dot(y.astype(jnp.bfloat16), wproj_ref[0],
                        preferred_element_type=f32)

    # ---- dilated 3x3 branches: 9-tap accumulation, no im2col anywhere ----
    for r, d in enumerate(rates):
        # centre tap reuses the hoisted slab
        yb = jnp.dot(center, wdil_ref[r, 4], preferred_element_type=f32)
        for ky in range(3):
            for kx in range(3):
                if ky == 1 and kx == 1:
                    continue                      # centre tap handled above
                dy, dx = (ky - 1) * d, (kx - 1) * d
                if abs(dy) >= H or abs(dx) >= W:
                    continue                      # tap reads only zero padding
                r0, r1 = max(0, -dy), min(H, H - dy)      # valid output rows
                # All W output columns at once; the W-only zero padding of the
                # input supplies out-of-range columns.  Row range, column
                # offset and sizes are all static -> plain static slices.
                src = x_ref[r0 + dy:r1 + dy, pw + dx:pw + dx + W, :]
                part = jnp.dot(src.reshape((r1 - r0) * W, Cin),
                               wdil_ref[r, ky * 3 + kx],
                               preferred_element_type=f32)
                pieces = []
                if r0:
                    pieces.append(jnp.zeros((r0 * W, Cout), f32))
                pieces.append(part)
                if H - r1:
                    pieces.append(jnp.zeros(((H - r1) * W, Cout), f32))
                yb = yb + (jnp.concatenate(pieces, axis=0)
                           if len(pieces) > 1 else part)
        yb = jnp.maximum(yb + bbr_ref[1 + r], 0.0)
        acc = acc + jnp.dot(yb.astype(jnp.bfloat16), wproj_ref[1 + r],
                            preferred_element_type=f32)

    # Final projection ReLU; Dropout(0.5) is identity at inference.
    o_ref[...] = jnp.maximum(acc, 0.0).astype(o_ref.dtype)


# --------------------------------------------------------------------------
# Host-side glue: BN folding, pooling-branch hoist, layout plumbing
# --------------------------------------------------------------------------
def fold_bn(gamma, beta, mean, var, eps=BN_EPS):
    scale = gamma / jnp.sqrt(var + eps)
    bias = beta - mean * scale
    return scale, bias


def _vmem_limit_bytes():
    """~85% of this generation's physical per-core VMEM (54 MiB on v7x,
    ~108 MiB on v5e/v6e), leaving headroom for compiler-internal scratch."""
    try:
        info = pltpu.get_tpu_info()
        cap = getattr(info, "vmem_capacity_bytes", None)
        if cap:
            return int(cap * 0.85)
    except Exception:
        pass
    return 48 * 1024 * 1024       # conservative fallback, fits every generation


def aspp_forward(x_nchw, params):
    N, Cin, H, W = x_nchw.shape
    rates = tuple(params["rates"])
    R = len(rates)
    Cout = params["b0_w"].shape[0]

    # Pad along W only, and only as far as the largest rate that can actually
    # reach back into the image (taps with rate >= W are skipped in-kernel).
    reachable = [d for d in rates if d < W]
    pw = max(reachable) if reachable else 0

    # NHWC bf16 activation; no H padding.
    x = jnp.transpose(x_nchw, (0, 2, 3, 1)).astype(jnp.bfloat16)
    xp = jnp.pad(x, ((0, 0), (0, 0), (pw, pw), (0, 0)))
    Wp = W + 2 * pw

    # ---- fold BN (inference) into conv weights; biases stay f32 ----
    s0, b0 = fold_bn(*params["b0_bn"])
    w0 = (params["b0_w"].reshape(Cout, Cin) * s0[:, None]).T.astype(jnp.bfloat16)
    wdil, bbr = [], [b0]
    for i, _d in enumerate(rates):
        s, b = fold_bn(*params[f"b{i + 1}_bn"])
        w = params[f"b{i + 1}_w"] * s[:, None, None, None]       # (Cout, Cin, 3, 3)
        wdil.append(jnp.transpose(w, (2, 3, 1, 0)).reshape(9, Cin, Cout))
        bbr.append(b)
    wdil = jnp.stack(wdil).astype(jnp.bfloat16)                  # (R, 9, Cin, Cout)
    bbr = jnp.stack(bbr).reshape(1 + R, 1, Cout).astype(jnp.float32)

    spj, bpj = fold_bn(*params["proj_bn"])
    wproj = (params["proj_w"].reshape(Cout, (2 + R) * Cout) * spj[:, None]).T
    wproj = wproj.reshape(2 + R, Cout, Cout)
    wproj_conv = wproj[:1 + R].astype(jnp.bfloat16)              # conv branches
    wproj_pool = wproj[1 + R]                                     # pool branch, f32

    # ---- pooling branch hoisted out of the grid (per batch, f32, host) ----
    # AdaptiveAvgPool2d(1) + 1x1 conv + BN + ReLU + bilinear-upsample(=bcast)
    # + its slice of the projection + projection bias, folded into one vector.
    sp, bp = fold_bn(*params["pool_bn"])
    wpool = (params["pool_w"].reshape(Cout, Cin) * sp[:, None]).T  # (Cin, Cout) f32
    pooled = jnp.mean(x_nchw, axis=(2, 3))                         # (N, Cin) f32
    pool_y = jnp.maximum(pooled @ wpool + bp, 0.0)                 # (N, Cout)
    pool_contrib = (pool_y @ wproj_pool + bpj).astype(jnp.float32)
    pool_contrib = pool_contrib.reshape(N, 1, Cout)

    kernel = functools.partial(_aspp_fused_kernel, H=H, W=W, pw=pw, Cout=Cout,
                               rates=rates)

    def build(single_buffer_invariants):
        def inv(shape, index_map):
            # Grid-invariant operands: a second pipeline buffer buys nothing,
            # so single-buffer them when this JAX supports pipeline_mode.
            if single_buffer_invariants:
                return pl.BlockSpec(shape, index_map,
                                    pipeline_mode=pl.Buffered(1))
            return pl.BlockSpec(shape, index_map)

        grid_spec = pltpu.PrefetchScalarGridSpec(
            num_scalar_prefetch=0,
            grid=(N,),
            in_specs=[
                pl.BlockSpec((None, H, Wp, Cin), lambda n: (n, 0, 0, 0)),
                inv((Cin, Cout), lambda n: (0, 0)),
                inv((R, 9, Cin, Cout), lambda n: (0, 0, 0, 0)),
                inv((1 + R, 1, Cout), lambda n: (0, 0, 0)),
                pl.BlockSpec((None, 1, Cout), lambda n: (n, 0, 0)),
                inv((1 + R, Cout, Cout), lambda n: (0, 0, 0)),
            ],
            out_specs=pl.BlockSpec((None, H * W, Cout), lambda n: (n, 0, 0)),
        )
        return pl.pallas_call(
            kernel,
            out_shape=jax.ShapeDtypeStruct((N, H * W, Cout), jnp.float32),
            grid_spec=grid_spec,
            compiler_params=pltpu.CompilerParams(
                dimension_semantics=("parallel",),
                vmem_limit_bytes=_vmem_limit_bytes(),
            ),
        )

    args = (xp, w0, wdil, bbr, pool_contrib, wproj_conv)
    want_single = hasattr(pl, "Buffered")
    try:
        out = build(want_single)(*args)
    except Exception:
        if not want_single:
            raise
        out = build(False)(*args)     # pipeline_mode unsupported -> default 2x buf

    out = out.reshape(N, H, W, Cout)
    return jnp.transpose(out, (0, 3, 1, 2))                      # back to NCHW


# --------------------------------------------------------------------------
# Pure-JAX reference (lax convs, f32) for correctness check
# --------------------------------------------------------------------------
def aspp_reference(x_nchw, params):
    x = jnp.transpose(x_nchw, (0, 2, 3, 1))
    N, H, W, Cin = x.shape

    def conv_bn_relu(inp, w, bn, dilation=1):
        d = dilation
        kh = w.shape[2]
        pad = d * (kh - 1) // 2
        w_hwio = jnp.transpose(w, (2, 3, 1, 0))
        y = jax.lax.conv_general_dilated(
            inp, w_hwio, (1, 1), [(pad, pad), (pad, pad)],
            rhs_dilation=(d, d),
            dimension_numbers=("NHWC", "HWIO", "NHWC"),
            precision=jax.lax.Precision.HIGHEST,
        )
        gamma, beta, mean, var = bn
        y = (y - mean) / jnp.sqrt(var + BN_EPS) * gamma + beta
        return jnp.maximum(y, 0.0)

    outs = [conv_bn_relu(x, params["b0_w"], params["b0_bn"])]
    for i, r in enumerate(params["rates"]):
        outs.append(conv_bn_relu(x, params[f"b{i + 1}_w"], params[f"b{i + 1}_bn"], r))
    pooled = jnp.mean(x, axis=(1, 2), keepdims=True)
    py = conv_bn_relu(pooled, params["pool_w"], params["pool_bn"])
    outs.append(jnp.broadcast_to(py, (N, H, W, py.shape[-1])))
    cat = jnp.concatenate(outs, axis=-1)
    out = conv_bn_relu(cat, params["proj_w"], params["proj_bn"])
    return jnp.transpose(out, (0, 3, 1, 2))


# --------------------------------------------------------------------------
# Deterministic parameter init (mirrors the nn.Module __init__ shapes)
# --------------------------------------------------------------------------
def init_params(key, in_channels, out_channels, rates):
    keys = iter(jax.random.split(key, 32))

    def conv_w(shape):
        fan_in = shape[1] * shape[2] * shape[3]
        bound = 1.0 / (fan_in ** 0.5)
        return jax.random.uniform(next(keys), shape, jnp.float32, -bound, bound)

    def bn(c):
        gamma = jax.random.uniform(next(keys), (c,), jnp.float32, 0.5, 1.5)
        beta = 0.1 * jax.random.normal(next(keys), (c,), jnp.float32)
        mean = 0.1 * jax.random.normal(next(keys), (c,), jnp.float32)
        var = jax.random.uniform(next(keys), (c,), jnp.float32, 0.5, 1.5)
        return (gamma, beta, mean, var)

    p = {"rates": tuple(rates)}
    p["b0_w"] = conv_w((out_channels, in_channels, 1, 1))
    p["b0_bn"] = bn(out_channels)
    for i, _r in enumerate(rates):
        p[f"b{i + 1}_w"] = conv_w((out_channels, in_channels, 3, 3))
        p[f"b{i + 1}_bn"] = bn(out_channels)
    p["pool_w"] = conv_w((out_channels, in_channels, 1, 1))
    p["pool_bn"] = bn(out_channels)
    n_branches = len(rates) + 2
    p["proj_w"] = conv_w((out_channels, n_branches * out_channels, 1, 1))
    p["proj_bn"] = bn(out_channels)
    return p


if __name__ == "__main__":
    key = jax.random.PRNGKey(0)
    k_x, k_p = jax.random.split(key)

    # Small shapes consistent with the module: NCHW input.
    N, Cin, H, W = 2, 4, 16, 16
    Cout = 32
    rates = [12, 24, 36]

    x = jax.random.normal(k_x, (N, Cin, H, W), jnp.float32)
    params = init_params(k_p, Cin, Cout, rates)

    out = jax.block_until_ready(aspp_forward(x, params))
    assert out.shape == (N, Cout, H, W), out.shape

    ref = jax.block_until_ready(aspp_reference(x, params))
    # bf16 MXU inputs with f32 accumulation -> slightly looser tolerance than f32.
    if not jnp.allclose(out, ref, rtol=3e-2, atol=3e-2):
        max_err = float(jnp.max(jnp.abs(out - ref)))
        raise AssertionError(f"Pallas ASPP mismatch vs reference, max_err={max_err}")

    print("KERNEL_OK")
</pallas_src>

<mosaic_0001>
module attributes {stable_mosaic.version = 11 : i64} {
  func.func @_aspp_fused_kernel(%arg0: i32, %arg1: memref<1x16x40x4xbf16, #tpu.memory_space<vmem>>, %arg2: memref<4x32xbf16, #tpu.memory_space<vmem>>, %arg3: memref<3x9x4x32xbf16, #tpu.memory_space<vmem>>, %arg4: memref<4x1x32xf32, #tpu.memory_space<vmem>>, %arg5: memref<1x1x32xf32, #tpu.memory_space<vmem>>, %arg6: memref<4x32x32xbf16, #tpu.memory_space<vmem>>, %arg7: memref<1x256x32xf32, #tpu.memory_space<vmem>>) attributes {dimension_semantics = [#tpu.dimension_semantics<parallel>], iteration_bounds = array<i64: 2>, scalar_prefetch = 0 : i64, scratch_operands = 0 : i64, tpu.core_type = #tpu.core_type<tc>, window_params = [{transform_indices = @transform_0, window_bounds = array<i64: 1, 16, 40, 4>}, {pipeline_mode = #tpu.pipeline_mode<synchronous>, transform_indices = @transform_1, window_bounds = array<i64: 4, 32>}, {pipeline_mode = #tpu.pipeline_mode<synchronous>, transform_indices = @transform_2, window_bounds = array<i64: 3, 9, 4, 32>}, {pipeline_mode = #tpu.pipeline_mode<synchronous>, transform_indices = @transform_3, window_bounds = array<i64: 4, 1, 32>}, {transform_indices = @transform_4, window_bounds = array<i64: 1, 1, 32>}, {pipeline_mode = #tpu.pipeline_mode<synchronous>, transform_indices = @transform_5, window_bounds = array<i64: 4, 32, 32>}, {transform_indices = @transform_6, window_bounds = array<i64: 1, 256, 32>}]} {
    %c0 = arith.constant 0 : index
    %c0_0 = arith.constant 0 : index
    %c12 = arith.constant 12 : index
    %c0_1 = arith.constant 0 : index
    %0 = vector.load %arg1[%c0, %c0_0, %c12, %c0_1] : memref<1x16x40x4xbf16, #tpu.memory_space<vmem>>, vector<1x16x16x4xbf16>
    %1 = vector.shape_cast %0 : vector<1x16x16x4xbf16> to vector<16x16x4xbf16>
    %2 = vector.shape_cast %1 : vector<16x16x4xbf16> to vector<256x4xbf16>
    %c0_2 = arith.constant 0 : index
    %c0_3 = arith.constant 0 : index
    %c0_4 = arith.constant 0 : index
    %3 = vector.load %arg5[%c0_2, %c0_3, %c0_4] : memref<1x1x32xf32, #tpu.memory_space<vmem>>, vector<1x1x32xf32>
    %4 = vector.shape_cast %3 : vector<1x1x32xf32> to vector<1x32xf32>
    %5 = vector.shape_cast %4 : vector<1x32xf32> to vector<1x32xf32>
    %6 = vector.broadcast %5 : vector<1x32xf32> to vector<256x32xf32>
    %c0_5 = arith.constant 0 : index
    %c0_6 = arith.constant 0 : index
    %7 = vector.load %arg2[%c0_5, %c0_6] : memref<4x32xbf16, #tpu.memory_space<vmem>>, vector<4x32xbf16>
    %cst = arith.constant dense<0.000000e+00> : vector<256x32xf32>
    %8 = tpu.matmul %2, %7, %cst {dimension_numbers = #tpu.dot_dimension_numbers<[1], [0], [0], [1], [0, 0, 1, 1], [], []>} : vector<256x4xbf16>, vector<4x32xbf16>, vector<256x32xf32> -> vector<256x32xf32>
    %c0_7 = arith.constant 0 : index
    %c0_8 = arith.constant 0 : index
    %c0_9 = arith.constant 0 : index
    %9 = vector.load %arg4[%c0_7, %c0_8, %c0_9] : memref<4x1x32xf32, #tpu.memory_space<vmem>>, vector<1x1x32xf32>
    %10 = vector.shape_cast %9 : vector<1x1x32xf32> to vector<1x32xf32>
    %11 = vector.broadcast %10 : vector<1x32xf32> to vector<256x32xf32>
    %12 = arith.addf %8, %11 : vector<256x32xf32>
    %cst_10 = arith.constant 0.000000e+00 : f32
    %13 = vector.broadcast %cst_10 : f32 to vector<256x32xf32>
    %14 = arith.maximumf %12, %13 : vector<256x32xf32>
    %15 = arith.truncf %14 : vector<256x32xf32> to vector<256x32xbf16>
    %c0_11 = arith.constant 0 : index
    %c0_12 = arith.constant 0 : index
    %c0_13 = arith.constant 0 : index
    %16 = vector.load %arg6[%c0_11, %c0_12, %c0_13] : memref<4x32x32xbf16, #tpu.memory_space<vmem>>, vector<1x32x32xbf16>
    %17 = vector.shape_cast %16 : vector<1x32x32xbf16> to vector<32x32xbf16>
    %cst_14 = arith.constant dense<0.000000e+00> : vector<256x32xf32>
    %18 = tpu.matmul %15, %17, %cst_14 {dimension_numbers = #tpu.dot_dimension_numbers<[1], [0], [0], [1], [0, 0, 1, 1], [], []>} : vector<256x32xbf16>, vector<32x32xbf16>, vector<256x32xf32> -> vector<256x32xf32>
    %19 = arith.addf %6, %18 : vector<256x32xf32>
    %c0_15 = arith.constant 0 : index
    %c4 = arith.constant 4 : index
    %c0_16 = arith.constant 0 : index
    %c0_17 = arith.constant 0 : index
    %20 = vector.load %arg3[%c0_15, %c4, %c0_16, %c0_17] : memref<3x9x4x32xbf16, #tpu.memory_space<vmem>>, vector<1x1x4x32xbf16>
    %21 = vector.shape_cast %20 : vector<1x1x4x32xbf16> to vector<4x32xbf16>
    %cst_18 = arith.constant dense<0.000000e+00> : vector<256x32xf32>
    %22 = tpu.matmul %2, %21, %cst_18 {dimension_numbers = #tpu.dot_dimension_numbers<[1], [0], [0], [1], [0, 0, 1, 1], [], []>} : vector<256x4xbf16>, vector<4x32xbf16>, vector<256x32xf32> -> vector<256x32xf32>
    %c0_19 = arith.constant 0 : index
    %c0_20 = arith.constant 0 : index
    %c0_21 = arith.constant 0 : index
    %c0_22 = arith.constant 0 : index
    %23 = vector.load %arg1[%c0_19, %c0_20, %c0_21, %c0_22] : memref<1x16x40x4xbf16, #tpu.memory_space<vmem>>, vector<1x4x16x4xbf16>
    %24 = vector.shape_cast %23 : vector<1x4x16x4xbf16> to vector<4x16x4xbf16>
    %25 = vector.shape_cast %24 : vector<4x16x4xbf16> to vector<64x4xbf16>
    %c0_23 = arith.constant 0 : index
    %c0_24 = arith.constant 0 : index
    %c0_25 = arith.constant 0 : index
    %c0_26 = arith.constant 0 : index
    %26 = vector.load %arg3[%c0_23, %c0_24, %c0_25, %c0_26] : memref<3x9x4x32xbf16, #tpu.memory_space<vmem>>, vector<1x1x4x32xbf16>
    %27 = vector.shape_cast %26 : vector<1x1x4x32xbf16> to vector<4x32xbf16>
    %cst_27 = arith.constant dense<0.000000e+00> : vector<64x32xf32>
    %28 = tpu.matmul %25, %27, %cst_27 {dimension_numbers = #tpu.dot_dimension_numbers<[1], [0], [0], [1], [0, 0, 1, 1], [], []>} : vector<64x4xbf16>, vector<4x32xbf16>, vector<64x32xf32> -> vector<64x32xf32>
    %cst_28 = arith.constant 0.000000e+00 : f32
    %29 = vector.broadcast %cst_28 : f32 to vector<192x32xf32>
    %30 = tpu.concatenate %29, %28 in 0 : vector<192x32xf32>, vector<64x32xf32> -> vector<256x32xf32>
    %31 = arith.addf %22, %30 : vector<256x32xf32>
    %c0_29 = arith.constant 0 : index
    %c0_30 = arith.constant 0 : index
    %c12_31 = arith.constant 12 : index
    %c0_32 = arith.constant 0 : index
    %32 = vector.load %arg1[%c0_29, %c0_30, %c12_31, %c0_32] : memref<1x16x40x4xbf16, #tpu.memory_space<vmem>>, vector<1x4x16x4xbf16>
    %33 = vector.shape_cast %32 : vector<1x4x16x4xbf16> to vector<4x16x4xbf16>
    %34 = vector.shape_cast %33 : vector<4x16x4xbf16> to vector<64x4xbf16>
    %c0_33 = arith.constant 0 : index
    %c1 = arith.constant 1 : index
    %c0_34 = arith.constant 0 : index
    %c0_35 = arith.constant 0 : index
    %35 = vector.load %arg3[%c0_33, %c1, %c0_34, %c0_35] : memref<3x9x4x32xbf16, #tpu.memory_space<vmem>>, vector<1x1x4x32xbf16>
    %36 = vector.shape_cast %35 : vector<1x1x4x32xbf16> to vector<4x32xbf16>
    %cst_36 = arith.constant dense<0.000000e+00> : vector<64x32xf32>
    %37 = tpu.matmul %34, %36, %cst_36 {dimension_numbers = #tpu.dot_dimension_numbers<[1], [0], [0], [1], [0, 0, 1, 1], [], []>} : vector<64x4xbf16>, vector<4x32xbf16>, vector<64x32xf32> -> vector<64x32xf32>
    %cst_37 = arith.constant 0.000000e+00 : f32
    %38 = vector.broadcast %cst_37 : f32 to vector<192x32xf32>
    %39 = tpu.concatenate %38, %37 in 0 : vector<192x32xf32>, vector<64x32xf32> -> vector<256x32xf32>
    %40 = arith.addf %31, %39 : vector<256x32xf32>
    %c0_38 = arith.constant 0 : index
    %c0_39 = arith.constant 0 : index
    %c24 = arith.constant 24 : index
    %c0_40 = arith.constant 0 : index
    %41 = vector.load %arg1[%c0_38, %c0_39, %c24, %c0_40] : memref<1x16x40x4xbf16, #tpu.memory_space<vmem>>, vector<1x4x16x4xbf16>
    %42 = vector.shape_cast %41 : vector<1x4x16x4xbf16> to vector<4x16x4xbf16>
    %43 = vector.shape_cast %42 : vector<4x16x4xbf16> to vector<64x4xbf16>
    %c0_41 = arith.constant 0 : index
    %c2 = arith.constant 2 : index
    %c0_42 = arith.constant 0 : index
    %c0_43 = arith.constant 0 : index
    %44 = vector.load %arg3[%c0_41, %c2, %c0_42, %c0_43] : memref<3x9x4x32xbf16, #tpu.memory_space<vmem>>, vector<1x1x4x32xbf16>
    %45 = vector.shape_cast %44 : vector<1x1x4x32xbf16> to vector<4x32xbf16>
    %cst_44 = arith.constant dense<0.000000e+00> : vector<64x32xf32>
    %46 = tpu.matmul %43, %45, %cst_44 {dimension_numbers = #tpu.dot_dimension_numbers<[1], [0], [0], [1], [0, 0, 1, 1], [], []>} : vector<64x4xbf16>, vector<4x32xbf16>, vector<64x32xf32> -> vector<64x32xf32>
    %cst_45 = arith.constant 0.000000e+00 : f32
    %47 = vector.broadcast %cst_45 : f32 to vector<192x32xf32>
    %48 = tpu.concatenate %47, %46 in 0 : vector<192x32xf32>, vector<64x32xf32> -> vector<256x32xf32>
    %49 = arith.addf %40, %48 : vector<256x32xf32>
    %c0_46 = arith.constant 0 : index
    %c0_47 = arith.constant 0 : index
    %c0_48 = arith.constant 0 : index
    %c0_49 = arith.constant 0 : index
    %50 = vector.load %arg1[%c0_46, %c0_47, %c0_48, %c0_49] : memref<1x16x40x4xbf16, #tpu.memory_space<vmem>>, vector<1x16x16x4xbf16>
    %51 = vector.shape_cast %50 : vector<1x16x16x4xbf16> to vector<16x16x4xbf16>
    %52 = vector.shape_cast %51 : vector<16x16x4xbf16> to vector<256x4xbf16>
    %c0_50 = arith.constant 0 : index
    %c3 = arith.constant 3 : index
    %c0_51 = arith.constant 0 : index
    %c0_52 = arith.constant 0 : index
    %53 = vector.load %arg3[%c0_50, %c3, %c0_51, %c0_52] : memref<3x9x4x32xbf16, #tpu.memory_space<vmem>>, vector<1x1x4x32xbf16>
    %54 = vector.shape_cast %53 : vector<1x1x4x32xbf16> to vector<4x32xbf16>
    %cst_53 = arith.constant dense<0.000000e+00> : vector<256x32xf32>
    %55 = tpu.matmul %52, %54, %cst_53 {dimension_numbers = #tpu.dot_dimension_numbers<[1], [0], [0], [1], [0, 0, 1, 1], [], []>} : vector<256x4xbf16>, vector<4x32xbf16>, vector<256x32xf32> -> vector<256x32xf32>
    %56 = arith.addf %49, %55 : vector<256x32xf32>
    %c0_54 = arith.constant 0 : index
    %c0_55 = arith.constant 0 : index
    %c24_56 = arith.constant 24 : index
    %c0_57 = arith.constant 0 : index
    %57 = vector.load %arg1[%c0_54, %c0_55, %c24_56, %c0_57] : memref<1x16x40x4xbf16, #tpu.memory_space<vmem>>, vector<1x16x16x4xbf16>
    %58 = vector.shape_cast %57 : vector<1x16x16x4xbf16> to vector<16x16x4xbf16>
    %59 = vector.shape_cast %58 : vector<16x16x4xbf16> to vector<256x4xbf16>
    %c0_58 = arith.constant 0 : index
    %c5 = arith.constant 5 : index
    %c0_59 = arith.constant 0 : index
    %c0_60 = arith.constant 0 : index
    %60 = vector.load %arg3[%c0_58, %c5, %c0_59, %c0_60] : memref<3x9x4x32xbf16, #tpu.memory_space<vmem>>, vector<1x1x4x32xbf16>
    %61 = vector.shape_cast %60 : vector<1x1x4x32xbf16> to vector<4x32xbf16>
    %cst_61 = arith.constant dense<0.000000e+00> : vector<256x32xf32>
    %62 = tpu.matmul %59, %61, %cst_61 {dimension_numbers = #tpu.dot_dimension_numbers<[1], [0], [0], [1], [0, 0, 1, 1], [], []>} : vector<256x4xbf16>, vector<4x32xbf16>, vector<256x32xf32> -> vector<256x32xf32>
    %63 = arith.addf %56, %62 : vector<256x32xf32>
    %c0_62 = arith.constant 0 : index
    %c12_63 = arith.constant 12 : index
    %c0_64 = arith.constant 0 : index
    %c0_65 = arith.constant 0 : index
    %64 = vector.load %arg1[%c0_62, %c12_63, %c0_64, %c0_65] : memref<1x16x40x4xbf16, #tpu.memory_space<vmem>>, vector<1x4x16x4xbf16>
    %65 = vector.shape_cast %64 : vector<1x4x16x4xbf16> to vector<4x16x4xbf16>
    %66 = vector.shape_cast %65 : vector<4x16x4xbf16> to vector<64x4xbf16>
    %c0_66 = arith.constant 0 : index
    %c6 = arith.constant 6 : index
    %c0_67 = arith.constant 0 : index
    %c0_68 = arith.constant 0 : index
    %67 = vector.load %arg3[%c0_66, %c6, %c0_67, %c0_68] : memref<3x9x4x32xbf16, #tpu.memory_space<vmem>>, vector<1x1x4x32xbf16>
    %68 = vector.shape_cast %67 : vector<1x1x4x32xbf16> to vector<4x32xbf16>
    %cst_69 = arith.constant dense<0.000000e+00> : vector<64x32xf32>
    %69 = tpu.matmul %66, %68, %cst_69 {dimension_numbers = #tpu.dot_dimension_numbers<[1], [0], [0], [1], [0, 0, 1, 1], [], []>} : vector<64x4xbf16>, vector<4x32xbf16>, vector<64x32xf32> -> vector<64x32xf32>
    %cst_70 = arith.constant 0.000000e+00 : f32
    %70 = vector.broadcast %cst_70 : f32 to vector<192x32xf32>
    %71 = tpu.concatenate %69, %70 in 0 : vector<64x32xf32>, vector<192x32xf32> -> vector<256x32xf32>
    %72 = arith.addf %63, %71 : vector<256x32xf32>
    %c0_71 = arith.constant 0 : index
    %c12_72 = arith.constant 12 : index
    %c12_73 = arith.constant 12 : index
    %c0_74 = arith.constant 0 : index
    %73 = vector.load %arg1[%c0_71, %c12_72, %c12_73, %c0_74] : memref<1x16x40x4xbf16, #tpu.memory_space<vmem>>, vector<1x4x16x4xbf16>
    %74 = vector.shape_cast %73 : vector<1x4x16x4xbf16> to vector<4x16x4xbf16>
    %75 = vector.shape_cast %74 : vector<4x16x4xbf16> to vector<64x4xbf16>
    %c0_75 = arith.constant 0 : index
    %c7 = arith.constant 7 : index
    %c0_76 = arith.constant 0 : index
    %c0_77 = arith.constant 0 : index
    %76 = vector.load %arg3[%c0_75, %c7, %c0_76, %c0_77] : memref<3x9x4x32xbf16, #tpu.memory_space<vmem>>, vector<1x1x4x32xbf16>
    %77 = vector.shape_cast %76 : vector<1x1x4x32xbf16> to vector<4x32xbf16>
    %cst_78 = arith.constant dense<0.000000e+00> : vector<64x32xf32>
    %78 = tpu.matmul %75, %77, %cst_78 {dimension_numbers = #tpu.dot_dimension_numbers<[1], [0], [0], [1], [0, 0, 1, 1], [], []>} : vector<64x4xbf16>, vector<4x32xbf16>, vector<64x32xf32> -> vector<64x32xf32>
    %cst_79 = arith.constant 0.000000e+00 : f32
    %79 = vector.broadcast %cst_79 : f32 to vector<192x32xf32>
    %80 = tpu.concatenate %78, %79 in 0 : vector<64x32xf32>, vector<192x32xf32> -> vector<256x32xf32>
    %81 = arith.addf %72, %80 : vector<256x32xf32>
    %c0_80 = arith.constant 0 : index
    %c12_81 = arith.constant 12 : index
    %c24_82 = arith.constant 24 : index
    %c0_83 = arith.constant 0 : index
    %82 = vector.load %arg1[%c0_80, %c12_81, %c24_82, %c0_83] : memref<1x16x40x4xbf16, #tpu.memory_space<vmem>>, vector<1x4x16x4xbf16>
    %83 = vector.shape_cast %82 : vector<1x4x16x4xbf16> to vector<4x16x4xbf16>
    %84 = vector.shape_cast %83 : vector<4x16x4xbf16> to vector<64x4xbf16>
    %c0_84 = arith.constant 0 : index
    %c8 = arith.constant 8 : index
    %c0_85 = arith.constant 0 : index
    %c0_86 = arith.constant 0 : index
    %85 = vector.load %arg3[%c0_84, %c8, %c0_85, %c0_86] : memref<3x9x4x32xbf16, #tpu.memory_space<vmem>>, vector<1x1x4x32xbf16>
    %86 = vector.shape_cast %85 : vector<1x1x4x32xbf16> to vector<4x32xbf16>
    %cst_87 = arith.constant dense<0.000000e+00> : vector<64x32xf32>
    %87 = tpu.matmul %84, %86, %cst_87 {dimension_numbers = #tpu.dot_dimension_numbers<[1], [0], [0], [1], [0, 0, 1, 1], [], []>} : vector<64x4xbf16>, vector<4x32xbf16>, vector<64x32xf32> -> vector<64x32xf32>
    %cst_88 = arith.constant 0.000000e+00 : f32
    %88 = vector.broadcast %cst_88 : f32 to vector<192x32xf32>
    %89 = tpu.concatenate %87, %88 in 0 : vector<64x32xf32>, vector<192x32xf32> -> vector<256x32xf32>
    %90 = arith.addf %81, %89 : vector<256x32xf32>
    %c1_89 = arith.constant 1 : index
    %c0_90 = arith.constant 0 : index
    %c0_91 = arith.constant 0 : index
    %91 = vector.load %arg4[%c1_89, %c0_90, %c0_91] : memref<4x1x32xf32, #tpu.memory_space<vmem>>, vector<1x1x32xf32>
    %92 = vector.shape_cast %91 : vector<1x1x32xf32> to vector<1x32xf32>
    %93 = vector.broadcast %92 : vector<1x32xf32> to vector<256x32xf32>
    %94 = arith.addf %90, %93 : vector<256x32xf32>
    %cst_92 = arith.constant 0.000000e+00 : f32
    %95 = vector.broadcast %cst_92 : f32 to vector<256x32xf32>
    %96 = arith.maximumf %94, %95 : vector<256x32xf32>
    %97 = arith.truncf %96 : vector<256x32xf32> to vector<256x32xbf16>
    %c1_93 = arith.constant 1 : index
    %c0_94 = arith.constant 0 : index
    %c0_95 = arith.constant 0 : index
    %98 = vector.load %arg6[%c1_93, %c0_94, %c0_95] : memref<4x32x32xbf16, #tpu.memory_space<vmem>>, vector<1x32x32xbf16>
    %99 = vector.shape_cast %98 : vector<1x32x32xbf16> to vector<32x32xbf16>
    %cst_96 = arith.constant dense<0.000000e+00> : vector<256x32xf32>
    %100 = tpu.matmul %97, %99, %cst_96 {dimension_numbers = #tpu.dot_dimension_numbers<[1], [0], [0], [1], [0, 0, 1, 1], [], []>} : vector<256x32xbf16>, vector<32x32xbf16>, vector<256x32xf32> -> vector<256x32xf32>
    %101 = arith.addf %19, %100 : vector<256x32xf32>
    %c1_97 = arith.constant 1 : index
    %c4_98 = arith.constant 4 : index
    %c0_99 = arith.constant 0 : index
    %c0_100 = arith.constant 0 : index
    %102 = vector.load %arg3[%c1_97, %c4_98, %c0_99, %c0_100] : memref<3x9x4x32xbf16, #tpu.memory_space<vmem>>, vector<1x1x4x32xbf16>
    %103 = vector.shape_cast %102 : vector<1x1x4x32xbf16> to vector<4x32xbf16>
    %cst_101 = arith.constant dense<0.000000e+00> : vector<256x32xf32>
    %104 = tpu.matmul %2, %103, %cst_101 {dimension_numbers = #tpu.dot_dimension_numbers<[1], [0], [0], [1], [0, 0, 1, 1], [], []>} : vector<256x4xbf16>, vector<4x32xbf16>, vector<256x32xf32> -> vector<256x32xf32>
    %c2_102 = arith.constant 2 : index
    %c0_103 = arith.constant 0 : index
    %c0_104 = arith.constant 0 : index
    %105 = vector.load %arg4[%c2_102, %c0_103, %c0_104] : memref<4x1x32xf32, #tpu.memory_space<vmem>>, vector<1x1x32xf32>
    %106 = vector.shape_cast %105 : vector<1x1x32xf32> to vector<1x32xf32>
    %107 = vector.broadcast %106 : vector<1x32xf32> to vector<256x32xf32>
    %108 = arith.addf %104, %107 : vector<256x32xf32>
    %cst_105 = arith.constant 0.000000e+00 : f32
    %109 = vector.broadcast %cst_105 : f32 to vector<256x32xf32>
    %110 = arith.maximumf %108, %109 : vector<256x32xf32>
    %111 = arith.truncf %110 : vector<256x32xf32> to vector<256x32xbf16>
    %c2_106 = arith.constant 2 : index
    %c0_107 = arith.constant 0 : index
    %c0_108 = arith.constant 0 : index
    %112 = vector.load %arg6[%c2_106, %c0_107, %c0_108] : memref<4x32x32xbf16, #tpu.memory_space<vmem>>, vector<1x32x32xbf16>
    %113 = vector.shape_cast %112 : vector<1x32x32xbf16> to vector<32x32xbf16>
    %cst_109 = arith.constant dense<0.000000e+00> : vector<256x32xf32>
    %114 = tpu.matmul %111, %113, %cst_109 {dimension_numbers = #tpu.dot_dimension_numbers<[1], [0], [0], [1], [0, 0, 1, 1], [], []>} : vector<256x32xbf16>, vector<32x32xbf16>, vector<256x32xf32> -> vector<256x32xf32>
    %115 = arith.addf %101, %114 : vector<256x32xf32>
    %c2_110 = arith.constant 2 : index
    %c4_111 = arith.constant 4 : index
    %c0_112 = arith.constant 0 : index
    %c0_113 = arith.constant 0 : index
    %116 = vector.load %arg3[%c2_110, %c4_111, %c0_112, %c0_113] : memref<3x9x4x32xbf16, #tpu.memory_space<vmem>>, vector<1x1x4x32xbf16>
    %117 = vector.shape_cast %116 : vector<1x1x4x32xbf16> to vector<4x32xbf16>
    %cst_114 = arith.constant dense<0.000000e+00> : vector<256x32xf32>
    %118 = tpu.matmul %2, %117, %cst_114 {dimension_numbers = #tpu.dot_dimension_numbers<[1], [0], [0], [1], [0, 0, 1, 1], [], []>} : vector<256x4xbf16>, vector<4x32xbf16>, vector<256x32xf32> -> vector<256x32xf32>
    %c3_115 = arith.constant 3 : index
    %c0_116 = arith.constant 0 : index
    %c0_117 = arith.constant 0 : index
    %119 = vector.load %arg4[%c3_115, %c0_116, %c0_117] : memref<4x1x32xf32, #tpu.memory_space<vmem>>, vector<1x1x32xf32>
    %120 = vector.shape_cast %119 : vector<1x1x32xf32> to vector<1x32xf32>
    %121 = vector.broadcast %120 : vector<1x32xf32> to vector<256x32xf32>
    %122 = arith.addf %118, %121 : vector<256x32xf32>
    %cst_118 = arith.constant 0.000000e+00 : f32
    %123 = vector.broadcast %cst_118 : f32 to vector<256x32xf32>
    %124 = arith.maximumf %122, %123 : vector<256x32xf32>
    %125 = arith.truncf %124 : vector<256x32xf32> to vector<256x32xbf16>
    %c3_119 = arith.constant 3 : index
    %c0_120 = arith.constant 0 : index
    %c0_121 = arith.constant 0 : index
    %126 = vector.load %arg6[%c3_119, %c0_120, %c0_121] : memref<4x32x32xbf16, #tpu.memory_space<vmem>>, vector<1x32x32xbf16>
    %127 = vector.shape_cast %126 : vector<1x32x32xbf16> to vector<32x32xbf16>
    %cst_122 = arith.constant dense<0.000000e+00> : vector<256x32xf32>
    %128 = tpu.matmul %125, %127, %cst_122 {dimension_numbers = #tpu.dot_dimension_numbers<[1], [0], [0], [1], [0, 0, 1, 1], [], []>} : vector<256x32xbf16>, vector<32x32xbf16>, vector<256x32xf32> -> vector<256x32xf32>
    %129 = arith.addf %115, %128 : vector<256x32xf32>
    %cst_123 = arith.constant 0.000000e+00 : f32
    %130 = vector.broadcast %cst_123 : f32 to vector<256x32xf32>
    %131 = arith.maximumf %129, %130 : vector<256x32xf32>
    %c0_124 = arith.constant 0 : index
    %c0_125 = arith.constant 0 : index
    %c0_126 = arith.constant 0 : index
    %132 = vector.load %arg7[%c0_124, %c0_125, %c0_126] : memref<1x256x32xf32, #tpu.memory_space<vmem>>, vector<1x256x32xf32>
    %133 = vector.shape_cast %132 : vector<1x256x32xf32> to vector<256x32xf32>
    %134 = vector.shape_cast %131 : vector<256x32xf32> to vector<1x256x32xf32>
    tpu.vector_store %arg7[%c0_124, %c0_125, %c0_126], %134 {strides = array<i32>} : memref<1x256x32xf32, #tpu.memory_space<vmem>>, vector<1x256x32xf32>,
    return
  }
  func.func @transform_0(%arg0: i32) -> (i32, i32, i32, i32) {
    %c0_i32 = arith.constant 0 : i32
    %c0_i32_0 = arith.constant 0 : i32
    %c0_i32_1 = arith.constant 0 : i32
    %c0_i32_2 = arith.constant 0 : i32
    return %arg0, %c0_i32, %c0_i32_0, %c0_i32_1 : i32, i32, i32, i32
  }
  func.func @transform_1(%arg0: i32) -> (i32, i32) {
    %c0_i32 = arith.constant 0 : i32
    %c0_i32_0 = arith.constant 0 : i32
    %c0_i32_1 = arith.constant 0 : i32
    return %c0_i32, %c0_i32_0 : i32, i32
  }
  func.func @transform_2(%arg0: i32) -> (i32, i32, i32, i32) {
    %c0_i32 = arith.constant 0 : i32
    %c0_i32_0 = arith.constant 0 : i32
    %c0_i32_1 = arith.constant 0 : i32
    %c0_i32_2 = arith.constant 0 : i32
    %c0_i32_3 = arith.constant 0 : i32
    return %c0_i32, %c0_i32_0, %c0_i32_1, %c0_i32_2 : i32, i32, i32, i32
  }
  func.func @transform_3(%arg0: i32) -> (i32, i32, i32) {
    %c0_i32 = arith.constant 0 : i32
    %c0_i32_0 = arith.constant 0 : i32
    %c0_i32_1 = arith.constant 0 : i32
    %c0_i32_2 = arith.constant 0 : i32
    return %c0_i32, %c0_i32_0, %c0_i32_1 : i32, i32, i32
  }
  func.func @transform_4(%arg0: i32) -> (i32, i32, i32) {
    %c0_i32 = arith.constant 0 : i32
    %c0_i32_0 = arith.constant 0 : i32
    %c0_i32_1 = arith.constant 0 : i32
    return %arg0, %c0_i32, %c0_i32_0 : i32, i32, i32
  }
  func.func @transform_5(%arg0: i32) -> (i32, i32, i32) {
    %c0_i32 = arith.constant 0 : i32
    %c0_i32_0 = arith.constant 0 : i32
    %c0_i32_1 = arith.constant 0 : i32
    %c0_i32_2 = arith.constant 0 : i32
    return %c0_i32, %c0_i32_0, %c0_i32_1 : i32, i32, i32
  }
  func.func @transform_6(%arg0: i32) -> (i32, i32, i32) {
    %c0_i32 = arith.constant 0 : i32
    %c0_i32_0 = arith.constant 0 : i32
    %c0_i32_1 = arith.constant 0 : i32
    return %arg0, %c0_i32, %c0_i32_0 : i32, i32, i32
  }
}

module attributes {stable_mosaic.version = 11 : i64} {
  func.func @_aspp_fused_kernel(%arg0: i32, %arg1: memref<1x16x40x4xbf16, #tpu.memory_space<vmem>>, %arg2: memref<4x32xbf16, #tpu.memory_space<vmem>>, %arg3: memref<3x9x4x32xbf16, #tpu.memory_space<vmem>>, %arg4: memref<4x1x32xf32, #tpu.memory_space<vmem>>, %arg5: memref<1x1x32xf32, #tpu.memory_space<vmem>>, %arg6: memref<4x32x32xbf16, #tpu.memory_space<vmem>>, %arg7: memref<1x256x32xf32, #tpu.memory_space<vmem>>) attributes {dimension_semantics = [#tpu.dimension_semantics<parallel>], iteration_bounds = array<i64: 2>, scalar_prefetch = 0 : i64, scratch_operands = 0 : i64, tpu.core_type = #tpu.core_type<tc>, window_params = [{transform_indices = @transform_0, window_bounds = array<i64: 1, 16, 40, 4>}, {pipeline_mode = #tpu.pipeline_mode<synchronous>, transform_indices = @transform_1, window_bounds = array<i64: 4, 32>}, {pipeline_mode = #tpu.pipeline_mode<synchronous>, transform_indices = @transform_2, window_bounds = array<i64: 3, 9, 4, 32>}, {pipeline_mode = #tpu.pipeline_mode<synchronous>, transform_indices = @transform_3, window_bounds = array<i64: 4, 1, 32>}, {transform_indices = @transform_4, window_bounds = array<i64: 1, 1, 32>}, {pipeline_mode = #tpu.pipeline_mode<synchronous>, transform_indices = @transform_5, window_bounds = array<i64: 4, 32, 32>}, {transform_indices = @transform_6, window_bounds = array<i64: 1, 256, 32>}]} {
    %c0 = arith.constant 0 : index
    %c0_0 = arith.constant 0 : index
    %c12 = arith.constant 12 : index
    %c0_1 = arith.constant 0 : index
    %0 = vector.load %arg1[%c0, %c0_0, %c12, %c0_1] : memref<1x16x40x4xbf16, #tpu.memory_space<vmem>>, vector<1x16x16x4xbf16>
    %1 = vector.shape_cast %0 : vector<1x16x16x4xbf16> to vector<16x16x4xbf16>
    %2 = vector.shape_cast %1 : vector<16x16x4xbf16> to vector<256x4xbf16>
    %c0_2 = arith.constant 0 : index
    %c0_3 = arith.constant 0 : index
    %c0_4 = arith.constant 0 : index
    %3 = vector.load %arg5[%c0_2, %c0_3, %c0_4] : memref<1x1x32xf32, #tpu.memory_space<vmem>>, vector<1x1x32xf32>
    %4 = vector.shape_cast %3 : vector<1x1x32xf32> to vector<1x32xf32>
    %5 = vector.shape_cast %4 : vector<1x32xf32> to vector<1x32xf32>
    %6 = vector.broadcast %5 : vector<1x32xf32> to vector<256x32xf32>
    %c0_5 = arith.constant 0 : index
    %c0_6 = arith.constant 0 : index
    %7 = vector.load %arg2[%c0_5, %c0_6] : memref<4x32xbf16, #tpu.memory_space<vmem>>, vector<4x32xbf16>
    %cst = arith.constant dense<0.000000e+00> : vector<256x32xf32>
    %8 = tpu.matmul %2, %7, %cst {dimension_numbers = #tpu.dot_dimension_numbers<[1], [0], [0], [1], [0, 0, 1, 1], [], []>} : vector<256x4xbf16>, vector<4x32xbf16>, vector<256x32xf32> -> vector<256x32xf32>
    %c0_7 = arith.constant 0 : index
    %c0_8 = arith.constant 0 : index
    %c0_9 = arith.constant 0 : index
    %9 = vector.load %arg4[%c0_7, %c0_8, %c0_9] : memref<4x1x32xf32, #tpu.memory_space<vmem>>, vector<1x1x32xf32>
    %10 = vector.shape_cast %9 : vector<1x1x32xf32> to vector<1x32xf32>
    %11 = vector.broadcast %10 : vector<1x32xf32> to vector<256x32xf32>
    %12 = arith.addf %8, %11 : vector<256x32xf32>
    %cst_10 = arith.constant 0.000000e+00 : f32
    %13 = vector.broadcast %cst_10 : f32 to vector<256x32xf32>
    %14 = arith.maximumf %12, %13 : vector<256x32xf32>
    %15 = arith.truncf %14 : vector<256x32xf32> to vector<256x32xbf16>
    %c0_11 = arith.constant 0 : index
    %c0_12 = arith.constant 0 : index
    %c0_13 = arith.constant 0 : index
    %16 = vector.load %arg6[%c0_11, %c0_12, %c0_13] : memref<4x32x32xbf16, #tpu.memory_space<vmem>>, vector<1x32x32xbf16>
    %17 = vector.shape_cast %16 : vector<1x32x32xbf16> to vector<32x32xbf16>
    %cst_14 = arith.constant dense<0.000000e+00> : vector<256x32xf32>
    %18 = tpu.matmul %15, %17, %cst_14 {dimension_numbers = #tpu.dot_dimension_numbers<[1], [0], [0], [1], [0, 0, 1, 1], [], []>} : vector<256x32xbf16>, vector<32x32xbf16>, vector<256x32xf32> -> vector<256x32xf32>
    %19 = arith.addf %6, %18 : vector<256x32xf32>
    %c0_15 = arith.constant 0 : index
    %c4 = arith.constant 4 : index
    %c0_16 = arith.constant 0 : index
    %c0_17 = arith.constant 0 : index
    %20 = vector.load %arg3[%c0_15, %c4, %c0_16, %c0_17] : memref<3x9x4x32xbf16, #tpu.memory_space<vmem>>, vector<1x1x4x32xbf16>
    %21 = vector.shape_cast %20 : vector<1x1x4x32xbf16> to vector<4x32xbf16>
    %cst_18 = arith.constant dense<0.000000e+00> : vector<256x32xf32>
    %22 = tpu.matmul %2, %21, %cst_18 {dimension_numbers = #tpu.dot_dimension_numbers<[1], [0], [0], [1], [0, 0, 1, 1], [], []>} : vector<256x4xbf16>, vector<4x32xbf16>, vector<256x32xf32> -> vector<256x32xf32>
    %c0_19 = arith.constant 0 : index
    %c0_20 = arith.constant 0 : index
    %c0_21 = arith.constant 0 : index
    %c0_22 = arith.constant 0 : index
    %23 = vector.load %arg1[%c0_19, %c0_20, %c0_21, %c0_22] : memref<1x16x40x4xbf16, #tpu.memory_space<vmem>>, vector<1x4x16x4xbf16>
    %24 = vector.shape_cast %23 : vector<1x4x16x4xbf16> to vector<4x16x4xbf16>
    %25 = vector.shape_cast %24 : vector<4x16x4xbf16> to vector<64x4xbf16>
    %c0_23 = arith.constant 0 : index
    %c0_24 = arith.constant 0 : index
    %c0_25 = arith.constant 0 : index
    %c0_26 = arith.constant 0 : index
    %26 = vector.load %arg3[%c0_23, %c0_24, %c0_25, %c0_26] : memref<3x9x4x32xbf16, #tpu.memory_space<vmem>>, vector<1x1x4x32xbf16>
    %27 = vector.shape_cast %26 : vector<1x1x4x32xbf16> to vector<4x32xbf16>
    %cst_27 = arith.constant dense<0.000000e+00> : vector<64x32xf32>
    %28 = tpu.matmul %25, %27, %cst_27 {dimension_numbers = #tpu.dot_dimension_numbers<[1], [0], [0], [1], [0, 0, 1, 1], [], []>} : vector<64x4xbf16>, vector<4x32xbf16>, vector<64x32xf32> -> vector<64x32xf32>
    %cst_28 = arith.constant 0.000000e+00 : f32
    %29 = vector.broadcast %cst_28 : f32 to vector<192x32xf32>
    %30 = tpu.concatenate %29, %28 in 0 : vector<192x32xf32>, vector<64x32xf32> -> vector<256x32xf32>
    %31 = arith.addf %22, %30 : vector<256x32xf32>
    %c0_29 = arith.constant 0 : index
    %c0_30 = arith.constant 0 : index
    %c12_31 = arith.constant 12 : index
    %c0_32 = arith.constant 0 : index
    %32 = vector.load %arg1[%c0_29, %c0_30, %c12_31, %c0_32] : memref<1x16x40x4xbf16, #tpu.memory_space<vmem>>, vector<1x4x16x4xbf16>
    %33 = vector.shape_cast %32 : vector<1x4x16x4xbf16> to vector<4x16x4xbf16>
    %34 = vector.shape_cast %33 : vector<4x16x4xbf16> to vector<64x4xbf16>
    %c0_33 = arith.constant 0 : index
    %c1 = arith.constant 1 : index
    %c0_34 = arith.constant 0 : index
    %c0_35 = arith.constant 0 : index
    %35 = vector.load %arg3[%c0_33, %c1, %c0_34, %c0_35] : memref<3x9x4x32xbf16, #tpu.memory_space<vmem>>, vector<1x1x4x32xbf16>
    %36 = vector.shape_cast %35 : vector<1x1x4x32xbf16> to vector<4x32xbf16>
    %cst_36 = arith.constant dense<0.000000e+00> : vector<64x32xf32>
    %37 = tpu.matmul %34, %36, %cst_36 {dimension_numbers = #tpu.dot_dimension_numbers<[1], [0], [0], [1], [0, 0, 1, 1], [], []>} : vector<64x4xbf16>, vector<4x32xbf16>, vector<64x32xf32> -> vector<64x32xf32>
    %cst_37 = arith.constant 0.000000e+00 : f32
    %38 = vector.broadcast %cst_37 : f32 to vector<192x32xf32>
    %39 = tpu.concatenate %38, %37 in 0 : vector<192x32xf32>, vector<64x32xf32> -> vector<256x32xf32>
    %40 = arith.addf %31, %39 : vector<256x32xf32>
    %c0_38 = arith.constant 0 : index
    %c0_39 = arith.constant 0 : index
    %c24 = arith.constant 24 : index
    %c0_40 = arith.constant 0 : index
    %41 = vector.load %arg1[%c0_38, %c0_39, %c24, %c0_40] : memref<1x16x40x4xbf16, #tpu.memory_space<vmem>>, vector<1x4x16x4xbf16>
    %42 = vector.shape_cast %41 : vector<1x4x16x4xbf16> to vector<4x16x4xbf16>
    %43 = vector.shape_cast %42 : vector<4x16x4xbf16> to vector<64x4xbf16>
    %c0_41 = arith.constant 0 : index
    %c2 = arith.constant 2 : index
    %c0_42 = arith.constant 0 : index
    %c0_43 = arith.constant 0 : index
    %44 = vector.load %arg3[%c0_41, %c2, %c0_42, %c0_43] : memref<3x9x4x32xbf16, #tpu.memory_space<vmem>>, vector<1x1x4x32xbf16>
    %45 = vector.shape_cast %44 : vector<1x1x4x32xbf16> to vector<4x32xbf16>
    %cst_44 = arith.constant dense<0.000000e+00> : vector<64x32xf32>
    %46 = tpu.matmul %43, %45, %cst_44 {dimension_numbers = #tpu.dot_dimension_numbers<[1], [0], [0], [1], [0, 0, 1, 1], [], []>} : vector<64x4xbf16>, vector<4x32xbf16>, vector<64x32xf32> -> vector<64x32xf32>
    %cst_45 = arith.constant 0.000000e+00 : f32
    %47 = vector.broadcast %cst_45 : f32 to vector<192x32xf32>
    %48 = tpu.concatenate %47, %46 in 0 : vector<192x32xf32>, vector<64x32xf32> -> vector<256x32xf32>
    %49 = arith.addf %40, %48 : vector<256x32xf32>
    %c0_46 = arith.constant 0 : index
    %c0_47 = arith.constant 0 : index
    %c0_48 = arith.constant 0 : index
    %c0_49 = arith.constant 0 : index
    %50 = vector.load %arg1[%c0_46, %c0_47, %c0_48, %c0_49] : memref<1x16x40x4xbf16, #tpu.memory_space<vmem>>, vector<1x16x16x4xbf16>
    %51 = vector.shape_cast %50 : vector<1x16x16x4xbf16> to vector<16x16x4xbf16>
    %52 = vector.shape_cast %51 : vector<16x16x4xbf16> to vector<256x4xbf16>
    %c0_50 = arith.constant 0 : index
    %c3 = arith.constant 3 : index
    %c0_51 = arith.constant 0 : index
    %c0_52 = arith.constant 0 : index
    %53 = vector.load %arg3[%c0_50, %c3, %c0_51, %c0_52] : memref<3x9x4x32xbf16, #tpu.memory_space<vmem>>, vector<1x1x4x32xbf16>
    %54 = vector.shape_cast %53 : vector<1x1x4x32xbf16> to vector<4x32xbf16>
    %cst_53 = arith.constant dense<0.000000e+00> : vector<256x32xf32>
    %55 = tpu.matmul %52, %54, %cst_53 {dimension_numbers = #tpu.dot_dimension_numbers<[1], [0], [0], [1], [0, 0, 1, 1], [], []>} : vector<256x4xbf16>, vector<4x32xbf16>, vector<256x32xf32> -> vector<256x32xf32>
    %56 = arith.addf %49, %55 : vector<256x32xf32>
    %c0_54 = arith.constant 0 : index
    %c0_55 = arith.constant 0 : index
    %c24_56 = arith.constant 24 : index
    %c0_57 = arith.constant 0 : index
    %57 = vector.load %arg1[%c0_54, %c0_55, %c24_56, %c0_57] : memref<1x16x40x4xbf16, #tpu.memory_space<vmem>>, vector<1x16x16x4xbf16>
    %58 = vector.shape_cast %57 : vector<1x16x16x4xbf16> to vector<16x16x4xbf16>
    %59 = vector.shape_cast %58 : vector<16x16x4xbf16> to vector<256x4xbf16>
    %c0_58 = arith.constant 0 : index
    %c5 = arith.constant 5 : index
    %c0_59 = arith.constant 0 : index
    %c0_60 = arith.constant 0 : index
    %60 = vector.load %arg3[%c0_58, %c5, %c0_59, %c0_60] : memref<3x9x4x32xbf16, #tpu.memory_space<vmem>>, vector<1x1x4x32xbf16>
    %61 = vector.shape_cast %60 : vector<1x1x4x32xbf16> to vector<4x32xbf16>
    %cst_61 = arith.constant dense<0.000000e+00> : vector<256x32xf32>
    %62 = tpu.matmul %59, %61, %cst_61 {dimension_numbers = #tpu.dot_dimension_numbers<[1], [0], [0], [1], [0, 0, 1, 1], [], []>} : vector<256x4xbf16>, vector<4x32xbf16>, vector<256x32xf32> -> vector<256x32xf32>
    %63 = arith.addf %56, %62 : vector<256x32xf32>
    %c0_62 = arith.constant 0 : index
    %c12_63 = arith.constant 12 : index
    %c0_64 = arith.constant 0 : index
    %c0_65 = arith.constant 0 : index
    %64 = vector.load %arg1[%c0_62, %c12_63, %c0_64, %c0_65] : memref<1x16x40x4xbf16, #tpu.memory_space<vmem>>, vector<1x4x16x4xbf16>
    %65 = vector.shape_cast %64 : vector<1x4x16x4xbf16> to vector<4x16x4xbf16>
    %66 = vector.shape_cast %65 : vector<4x16x4xbf16> to vector<64x4xbf16>
    %c0_66 = arith.constant 0 : index
    %c6 = arith.constant 6 : index
    %c0_67 = arith.constant 0 : index
    %c0_68 = arith.constant 0 : index
    %67 = vector.load %arg3[%c0_66, %c6, %c0_67, %c0_68] : memref<3x9x4x32xbf16, #tpu.memory_space<vmem>>, vector<1x1x4x32xbf16>
    %68 = vector.shape_cast %67 : vector<1x1x4x32xbf16> to vector<4x32xbf16>
    %cst_69 = arith.constant dense<0.000000e+00> : vector<64x32xf32>
    %69 = tpu.matmul %66, %68, %cst_69 {dimension_numbers = #tpu.dot_dimension_numbers<[1], [0], [0], [1], [0, 0, 1, 1], [], []>} : vector<64x4xbf16>, vector<4x32xbf16>, vector<64x32xf32> -> vector<64x32xf32>
    %cst_70 = arith.constant 0.000000e+00 : f32
    %70 = vector.broadcast %cst_70 : f32 to vector<192x32xf32>
    %71 = tpu.concatenate %69, %70 in 0 : vector<64x32xf32>, vector<192x32xf32> -> vector<256x32xf32>
    %72 = arith.addf %63, %71 : vector<256x32xf32>
    %c0_71 = arith.constant 0 : index
    %c12_72 = arith.constant 12 : index
    %c12_73 = arith.constant 12 : index
    %c0_74 = arith.constant 0 : index
    %73 = vector.load %arg1[%c0_71, %c12_72, %c12_73, %c0_74] : memref<1x16x40x4xbf16, #tpu.memory_space<vmem>>, vector<1x4x16x4xbf16>
    %74 = vector.shape_cast %73 : vector<1x4x16x4xbf16> to vector<4x16x4xbf16>
    %75 = vector.shape_cast %74 : vector<4x16x4xbf16> to vector<64x4xbf16>
    %c0_75 = arith.constant 0 : index
    %c7 = arith.constant 7 : index
    %c0_76 = arith.constant 0 : index
    %c0_77 = arith.constant 0 : index
    %76 = vector.load %arg3[%c0_75, %c7, %c0_76, %c0_77] : memref<3x9x4x32xbf16, #tpu.memory_space<vmem>>, vector<1x1x4x32xbf16>
    %77 = vector.shape_cast %76 : vector<1x1x4x32xbf16> to vector<4x32xbf16>
    %cst_78 = arith.constant dense<0.000000e+00> : vector<64x32xf32>
    %78 = tpu.matmul %75, %77, %cst_78 {dimension_numbers = #tpu.dot_dimension_numbers<[1], [0], [0], [1], [0, 0, 1, 1], [], []>} : vector<64x4xbf16>, vector<4x32xbf16>, vector<64x32xf32> -> vector<64x32xf32>
    %cst_79 = arith.constant 0.000000e+00 : f32
    %79 = vector.broadcast %cst_79 : f32 to vector<192x32xf32>
    %80 = tpu.concatenate %78, %79 in 0 : vector<64x32xf32>, vector<192x32xf32> -> vector<256x32xf32>
    %81 = arith.addf %72, %80 : vector<256x32xf32>
    %c0_80 = arith.constant 0 : index
    %c12_81 = arith.constant 12 : index
    %c24_82 = arith.constant 24 : index
    %c0_83 = arith.constant 0 : index
    %82 = vector.load %arg1[%c0_80, %c12_81, %c24_82, %c0_83] : memref<1x16x40x4xbf16, #tpu.memory_space<vmem>>, vector<1x4x16x4xbf16>
    %83 = vector.shape_cast %82 : vector<1x4x16x4xbf16> to vector<4x16x4xbf16>
    %84 = vector.shape_cast %83 : vector<4x16x4xbf16> to vector<64x4xbf16>
    %c0_84 = arith.constant 0 : index
    %c8 = arith.constant 8 : index
    %c0_85 = arith.constant 0 : index
    %c0_86 = arith.constant 0 : index
    %85 = vector.load %arg3[%c0_84, %c8, %c0_85, %c0_86] : memref<3x9x4x32xbf16, #tpu.memory_space<vmem>>, vector<1x1x4x32xbf16>
    %86 = vector.shape_cast %85 : vector<1x1x4x32xbf16> to vector<4x32xbf16>
    %cst_87 = arith.constant dense<0.000000e+00> : vector<64x32xf32>
    %87 = tpu.matmul %84, %86, %cst_87 {dimension_numbers = #tpu.dot_dimension_numbers<[1], [0], [0], [1], [0, 0, 1, 1], [], []>} : vector<64x4xbf16>, vector<4x32xbf16>, vector<64x32xf32> -> vector<64x32xf32>
    %cst_88 = arith.constant 0.000000e+00 : f32
    %88 = vector.broadcast %cst_88 : f32 to vector<192x32xf32>
    %89 = tpu.concatenate %87, %88 in 0 : vector<64x32xf32>, vector<192x32xf32> -> vector<256x32xf32>
    %90 = arith.addf %81, %89 : vector<256x32xf32>
    %c1_89 = arith.constant 1 : index
    %c0_90 = arith.constant 0 : index
    %c0_91 = arith.constant 0 : index
    %91 = vector.load %arg4[%c1_89, %c0_90, %c0_91] : memref<4x1x32xf32, #tpu.memory_space<vmem>>, vector<1x1x32xf32>
    %92 = vector.shape_cast %91 : vector<1x1x32xf32> to vector<1x32xf32>
    %93 = vector.broadcast %92 : vector<1x32xf32> to vector<256x32xf32>
    %94 = arith.addf %90, %93 : vector<256x32xf32>
    %cst_92 = arith.constant 0.000000e+00 : f32
    %95 = vector.broadcast %cst_92 : f32 to vector<256x32xf32>
    %96 = arith.maximumf %94, %95 : vector<256x32xf32>
    %97 = arith.truncf %96 : vector<256x32xf32> to vector<256x32xbf16>
    %c1_93 = arith.constant 1 : index
    %c0_94 = arith.constant 0 : index
    %c0_95 = arith.constant 0 : index
    %98 = vector.load %arg6[%c1_93, %c0_94, %c0_95] : memref<4x32x32xbf16, #tpu.memory_space<vmem>>, vector<1x32x32xbf16>
    %99 = vector.shape_cast %98 : vector<1x32x32xbf16> to vector<32x32xbf16>
    %cst_96 = arith.constant dense<0.000000e+00> : vector<256x32xf32>
    %100 = tpu.matmul %97, %99, %cst_96 {dimension_numbers = #tpu.dot_dimension_numbers<[1], [0], [0], [1], [0, 0, 1, 1], [], []>} : vector<256x32xbf16>, vector<32x32xbf16>, vector<256x32xf32> -> vector<256x32xf32>
    %101 = arith.addf %19, %100 : vector<256x32xf32>
    %c1_97 = arith.constant 1 : index
    %c4_98 = arith.constant 4 : index
    %c0_99 = arith.constant 0 : index
    %c0_100 = arith.constant 0 : index
    %102 = vector.load %arg3[%c1_97, %c4_98, %c0_99, %c0_100] : memref<3x9x4x32xbf16, #tpu.memory_space<vmem>>, vector<1x1x4x32xbf16>
    %103 = vector.shape_cast %102 : vector<1x1x4x32xbf16> to vector<4x32xbf16>
    %cst_101 = arith.constant dense<0.000000e+00> : vector<256x32xf32>
    %104 = tpu.matmul %2, %103, %cst_101 {dimension_numbers = #tpu.dot_dimension_numbers<[1], [0], [0], [1], [0, 0, 1, 1], [], []>} : vector<256x4xbf16>, vector<4x32xbf16>, vector<256x32xf32> -> vector<256x32xf32>
    %c2_102 = arith.constant 2 : index
    %c0_103 = arith.constant 0 : index
    %c0_104 = arith.constant 0 : index
    %105 = vector.load %arg4[%c2_102, %c0_103, %c0_104] : memref<4x1x32xf32, #tpu.memory_space<vmem>>, vector<1x1x32xf32>
    %106 = vector.shape_cast %105 : vector<1x1x32xf32> to vector<1x32xf32>
    %107 = vector.broadcast %106 : vector<1x32xf32> to vector<256x32xf32>
    %108 = arith.addf %104, %107 : vector<256x32xf32>
    %cst_105 = arith.constant 0.000000e+00 : f32
    %109 = vector.broadcast %cst_105 : f32 to vector<256x32xf32>
    %110 = arith.maximumf %108, %109 : vector<256x32xf32>
    %111 = arith.truncf %110 : vector<256x32xf32> to vector<256x32xbf16>
    %c2_106 = arith.constant 2 : index
    %c0_107 = arith.constant 0 : index
    %c0_108 = arith.constant 0 : index
    %112 = vector.load %arg6[%c2_106, %c0_107, %c0_108] : memref<4x32x32xbf16, #tpu.memory_space<vmem>>, vector<1x32x32xbf16>
    %113 = vector.shape_cast %112 : vector<1x32x32xbf16> to vector<32x32xbf16>
    %cst_109 = arith.constant dense<0.000000e+00> : vector<256x32xf32>
    %114 = tpu.matmul %111, %113, %cst_109 {dimension_numbers = #tpu.dot_dimension_numbers<[1], [0], [0], [1], [0, 0, 1, 1], [], []>} : vector<256x32xbf16>, vector<32x32xbf16>, vector<256x32xf32> -> vector<256x32xf32>
    %115 = arith.addf %101, %114 : vector<256x32xf32>
    %c2_110 = arith.constant 2 : index
    %c4_111 = arith.constant 4 : index
    %c0_112 = arith.constant 0 : index
    %c0_113 = arith.constant 0 : index
    %116 = vector.load %arg3[%c2_110, %c4_111, %c0_112, %c0_113] : memref<3x9x4x32xbf16, #tpu.memory_space<vmem>>, vector<1x1x4x32xbf16>
    %117 = vector.shape_cast %116 : vector<1x1x4x32xbf16> to vector<4x32xbf16>
    %cst_114 = arith.constant dense<0.000000e+00> : vector<256x32xf32>
    %118 = tpu.matmul %2, %117, %cst_114 {dimension_numbers = #tpu.dot_dimension_numbers<[1], [0], [0], [1], [0, 0, 1, 1], [], []>} : vector<256x4xbf16>, vector<4x32xbf16>, vector<256x32xf32> -> vector<256x32xf32>
    %c3_115 = arith.constant 3 : index
    %c0_116 = arith.constant 0 : index
    %c0_117 = arith.constant 0 : index
    %119 = vector.load %arg4[%c3_115, %c0_116, %c0_117] : memref<4x1x32xf32, #tpu.memory_space<vmem>>, vector<1x1x32xf32>
    %120 = vector.shape_cast %119 : vector<1x1x32xf32> to vector<1x32xf32>
    %121 = vector.broadcast %120 : vector<1x32xf32> to vector<256x32xf32>
    %122 = arith.addf %118, %121 : vector<256x32xf32>
    %cst_118 = arith.constant 0.000000e+00 : f32
    %123 = vector.broadcast %cst_118 : f32 to vector<256x32xf32>
    %124 = arith.maximumf %122, %123 : vector<256x32xf32>
    %125 = arith.truncf %124 : vector<256x32xf32> to vector<256x32xbf16>
    %c3_119 = arith.constant 3 : index
    %c0_120 = arith.constant 0 : index
    %c0_121 = arith.constant 0 : index
    %126 = vector.load %arg6[%c3_119, %c0_120, %c0_121] : memref<4x32x32xbf16, #tpu.memory_space<vmem>>, vector<1x32x32xbf16>
    %127 = vector.shape_cast %126 : vector<1x32x32xbf16> to vector<32x32xbf16>
    %cst_122 = arith.constant dense<0.000000e+00> : vector<256x32xf32>
    %128 = tpu.matmul %125, %127, %cst_122 {dimension_numbers = #tpu.dot_dimension_numbers<[1], [0], [0], [1], [0, 0, 1, 1], [], []>} : vector<256x32xbf16>, vector<32x32xbf16>, vector<256x32xf32> -> vector<256x32xf32>
    %129 = arith.addf %115, %128 : vector<256x32xf32>
    %cst_123 = arith.constant 0.000000e+00 : f32
    %130 = vector.broadcast %cst_123 : f32 to vector<256x32xf32>
    %131 = arith.maximumf %129, %130 : vector<256x32xf32>
    %c0_124 = arith.constant 0 : index
    %c0_125 = arith.constant 0 : index
    %c0_126 = arith.constant 0 : index
    %132 = vector.load %arg7[%c0_124, %c0_125, %c0_126] : memref<1x256x32xf32, #tpu.memory_space<vmem>>, vector<1x256x32xf32>
    %133 = vector.shape_cast %132 : vector<1x256x32xf32> to vector<256x32xf32>
    %134 = vector.shape_cast %131 : vector<256x32xf32> to vector<1x256x32xf32>
    tpu.vector_store %arg7[%c0_124, %c0_125, %c0_126], %134 {strides = array<i32>} : memref<1x256x32xf32, #tpu.memory_space<vmem>>, vector<1x256x32xf32>,
    return
  }
  func.func @transform_0(%arg0: i32) -> (i32, i32, i32, i32) {
    %c0_i32 = arith.constant 0 : i32
    %c0_i32_0 = arith.constant 0 : i32
    %c0_i32_1 = arith.constant 0 : i32
    %c0_i32_2 = arith.constant 0 : i32
    return %arg0, %c0_i32, %c0_i32_0, %c0_i32_1 : i32, i32, i32, i32
  }
  func.func @transform_1(%arg0: i32) -> (i32, i32) {
    %c0_i32 = arith.constant 0 : i32
    %c0_i32_0 = arith.constant 0 : i32
    %c0_i32_1 = arith.constant 0 : i32
    return %c0_i32, %c0_i32_0 : i32, i32
  }
  func.func @transform_2(%arg0: i32) -> (i32, i32, i32, i32) {
    %c0_i32 = arith.constant 0 : i32
    %c0_i32_0 = arith.constant 0 : i32
    %c0_i32_1 = arith.constant 0 : i32
    %c0_i32_2 = arith.constant 0 : i32
    %c0_i32_3 = arith.constant 0 : i32
    return %c0_i32, %c0_i32_0, %c0_i32_1, %c0_i32_2 : i32, i32, i32, i32
  }
  func.func @transform_3(%arg0: i32) -> (i32, i32, i32) {
    %c0_i32 = arith.constant 0 : i32
    %c0_i32_0 = arith.constant 0 : i32
    %c0_i32_1 = arith.constant 0 : i32
    %c0_i32_2 = arith.constant 0 : i32
    return %c0_i32, %c0_i32_0, %c0_i32_1 : i32, i32, i32
  }
  func.func @transform_4(%arg0: i32) -> (i32, i32, i32) {
    %c0_i32 = arith.constant 0 : i32
    %c0_i32_0 = arith.constant 0 : i32
    %c0_i32_1 = arith.constant 0 : i32
    return %arg0, %c0_i32, %c0_i32_0 : i32, i32, i32
  }
  func.func @transform_5(%arg0: i32) -> (i32, i32, i32) {
    %c0_i32 = arith.constant 0 : i32
    %c0_i32_0 = arith.constant 0 : i32
    %c0_i32_1 = arith.constant 0 : i32
    %c0_i32_2 = arith.constant 0 : i32
    return %c0_i32, %c0_i32_0, %c0_i32_1 : i32, i32, i32
  }
  func.func @transform_6(%arg0: i32) -> (i32, i32, i32) {
    %c0_i32 = arith.constant 0 : i32
    %c0_i32_0 = arith.constant 0 : i32
    %c0_i32_1 = arith.constant 0 : i32
    return %arg0, %c0_i32, %c0_i32_0 : i32, i32, i32
  }
}

</mosaic_0001>

<bundles_post_ra>
// kernel: tpu_custom_call.1
= control target key start
LH: loop header
LB: loop body
LE: loop exit
PB: predicated region body
PF: predicated region fallthrough
CT: control target
= control target key end

     0   :  { %s5361_s21 = smov 0   ;;  %s6989_s0 = inlined_call_operand.vmem [shape: bf16[2,16,40,4], index: 0, kind: input, shape index: {}]   ;;  %s6990_s1 = inlined_call_operand.vmem [shape: bf16[4,32], index: 1, kind: input, shape index: {}]   ;;  %s6991_s2 = inlined_call_operand.vmem [shape: bf16[3,9,4,32], index: 2, kind: input, shape index: {}]   ;;  %s6992_s3 = inlined_call_operand.vmem [shape: f32[4,1,32], index: 3, kind: input, shape index: {}]   ;;  %s6993_s4 = inlined_call_operand.vmem [shape: f32[2,1,32], index: 4, kind: input, shape index: {}]   ;;  %s6994_s5 = inlined_call_operand.vmem [shape: bf16[4,32,32], index: 5, kind: input, shape index: {}]   ;;  %s6995_s6 = inlined_call_operand.vmem [shape: f32[2,256,32], index: 6, kind: output, shape index: {}]  }
   0x1 LB: > { %s4269_s22 = sadd.s32 4294967295, %s5324_s21   ;;  %p4273_p0 = scmp.ge.s32.totalorder %s5324_s21, 1  ;;  %s5324_s21 = sphi %s5361_s21, %s16_s21  }
   0x2   : > { %p220_p1 = scmp.lt.s32.totalorder %s5324_s21, 3 }
   0x4   : > { %p221_p2 = pnand %p4273_p0, %p220_p1 }
   0x6   : > { %224 = sbr.rel (%p221_p2) target bundleno = 1021 (0x3fd), region = 44 }
   0xb   : > { %vm363_vm0 = vcmask 1041408   ;;  %v485_v0 = vld [vmem:[%s6990_s1] sm:$0x3]  ;;  %p253_p3 = scmp.lt.s32.totalorder %s4269_s22, 1  ;;  %vm364_vm1 = vcmask 1045508   ;;  %v5380_v2 = vld [vmem:[%s6994_s5 + $0x8] sm:$0xff]  }
   0xc   : > { %5240 = vmatprep.subr.msk.bf16.mxu0 %vm363_vm0, %v485_v0  ;;  %v592_v1 = vsel %vm363_vm0, %v485_v0, 0  ;;  %5241 = vmatprep.subr.msk.bf16.mxu1 %vm363_vm0, %v485_v0  ;;  %vm5383_vm2 = vmor %vm363_vm0, %vm364_vm1  ;;  %vm541_vm3 = vcmask 31744   ;;  %vm819_vm4 = vcmask 261120  }
   0xd   : > { %4831 = vmatpush3.bf16.msra.mxu0 %v592_v1  ;;  %s7172_s22 = smov (!%p253_p3, %s4269_s22), 1  ;;  %5239 = vmatpush3.bf16.msra.mxu1 %v592_v1 }
   0xe   : > { %s5253_s27 = smul.u32 320, %s7172_s22  ;;  %4864 = vmatprep.subr.bf16.mxu1 %v5380_v2  ;;  %s260_s10 = scalar_lea.vmem %s6993_s4, %s7172_s22 }
   0xf   : > { %s4625_s11 = sshll.u32 %s7172_s22, 8 }
  0x10   : > { %s5392_s30 = scalar_lea.vmem %s6989_s0, %s5253_s27  ;;  %s6867_s13 = scalar_lea.vmem %s6995_s6, %s4625_s11 }
  0x11   : > { %v267_v4 = vld [vmem:[%s5392_s30 + $0x4] sm:$0xc]  ;;  %v268_v5 = vld [vmem:[%s5392_s30 + $0x8] sm:$0xf]  ;;  %v269_v6 = vld [vmem:[%s5392_s30 + $0xc] sm:$0x3] }
  0x12   : > { %v4277_v7 = vrot.slane %v267_v4, 10  ;;  %v368_v8 = vrot.slane %v268_v5, 6  ;;  %v371_v9 = vrot.slane %v269_v6, 6  ;;  %v270_v10 = vld [vmem:[%s5392_s30 + $0x18] sm:$0xc] }
  0x13   : > { %v271_v11 = vld [vmem:[%s5392_s30 + $0x1c] sm:$0xf]  ;;  %v272_v12 = vld [vmem:[%s5392_s30 + $0x20] sm:$0x3]  ;;  %v4278_v13 = vrot.slane %v270_v10, 10 }
  0x14   : > { %v369_v14 = vsel %vm5383_vm2, %v4277_v7, %v368_v8  ;;  %v370_v15 = vrot.slane %v368_v8, 4  ;;  %v375_v16 = vrot.slane %v271_v11, 6  ;;  %v378_v17 = vrot.slane %v272_v12, 6  ;;  %v273_v18 = vld [vmem:[%s5392_s30 + $0x2c] sm:$0xc] }
  0x15   : > { %v274_v19 = vld [vmem:[%s5392_s30 + $0x30] sm:$0xf]  ;;  %v275_v20 = vld [vmem:[%s5392_s30 + $0x34] sm:$0x3]  ;;  %v4279_v21 = vrot.slane %v273_v18, 10 }
  0x16   : > { %v372_v22 = vsel %vm5383_vm2, %v370_v15, %v371_v9  ;;  %v376_v23 = vsel %vm5383_vm2, %v4278_v13, %v375_v16  ;;  %v377_v24 = vrot.slane %v375_v16, 4  ;;  %v382_v25 = vrot.slane %v274_v19, 6  ;;  %v276_v26 = vld [vmem:[%s5392_s30 + $0x40] sm:$0xc]  ;;  %v277_v27 = vld [vmem:[%s5392_s30 + $0x44] sm:$0xf] }
  0x17   : > { %v5411_v28 = vcombine.low %v369_v14, %v372_v22  ;;  %v385_v29 = vrot.slane %v275_v20, 6  ;;  %v278_v30 = vld [vmem:[%s5392_s30 + $0x48] sm:$0x3]  ;;  %v4280_v31 = vrot.slane %v276_v26, 10  ;;  %v389_v32 = vrot.slane %v277_v27, 6 }
  0x18   : > { %v379_v33 = vsel %vm5383_vm2, %v377_v24, %v378_v17  ;;  %v383_v34 = vsel %vm5383_vm2, %v4279_v21, %v382_v25  ;;  %v384_v35 = vrot.slane %v382_v25, 4  ;;  %v392_v36 = vrot.slane %v278_v30, 6  ;;  %v279_v37 = vld [vmem:[%s5392_s30 + $0x54] sm:$0xc]  ;;  %v280_v38 = vld [vmem:[%s5392_s30 + $0x58] sm:$0xf] }
  0x19   : > { %4832 = vmatprep.mubr.msk.bf16.mxu0 %vm541_vm3, %v5411_v28  ;;  %v5422_v39 = vcombine.low %v376_v23, %v379_v33  ;;  %v391_v40 = vrot.slane %v389_v32, 4  ;;  %v281_v41 = vld [vmem:[%s5392_s30 + $0x5c] sm:$0x3]  ;;  %v4281_v42 = vrot.slane %v279_v37, 10  ;;  %v282_v43 = vld [vmem:[%s5392_s30 + $0x68] sm:$0xc]  ;;  %v390_v54 = vsel %vm5383_vm2, %v4280_v31, %v389_v32 }
  0x1a   : > { %v386_v44 = vsel %vm5383_vm2, %v384_v35, %v385_v29  ;;  %v396_v45 = vrot.slane %v280_v38, 6  ;;  %v399_v46 = vrot.slane %v281_v41, 6  ;;  %v283_v47 = vld [vmem:[%s5392_s30 + $0x6c] sm:$0xf]  ;;  %v284_v48 = vld [vmem:[%s5392_s30 + $0x70] sm:$0x3] }
  0x1b   : > { %4833 = vmatmul.mubr.msk.bf16.vlgmr.msra.gmra.mxu0 %vm541_vm3, %v5422_v39  ;;  %v5432_v49 = vcombine.low %v383_v34, %v386_v44  ;;  %v4282_v50 = vrot.slane %v282_v43, 10  ;;  %v403_v51 = vrot.slane %v283_v47, 6  ;;  %v285_v52 = vld [vmem:[%s5392_s30 + $0x7c] sm:$0xc]  ;;  %v286_v53 = vld [vmem:[%s5392_s30 + $0x80] sm:$0xf]  ;;  %v393_v55 = vsel %vm5383_vm2, %v391_v40, %v392_v36 }
  0x1c   : > { %v398_v56 = vrot.slane %v396_v45, 4  ;;  %v406_v57 = vrot.slane %v284_v48, 6  ;;  %v287_v58 = vld [vmem:[%s5392_s30 + $0x84] sm:$0x3]  ;;  %v5442_v59 = vld [vmem:[%s5392_s30 + $0x90] sm:$0xc]  ;;  %v397_v60 = vsel %vm5383_vm2, %v4281_v42, %v396_v45  ;;  %v5457_v6 = vcombine.low %v390_v54, %v393_v55 }
  0x1d   : > { %4836 = vmatprep.mubr.msk.bf16.mxu0 %vm541_vm3, %v5432_v49  ;;  %v405_v61 = vrot.slane %v403_v51, 4  ;;  %v410_v62 = vrot.slane %v286_v53, 6  ;;  %v5449_v63 = vld [vmem:[%s5392_s30 + $0x94] sm:$0xf]  ;;  %v4283_v1 = vrot.slane %v285_v52, 10  ;;  %v404_v7 = vsel %vm5383_vm2, %v4282_v50, %v403_v51 }
  0x1e   : > { %v400_v0 = vsel %vm5383_vm2, %v398_v56, %v399_v46  ;;  %v5454_v4 = vld [vmem:[%s5392_s30 + $0x98] sm:$0x3]  ;;  %v417_v5 = vrot.slane %v5449_v63, 6  ;;  %v413_v8 = vrot.slane %v287_v58, 6  ;;  %v4284_v9 = vrot.slane %v5442_v59, 10  ;;  %v5263_v59 = vld [vmem:[%s6994_s5] sm:$0xff]  }
  0x1f   : > { %v291_v10 = vld [vmem:[%s5392_s30 + $0xa4] sm:$0xc]  ;;  %v292_v11 = vld [vmem:[%s5392_s30 + $0xa8] sm:$0xf]  ;;  %v5464_v12 = vcombine.low %v397_v60, %v400_v0  ;;  %v407_v13 = vsel %vm5383_vm2, %v405_v61, %v406_v57  ;;  %v412_v14 = vrot.slane %v410_v62, 4  ;;  %v420_v18 = vrot.slane %v5454_v4, 6 }
  0x20   : > { %v5468_v15 = vrot.slane %v417_v5, 4  ;;  %v293_v16 = vld [vmem:[%s5392_s30 + $0xac] sm:$0x3]  ;;  %v294_v17 = vld [vmem:[%s5392_s30 + $0xb8] sm:$0xc]  ;;  %v4285_v19 = vrot.slane %v291_v10, 10  ;;  %v411_v23 = vsel %vm5383_vm2, %v4283_v1, %v410_v62  ;;  %v5480_v29 = vcombine.low %v404_v7, %v407_v13 }
  0x21   : > { %v424_v20 = vrot.slane %v292_v11, 6  ;;  %v427_v21 = vrot.slane %v293_v16, 6  ;;  %v295_v22 = vld [vmem:[%s5392_s30 + $0xbc] sm:$0xf]  ;;  %v296_v24 = vld [vmem:[%s5392_s30 + $0xc0] sm:$0x3]  ;;  %v414_v41 = vsel %vm5383_vm2, %v412_v14, %v413_v8  ;;  %v418_v4 = vsel %vm5383_vm2, %v4284_v9, %v417_v5 }
  0x22   : > { %v4286_v25 = vrot.slane %v294_v17, 10  ;;  %v431_v26 = vrot.slane %v295_v22, 6  ;;  %v297_v27 = vld [vmem:[%s5392_s30 + $0xcc] sm:$0xc]  ;;  %v434_v32 = vrot.slane %v296_v24, 6  ;;  %v5511_v60 = vcombine.low %v411_v23, %v414_v41 }
  0x23   : > { %4837 = vmatmul.mubr.msk.bf16.gmra.mxu0 %vm541_vm3, %v5457_v6  ;;  %v425_v30 = vsel %vm5383_vm2, %v4285_v19, %v424_v20  ;;  %v426_v31 = vrot.slane %v424_v20, 4  ;;  %v298_v33 = vld [vmem:[%s5392_s30 + $0xd0] sm:$0xf]  ;;  %v299_v34 = vld [vmem:[%s5392_s30 + $0xd4] sm:$0x3]  ;;  %v4287_v37 = vrot.slane %v297_v27, 10  ;;  %v421_v9 = vsel %vm5383_vm2, %v5468_v15, %v420_v18 }
  0x24   : > { %4840 = vmatprep.mubr.msk.bf16.mxu0 %vm541_vm3, %v5464_v12  ;;  %v432_v35 = vsel %vm5383_vm2, %v4286_v25, %v431_v26  ;;  %v433_v36 = vrot.slane %v431_v26, 4  ;;  %v438_v38 = vrot.slane %v298_v33, 6  ;;  %v300_v40 = vld [vmem:[%s5392_s30 + $0xe0] sm:$0xc]  ;;  %v441_v43 = vrot.slane %v299_v34, 6 }
  0x25   : > { %v428_v42 = vsel %vm5383_vm2, %v426_v31, %v427_v21  ;;  %v301_v44 = vld [vmem:[%s5392_s30 + $0xe4] sm:$0xf]  ;;  %v302_v45 = vld [vmem:[%s5392_s30 + $0xe8] sm:$0x3]  ;;  %v4288_v46 = vrot.slane %v300_v40, 10 }
  0x26   : > { %v5497_v47 = vcombine.low %v425_v30, %v428_v42  ;;  %v435_v48 = vsel %vm5383_vm2, %v433_v36, %v434_v32  ;;  %v439_v50 = vsel %vm5383_vm2, %v4287_v37, %v438_v38  ;;  %v440_v51 = vrot.slane %v438_v38, 4  ;;  %v303_v52 = vld [vmem:[%s5392_s30 + $0xf4] sm:$0xc]  ;;  %v304_v53 = vld [vmem:[%s5392_s30 + $0xf8] sm:$0xf] }
  0x27   : > { %v5505_v54 = vcombine.low %v432_v35, %v435_v48  ;;  %v445_v55 = vrot.slane %v301_v44, 6  ;;  %v448_v56 = vrot.slane %v302_v45, 6  ;;  %v305_v57 = vld [vmem:[%s5392_s30 + $0xfc] sm:$0x3]  ;;  %v4289_v58 = vrot.slane %v303_v52, 10  ;;  %v5264_v52 = vld [vmem:[%s5392_s30] sm:$0xff]  }
  0x28   : > { %4848 = vmatprep.mubr.msk.bf16.mxu1 %vm541_vm3, %v5497_v47  ;;  %v442_v61 = vsel %vm5383_vm2, %v440_v51, %v441_v43  ;;  %v452_v62 = vrot.slane %v304_v53, 6  ;;  %v455_v63 = vrot.slane %v305_v57, 6  ;;  %v306_v0 = vld [vmem:[%s5392_s30 + $0x108] sm:$0xc]  ;;  %v307_v1 = vld [vmem:[%s5392_s30 + $0x10c] sm:$0xf]  ;;  %v5554_v35 = vcombine.low %v418_v4, %v421_v9 }
  0x29   : > { %4849 = vmatmul.mubr.msk.bf16.vlgmr.msra.gmra.mxu1 %vm541_vm3, %v5505_v54  ;;  %v5523_v7 = vcombine.low %v439_v50, %v442_v61  ;;  %v447_v8 = vrot.slane %v445_v55, 4  ;;  %v308_v10 = vld [vmem:[%s5392_s30 + $0x110] sm:$0x3]  ;;  %v309_v11 = vld [vmem:[%s5392_s30 + $0x11c] sm:$0xc]  ;;  %v446_v13 = vsel %vm5383_vm2, %v4288_v46, %v445_v55  ;;  %v459_v17 = vrot.slane %v307_v1, 6 }
  0x2a   : > { %v453_v14 = vsel %vm5383_vm2, %v4289_v58, %v452_v62  ;;  %v454_v16 = vrot.slane %v452_v62, 4  ;;  %v310_v5 = vld [vmem:[%s5392_s30 + $0x120] sm:$0xf]  ;;  %4865 = vmatpush3.bf16.msra.mxu1 %v5380_v2  ;;  %v4290_v20 = vrot.slane %v306_v0, 10  ;;  %v311_v21 = vld [vmem:[%s5392_s30 + $0x124] sm:$0x3] }
  0x2b   : > { %4841 = vmatmul.mubr.msk.bf16.gmra.mxu0 %vm541_vm3, %v5480_v29  ;;  %4852 = vmatprep.mubr.msk.bf16.mxu1 %vm541_vm3, %v5523_v7  ;;  %v449_v19 = vsel %vm5383_vm2, %v447_v8, %v448_v56  ;;  %v466_v22 = vrot.slane %v310_v5, 6  ;;  %v312_v23 = vld [vmem:[%s5392_s30 + $0x130] sm:$0xc]  ;;  %v461_v24 = vrot.slane %v459_v17, 4  ;;  %v462_v25 = vrot.slane %v308_v10, 6  ;;  %v5265_v53 = vld [vmem:[%s5392_s30 + $0x14] sm:$0xff]  }
  0x2c   : > { %4844 = vmatprep.mubr.msk.bf16.mxu0 %vm541_vm3, %v5511_v60  ;;  %v456_v2 = vsel %vm5383_vm2, %v454_v16, %v455_v63  ;;  %v4291_v15 = vrot.slane %v309_v11, 10  ;;  %v313_v18 = vld [vmem:[%s5392_s30 + $0x134] sm:$0xf]  ;;  %4866 = vmatprep.subr.bf16.mxu1 %v5263_v59  ;;  %v5549_v26 = vcombine.low %v446_v13, %v449_v19  ;;  %v314_v30 = vld [vmem:[%s5392_s30 + $0x138] sm:$0x3]  ;;  %v469_v32 = vrot.slane %v311_v21, 6 }
  0x2d   : > { %v5551_v27 = vcombine.low %v453_v14, %v456_v2  ;;  %v468_v31 = vrot.slane %v466_v22, 4  ;;  %v4292_v33 = vrot.slane %v312_v23, 10  ;;  %v473_v34 = vrot.slane %v313_v18, 6  ;;  %v1071_v50 = vld [vmem:[%s6991_s2] sm:$0x3]  ;;  %v5266_v56 = vld [vmem:[%s5392_s30 + $0x28] sm:$0xff]  }
  0x2e   : > { %4867 = vmatpush3.bf16.msra.mxu1 %v5263_v59  ;;  %v476_v37 = vrot.slane %v314_v30, 6  ;;  %v460_v38 = vsel %vm5383_vm2, %v4290_v20, %v459_v17  ;;  %v463_v40 = vsel %vm5383_vm2, %v461_v24, %v462_v25  ;;  %v467_v41 = vsel %vm5383_vm2, %v4291_v15, %v466_v22  ;;  %5242 = vmatprep.subr.msk.bf16.mxu0 %vm363_vm0, %v1071_v50  ;;  %v5596_v55 = vld [vmem:[%s6991_s2 + $0x8] sm:$0x3]  ;;  %v5267_v57 = vld [vmem:[%s5392_s30 + $0x3c] sm:$0xff]   ;;  %v1336_v62 = vld [vmem:[%s5392_s30 + $0x4] sm:$0xc] }
  0x2f   : > { %v475_v36 = vrot.slane %v473_v34, 4  ;;  %v470_v42 = vsel %vm5383_vm2, %v468_v31, %v469_v32  ;;  %v5570_v43 = vcombine.low %v460_v38, %v463_v40  ;;  %v474_v45 = vsel %vm5383_vm2, %v4292_v33, %v473_v34  ;;  %5243 = vmatprep.subr.msk.bf16.mxu1 %vm363_vm0, %v5596_v55  ;;  %v1337_v58 = vld [vmem:[%s5392_s30 + $0x8] sm:$0xf]  ;;  %v1340_v61 = vld [vmem:[%s5392_s30 + $0x1c] sm:$0xf] }
  0x30   : > { %v5572_v44 = vcombine.low %v467_v41, %v470_v42  ;;  %v1105_v51 = vsel %vm363_vm0, %v1071_v50, 0  ;;  %v1362_v59 = vrot.slane %v1337_v58, 6  ;;  %v1338_v63 = vld [vmem:[%s5392_s30 + $0xc] sm:$0x3]  ;;  %v1369_v0 = vrot.slane %v1340_v61, 6  ;;  %v5270_v58 = vld [vmem:[%s5392_s30 + $0x34] sm:$0xff]  }
  0x31   : > { %4853 = vmatmul.mubr.msk.bf16.gmra.mxu1 %vm541_vm3, %v5549_v26  ;;  %v477_v46 = vsel %vm5383_vm2, %v475_v36, %v476_v37  ;;  %4901 = vmatpush3.bf16.msra.mxu0 %v1105_v51  ;;  %v4370_v1 = vrot.slane %v1336_v62, 10  ;;  %v1365_v8 = vrot.slane %v1338_v63, 6  ;;  %v1339_v10 = vld [vmem:[%s5392_s30 + $0x18] sm:$0xc]  ;;  %v4374_v11 = vld [vmem:[%s6991_s2 + $0x2] sm:$0x3] }
  0x32   : > { %4856 = vmatprep.mubr.msk.bf16.mxu1 %vm541_vm3, %v5551_v27  ;;  %v5582_v48 = vcombine.low %v474_v45, %v477_v46  ;;  %v1364_v4 = vrot.slane %v1362_v59, 4  ;;  %v1341_v13 = vld [vmem:[%s5392_s30 + $0x20] sm:$0x3]  ;;  %v4371_v14 = vrot.slane %v1339_v10, 10  ;;  %v1371_v16 = vrot.slane %v1369_v0, 4  ;;  %5244 = vmatprep.subr.msk.bf16.mxu0 %vm363_vm0, %v4374_v11  ;;  %v5277_v10 = vld [vmem:[%s5392_s30 + $0x64] sm:$0xff]  }
  0x33   : > { %4845 = vmatmul.mubr.msk.bf16.gmra.mxu0 %vm541_vm3, %v5554_v35  ;;  %v1415_v17 = vsel %vm363_vm0, %v4374_v11, 0  ;;  %v1363_v5 = vsel %vm5383_vm2, %v4370_v1, %v1362_v59  ;;  %v1372_v19 = vrot.slane %v1341_v13, 6  ;;  %v1343_v2 = vld [vmem:[%s5392_s30 + $0x30] sm:$0xf]  ;;  %v1346_v25 = vld [vmem:[%s5392_s30 + $0x44] sm:$0xf] }
  0x34   : > { %4902 = vmatprep.mubr.msk.bf16.mxu0 %vm541_vm3, %v5264_v52  ;;  %v1366_v9 = vsel %vm5383_vm2, %v1364_v4, %v1365_v8  ;;  %v1370_v21 = vsel %vm5383_vm2, %v4371_v14, %v1369_v0  ;;  %v1376_v24 = vrot.slane %v1343_v2, 6  ;;  %v1342_v15 = vld [vmem:[%s5392_s30 + $0x2c] sm:$0xc]  ;;  %v1344_v18 = vld [vmem:[%s5392_s30 + $0x34] sm:$0x3]  ;;  %v1383_v30 = vrot.slane %v1346_v25, 6 }
  0x35   : > { %v4375_v20 = vcombine.low %v1363_v5, %v1366_v9  ;;  %v1373_v22 = vsel %vm5383_vm2, %v1371_v16, %v1372_v19  ;;  %v4372_v31 = vrot.slane %v1342_v15, 10  ;;  %v1379_v33 = vrot.slane %v1344_v18, 6  ;;  %v1345_v34 = vld [vmem:[%s5392_s30 + $0x40] sm:$0xc]  ;;  %v1347_v36 = vld [vmem:[%s5392_s30 + $0x48] sm:$0x3] }
  0x36   : > { %v4376_v23 = vcombine.low %v1370_v21, %v1373_v22  ;;  %v1378_v32 = vrot.slane %v1376_v24, 4  ;;  %v4373_v37 = vrot.slane %v1345_v34, 10  ;;  %v1385_v38 = vrot.slane %v1383_v30, 4  ;;  %v4383_v52 = vld [vmem:[%s6991_s2 + $0x4] sm:$0x3]  ;;  %v5271_v59 = vld [vmem:[%s5392_s30 + $0x48] sm:$0xff]  }
  0x37   : > { %v1377_v40 = vsel %vm5383_vm2, %v4372_v31, %v1376_v24  ;;  %v1386_v42 = vrot.slane %v1347_v36, 6  ;;  %v4392_v61 = vld [vmem:[%s6991_s2 + $0x6] sm:$0x3]  ;;  %v5273_v0 = vld [vmem:[%s5392_s30 + $0x14] sm:$0xff]   ;;  %v5274_v1 = vld [vmem:[%s5392_s30 + $0x28] sm:$0xff]  }
  0x38   : > { %v1380_v41 = vsel %vm5383_vm2, %v1378_v32, %v1379_v33  ;;  %v1384_v46 = vsel %vm5383_vm2, %v4373_v37, %v1383_v30  ;;  %v1819_v62 = vsel %vm363_vm0, %v4392_v61, 0  ;;  %v5272_v63 = vld [vmem:[%s5392_s30] sm:$0xff]   ;;  %v5276_v8 = vld [vmem:[%s5392_s30 + $0x50] sm:$0xff]   ;;  %v5278_v11 = vld [vmem:[%s5392_s30 + $0x78] sm:$0xff]  }
  0x39   : > { %4857 = vmatmul.mubr.msk.bf16.gmra.mxu1 %vm541_vm3, %v5570_v43  ;;  %v4377_v45 = vcombine.low %v1377_v40, %v1380_v41  ;;  %v1387_v50 = vsel %vm5383_vm2, %v1385_v38, %v1386_v42  ;;  %v5275_v4 = vld [vmem:[%s5392_s30 + $0x3c] sm:$0xff]   ;;  %v5279_v13 = vld [vmem:[%s5392_s30 + $0x8c] sm:$0xff]   ;;  %v5281_v16 = vld [vmem:[%s5392_s30 + $0xb4] sm:$0xff]  }
  0x3a   : > { %4860 = vmatprep.mubr.msk.bf16.mxu1 %vm541_vm3, %v5572_v44  ;;  %v4378_v51 = vcombine.low %v1384_v46, %v1387_v50  ;;  %v5280_v14 = vld [vmem:[%s5392_s30 + $0xa0] sm:$0xff]   ;;  %v5284_v9 = vld [vmem:[%s5392_s30 + $0xf0] sm:$0xff]   ;;  %v4466_v21 = vld [vmem:[%s6991_s2 + $0xc] sm:$0x3] }
  0x3b   : > { %4903 = vmatmul.mubr.msk.bf16.vlgmr.msra.gmra.mxu0 %vm541_vm3, %v5265_v53  ;;  %v1557_v53 = vsel %vm363_vm0, %v4383_v52, 0  ;;  %v5283_v5 = vld [vmem:[%s5392_s30 + $0xdc] sm:$0xff]   ;;  %v5285_v19 = vld [vmem:[%s5392_s30 + $0x104] sm:$0xff]   ;;  %v5287_v22 = vld [vmem:[%s5392_s30 + $0x12c] sm:$0xff]  }
  0x3c   : > { %4906 = vmatprep.mubr.msk.bf16.mxu0 %vm541_vm3, %v5266_v56  ;;  %4945 = vmatpush3.bf16.msra.mxu0 %v1415_v17  ;;  %v5268_v56 = vld [vmem:[%s5392_s30 + $0xc] sm:$0xff]   ;;  %v5289_v24 = vld [vmem:[%s5392_s30 + $0x104] sm:$0xff]   ;;  %v5704_v15 = vld [vmem:[%s6992_s3] ss:$0 sm:$0xff] }
  0x3d   : > { %5245 = vmatprep.subr.msk.bf16.mxu0 %vm363_vm0, %v4383_v52  ;;  %v5282_v17 = vld [vmem:[%s5392_s30 + $0xc8] sm:$0xff]   ;;  %v5288_v2 = vld [vmem:[%s5392_s30 + $0xf0] sm:$0xff]   ;;  %v5290_v36 = vld [vmem:[%s5392_s30 + $0x118] sm:$0xff]   ;;  %v1173_v52 = vsel %vm363_vm0, %v5596_v55, 0 }
  0x3e   : > { %v5291_v40 = vld [vmem:[%s5392_s30 + $0x12c] sm:$0xff]   ;;  %v4476_v50 = vld [vmem:[%s5392_s30 + $0xf8] sm:$0xf] }
  0x41   : > { %4861 = vmatmul.mubr.msk.bf16.gmra.mxu1 %vm541_vm3, %v5582_v48 }
  0x43   : > { %4907 = vmatmul.mubr.msk.bf16.gmra.mxu0 %vm541_vm3, %v5267_v57  ;;  %v5269_v57 = vld [vmem:[%s5392_s30 + $0x20] sm:$0xff]  }
  0x44   : > { %4946 = vmatprep.mubr.msk.bf16.mxu0 %vm541_vm3, %v4375_v20  ;;  %v5286_v20 = vld [vmem:[%s5392_s30 + $0x118] sm:$0xff]  }
  0x4b   : > { %4947 = vmatmul.mubr.msk.bf16.vlgmr.msra.gmra.mxu0 %vm541_vm3, %v4376_v23  ;;  %v2416_v23 = vsel %vm363_vm0, %v4466_v21, 0 }
  0x4c   : > { %4950 = vmatprep.mubr.msk.bf16.mxu0 %vm541_vm3, %v4377_v45  ;;  %4955 = vmatpush3.bf16.msra.mxu0 %v1557_v53  ;;  %v2541_v53 = vrot.slane %v4476_v50, 6  ;;  %v4485_v50 = vld [vmem:[%s5392_s30 + $0x134] sm:$0xf] }
  0x4d   : > { %5246 = vmatprep.subr.msk.bf16.mxu0 %vm363_vm0, %v4392_v61  ;;  %v4475_v61 = vld [vmem:[%s5392_s30 + $0xf4] sm:$0xc] }
  0x53   : > { %4951 = vmatmul.mubr.msk.bf16.gmra.mxu0 %vm541_vm3, %v4378_v51 }
  0x54   : > { %4956 = vmatprep.mubr.msk.bf16.mxu0 %vm541_vm3, %v5268_v56  ;;  %v4479_v56 = vld [vmem:[%s5392_s30 + $0x10c] sm:$0xf] }
  0x55   : > { %v2548_v55 = vrot.slane %v4479_v56, 6 }
  0x5b   : > { %4957 = vmatmul.mubr.msk.bf16.vlgmr.msra.gmra.mxu0 %vm541_vm3, %v5269_v57 }
  0x5c   : > { %4960 = vmatprep.mubr.msk.bf16.mxu0 %vm541_vm3, %v5270_v58  ;;  %4965 = vmatpush3.bf16.msra.mxu0 %v1819_v62  ;;  %v4477_v62 = vld [vmem:[%s5392_s30 + $0xfc] sm:$0x3] }
  0x5d   : > { %5248 = vmatprep.subr.msk.bf16.mxu0 %vm363_vm0, %v4466_v21 }
  0x63   : > { %4961 = vmatmul.mubr.msk.bf16.gmra.mxu0 %vm541_vm3, %v5271_v59  ;;  %v5721_v59 = vld [vmem:[%s6991_s2 + $0xa] sm:$0x3] }
  0x64   : > { %4966 = vmatprep.mubr.msk.bf16.mxu0 %vm541_vm3, %v5272_v63 }
  0x6b   : > { %4967 = vmatmul.mubr.msk.bf16.vlgmr.msra.gmra.mxu0 %vm541_vm3, %v5273_v0  ;;  %v4487_v0 = vrot.slane %v4475_v61, 10  ;;  %v4484_v61 = vld [vmem:[%s5392_s30 + $0x130] sm:$0xc] }
  0x6c   : > { %4970 = vmatprep.mubr.msk.bf16.mxu0 %vm541_vm3, %v5274_v1  ;;  %5033 = vmatpush3.bf16.msra.mxu0 %v2416_v23  ;;  %v2543_v1 = vrot.slane %v2541_v53, 4 }
  0x73   : > { %4971 = vmatmul.mubr.msk.bf16.gmra.mxu0 %vm541_vm3, %v5275_v4  ;;  %v2544_v4 = vrot.slane %v4477_v62, 6 }
  0x74   : > { %4974 = vmatprep.mubr.msk.bf16.mxu0 %vm541_vm3, %v5276_v8  ;;  %v4478_v8 = vld [vmem:[%s5392_s30 + $0x108] sm:$0xc] }
  0x75   : > { %v2545_v21 = vsel %vm5383_vm2, %v2543_v1, %v2544_v4 }
  0x7b   : > { %4975 = vmatmul.mubr.msk.bf16.gmra.mxu0 %vm541_vm3, %v5277_v10 }
  0x7c   : > { %4978 = vmatprep.mubr.msk.bf16.mxu0 %vm541_vm3, %v5278_v11 }
  0x83   : > { %4979 = vmatmul.mubr.msk.bf16.gmra.mxu0 %vm541_vm3, %v5279_v13  ;;  %v4491_v13 = vld [vmem:[%s6991_s2 + $0xe] sm:$0x3] }
  0x84   : > { %4982 = vmatprep.mubr.msk.bf16.mxu0 %vm541_vm3, %v5280_v14  ;;  %v4480_v14 = vld [vmem:[%s5392_s30 + $0x110] sm:$0x3]  ;;  %5249 = vmatprep.subr.msk.bf16.mxu0 %vm363_vm0, %v4491_v13 }
  0x8b   : > { %4983 = vmatmul.mubr.msk.bf16.gmra.mxu0 %vm541_vm3, %v5281_v16  ;;  %v4488_v16 = vrot.slane %v4478_v8, 10 }
  0x8c   : > { %4986 = vmatprep.mubr.msk.bf16.mxu0 %vm541_vm3, %v5282_v17 }
  0x93   : > { %4987 = vmatmul.mubr.msk.bf16.gmra.mxu0 %vm541_vm3, %v5283_v5 }
  0x94   : > { %4990 = vmatprep.mubr.msk.bf16.mxu0 %vm541_vm3, %v5284_v9 }
  0x9b   : > { %4991 = vmatmul.mubr.msk.bf16.gmra.mxu0 %vm541_vm3, %v5285_v19  ;;  %v2594_v19 = vsel %vm363_vm0, %v4491_v13, 0  ;;  %v4486_v13 = vld [vmem:[%s5392_s30 + $0x138] sm:$0x3] }
  0x9c   : > { %4994 = vmatprep.mubr.msk.bf16.mxu0 %vm541_vm3, %v5286_v20  ;;  %v2542_v20 = vsel %vm5383_vm2, %v4487_v0, %v2541_v53 }
  0x9d   : > { %v4492_v23 = vcombine.low %v2542_v20, %v2545_v21 }
  0xa3   : > { %4995 = vmatmul.mubr.msk.bf16.gmra.mxu0 %vm541_vm3, %v5287_v22 }
  0xa4   : > { %5034 = vmatprep.mubr.msk.bf16.mxu0 %vm541_vm3, %v5288_v2 }
  0xab   : > { %5035 = vmatmul.mubr.msk.bf16.vlgmr.msra.gmra.mxu0 %vm541_vm3, %v5289_v24 }
  0xac   : > { %5038 = vmatprep.mubr.msk.bf16.mxu0 %vm541_vm3, %v5290_v36  ;;  %5043 = vmatpush3.bf16.msra.mxu0 %v2594_v19 }
  0xb3   : > { %5039 = vmatmul.mubr.msk.bf16.gmra.mxu0 %vm541_vm3, %v5291_v40 }
  0xb4   : > { %5044 = vmatprep.mubr.msk.bf16.mxu0 %vm541_vm3, %v4492_v23 }
  0xdb   : > { %v4834_v25 = vpop.f32.mrf.mxu0 }
  0xdc   : > { %v637_v31 = vadd.f32 %v4834_v25, %v5704_v15 }
  0xdd   : > { %v628_v18 = vpop.f32.mrf.mxu0 }
  0xde   : > { %v629_v32 = vadd.f32 %v5704_v15, %v628_v18  ;;  %v757_v42 = vmax.f32 %v637_v31, 0.0  ;;  %v2550_v18 = vrot.slane %v2548_v55, 4 }
  0xdf   : > { %v4835_v30 = vpop.f32.mrf.mxu0 }
  0xe0   : > { %v640_v33 = vadd.f32 %v4835_v30, %v5704_v15  ;;  %v755_v45 = vmax.f32 %v629_v32, 0.0  ;;  %v2551_v30 = vrot.slane %v4480_v14, 6  ;;  %v4490_v14 = vrot.slane %v4484_v61, 10 }
  0xe1   : > { %v631_v34 = vpop.f32.mrf.mxu0 }
  0xe2   : > { %v758_v37 = vmax.f32 %v640_v33, 0.0  ;;  %v632_v38 = vadd.f32 %v5704_v15, %v631_v34  ;;  %v2549_v33 = vsel %vm5383_vm2, %v4488_v16, %v2548_v55  ;;  %v4482_v34 = vld [vmem:[%s5392_s30 + $0x120] sm:$0xf]  ;;  %v2552_v40 = vsel %vm5383_vm2, %v2550_v18, %v2551_v30 }
  0xe3   : > { %v4838_v41 = vpop.f32.mrf.mxu0  ;;  %v4493_v56 = vcombine.low %v2549_v33, %v2552_v40  ;;  %v2562_v55 = vrot.slane %v4485_v50, 6  ;;  %v2565_v30 = vrot.slane %v4486_v13, 6 }
  0xe4   : > { %v756_v46 = vmax.f32 %v632_v38, 0.0  ;;  %v788_v57 = vpack.c.bf16 %v758_v37, %v757_v42  ;;  %v653_v17 = vadd.f32 %v4838_v41, %v5704_v15  ;;  %v2555_v41 = vrot.slane %v4482_v34, 6 }
  0xe5   : > { %v644_v51 = vpop.f32.mrf.mxu0  ;;  %5045 = vmatmul.mubr.msk.bf16.vlgmr.msra.gmra.mxu0 %vm541_vm3, %v4493_v56  ;;  %v2564_v20 = vrot.slane %v2562_v55, 4  ;;  %v2563_v34 = vsel %vm5383_vm2, %v4490_v14, %v2562_v55 }
  0xe6   : > { %v787_v58 = vpack.c.bf16 %v756_v46, %v755_v45  ;;  %v645_v10 = vadd.f32 %v5704_v15, %v644_v51  ;;  %v761_v36 = vmax.f32 %v653_v17, 0.0  ;;  %v4481_v45 = vld [vmem:[%s5392_s30 + $0x11c] sm:$0xc]  ;;  %v4483_v46 = vld [vmem:[%s5392_s30 + $0x124] sm:$0x3] }
  0xe7   : > { %v4839_v63 = vpop.f32.mrf.mxu0  ;;  %v2558_v8 = vrot.slane %v4483_v46, 6 }
  0xe8   : > { %v656_v11 = vadd.f32 %v4839_v63, %v5704_v15  ;;  %4868 = vmatprep.mubr.msk.bf16.mxu1 %vm819_vm4, %v787_v58  ;;  %v759_v31 = vmax.f32 %v645_v10, 0.0  ;;  %v2557_v58 = vrot.slane %v2555_v41, 4 }
  0xe9   : > { %v647_v5 = vpop.f32.mrf.mxu0  ;;  %4869 = vmatmul.mubr.msk.bf16.vlgmr.msra.gmra.mxu1 %vm819_vm4, %v788_v57  ;;  %v5736_v9 = vpop.f32.mrf.mxu1  ;;  %v4489_v57 = vrot.slane %v4481_v45, 10 }
  0xea   : > { %v648_v22 = vadd.f32 %v5704_v15, %v647_v5  ;;  %4911 = vmatpush3.bf16.msra.mxu1 %v1173_v52  ;;  %v762_v2 = vmax.f32 %v656_v11, 0.0  ;;  %v2559_v19 = vsel %vm5383_vm2, %v2557_v58, %v2558_v8 }
  0xeb   : > { %v4842_v24 = vpop.f32.mrf.mxu0  ;;  %v692_v25 = vpop.f32.mrf.mxu1  ;;  %5247 = vmatprep.subr.msk.bf16.mxu1 %vm363_vm0, %v5721_v59  ;;  %v2556_v11 = vsel %vm5383_vm2, %v4489_v57, %v2555_v41  ;;  %v2566_v41 = vsel %vm5383_vm2, %v2564_v20, %v2565_v30 }
  0xec   : > { %v760_v32 = vmax.f32 %v648_v22, 0.0  ;;  %v790_v51 = vpack.c.bf16 %v762_v2, %v761_v36  ;;  %v669_v0 = vadd.f32 %v4842_v24, %v5704_v15  ;;  %v4494_v18 = vcombine.low %v2556_v11, %v2559_v19 }
  0xed   : > { %v660_v37 = vpop.f32.mrf.mxu0  ;;  %v5751_v38 = vpop.f32.mrf.mxu1 }
  0xee   : > { %v789_v42 = vpack.c.bf16 %v760_v32, %v759_v31  ;;  %v661_v62 = vadd.f32 %v5704_v15, %v660_v37  ;;  %v765_v23 = vmax.f32 %v669_v0, 0.0  ;;  %v693_v32 = vadd.f32 %v5704_v15, %v692_v25  ;;  %5048 = vmatprep.mubr.msk.bf16.mxu0 %vm541_vm3, %v4494_v18 }
  0xef   : > { %v4843_v52 = vpop.f32.mrf.mxu0  ;;  %v695_v53 = vpop.f32.mrf.mxu1  ;;  %v704_v13 = vadd.f32 %v5751_v38, %v5704_v15 }
  0xf0   : > { %v672_v63 = vadd.f32 %v4843_v52, %v5704_v15  ;;  %4872 = vmatprep.mubr.msk.bf16.mxu1 %vm819_vm4, %v789_v42  ;;  %v763_v21 = vmax.f32 %v661_v62, 0.0  ;;  %v696_v33 = vadd.f32 %v5704_v15, %v695_v53  ;;  %v771_v52 = vmax.f32 %v693_v32, 0.0 }
  0xf1   : > { %v663_v1 = vpop.f32.mrf.mxu0  ;;  %4873 = vmatmul.mubr.msk.bf16.gmra.mxu1 %vm819_vm4, %v790_v51  ;;  %v5764_v4 = vpop.f32.mrf.mxu1  ;;  %v4495_v51 = vcombine.low %v2563_v34, %v2566_v41  ;;  %v774_v20 = vmax.f32 %v704_v13, 0.0  ;;  %v4541_v13 = vld [vmem:[%s6991_s2 + $0x1a] sm:$0x3] }
  0xf2   : > { %v664_v10 = vadd.f32 %v5704_v15, %v663_v1  ;;  %v766_v16 = vmax.f32 %v672_v63, 0.0  ;;  %v772_v56 = vmax.f32 %v696_v33, 0.0  ;;  %v717_v38 = vadd.f32 %v5764_v4, %v5704_v15 }
  0xf3   : > { %v4846_v17 = vpop.f32.mrf.mxu0  ;;  %v708_v5 = vpop.f32.mrf.mxu1  ;;  %5049 = vmatmul.mubr.msk.bf16.gmra.mxu0 %vm541_vm3, %v4495_v51 }
  0xf4   : > { %v764_v22 = vmax.f32 %v664_v10, 0.0  ;;  %v792_v36 = vpack.c.bf16 %v766_v16, %v765_v23  ;;  %v685_v25 = vadd.f32 %v4846_v17, %v5704_v15  ;;  %v795_v1 = vpack.c.bf16 %v772_v56, %v771_v52 }
  0xf5   : > { %v676_v2 = vpop.f32.mrf.mxu0  ;;  %v4855_v24 = vpop.f32.mrf.mxu1  ;;  %v709_v8 = vadd.f32 %v5704_v15, %v708_v5  ;;  %v701_v10 = vadd.f32 %v5736_v9, %v5704_v15  ;;  %v777_v33 = vmax.f32 %v717_v38, 0.0 }
  0xf6   : > { %v791_v31 = vpack.c.bf16 %v764_v22, %v763_v21  ;;  %v677_v42 = vadd.f32 %v5704_v15, %v676_v2  ;;  %v769_v62 = vmax.f32 %v685_v25, 0.0  ;;  %v720_v18 = vadd.f32 %v4855_v24, %v5704_v15 }
  0xf7   : > { %v4847_v37 = vpop.f32.mrf.mxu0  ;;  %v711_v40 = vpop.f32.mrf.mxu1  ;;  %v775_v17 = vmax.f32 %v709_v8, 0.0  ;;  %v773_v5 = vmax.f32 %v701_v10, 0.0  ;;  %v5293_v8 = vld [vmem:[%s5392_s30 + $0x20] sm:$0xff]  }
  0xf8   : > { %v688_v45 = vadd.f32 %v4847_v37, %v5704_v15  ;;  %4876 = vmatprep.mubr.msk.bf16.mxu1 %vm819_vm4, %v791_v31  ;;  %v767_v58 = vmax.f32 %v677_v42, 0.0  ;;  %v712_v55 = vadd.f32 %v5704_v15, %v711_v40  ;;  %v778_v34 = vmax.f32 %v720_v18, 0.0 }
  0xf9   : > { %v679_v46 = vpop.f32.mrf.mxu0  ;;  %4877 = vmatmul.mubr.msk.bf16.gmra.mxu1 %vm819_vm4, %v792_v36  ;;  %v4858_v50 = vpop.f32.mrf.mxu1  ;;  %v796_v2 = vpack.c.bf16 %v774_v20, %v773_v5  ;;  %v5297_v20 = vld [vmem:[%s5392_s30 + $0x70] sm:$0xff]  }
  0xfa   : > { %v680_v53 = vadd.f32 %v5704_v15, %v679_v46  ;;  %v770_v57 = vmax.f32 %v688_v45, 0.0  ;;  %v776_v19 = vmax.f32 %v712_v55, 0.0  ;;  %v798_v42 = vpack.c.bf16 %v778_v34, %v777_v33  ;;  %v5294_v55 = vld [vmem:[%s5392_s30 + $0x34] sm:$0xff]   ;;  %v5303_v34 = vld [vmem:[%s5392_s30 + $0xe8] sm:$0xff]  }
  0xfb   : > { %v724_v3 = vpop.f32.mrf.mxu1  ;;  %v733_v4 = vadd.f32 %v4858_v50, %v5704_v15 }
  0xfc   : > { %v768_v61 = vmax.f32 %v680_v53, 0.0  ;;  %v794_v11 = vpack.c.bf16 %v770_v57, %v769_v62  ;;  %v797_v22 = vpack.c.bf16 %v776_v19, %v775_v17  ;;  %v725_v9 = vadd.f32 %v5704_v15, %v724_v3  ;;  %v4508_v62 = vld [vmem:[%s6991_s2 + $0x10] sm:$0x3]  ;;  %v5296_v17 = vld [vmem:[%s5392_s30 + $0x5c] sm:$0xff]  }
  0xfd   : > { %v4859_v63 = vpop.f32.mrf.mxu1  ;;  %v781_v46 = vmax.f32 %v733_v4, 0.0  ;;  %v2736_v10 = vsel %vm363_vm0, %v4508_v62, 0 }
  0xfe   : > { %v793_v0 = vpack.c.bf16 %v768_v61, %v767_v58  ;;  %v779_v31 = vmax.f32 %v725_v9, 0.0  ;;  %v736_v24 = vadd.f32 %v4859_v63, %v5704_v15  ;;  %v2177_v61 = vsel %vm363_vm0, %v5721_v59, 0  ;;  %v5292_v63 = vld [vmem:[%s5392_s30 + $0xc] sm:$0xff]  }
  0xff   : > { %v727_v14 = vpop.f32.mrf.mxu1 }
 0x100   : > { %4880 = vmatprep.mubr.msk.bf16.mxu1 %vm819_vm4, %v793_v0  ;;  %v728_v23 = vadd.f32 %v5704_v15, %v727_v14  ;;  %v782_v51 = vmax.f32 %v736_v24, 0.0 }
 0x101   : > { %4881 = vmatmul.mubr.msk.bf16.gmra.mxu1 %vm819_vm4, %v794_v11  ;;  %v4862_v16 = vpop.f32.mrf.mxu1 }
 0x102   : > { %4884 = vmatprep.mubr.msk.bf16.mxu1 %vm819_vm4, %v795_v1  ;;  %v780_v32 = vmax.f32 %v728_v23, 0.0  ;;  %v800_v53 = vpack.c.bf16 %v782_v51, %v781_v46  ;;  %v749_v56 = vadd.f32 %v4862_v16, %v5704_v15  ;;  %v5295_v16 = vld [vmem:[%s5392_s30 + $0x48] sm:$0xff]   ;;  %v5299_v23 = vld [vmem:[%s5392_s30 + $0x98] sm:$0xff]  }
 0x103   : > { %v740_v21 = vpop.f32.mrf.mxu1 }
 0x104   : > { %v799_v37 = vpack.c.bf16 %v780_v32, %v779_v31  ;;  %v741_v40 = vadd.f32 %v5704_v15, %v740_v21  ;;  %v785_v50 = vmax.f32 %v749_v56, 0.0  ;;  %v5298_v21 = vld [vmem:[%s5392_s30 + $0x84] sm:$0xff]   ;;  %v5302_v31 = vld [vmem:[%s5392_s30 + $0xd4] sm:$0xff]  }
 0x105   : > { %v4863_v30 = vpop.f32.mrf.mxu1 }
 0x106   : > { %v783_v45 = vmax.f32 %v741_v40, 0.0  ;;  %v752_v57 = vadd.f32 %v4863_v30, %v5704_v15  ;;  %v5301_v30 = vld [vmem:[%s5392_s30 + $0xc0] sm:$0xff]  }
 0x107   : > { %v743_v36 = vpop.f32.mrf.mxu1 }
 0x108   : > { %v744_v41 = vadd.f32 %v5704_v15, %v743_v36  ;;  %v786_v3 = vmax.f32 %v752_v57, 0.0  ;;  %v5846_v15 = vpop.f32.mrf.mxu0  ;;  %v5304_v36 = vld [vmem:[%s5392_s30 + $0xfc] sm:$0xff]   ;;  %v3192_v57 = vsel %vm363_vm0, %v4541_v13, 0 }
 0x109   : > { %4885 = vmatmul.mubr.msk.bf16.gmra.mxu1 %vm819_vm4, %v796_v2  ;;  %v5300_v2 = vld [vmem:[%s5392_s30 + $0xac] sm:$0xff]  }
 0x10a   : > { %4888 = vmatprep.mubr.msk.bf16.mxu1 %vm819_vm4, %v797_v22  ;;  %v784_v25 = vmax.f32 %v744_v41, 0.0  ;;  %v802_v58 = vpack.c.bf16 %v786_v3, %v785_v50  ;;  %v5852_v59 = vpop.f32.mrf.mxu0  ;;  %v5305_v41 = vld [vmem:[%s5392_s30 + $0x110] sm:$0xff]   ;;  %v4582_v50 = vld [vmem:[%s6991_s2 + $0x2c] sm:$0x3] }
 0x10c   : > { %v801_v52 = vpack.c.bf16 %v784_v25, %v783_v45  ;;  %v5855_v0 = vpop.f32.mrf.mxu0  ;;  %v5307_v45 = vld [vmem:[%s5392_s30 + $0x138] sm:$0xff]  }
 0x10d   : > { %v5308_v25 = vld [vmem:[%s5392_s30 + $0xfc] sm:$0xff]  }
 0x10e   : > { %v5860_v1 = vpop.f32.mrf.mxu0 }
 0x110   : > { %v5865_v11 = vpop.f32.mrf.mxu0 }
 0x111   : > { %4889 = vmatmul.mubr.msk.bf16.gmra.mxu1 %vm819_vm4, %v798_v42  ;;  %v5306_v42 = vld [vmem:[%s5392_s30 + $0x124] sm:$0xff]  }
 0x112   : > { %4892 = vmatprep.mubr.msk.bf16.mxu1 %vm819_vm4, %v799_v37  ;;  %v5872_v14 = vpop.f32.mrf.mxu0 }
 0x114   : > { %v5877_v19 = vpop.f32.mrf.mxu0 }
 0x115   : > { %6999 = vst [vmem:[#allocation2_spill] sm:$0xff] %v5877_v19 }
 0x116   : > { %v5881_v5 = vpop.f32.mrf.mxu0 }
 0x117   : > { %7000 = vst [vmem:[#allocation3_spill] sm:$0xff] %v5881_v5 }
 0x118   : > { %v5885_v22 = vpop.f32.mrf.mxu0 }
 0x119   : > { %4893 = vmatmul.mubr.msk.bf16.gmra.mxu1 %vm819_vm4, %v800_v53  ;;  %v5310_v53 = vld [vmem:[%s5392_s30 + $0x124] sm:$0xff]  }
 0x11a   : > { %4896 = vmatprep.mubr.msk.bf16.mxu1 %vm819_vm4, %v801_v52  ;;  %v5889_v9 = vpop.f32.mrf.mxu0  ;;  %v5309_v52 = vld [vmem:[%s5392_s30 + $0x110] sm:$0xff]  }
 0x11c   : > { %v5893_v38 = vpop.f32.mrf.mxu0 }
 0x11e   : > { %v5897_v18 = vpop.f32.mrf.mxu0 }
 0x120   : > { %v5901_v32 = vpop.f32.mrf.mxu0 }
 0x121   : > { %4897 = vmatmul.mubr.msk.bf16.gmra.mxu1 %vm819_vm4, %v802_v58  ;;  %7001 = vst [vmem:[#allocation4_spill] sm:$0xff] %v5901_v32 }
 0x122   : > { %4912 = vmatprep.mubr.msk.bf16.mxu1 %vm541_vm3, %v5411_v28  ;;  %v5905_v33 = vpop.f32.mrf.mxu0 }
 0x123   : > { %7002 = vst [vmem:[#allocation5_spill] sm:$0xff] %v5905_v33 }
 0x124   : > { %v5909_v37 = vpop.f32.mrf.mxu0 }
 0x125   : > { %7003 = vst [vmem:[#allocation6_spill] sm:$0xff] %v5909_v37 }
 0x126   : > { %v5913_v40 = vpop.f32.mrf.mxu0 }
 0x127   : > { %7004 = vst [vmem:[#allocation7_spill] sm:$0xff] %v5913_v40 }
 0x128   : > { %v5917_v4 = vpop.f32.mrf.mxu0 }
 0x129   : > { %4913 = vmatmul.mubr.msk.bf16.vlgmr.msra.gmra.mxu1 %vm541_vm3, %v5422_v39 }
 0x12a   : > { %4999 = vmatpush3.bf16.msra.mxu1 %v2177_v61  ;;  %4916 = vmatprep.mubr.msk.bf16.mxu1 %vm541_vm3, %v5432_v49  ;;  %v5921_v24 = vpop.f32.mrf.mxu0 }
 0x12b   : > { %5250 = vmatprep.subr.msk.bf16.mxu1 %vm363_vm0, %v4508_v62 }
 0x12c   : > { %v5925_v46 = vpop.f32.mrf.mxu0 }
 0x12d   : > { %7005 = vst [vmem:[#allocation8_spill] sm:$0xff] %v5925_v46 }
 0x12e   : > { %v5929_v51 = vpop.f32.mrf.mxu0 }
 0x12f   : > { %7006 = vst [vmem:[#allocation9_spill] sm:$0xff] %v5929_v51 }
 0x130   : > { %v5933_v56 = vpop.f32.mrf.mxu0 }
 0x131   : > { %4917 = vmatmul.mubr.msk.bf16.gmra.mxu1 %vm541_vm3, %v5457_v6  ;;  %7007 = vst [vmem:[#allocation10_spill] sm:$0xff] %v5933_v56 }
 0x132   : > { %4920 = vmatprep.mubr.msk.bf16.mxu1 %vm541_vm3, %v5464_v12  ;;  %v5945_v61 = vpop.f32.mrf.mxu0 }
 0x133   : > { %7010 = vst [vmem:[#allocation13_spill] sm:$0xff] %v5945_v61 }
 0x139   : > { %4921 = vmatmul.mubr.msk.bf16.gmra.mxu1 %vm541_vm3, %v5480_v29 }
 0x13a   : > { %4924 = vmatprep.mubr.msk.bf16.mxu1 %vm541_vm3, %v5511_v60 }
 0x141   : > { %4925 = vmatmul.mubr.msk.bf16.gmra.mxu1 %vm541_vm3, %v5554_v35 }
 0x142   : > { %4928 = vmatprep.mubr.msk.bf16.mxu1 %vm541_vm3, %v5497_v47 }
 0x149   : > { %4929 = vmatmul.mubr.msk.bf16.gmra.mxu1 %vm541_vm3, %v5505_v54 }
 0x14a   : > { %4932 = vmatprep.mubr.msk.bf16.mxu1 %vm541_vm3, %v5523_v7 }
 0x151   : > { %4933 = vmatmul.mubr.msk.bf16.gmra.mxu1 %vm541_vm3, %v5549_v26 }
 0x152   : > { %4936 = vmatprep.mubr.msk.bf16.mxu1 %vm541_vm3, %v5551_v27 }
 0x159   : > { %4937 = vmatmul.mubr.msk.bf16.gmra.mxu1 %vm541_vm3, %v5570_v43 }
 0x15a   : > { %4940 = vmatprep.mubr.msk.bf16.mxu1 %vm541_vm3, %v5572_v44 }
 0x161   : > { %4941 = vmatmul.mubr.msk.bf16.gmra.mxu1 %vm541_vm3, %v5582_v48 }
 0x162   : > { %5000 = vmatprep.mubr.msk.bf16.mxu1 %vm541_vm3, %v5292_v63  ;;  %v5311_v63 = vld [vmem:[%s5392_s30 + $0x138] sm:$0xff]  }
 0x169   : > { %5001 = vmatmul.mubr.msk.bf16.vlgmr.msra.gmra.mxu1 %vm541_vm3, %v5293_v8 }
 0x16a   : > { %5053 = vmatpush3.bf16.msra.mxu1 %v2736_v10  ;;  %5004 = vmatprep.mubr.msk.bf16.mxu1 %vm541_vm3, %v5294_v55  ;;  %v5953_v55 = vpop.f32.mrf.mxu0 }
 0x16b   : > { %5251 = vmatprep.subr.msk.bf16.mxu1 %vm363_vm0, %v4541_v13  ;;  %7013 = vst [vmem:[#allocation16_spill] sm:$0xff] %v5953_v55 }
 0x171   : > { %5005 = vmatmul.mubr.msk.bf16.gmra.mxu1 %vm541_vm3, %v5295_v16  ;;  %v5962_v16 = vpop.f32.mrf.mxu0 }
 0x172   : > { %5008 = vmatprep.mubr.msk.bf16.mxu1 %vm541_vm3, %v5296_v17  ;;  %7016 = vst [vmem:[#allocation19_spill] sm:$0xff] %v5962_v16 }
 0x179   : > { %5009 = vmatmul.mubr.msk.bf16.gmra.mxu1 %vm541_vm3, %v5297_v20 }
 0x17a   : > { %5012 = vmatprep.mubr.msk.bf16.mxu1 %vm541_vm3, %v5298_v21  ;;  %v5968_v21 = vpop.f32.mrf.mxu0 }
 0x181   : > { %5013 = vmatmul.mubr.msk.bf16.gmra.mxu1 %vm541_vm3, %v5299_v23  ;;  %v3672_v23 = vsel %vm363_vm0, %v4582_v50, 0 }
 0x182   : > { %5016 = vmatprep.mubr.msk.bf16.mxu1 %vm541_vm3, %v5300_v2 }
 0x189   : > { %5017 = vmatmul.mubr.msk.bf16.gmra.mxu1 %vm541_vm3, %v5301_v30 }
 0x18a   : > { %5020 = vmatprep.mubr.msk.bf16.mxu1 %vm541_vm3, %v5302_v31  ;;  %v5979_v31 = vpop.f32.mrf.mxu0 }
 0x18b   : > { %7021 = vst [vmem:[#allocation24_spill] sm:$0xff] %v5979_v31 }
 0x191   : > { %5021 = vmatmul.mubr.msk.bf16.gmra.mxu1 %vm541_vm3, %v5303_v34 }
 0x192   : > { %5024 = vmatprep.mubr.msk.bf16.mxu1 %vm541_vm3, %v5304_v36 }
 0x199   : > { %5025 = vmatmul.mubr.msk.bf16.gmra.mxu1 %vm541_vm3, %v5305_v41  ;;  %v5985_v41 = vpop.f32.mrf.mxu0 }
 0x19a   : > { %5028 = vmatprep.mubr.msk.bf16.mxu1 %vm541_vm3, %v5306_v42  ;;  %7024 = vst [vmem:[#allocation27_spill] sm:$0xff] %v5985_v41 }
 0x1a1   : > { %5029 = vmatmul.mubr.msk.bf16.gmra.mxu1 %vm541_vm3, %v5307_v45 }
 0x1a2   : > { %5054 = vmatprep.mubr.msk.bf16.mxu1 %vm541_vm3, %v5308_v25  ;;  %v5995_v25 = vpop.f32.mrf.mxu0 }
 0x1a3   : > { %7027 = vst [vmem:[#allocation30_spill] sm:$0xff] %v5995_v25 }
 0x1a9   : > { %v5939_v3 = vpop.f32.mrf.mxu1  ;;  %5055 = vmatmul.mubr.msk.bf16.vlgmr.msra.gmra.mxu1 %vm541_vm3, %v5309_v52 }
 0x1aa   : > { %7008 = vst [vmem:[#allocation11_spill] sm:$0xff] %v5939_v3  ;;  %5058 = vmatprep.mubr.msk.bf16.mxu1 %vm541_vm3, %v5310_v53  ;;  %5099 = vmatpush3.bf16.msra.mxu1 %v3192_v57  ;;  %v6001_v57 = vpop.f32.mrf.mxu0  ;;  %v5313_v3 = vld [vmem:[%s6994_s5 + $0x10] sm:$0xff]  }
 0x1ab   : > { %v5943_v58 = vpop.f32.mrf.mxu1  ;;  %5252 = vmatprep.subr.msk.bf16.mxu1 %vm363_vm0, %v4582_v50 }
 0x1ac   : > { %7009 = vst [vmem:[#allocation12_spill] sm:$0xff] %v5943_v58 }
 0x1ad   : > { %v5948_v62 = vpop.f32.mrf.mxu1 }
 0x1ae   : > { %7011 = vst [vmem:[#allocation14_spill] sm:$0xff] %v5948_v62 }
 0x1af   : > { %v5951_v8 = vpop.f32.mrf.mxu1 }
 0x1b0   : > { %7012 = vst [vmem:[#allocation15_spill] sm:$0xff] %v5951_v8 }
 0x1b1   : > { %v5955_v10 = vpop.f32.mrf.mxu1  ;;  %5059 = vmatmul.mubr.msk.bf16.gmra.mxu1 %vm541_vm3, %v5311_v63 }
 0x1b2   : > { %7014 = vst [vmem:[#allocation17_spill] sm:$0xff] %v5955_v10  ;;  %5100 = vmatprep.mubr.msk.bf16.mxu1 %vm541_vm3, %v5411_v28 }
 0x1b3   : > { %v5960_v13 = vpop.f32.mrf.mxu1 }
 0x1b4   : > { %7015 = vst [vmem:[#allocation18_spill] sm:$0xff] %v5960_v13 }
 0x1b5   : > { %v5964_v17 = vpop.f32.mrf.mxu1 }
 0x1b6   : > { %7017 = vst [vmem:[#allocation20_spill] sm:$0xff] %v5964_v17 }
 0x1b7   : > { %v5966_v20 = vpop.f32.mrf.mxu1 }
 0x1b8   : > { %7018 = vst [vmem:[#allocation21_spill] sm:$0xff] %v5966_v20 }
 0x1b9   : > { %v5971_v2 = vpop.f32.mrf.mxu1  ;;  %5101 = vmatmul.mubr.msk.bf16.vlgmr.msra.gmra.mxu1 %vm541_vm3, %v5422_v39 }
 0x1ba   : > { %7019 = vst [vmem:[#allocation22_spill] sm:$0xff] %v5971_v2  ;;  %5169 = vmatpush3.bf16.msra.mxu1 %v3672_v23  ;;  %5104 = vmatprep.mubr.msk.bf16.mxu1 %vm541_vm3, %v5432_v49  ;;  %v6011_v23 = vpop.f32.mrf.mxu0 }
 0x1bb   : > { %v5977_v30 = vpop.f32.mrf.mxu1  ;;  %7032 = vst [vmem:[#allocation35_spill] sm:$0xff] %v6011_v23 }
 0x1bc   : > { %7020 = vst [vmem:[#allocation23_spill] sm:$0xff] %v5977_v30 }
 0x1bd   : > { %v5981_v34 = vpop.f32.mrf.mxu1 }
 0x1be   : > { %7022 = vst [vmem:[#allocation25_spill] sm:$0xff] %v5981_v34 }
 0x1bf   : > { %v5983_v36 = vpop.f32.mrf.mxu1 }
 0x1c0   : > { %7023 = vst [vmem:[#allocation26_spill] sm:$0xff] %v5983_v36 }
 0x1c1   : > { %v5987_v42 = vpop.f32.mrf.mxu1  ;;  %5105 = vmatmul.mubr.msk.bf16.gmra.mxu1 %vm541_vm3, %v5457_v6 }
 0x1c2   : > { %7025 = vst [vmem:[#allocation28_spill] sm:$0xff] %v5987_v42  ;;  %5108 = vmatprep.mubr.msk.bf16.mxu1 %vm541_vm3, %v5464_v12 }
 0x1c3   : > { %v5993_v45 = vpop.f32.mrf.mxu1 }
 0x1c4   : > { %7026 = vst [vmem:[#allocation29_spill] sm:$0xff] %v5993_v45 }
 0x1c5   : > { %v5997_v52 = vpop.f32.mrf.mxu1 }
 0x1c6   : > { %7028 = vst [vmem:[#allocation31_spill] sm:$0xff] %v5997_v52  ;;  %v6017_v52 = vpop.f32.mrf.mxu0 }
 0x1c7   : > { %v5999_v53 = vpop.f32.mrf.mxu1  ;;  %7035 = vst [vmem:[#allocation38_spill] sm:$0xff] %v6017_v52 }
 0x1c8   : > { %7029 = vst [vmem:[#allocation32_spill] sm:$0xff] %v5999_v53  ;;  %v6027_v36 = vpop.f32.mrf.mxu0 }
 0x1c9   : > { %v6003_v50 = vpop.f32.mrf.mxu1  ;;  %5109 = vmatmul.mubr.msk.bf16.gmra.mxu1 %vm541_vm3, %v5480_v29  ;;  %7038 = vst [vmem:[#allocation41_spill] sm:$0xff] %v6027_v36 }
 0x1ca   : > { %7030 = vst [vmem:[#allocation33_spill] sm:$0xff] %v6003_v50  ;;  %5112 = vmatprep.mubr.msk.bf16.mxu1 %vm541_vm3, %v5511_v60 }
 0x1cb   : > { %v6009_v63 = vpop.f32.mrf.mxu1 }
 0x1cc   : > { %7031 = vst [vmem:[#allocation34_spill] sm:$0xff] %v6009_v63 }
 0x1cd   : > { %v6013_v45 = vpop.f32.mrf.mxu1 }
 0x1ce   : > { %7033 = vst [vmem:[#allocation36_spill] sm:$0xff] %v6013_v45  ;;  %v6033_v45 = vpop.f32.mrf.mxu0 }
 0x1cf   : > { %v6015_v42 = vpop.f32.mrf.mxu1 }
 0x1d0   : > { %7034 = vst [vmem:[#allocation37_spill] sm:$0xff] %v6015_v42  ;;  %v6043_v30 = vpop.f32.mrf.mxu0 }
 0x1d1   : > { %v6019_v53 = vpop.f32.mrf.mxu1  ;;  %5113 = vmatmul.mubr.msk.bf16.gmra.mxu1 %vm541_vm3, %v5554_v35 }
 0x1d2   : > { %7036 = vst [vmem:[#allocation39_spill] sm:$0xff] %v6019_v53  ;;  %5116 = vmatprep.mubr.msk.bf16.mxu1 %vm541_vm3, %v5497_v47 }
 0x1d3   : > { %v6025_v50 = vpop.f32.mrf.mxu1 }
 0x1d4   : > { %7037 = vst [vmem:[#allocation40_spill] sm:$0xff] %v6025_v50 }
 0x1d5   : > { %v6029_v63 = vpop.f32.mrf.mxu1 }
 0x1d6   : > { %7039 = vst [vmem:[#allocation42_spill] sm:$0xff] %v6029_v63  ;;  %v6049_v63 = vpop.f32.mrf.mxu0 }
 0x1d7   : > { %v6031_v34 = vpop.f32.mrf.mxu1 }
 0x1d8   : > { %7040 = vst [vmem:[#allocation43_spill] sm:$0xff] %v6031_v34  ;;  %v6059_v20 = vpop.f32.mrf.mxu0 }
 0x1d9   : > { %v6035_v42 = vpop.f32.mrf.mxu1  ;;  %5117 = vmatmul.mubr.msk.bf16.gmra.mxu1 %vm541_vm3, %v5505_v54 }
 0x1da   : > { %7041 = vst [vmem:[#allocation44_spill] sm:$0xff] %v6035_v42  ;;  %5120 = vmatprep.mubr.msk.bf16.mxu1 %vm541_vm3, %v5523_v7 }
 0x1db   : > { %v6041_v53 = vpop.f32.mrf.mxu1 }
 0x1dc   : > { %7042 = vst [vmem:[#allocation45_spill] sm:$0xff] %v6041_v53 }
 0x1dd   : > { %v6045_v50 = vpop.f32.mrf.mxu1 }
 0x1de   : > { %7043 = vst [vmem:[#allocation46_spill] sm:$0xff] %v6045_v50  ;;  %v6065_v50 = vpop.f32.mrf.mxu0 }
 0x1df   : > { %v6047_v2 = vpop.f32.mrf.mxu1 }
 0x1e0   : > { %7044 = vst [vmem:[#allocation47_spill] sm:$0xff] %v6047_v2  ;;  %v6075_v13 = vpop.f32.mrf.mxu0 }
 0x1e1   : > { %v6051_v34 = vpop.f32.mrf.mxu1  ;;  %5121 = vmatmul.mubr.msk.bf16.gmra.mxu1 %vm541_vm3, %v5549_v26 }
 0x1e2   : > { %7045 = vst [vmem:[#allocation48_spill] sm:$0xff] %v6051_v34  ;;  %5124 = vmatprep.mubr.msk.bf16.mxu1 %vm541_vm3, %v5551_v27  ;;  %v6084_v10 = vpop.f32.mrf.mxu0 }
 0x1e3   : > { %v6057_v42 = vpop.f32.mrf.mxu1 }
 0x1e4   : > { %7046 = vst [vmem:[#allocation49_spill] sm:$0xff] %v6057_v42  ;;  %v6094_v58 = vpop.f32.mrf.mxu0 }
 0x1e5   : > { %v6061_v53 = vpop.f32.mrf.mxu1 }
 0x1e6   : > { %7047 = vst [vmem:[#allocation50_spill] sm:$0xff] %v6061_v53  ;;  %v6103_v23 = vpop.f32.mrf.mxu0 }
 0x1e7   : > { %v6063_v17 = vpop.f32.mrf.mxu1 }
 0x1e8   : > { %7048 = vst [vmem:[#allocation51_spill] sm:$0xff] %v6063_v17  ;;  %v5312_v17 = vld [vmem:[%s6994_s5 + $0x18] sm:$0xff]  }
 0x1e9   : > { %v6067_v2 = vpop.f32.mrf.mxu1  ;;  %5125 = vmatmul.mubr.msk.bf16.gmra.mxu1 %vm541_vm3, %v5570_v43  ;;  %5062 = vmatprep.subr.bf16.mxu0 %v5312_v17 }
 0x1ea   : > { %5128 = vmatprep.mubr.msk.bf16.mxu1 %vm541_vm3, %v5572_v44  ;;  %5063 = vmatpush3.bf16.msra.mxu0 %v5312_v17 }
 0x1eb   : > { %v6073_v34 = vpop.f32.mrf.mxu1  ;;  %5064 = vmatprep.subr.bf16.mxu0 %v5313_v3 }
 0x1ec   : > { %7049 = vst [vmem:[#allocation52_spill] sm:$0xff] %v6073_v34 }
 0x1ed   : > { %v6077_v42 = vpop.f32.mrf.mxu1 }
 0x1ee   : > { %7050 = vst [vmem:[#allocation53_spill] sm:$0xff] %v6077_v42  ;;  %5065 = vmatpush3.bf16.msra.mxu0 %v5313_v3  ;;  %v6120_v3 = vld [vmem:[%s6994_s5 + $0x28] sm:$0xff]  }
 0x1ef   : > { %v6082_v53 = vpop.f32.mrf.mxu1  ;;  %7055 = vst [vmem:[#allocation58_spill] sm:$0xff] %v6120_v3  ;;  %5132 = vmatprep.subr.bf16.mxu0 %v6120_v3 }
 0x1f0   : > { %7051 = vst [vmem:[#allocation54_spill] sm:$0xff] %v6082_v53 }
 0x1f1   : > { %v6086_v8 = vpop.f32.mrf.mxu1  ;;  %5129 = vmatmul.mubr.msk.bf16.gmra.mxu1 %vm541_vm3, %v5582_v48 }
 0x1f2   : > { %5170 = vmatprep.mubr.msk.bf16.mxu1 %vm541_vm3, %v5411_v28 }
 0x1f3   : > { %v6092_v62 = vpop.f32.mrf.mxu1 }
 0x1f4   : > { %7052 = vst [vmem:[#allocation55_spill] sm:$0xff] %v6092_v62  ;;  %v6113_v62 = vpop.f32.mrf.mxu0 }
 0x1f5   : > { %v6099_v36 = vpop.f32.mrf.mxu1 }
 0x1f6   : > { %7053 = vst [vmem:[#allocation56_spill] sm:$0xff] %v6099_v36  ;;  %v6124_v36 = vpop.f32.mrf.mxu0 }
 0x1f7   : > { %v6101_v52 = vpop.f32.mrf.mxu1 }
 0x1f8   : > { %7054 = vst [vmem:[#allocation57_spill] sm:$0xff] %v6101_v52  ;;  %v6135_v53 = vpop.f32.mrf.mxu0 }
 0x1f9   : > { %v6105_v17 = vpop.f32.mrf.mxu1  ;;  %5171 = vmatmul.mubr.msk.bf16.vlgmr.msra.gmra.mxu1 %vm541_vm3, %v5422_v39 }
 0x1fa   : > { %5174 = vmatprep.mubr.msk.bf16.mxu1 %vm541_vm3, %v5432_v49  ;;  %v6139_v41 = vpop.f32.mrf.mxu0 }
 0x1fb   : > { %v6111_v28 = vpop.f32.mrf.mxu1 }
 0x1fd   : > { %v6115_v25 = vpop.f32.mrf.mxu1 }
 0x1ff   : > { %v6122_v52 = vpop.f32.mrf.mxu1 }
 0x201   : > { %v6127_v39 = vpop.f32.mrf.mxu1  ;;  %5175 = vmatmul.mubr.msk.bf16.gmra.mxu1 %vm541_vm3, %v5457_v6  ;;  %v6149_v6 = vpop.f32.mrf.mxu0 }
 0x202   : > { %5178 = vmatprep.mubr.msk.bf16.mxu1 %vm541_vm3, %v5464_v12 }
 0x203   : > { %v6133_v49 = vpop.f32.mrf.mxu1  ;;  %v6155_v31 = vpop.f32.mrf.mxu0 }
 0x205   : > { %v6137_v16 = vpop.f32.mrf.mxu1 }
 0x207   : > { %v6141_v42 = vpop.f32.mrf.mxu1 }
 0x209   : > { %v6143_v55 = vpop.f32.mrf.mxu1  ;;  %5179 = vmatmul.mubr.msk.bf16.gmra.mxu1 %vm541_vm3, %v5480_v29  ;;  %v6165_v29 = vpop.f32.mrf.mxu0 }
 0x20a   : > { %5182 = vmatprep.mubr.msk.bf16.mxu1 %vm541_vm3, %v5511_v60  ;;  %7056 = vst [vmem:[#allocation59_spill] sm:$0xff] %v6165_v29 }
 0x20b   : > { %v6151_v12 = vpop.f32.mrf.mxu1  ;;  %v6171_v56 = vpop.f32.mrf.mxu0 }
 0x20c   : > { %7057 = vst [vmem:[#allocation60_spill] sm:$0xff] %v6171_v56 }
 0x20d   : > { %v6153_v3 = vpop.f32.mrf.mxu1 }
 0x20f   : > { %v6157_v34 = vpop.f32.mrf.mxu1 }
 0x211   : > { %v6159_v61 = vpop.f32.mrf.mxu1  ;;  %5183 = vmatmul.mubr.msk.bf16.gmra.mxu1 %vm541_vm3, %v5554_v35  ;;  %v6181_v35 = vpop.f32.mrf.mxu0 }
 0x212   : > { %5186 = vmatprep.mubr.msk.bf16.mxu1 %vm541_vm3, %v5497_v47  ;;  %7058 = vst [vmem:[#allocation61_spill] sm:$0xff] %v6181_v35 }
 0x213   : > { %v6167_v60 = vpop.f32.mrf.mxu1  ;;  %v6187_v33 = vpop.f32.mrf.mxu0 }
 0x214   : > { %7059 = vst [vmem:[#allocation62_spill] sm:$0xff] %v6187_v33  ;;  %v1984_v33 = vadd.f32 %v5968_v21, %v6067_v2  ;;  %v1988_v21 = vadd.f32 %v6001_v57, %v6086_v8  ;;  %v1990_v57 = vadd.f32 %v6043_v30, %v6111_v28 }
 0x215   : > { %v6169_v40 = vpop.f32.mrf.mxu1 }
 0x217   : > { %v6173_v37 = vpop.f32.mrf.mxu1 }
 0x219   : > { %v6175_v51 = vpop.f32.mrf.mxu1  ;;  %5187 = vmatmul.mubr.msk.bf16.gmra.mxu1 %vm541_vm3, %v5505_v54  ;;  %v6197_v54 = vpop.f32.mrf.mxu0 }
 0x21a   : > { %5190 = vmatprep.mubr.msk.bf16.mxu1 %vm541_vm3, %v5523_v7  ;;  %7060 = vst [vmem:[#allocation63_spill] sm:$0xff] %v6197_v54 }
 0x21b   : > { %v6183_v47 = vpop.f32.mrf.mxu1  ;;  %v6203_v19 = vpop.f32.mrf.mxu0 }
 0x21c   : > { %7062 = vst [vmem:[#allocation65_spill] sm:$0xff] %v6203_v19 }
 0x21d   : > { %v6185_v5 = vpop.f32.mrf.mxu1 }
 0x21f   : > { %v6189_v46 = vpop.f32.mrf.mxu1 }
 0x221   : > { %v6191_v56 = vpop.f32.mrf.mxu1  ;;  %5191 = vmatmul.mubr.msk.bf16.gmra.mxu1 %vm541_vm3, %v5549_v26 }
 0x222   : > { %5194 = vmatprep.mubr.msk.bf16.mxu1 %vm541_vm3, %v5551_v27  ;;  %v6215_v27 = vpop.f32.mrf.mxu0 }
 0x223   : > { %v6199_v7 = vpop.f32.mrf.mxu1 }
 0x224   : > { %v6221_v19 = vpop.f32.mrf.mxu0 }
 0x225   : > { %v6201_v35 = vpop.f32.mrf.mxu1  ;;  %7065 = vst [vmem:[#allocation68_spill] sm:$0xff] %v6221_v19 }
 0x226   : > { %7061 = vst [vmem:[#allocation64_spill] sm:$0xff] %v6201_v35 }
 0x227   : > { %v6205_v32 = vpop.f32.mrf.mxu1 }
 0x228   : > { %7063 = vst [vmem:[#allocation66_spill] sm:$0xff] %v6205_v32 }
 0x229   : > { %v5002_v29 = vpop.f32.mrf.mxu1  ;;  %5195 = vmatmul.mubr.msk.bf16.gmra.mxu1 %vm541_vm3, %v5570_v43 }
 0x22a   : > { %v6211_v26 = vadd.f32 %v5002_v29, %v1984_v33  ;;  %5198 = vmatprep.mubr.msk.bf16.mxu1 %vm541_vm3, %v5572_v44  ;;  %v6231_v44 = vpop.f32.mrf.mxu0 }
 0x22b   : > { %v6217_v54 = vpop.f32.mrf.mxu1  ;;  %7068 = vst [vmem:[#allocation71_spill] sm:$0xff] %v6231_v44 }
 0x22c   : > { %7064 = vst [vmem:[#allocation67_spill] sm:$0xff] %v6211_v26  ;;  %v6237_v26 = vpop.f32.mrf.mxu0 }
 0x22d   : > { %v6219_v35 = vpop.f32.mrf.mxu1  ;;  %7071 = vst [vmem:[#allocation74_spill] sm:$0xff] %v6237_v26 }
 0x22f   : > { %v6223_v32 = vpop.f32.mrf.mxu1 }
 0x230   : > { %7066 = vst [vmem:[#allocation69_spill] sm:$0xff] %v6223_v32  ;;  %v1992_v32 = vadd.f32 %v6033_v45, %v6105_v17  ;;  %v1991_v45 = vadd.f32 %v6059_v20, %v6122_v52 }
 0x231   : > { %v5006_v2 = vpop.f32.mrf.mxu1  ;;  %5199 = vmatmul.mubr.msk.bf16.gmra.mxu1 %vm541_vm3, %v5582_v48 }
 0x232   : > { %v6229_v43 = vadd.f32 %v5006_v2, %v1988_v21  ;;  %v6245_v21 = vpop.f32.mrf.mxu0  ;;  %v6250_v2 = vld [vmem:[%s6992_s3 + $0x1] ss:$0 sm:$0xff] }
 0x233   : > { %v6233_v33 = vpop.f32.mrf.mxu1  ;;  %7073 = vst [vmem:[#allocation76_spill] sm:$0xff] %v6245_v21 }
 0x234   : > { %7067 = vst [vmem:[#allocation70_spill] sm:$0xff] %v6229_v43  ;;  %7069 = vst [vmem:[#allocation72_spill] sm:$0xff] %v6233_v33 }
 0x235   : > { %v6235_v29 = vpop.f32.mrf.mxu1 }
 0x236   : > { %7070 = vst [vmem:[#allocation73_spill] sm:$0xff] %v6235_v29  ;;  %v1993_v29 = vadd.f32 %v6049_v63, %v6115_v25  ;;  %v1994_v25 = vadd.f32 %v6075_v13, %v6133_v49  ;;  %v1995_v13 = vadd.f32 %v6094_v58, %v6141_v42 }
 0x237   : > { %v6239_v19 = vpop.f32.mrf.mxu1 }
 0x238   : > { %7072 = vst [vmem:[#allocation75_spill] sm:$0xff] %v6239_v19 }
 0x239   : > { %v5010_v8 = vpop.f32.mrf.mxu1 }
 0x23a   : > { %v2350_v48 = vadd.f32 %v5010_v8, %v1992_v32  ;;  %v6257_v32 = vpop.f32.mrf.mxu0  ;;  %v1996_v8 = vadd.f32 %v6065_v50, %v6127_v39 }
 0x23b   : > { %v2245_v43 = vpop.f32.mrf.mxu1 }
 0x23c   : > { %v2348_v19 = vadd.f32 %v2245_v43, %v1990_v57  ;;  %v2853_v17 = vadd.f32 %v6250_v2, %v2350_v48  ;;  %v6268_v57 = vpop.f32.mrf.mxu0 }
 0x23d   : > { %v5011_v33 = vpop.f32.mrf.mxu1 }
 0x23e   : > { %v2351_v30 = vadd.f32 %v5011_v33, %v1993_v29  ;;  %v2851_v44 = vadd.f32 %v6250_v2, %v2348_v19  ;;  %v2885_v43 = vmax.f32 %v2853_v17, 0.0  ;;  %v1997_v29 = vadd.f32 %v6084_v10, %v6137_v16  ;;  %v6277_v17 = vpop.f32.mrf.mxu0 }
 0x23f   : > { %v2248_v28 = vpop.f32.mrf.mxu1  ;;  %v2000_v16 = vadd.f32 %v6103_v23, %v6143_v55  ;;  %v1314_v55 = vadd.f32 %v6175_v51, %v5846_v15 }
 0x240   : > { %v2854_v21 = vadd.f32 %v6250_v2, %v2351_v30  ;;  %v2349_v26 = vadd.f32 %v2248_v28, %v1991_v45  ;;  %v2883_v39 = vmax.f32 %v2851_v44, 0.0  ;;  %v6290_v23 = vpop.f32.mrf.mxu0 }
 0x241   : > { %v5014_v63 = vpop.f32.mrf.mxu1  ;;  %v1508_v51 = vadd.f32 %v5885_v22, %v1314_v55  ;;  %v1309_v22 = vadd.f32 %v6189_v46, %v5860_v1  ;;  %v7076_v55 = vld [vmem:[#allocation2_spill] sm:$0xff] }
 0x242   : > { %v2886_v20 = vmax.f32 %v2854_v21, 0.0  ;;  %v2852_v52 = vadd.f32 %v6250_v2, %v2349_v26  ;;  %v2354_v33 = vadd.f32 %v5014_v63, %v1996_v8 }
 0x243   : > { %v2261_v50 = vpop.f32.mrf.mxu1 }
 0x244   : > { %v6270_v19 = vpack.c.bf16 %v2886_v20, %v2885_v43  ;;  %v2884_v48 = vmax.f32 %v2852_v52, 0.0  ;;  %v2352_v45 = vadd.f32 %v2261_v50, %v1994_v25  ;;  %v2857_v26 = vadd.f32 %v6250_v2, %v2354_v33 }
 0x245   : > { %v5015_v30 = vpop.f32.mrf.mxu1  ;;  %v1998_v25 = vadd.f32 %v6113_v62, %v6151_v12  ;;  %v2001_v52 = vadd.f32 %v6124_v36, %v6153_v3  ;;  %v1306_v12 = vadd.f32 %v6183_v47, %v5852_v59  ;;  %v1317_v3 = vadd.f32 %v6185_v5, %v5855_v0 }
 0x246   : > { %v6274_v49 = vpack.c.bf16 %v2884_v48, %v2883_v39  ;;  %v2355_v21 = vadd.f32 %v5015_v30, %v1997_v29  ;;  %v2855_v44 = vadd.f32 %v6250_v2, %v2352_v45  ;;  %v2889_v42 = vmax.f32 %v2857_v26, 0.0 }
 0x247   : > { %v2264_v10 = vpop.f32.mrf.mxu1  ;;  %v1999_v45 = vadd.f32 %v6135_v53, %v6157_v34  ;;  %v2004_v59 = vadd.f32 %v6139_v41, %v6159_v61  ;;  %v2005_v61 = vadd.f32 %v6155_v31, %v6169_v40  ;;  %v1509_v41 = vadd.f32 %v5893_v38, %v1317_v3 }
 0x248   : > { %v2858_v28 = vadd.f32 %v6250_v2, %v2355_v21  ;;  %v2353_v8 = vadd.f32 %v2264_v10, %v1995_v13  ;;  %v2887_v29 = vmax.f32 %v2855_v44, 0.0  ;;  %v6304_v13 = vpop.f32.mrf.mxu0  ;;  %v2002_v21 = vadd.f32 %v6149_v6, %v6167_v60 }
 0x249   : > { %v5018_v58 = vpop.f32.mrf.mxu1  ;;  %v1506_v10 = vadd.f32 %v5889_v9, %v1306_v12  ;;  %v1650_v60 = vadd.f32 %v5917_v4, %v1508_v51  ;;  %v1322_v40 = vadd.f32 %v6199_v7, %v5872_v14  ;;  %v7078_v14 = vld [vmem:[#allocation8_spill] sm:$0xff]  ;;  %v7082_v51 = vld [vmem:[#allocation66_spill] sm:$0xff] }
 0x24a   : > { %v2890_v63 = vmax.f32 %v2858_v28, 0.0  ;;  %v2856_v43 = vadd.f32 %v6250_v2, %v2353_v8  ;;  %v2358_v20 = vadd.f32 %v5018_v58, %v2000_v16  ;;  %v1330_v8 = vadd.f32 %v6191_v56, %v5865_v11  ;;  %v6321_v6 = vpop.f32.mrf.mxu0  ;;  %v7074_v11 = vld [vmem:[#allocation59_spill] sm:$0xff]  ;;  %v7079_v12 = vld [vmem:[#allocation60_spill] sm:$0xff] }
 0x24b   : > { %v2277_v33 = vpop.f32.mrf.mxu1  ;;  %v1648_v38 = vadd.f32 %v5921_v24, %v1506_v10  ;;  %v2003_v56 = vadd.f32 %v7074_v11, %v6173_v37  ;;  %v1651_v7 = vadd.f32 %v7078_v14, %v1509_v41 }
 0x24c   : > { %v6292_v50 = vpack.c.bf16 %v2890_v63, %v2889_v42  ;;  %v2888_v39 = vmax.f32 %v2856_v43, 0.0  ;;  %v2356_v62 = vadd.f32 %v2277_v33, %v1998_v25  ;;  %v2861_v36 = vadd.f32 %v6250_v2, %v2358_v20  ;;  %v7075_v20 = vld [vmem:[#allocation4_spill] sm:$0xff] }
 0x24d   : > { %v5019_v48 = vpop.f32.mrf.mxu1  ;;  %v1507_v42 = vadd.f32 %v5897_v18, %v1309_v22  ;;  %v7077_v33 = vld [vmem:[#allocation64_spill] sm:$0xff]  ;;  %v6338_v18 = vpop.f32.mrf.mxu0 }
 0x24e   : > { %v6298_v30 = vpack.c.bf16 %v2888_v39, %v2887_v29  ;;  %v2359_v15 = vadd.f32 %v5019_v48, %v2001_v52  ;;  %v2859_v47 = vadd.f32 %v6250_v2, %v2356_v62  ;;  %v2893_v5 = vmax.f32 %v2861_v36, 0.0 }
 0x24f   : > { %v2280_v26 = vpop.f32.mrf.mxu1  ;;  %v1512_v52 = vadd.f32 %v7075_v20, %v1330_v8  ;;  %v1333_v29 = vadd.f32 %v7077_v33, %v7076_v55  ;;  %v2008_v48 = vadd.f32 %v7079_v12, %v1650_v60  ;;  %v7087_v8 = vld [vmem:[#allocation10_spill] sm:$0xff]  ;;  %v7090_v20 = vld [vmem:[#allocation63_spill] sm:$0xff]  ;;  %v7091_v33 = vld [vmem:[#allocation52_spill] sm:$0xff] }
 0x250   : > { %v2862_v34 = vadd.f32 %v6250_v2, %v2359_v15  ;;  %v2357_v53 = vadd.f32 %v2280_v26, %v1999_v45  ;;  %v2891_v1 = vmax.f32 %v2859_v47, 0.0  ;;  %v7080_v45 = vld [vmem:[#allocation5_spill] sm:$0xff]  ;;  %v7081_v15 = vld [vmem:[#allocation3_spill] sm:$0xff] }
 0x251   : > { %v5022_v0 = vpop.f32.mrf.mxu1  ;;  %v1510_v36 = vadd.f32 %v7080_v45, %v1322_v40  ;;  %v1325_v3 = vadd.f32 %v7082_v51, %v7081_v15  ;;  %v7088_v40 = vld [vmem:[#allocation7_spill] sm:$0xff] }
 0x252   : > { %v2894_v16 = vmax.f32 %v2862_v34, 0.0  ;;  %v2860_v44 = vadd.f32 %v6250_v2, %v2357_v53  ;;  %v2362_v28 = vadd.f32 %v5022_v0, %v2004_v59  ;;  %v7083_v59 = vld [vmem:[#allocation61_spill] sm:$0xff]  ;;  %v7096_v15 = vld [vmem:[#allocation27_spill] sm:$0xff] }
 0x253   : > { %v2293_v9 = vpop.f32.mrf.mxu1  ;;  %v2006_v47 = vadd.f32 %v7083_v59, %v1648_v38  ;;  %v7084_v34 = vld [vmem:[#allocation9_spill] sm:$0xff] }
 0x254   : > { %v6324_v46 = vpack.c.bf16 %v2894_v16, %v2893_v5  ;;  %v2892_v25 = vmax.f32 %v2860_v44, 0.0  ;;  %v2360_v58 = vadd.f32 %v2293_v9, %v2002_v21  ;;  %v2865_v4 = vadd.f32 %v6250_v2, %v2362_v28  ;;  %v7085_v5 = vld [vmem:[#allocation6_spill] sm:$0xff]  ;;  %v2630_v44 = vpop.f32.mrf.mxu0  ;;  %v7089_v38 = vld [vmem:[#allocation13_spill] sm:$0xff] }
 0x255   : > { %v5023_v31 = vpop.f32.mrf.mxu1  ;;  %v1649_v53 = vadd.f32 %v7084_v34, %v1507_v42  ;;  %v1513_v16 = vadd.f32 %v7085_v5, %v1333_v29  ;;  %v1654_v9 = vadd.f32 %v7087_v8, %v1512_v52  ;;  %v1511_v42 = vadd.f32 %v7088_v40, %v1325_v3  ;;  %v7092_v29 = vld [vmem:[#allocation24_spill] sm:$0xff]  ;;  %v7099_v5 = vld [vmem:[#allocation30_spill] sm:$0xff] }
 0x256   : > { %v6332_v63 = vpack.c.bf16 %v2892_v25, %v2891_v1  ;;  %v2363_v43 = vadd.f32 %v5023_v31, %v2005_v61  ;;  %v2863_v24 = vadd.f32 %v6250_v2, %v2360_v58  ;;  %v2897_v21 = vmax.f32 %v2865_v4, 0.0  ;;  %v7086_v61 = vld [vmem:[#allocation62_spill] sm:$0xff] }
 0x257   : > { %v2296_v39 = vpop.f32.mrf.mxu1  ;;  %v2009_v41 = vadd.f32 %v7086_v61, %v1651_v7  ;;  %v1652_v11 = vadd.f32 %v7089_v38, %v1510_v36  ;;  %v2007_v55 = vadd.f32 %v7090_v20, %v1649_v53  ;;  %v1982_v52 = vadd.f32 %v7092_v29, %v7091_v33  ;;  %v7093_v7 = vld [vmem:[#allocation16_spill] sm:$0xff]  ;;  %v7095_v36 = vld [vmem:[#allocation53_spill] sm:$0xff]  ;;  %v7100_v61 = vld [vmem:[#allocation67_spill] sm:$0xff] }
 0x258   : > { %v2866_v62 = vadd.f32 %v6250_v2, %v2363_v43  ;;  %v2361_v37 = vadd.f32 %v2296_v39, %v2003_v56  ;;  %v2895_v60 = vmax.f32 %v2863_v24, 0.0  ;;  %v5047_v39 = vpop.f32.mrf.mxu0  ;;  %v1655_v24 = vadd.f32 %v7093_v7, %v1513_v16  ;;  %v7105_v33 = vld [vmem:[#allocation71_spill] sm:$0xff] }
 0x259   : > { %v5026_v26 = vpop.f32.mrf.mxu1  ;;  %v1985_v51 = vadd.f32 %v7096_v15, %v7095_v36  ;;  %v2340_v3 = vadd.f32 %v6217_v54, %v1982_v52  ;;  %v2010_v59 = vadd.f32 %v6215_v27, %v1652_v11  ;;  %v7104_v11 = vld [vmem:[#allocation76_spill] sm:$0xff]  ;;  %v7106_v52 = vld [vmem:[#allocation55_spill] sm:$0xff] }
 0x25a   : > { %v2898_v10 = vmax.f32 %v2866_v62, 0.0  ;;  %v2864_v22 = vadd.f32 %v6250_v2, %v2361_v37  ;;  %v2366_v0 = vadd.f32 %v5026_v26, %v2008_v48  ;;  %v7094_v48 = vld [vmem:[#allocation65_spill] sm:$0xff]  ;;  %v7108_v15 = vld [vmem:[#allocation56_spill] sm:$0xff] }
 0x25b   : > { %v2309_v28 = vpop.f32.mrf.mxu1  ;;  %v2012_v45 = vadd.f32 %v7094_v48, %v1654_v9  ;;  %v2633_v9 = vpop.f32.mrf.mxu0 }
 0x25c   : > { %v6353_v1 = vpack.c.bf16 %v2898_v10, %v2897_v21  ;;  %v2896_v25 = vmax.f32 %v2864_v22, 0.0  ;;  %v2364_v58 = vadd.f32 %v2309_v28, %v2006_v47  ;;  %v2869_v4 = vadd.f32 %v6250_v2, %v2366_v0  ;;  %v7097_v47 = vld [vmem:[#allocation19_spill] sm:$0xff]  ;;  %v7098_v0 = vld [vmem:[#allocation54_spill] sm:$0xff] }
 0x25d   : > { %v5027_v31 = vpop.f32.mrf.mxu1  ;;  %v1653_v34 = vadd.f32 %v7097_v47, %v1511_v42  ;;  %v1983_v16 = vadd.f32 %v7099_v5, %v7098_v0  ;;  %v2343_v28 = vadd.f32 %v6219_v35, %v1985_v51  ;;  %v7109_v51 = vld [vmem:[#allocation38_spill] sm:$0xff]  ;;  %v7112_v0 = vld [vmem:[#allocation41_spill] sm:$0xff] }
 0x25e   : > { %v6357_v56 = vpack.c.bf16 %v2896_v25, %v2895_v60  ;;  %v2367_v43 = vadd.f32 %v5027_v31, %v2009_v41  ;;  %v2867_v62 = vadd.f32 %v6250_v2, %v2364_v58  ;;  %v2901_v53 = vmax.f32 %v2869_v4, 0.0  ;;  %v7101_v41 = vld [vmem:[#allocation74_spill] sm:$0xff]  ;;  %v7102_v60 = vld [vmem:[#allocation68_spill] sm:$0xff]  ;;  %v7103_v31 = vld [vmem:[#allocation69_spill] sm:$0xff] }
 0x25f   : > { %v2312_v14 = vpop.f32.mrf.mxu1  ;;  %v2485_v8 = vadd.f32 %v7101_v41, %v7100_v61  ;;  %v2013_v25 = vadd.f32 %v7102_v60, %v1655_v24  ;;  %v2341_v38 = vadd.f32 %v7103_v31, %v1983_v16  ;;  %v2483_v4 = vadd.f32 %v7104_v11, %v2340_v3  ;;  %v7114_v41 = vld [vmem:[#allocation70_spill] sm:$0xff] }
 0x260   : > { %v2870_v37 = vadd.f32 %v6250_v2, %v2367_v43  ;;  %v2365_v12 = vadd.f32 %v2312_v14, %v2007_v55  ;;  %v2899_v27 = vmax.f32 %v2867_v62, 0.0  ;;  %v2011_v29 = vadd.f32 %v7105_v33, %v1653_v34  ;;  %v7107_v14 = vld [vmem:[#allocation35_spill] sm:$0xff]  ;;  %v5050_v62 = vpop.f32.mrf.mxu0 }
 0x261   : > { %v5030_v26 = vpop.f32.mrf.mxu1  ;;  %v1986_v7 = vadd.f32 %v7107_v14, %v7106_v52  ;;  %v2486_v24 = vadd.f32 %v6257_v32, %v2343_v28  ;;  %v1989_v3 = vadd.f32 %v7109_v51, %v7108_v15  ;;  %v2484_v34 = vadd.f32 %v6268_v57, %v2341_v38  ;;  %v7113_v28 = vld [vmem:[#allocation73_spill] sm:$0xff] }
 0x262   : > { %v2902_v21 = vmax.f32 %v2870_v37, 0.0  ;;  %v2868_v10 = vadd.f32 %v6250_v2, %v2365_v12  ;;  %v2370_v22 = vadd.f32 %v5030_v26, %v2012_v45  ;;  %v2663_v12 = vadd.f32 %v6338_v18, %v2485_v8  ;;  %v7111_v18 = vld [vmem:[#allocation57_spill] sm:$0xff] }
 0x263   : > { %v2325_v54 = vpop.f32.mrf.mxu1  ;;  %v2661_v26 = vadd.f32 %v2630_v44, %v2483_v4  ;;  %v1987_v5 = vadd.f32 %v7112_v0, %v7111_v18  ;;  %v2664_v16 = vadd.f32 %v5047_v39, %v2486_v24  ;;  %v2347_v61 = vadd.f32 %v7113_v28, %v1989_v3  ;;  %v2646_v44 = vpop.f32.mrf.mxu0  ;;  %v7116_v28 = vld [vmem:[#allocation58_spill] sm:$0xff] }
 0x264   : > { %v6379_v58 = vpack.c.bf16 %v2902_v21, %v2901_v53  ;;  %v2900_v40 = vmax.f32 %v2868_v10, 0.0  ;;  %v2368_v42 = vadd.f32 %v2325_v54, %v2010_v59  ;;  %v2873_v35 = vadd.f32 %v6250_v2, %v2370_v22  ;;  %v7110_v59 = vld [vmem:[#allocation72_spill] sm:$0xff] }
 0x265   : > { %v5031_v43 = vpop.f32.mrf.mxu1  ;;  %v2344_v47 = vadd.f32 %v7110_v59, %v1986_v7  ;;  %v2489_v8 = vadd.f32 %v6277_v17, %v7114_v41  ;;  %v2662_v11 = vadd.f32 %v2633_v9, %v2484_v34  ;;  %v2490_v17 = vadd.f32 %v6304_v13, %v2347_v61  ;;  %v6428_v41 = vld [vmem:[%s6994_s5 + $0x38] sm:$0xff]  }
 0x266   : > { %v6383_v20 = vpack.c.bf16 %v2900_v40, %v2899_v27  ;;  %v2371_v55 = vadd.f32 %v5031_v43, %v2013_v25  ;;  %v2871_v48 = vadd.f32 %v6250_v2, %v2368_v42  ;;  %v2905_v21 = vmax.f32 %v2873_v35, 0.0  ;;  %v7115_v40 = vld [vmem:[#allocation75_spill] sm:$0xff]  ;;  %v5051_v35 = vpop.f32.mrf.mxu0 }
 0x267   : > { %v2328_v37 = vpop.f32.mrf.mxu1  ;;  %v2345_v42 = vadd.f32 %v7115_v40, %v1987_v5  ;;  %v2487_v31 = vadd.f32 %v6290_v23, %v2344_v47  ;;  %v2667_v33 = vadd.f32 %v5050_v62, %v2489_v8 }
 0x268   : > { %v2874_v45 = vadd.f32 %v6250_v2, %v2371_v55  ;;  %v2369_v36 = vadd.f32 %v2328_v37, %v2011_v29  ;;  %v2903_v60 = vmax.f32 %v2871_v48, 0.0 }
 0x269   : > { %v5056_v53 = vpop.f32.mrf.mxu1  ;;  %v2665_v7 = vadd.f32 %v2646_v44, %v2487_v31  ;;  %v2488_v23 = vadd.f32 %v6321_v6, %v2345_v42 }
 0x26a   : > { %v2906_v32 = vmax.f32 %v2874_v45, 0.0  ;;  %v2872_v10 = vadd.f32 %v6250_v2, %v2369_v36  ;;  %v2805_v22 = vadd.f32 %v5056_v53, %v2663_v12  ;;  %v2668_v45 = vadd.f32 %v5051_v35, %v2490_v17  ;;  %v2649_v36 = vpop.f32.mrf.mxu0 }
 0x26b   : > { %v2772_v54 = vpop.f32.mrf.mxu1  ;;  %v2666_v59 = vadd.f32 %v2649_v36, %v2488_v23 }
 0x26c   : > { %v6403_v25 = vpack.c.bf16 %v2906_v32, %v2905_v21  ;;  %v2904_v57 = vmax.f32 %v2872_v10, 0.0  ;;  %v2803_v27 = vadd.f32 %v2772_v54, %v2661_v26  ;;  %v2845_v39 = vadd.f32 %v6250_v2, %v2805_v22  ;;  %v5315_v21 = vld [vmem:[%s6994_s5 + $0x20] sm:$0xff]  }
 0x26d   : > { %v5057_v38 = vpop.f32.mrf.mxu1 }
 0x26e   : > { %v6407_v4 = vpack.c.bf16 %v2904_v57, %v2903_v60  ;;  %v2806_v43 = vadd.f32 %v5057_v38, %v2664_v16  ;;  %v2843_v29 = vadd.f32 %v6250_v2, %v2803_v27  ;;  %v2877_v9 = vmax.f32 %v2845_v39, 0.0 }
 0x26f   : > { %v2775_v55 = vpop.f32.mrf.mxu1 }
 0x270   : > { %v2846_v52 = vadd.f32 %v6250_v2, %v2806_v43  ;;  %v2804_v14 = vadd.f32 %v2775_v55, %v2662_v11  ;;  %v2875_v15 = vmax.f32 %v2843_v29, 0.0 }
 0x271   : > { %v5060_v24 = vpop.f32.mrf.mxu1 }
 0x272   : > { %v2878_v37 = vmax.f32 %v2846_v52, 0.0  ;;  %v2844_v12 = vadd.f32 %v6250_v2, %v2804_v14  ;;  %v2809_v48 = vadd.f32 %v5060_v24, %v2667_v33 }
 0x273   : > { %v2788_v13 = vpop.f32.mrf.mxu1 }
 0x274   : > { %v2908_v51 = vpack.c.bf16 %v2878_v37, %v2877_v9  ;;  %v2876_v62 = vmax.f32 %v2844_v12, 0.0  ;;  %v2807_v3 = vadd.f32 %v2788_v13, %v2665_v7  ;;  %v2849_v34 = vadd.f32 %v6250_v2, %v2809_v48 }
 0x275   : > { %v5061_v26 = vpop.f32.mrf.mxu1 }
 0x276   : > { %v2907_v47 = vpack.c.bf16 %v2876_v62, %v2875_v15  ;;  %v2810_v53 = vadd.f32 %v5061_v26, %v2668_v45  ;;  %v2847_v32 = vadd.f32 %v6250_v2, %v2807_v3  ;;  %v2881_v0 = vmax.f32 %v2849_v34, 0.0 }
 0x277   : > { %v2791_v6 = vpop.f32.mrf.mxu1 }
 0x278   : > { %v2850_v10 = vadd.f32 %v6250_v2, %v2810_v53  ;;  %v2808_v22 = vadd.f32 %v2791_v6, %v2666_v59  ;;  %5066 = vmatprep.mubr.msk.bf16.mxu0 %vm819_vm4, %v2907_v47  ;;  %v2879_v8 = vmax.f32 %v2847_v32, 0.0 }
 0x279   : > { %5067 = vmatmul.mubr.msk.bf16.vlgmr.msra.gmra.mxu0 %vm819_vm4, %v2908_v51  ;;  %v5102_v18 = vpop.f32.mrf.mxu1 }
 0x27a   : > { %v2882_v5 = vmax.f32 %v2850_v10, 0.0  ;;  %v2848_v16 = vadd.f32 %v6250_v2, %v2808_v22  ;;  %5133 = vmatpush3.bf16.msra.mxu0 %v7116_v28 }
 0x27b   : > { %5134 = vmatprep.subr.bf16.mxu0 %v5315_v21  ;;  %v3228_v61 = vpop.f32.mrf.mxu1 }
 0x27c   : > { %v2910_v44 = vpack.c.bf16 %v2882_v5, %v2881_v0  ;;  %v2880_v54 = vmax.f32 %v2848_v16, 0.0 }
 0x27d   : > { %v5103_v60 = vpop.f32.mrf.mxu1 }
 0x27e   : > { %v2909_v57 = vpack.c.bf16 %v2880_v54, %v2879_v8  ;;  %5135 = vmatpush3.bf16.msra.mxu0 %v5315_v21  ;;  %v5317_v21 = vld [vmem:[%s6994_s5 + $0x30] sm:$0xff]  }
 0x27f   : > { %v3231_v27 = vpop.f32.mrf.mxu1  ;;  %5202 = vmatprep.subr.bf16.mxu0 %v6428_v41 }
 0x280   : > { %5070 = vmatprep.mubr.msk.bf16.mxu0 %vm819_vm4, %v2909_v57 }
 0x281   : > { %5071 = vmatmul.mubr.msk.bf16.gmra.mxu0 %vm819_vm4, %v2910_v44  ;;  %v5106_v2 = vpop.f32.mrf.mxu1 }
 0x282   : > { %5074 = vmatprep.mubr.msk.bf16.mxu0 %vm819_vm4, %v6274_v49 }
 0x283   : > { %v3244_v40 = vpop.f32.mrf.mxu1 }
 0x285   : > { %v5107_v42 = vpop.f32.mrf.mxu1 }
 0x287   : > { %v3247_v31 = vpop.f32.mrf.mxu1 }
 0x289   : > { %5075 = vmatmul.mubr.msk.bf16.gmra.mxu0 %vm819_vm4, %v6270_v19  ;;  %v6437_v38 = vpop.f32.mrf.mxu1 }
 0x28a   : > { %5078 = vmatprep.mubr.msk.bf16.mxu0 %vm819_vm4, %v6298_v30 }
 0x28b   : > { %v3260_v11 = vpop.f32.mrf.mxu1 }
 0x28d   : > { %v6441_v39 = vpop.f32.mrf.mxu1 }
 0x28f   : > { %v3263_v43 = vpop.f32.mrf.mxu1 }
 0x291   : > { %5079 = vmatmul.mubr.msk.bf16.gmra.mxu0 %vm819_vm4, %v6292_v50  ;;  %v6445_v17 = vpop.f32.mrf.mxu1 }
 0x292   : > { %5082 = vmatprep.mubr.msk.bf16.mxu0 %vm819_vm4, %v6332_v63 }
 0x293   : > { %v3276_v49 = vpop.f32.mrf.mxu1 }
 0x295   : > { %v6449_v35 = vpop.f32.mrf.mxu1 }
 0x297   : > { %v3279_v19 = vpop.f32.mrf.mxu1 }
 0x299   : > { %5083 = vmatmul.mubr.msk.bf16.gmra.mxu0 %vm819_vm4, %v6324_v46  ;;  %v6453_v30 = vpop.f32.mrf.mxu1  ;;  %v6472_v46 = vld [vmem:[%s6992_s3 + $0x2] ss:$0 sm:$0xff] }
 0x29a   : > { %5086 = vmatprep.mubr.msk.bf16.mxu0 %vm819_vm4, %v6357_v56  ;;  %v3229_v52 = vadd.f32 %v6472_v46, %v3228_v61  ;;  %v3232_v14 = vadd.f32 %v6472_v46, %v3231_v27  ;;  %v3245_v12 = vadd.f32 %v6472_v46, %v3244_v40  ;;  %v3248_v48 = vadd.f32 %v6472_v46, %v3247_v31 }
 0x29b   : > { %v6457_v55 = vpop.f32.mrf.mxu1  ;;  %v3237_v45 = vadd.f32 %v5102_v18, %v6472_v46  ;;  %v3261_v47 = vadd.f32 %v6472_v46, %v3260_v11  ;;  %v3264_v34 = vadd.f32 %v6472_v46, %v3263_v43  ;;  %v3256_v6 = vadd.f32 %v5107_v42, %v6472_v46 }
 0x29c   : > { %v3356_v23 = vmax.f32 %v3232_v14, 0.0  ;;  %v3359_v13 = vmax.f32 %v3245_v12, 0.0  ;;  %v3360_v15 = vmax.f32 %v3248_v48, 0.0  ;;  %v3277_v8 = vadd.f32 %v6472_v46, %v3276_v49 }
 0x29d   : > { %v6459_v50 = vpop.f32.mrf.mxu1  ;;  %v3357_v51 = vmax.f32 %v3237_v45, 0.0  ;;  %v3363_v22 = vmax.f32 %v3261_v47, 0.0  ;;  %v3364_v18 = vmax.f32 %v3264_v34, 0.0  ;;  %v3362_v5 = vmax.f32 %v3256_v6, 0.0 }
 0x29e   : > { %v3389_v59 = vpack.c.bf16 %v3360_v15, %v3359_v13  ;;  %v3280_v44 = vadd.f32 %v6472_v46, %v3279_v19  ;;  %v3288_v14 = vadd.f32 %v6449_v35, %v6472_v46  ;;  %v3301_v15 = vadd.f32 %v6453_v30, %v6472_v46 }
 0x29f   : > { %v6461_v33 = vpop.f32.mrf.mxu1  ;;  %v3391_v61 = vpack.c.bf16 %v3364_v18, %v3363_v22 }
 0x2a0   : > { %v3368_v40 = vmax.f32 %v3280_v44, 0.0  ;;  %v3296_v49 = vadd.f32 %v6472_v46, %v6461_v33  ;;  %v3370_v48 = vmax.f32 %v3288_v14, 0.0  ;;  %v3373_v34 = vmax.f32 %v3301_v15, 0.0 }
 0x2a1   : > { %5087 = vmatmul.mubr.msk.bf16.gmra.mxu0 %vm819_vm4, %v6353_v1  ;;  %v6465_v63 = vpop.f32.mrf.mxu1 }
 0x2a2   : > { %5090 = vmatprep.mubr.msk.bf16.mxu0 %vm819_vm4, %v6383_v20  ;;  %v3355_v20 = vmax.f32 %v3229_v52, 0.0  ;;  %v3285_v52 = vadd.f32 %v6445_v17, %v6472_v46 }
 0x2a3   : > { %v6474_v56 = vpop.f32.mrf.mxu1 }
 0x2a4   : > { %v3387_v37 = vpack.c.bf16 %v3356_v23, %v3355_v20  ;;  %v3369_v12 = vmax.f32 %v3285_v52, 0.0  ;;  %v3309_v35 = vadd.f32 %v6472_v46, %v6474_v56 }
 0x2a5   : > { %v6476_v29 = vpop.f32.mrf.mxu1 }
 0x2a6   : > { %v3394_v13 = vpack.c.bf16 %v3370_v48, %v3369_v12  ;;  %v3375_v47 = vmax.f32 %v3309_v35, 0.0  ;;  %v3320_v22 = vadd.f32 %v6476_v29, %v6472_v46 }
 0x2a7   : > { %v6480_v7 = vpop.f32.mrf.mxu1 }
 0x2a9   : > { %5091 = vmatmul.mubr.msk.bf16.gmra.mxu0 %vm819_vm4, %v6379_v58  ;;  %v6484_v1 = vpop.f32.mrf.mxu1  ;;  %v3240_v58 = vadd.f32 %v5103_v60, %v6472_v46  ;;  %v3272_v60 = vadd.f32 %v6441_v39, %v6472_v46  ;;  %v3293_v39 = vadd.f32 %v6472_v46, %v6457_v55  ;;  %v3372_v55 = vmax.f32 %v3296_v49, 0.0 }
 0x2aa   : > { %5094 = vmatprep.mubr.msk.bf16.mxu0 %vm819_vm4, %v6407_v4  ;;  %v3333_v29 = vadd.f32 %v6484_v1, %v6472_v46 }
 0x2ab   : > { %v6488_v24 = vpop.f32.mrf.mxu1  ;;  %v3358_v62 = vmax.f32 %v3240_v58, 0.0  ;;  %v3366_v31 = vmax.f32 %v3272_v60, 0.0  ;;  %v3312_v58 = vadd.f32 %v6472_v46, %v6480_v7 }
 0x2ac   : > { %v3325_v30 = vadd.f32 %v6472_v46, %v6488_v24  ;;  %v3378_v24 = vmax.f32 %v3320_v22, 0.0 }
 0x2ad   : > { %v6490_v9 = vpop.f32.mrf.mxu1  ;;  %v3388_v53 = vpack.c.bf16 %v3358_v62, %v3357_v51  ;;  %v3304_v51 = vadd.f32 %v6459_v50, %v6472_v46  ;;  %v3376_v56 = vmax.f32 %v3312_v58, 0.0 }
 0x2af   : > { %v6496_v36 = vpop.f32.mrf.mxu1 }
 0x2b0   : > { %v3328_v50 = vadd.f32 %v6472_v46, %v6496_v36 }
 0x2b1   : > { %5095 = vmatmul.mubr.msk.bf16.gmra.mxu0 %vm819_vm4, %v6403_v25  ;;  %v6500_v4 = vpop.f32.mrf.mxu1  ;;  %v3253_v25 = vadd.f32 %v5106_v2, %v6472_v46  ;;  %v3367_v2 = vmax.f32 %v3277_v8, 0.0 }
 0x2b2   : > { %5136 = vmatprep.mubr.msk.bf16.mxu0 %vm819_vm4, %v3387_v37  ;;  %v3371_v37 = vmax.f32 %v3293_v39, 0.0  ;;  %v3349_v49 = vadd.f32 %v6500_v4, %v6472_v46 }
 0x2b3   : > { %v6503_v3 = vpop.f32.mrf.mxu1  ;;  %v3361_v0 = vmax.f32 %v3253_v25, 0.0  ;;  %v3397_v25 = vpack.c.bf16 %v3376_v56, %v3375_v47 }
 0x2b4   : > { %v3395_v17 = vpack.c.bf16 %v3372_v55, %v3371_v37  ;;  %v3341_v36 = vadd.f32 %v6472_v46, %v6503_v3  ;;  %v3385_v55 = vmax.f32 %v3349_v49, 0.0 }
 0x2b5   : > { %v6505_v26 = vpop.f32.mrf.mxu1  ;;  %v3390_v54 = vpack.c.bf16 %v3362_v5, %v3361_v0  ;;  %v3379_v0 = vmax.f32 %v3325_v30, 0.0  ;;  %v3380_v5 = vmax.f32 %v3328_v50, 0.0 }
 0x2b7   : > { %v6514_v32 = vpop.f32.mrf.mxu1  ;;  %v3399_v44 = vpack.c.bf16 %v3380_v5, %v3379_v0 }
 0x2b9   : > { %5137 = vmatmul.mubr.msk.bf16.vlgmr.msra.gmra.mxu0 %vm819_vm4, %v3388_v53  ;;  %v6517_v10 = vpop.f32.mrf.mxu1  ;;  %v3374_v53 = vmax.f32 %v3304_v51, 0.0 }
 0x2ba   : > { %5203 = vmatpush3.bf16.msra.mxu0 %v6428_v41  ;;  %5140 = vmatprep.mubr.msk.bf16.mxu0 %vm819_vm4, %v3389_v59  ;;  %v3269_v41 = vadd.f32 %v6437_v38, %v6472_v46  ;;  %v3393_v38 = vpack.c.bf16 %v3368_v40, %v3367_v2  ;;  %v3383_v2 = vmax.f32 %v3341_v36, 0.0 }
 0x2bb   : > { %5204 = vmatprep.subr.bf16.mxu0 %v5317_v21  ;;  %v6521_v16 = vpop.f32.mrf.mxu1  ;;  %v3396_v6 = vpack.c.bf16 %v3374_v53, %v3373_v34 }
 0x2bc   : > { %v3365_v42 = vmax.f32 %v3269_v41, 0.0  ;;  %v3336_v41 = vadd.f32 %v6490_v9, %v6472_v46 }
 0x2bd   : > { %v6523_v28 = vpop.f32.mrf.mxu1 }
 0x2be   : > { %5205 = vmatpush3.bf16.msra.mxu0 %v5317_v21  ;;  %v3392_v19 = vpack.c.bf16 %v3366_v31, %v3365_v42  ;;  %v3317_v21 = vadd.f32 %v6465_v63, %v6472_v46  ;;  %v3344_v63 = vadd.f32 %v6472_v46, %v6514_v32  ;;  %v3381_v42 = vmax.f32 %v3333_v29, 0.0  ;;  %v6602_v32 = vld [vmem:[%s6992_s3 + $0x3] ss:$0 sm:$0xff] }
 0x2bf   : > { %v6531_v57 = vpop.f32.mrf.mxu1  ;;  %v3382_v3 = vmax.f32 %v3336_v41, 0.0  ;;  %v3709_v9 = vadd.f32 %v6602_v32, %v6521_v16 }
 0x2c0   : > { %v3384_v40 = vmax.f32 %v3344_v63, 0.0 }
 0x2c1   : > { %5141 = vmatmul.mubr.msk.bf16.gmra.mxu0 %vm819_vm4, %v3390_v54  ;;  %v6534_v27 = vpop.f32.mrf.mxu1  ;;  %v3400_v39 = vpack.c.bf16 %v3382_v3, %v3381_v42  ;;  %v3835_v14 = vmax.f32 %v3709_v9, 0.0 }
 0x2c2   : > { %5144 = vmatprep.mubr.msk.bf16.mxu0 %vm819_vm4, %v3391_v61  ;;  %v3377_v61 = vmax.f32 %v3317_v21, 0.0  ;;  %v3401_v1 = vpack.c.bf16 %v3384_v40, %v3383_v2 }
 0x2c3   : > { %v6537_v11 = vpop.f32.mrf.mxu1 }
 0x2c4   : > { %v3398_v54 = vpack.c.bf16 %v3378_v24, %v3377_v61 }
 0x2c5   : > { %v6539_v43 = vpop.f32.mrf.mxu1 }
 0x2c6   : > { %v3736_v34 = vadd.f32 %v6539_v43, %v6602_v32 }
 0x2c7   : > { %v6549_v20 = vpop.f32.mrf.mxu1 }
 0x2c8   : > { %v3728_v4 = vadd.f32 %v6602_v32, %v6549_v20 }
 0x2c9   : > { %5145 = vmatmul.mubr.msk.bf16.gmra.mxu0 %vm819_vm4, %v3392_v19  ;;  %v6552_v23 = vpop.f32.mrf.mxu1  ;;  %v3352_v19 = vadd.f32 %v6505_v26, %v6472_v46  ;;  %v3717_v46 = vadd.f32 %v6517_v10, %v6602_v32  ;;  %v3720_v26 = vadd.f32 %v6523_v28, %v6602_v32  ;;  %v3733_v28 = vadd.f32 %v6534_v27, %v6602_v32 }
 0x2ca   : > { %5148 = vmatprep.mubr.msk.bf16.mxu0 %vm819_vm4, %v3393_v38  ;;  %v3712_v38 = vadd.f32 %v6602_v32, %v6531_v57  ;;  %v3725_v57 = vadd.f32 %v6602_v32, %v6537_v11  ;;  %v3749_v43 = vadd.f32 %v6552_v23, %v6602_v32 }
 0x2cb   : > { %v6555_v33 = vpop.f32.mrf.mxu1  ;;  %v3386_v16 = vmax.f32 %v3352_v19, 0.0  ;;  %v3837_v15 = vmax.f32 %v3717_v46, 0.0  ;;  %v3838_v11 = vmax.f32 %v3720_v26, 0.0  ;;  %v3841_v50 = vmax.f32 %v3733_v28, 0.0 }
 0x2cc   : > { %v3836_v37 = vmax.f32 %v3712_v38, 0.0  ;;  %v3839_v58 = vmax.f32 %v3725_v57, 0.0  ;;  %v3741_v20 = vadd.f32 %v6602_v32, %v6555_v33 }
 0x2cd   : > { %v6557_v45 = vpop.f32.mrf.mxu1  ;;  %v3868_v56 = vpack.c.bf16 %v3838_v11, %v3837_v15 }
 0x2ce   : > { %v3867_v48 = vpack.c.bf16 %v3836_v37, %v3835_v14  ;;  %v3752_v0 = vadd.f32 %v6557_v45, %v6602_v32 }
 0x2cf   : > { %v6567_v62 = vpop.f32.mrf.mxu1 }
 0x2d0   : > { %v3744_v10 = vadd.f32 %v6602_v32, %v6567_v62  ;;  %v3846_v36 = vmax.f32 %v3752_v0, 0.0 }
 0x2d1   : > { %5149 = vmatmul.mubr.msk.bf16.gmra.mxu0 %vm819_vm4, %v3394_v13  ;;  %v6570_v59 = vpop.f32.mrf.mxu1  ;;  %v3840_v13 = vmax.f32 %v3728_v4, 0.0 }
 0x2d2   : > { %5152 = vmatprep.mubr.msk.bf16.mxu0 %vm819_vm4, %v3395_v17  ;;  %v3402_v17 = vpack.c.bf16 %v3386_v16, %v3385_v55  ;;  %v3844_v30 = vmax.f32 %v3744_v10, 0.0  ;;  %v3765_v23 = vadd.f32 %v6570_v59, %v6602_v32 }
 0x2d3   : > { %v6573_v7 = vpop.f32.mrf.mxu1  ;;  %v3869_v47 = vpack.c.bf16 %v3840_v13, %v3839_v58 }
 0x2d4   : > { %v3757_v62 = vadd.f32 %v6602_v32, %v6573_v7  ;;  %v3849_v42 = vmax.f32 %v3765_v23, 0.0 }
 0x2d5   : > { %v6583_v18 = vpop.f32.mrf.mxu1 }
 0x2d6   : > { %v3847_v61 = vmax.f32 %v3757_v62, 0.0  ;;  %v3768_v45 = vadd.f32 %v6583_v18, %v6602_v32 }
 0x2d7   : > { %v3759_v8 = vpop.f32.mrf.mxu1 }
 0x2d8   : > { %v3760_v22 = vadd.f32 %v6602_v32, %v3759_v8  ;;  %v3850_v3 = vmax.f32 %v3768_v45, 0.0  ;;  %v7121_v45 = vld [vmem:[#allocation17_spill] sm:$0xff] }
 0x2d9   : > { %5153 = vmatmul.mubr.msk.bf16.gmra.mxu0 %vm819_vm4, %v3396_v6  ;;  %v6595_v60 = vpop.f32.mrf.mxu1  ;;  %v3842_v6 = vmax.f32 %v3736_v34, 0.0 }
 0x2da   : > { %5156 = vmatprep.mubr.msk.bf16.mxu0 %vm819_vm4, %v3397_v25  ;;  %v3843_v25 = vmax.f32 %v3741_v20, 0.0  ;;  %v3848_v24 = vmax.f32 %v3760_v22, 0.0  ;;  %v3781_v59 = vadd.f32 %v6595_v60, %v6602_v32  ;;  %v6685_v22 = vld [vmem:[%s260_s10] ss:$0 sm:$0xff] }
 0x2db   : > { %v3772_v31 = vpop.f32.mrf.mxu1  ;;  %v3870_v27 = vpack.c.bf16 %v3842_v6, %v3841_v50 }
 0x2dc   : > { %v3871_v21 = vpack.c.bf16 %v3844_v30, %v3843_v25  ;;  %v3873_v7 = vpack.c.bf16 %v3848_v24, %v3847_v61  ;;  %v3773_v8 = vadd.f32 %v6602_v32, %v3772_v31  ;;  %v3853_v37 = vmax.f32 %v3781_v59, 0.0 }
 0x2dd   : > { %v6612_v52 = vpop.f32.mrf.mxu1 }
 0x2de   : > { %v3851_v2 = vmax.f32 %v3773_v8, 0.0  ;;  %v3784_v18 = vadd.f32 %v6612_v52, %v6602_v32  ;;  %v7120_v8 = vld [vmem:[#allocation15_spill] sm:$0xff] }
 0x2df   : > { %v3775_v12 = vpop.f32.mrf.mxu1 }
 0x2e0   : > { %v3854_v55 = vmax.f32 %v3784_v18, 0.0  ;;  %v7124_v18 = vld [vmem:[#allocation21_spill] sm:$0xff] }
 0x2e1   : > { %5157 = vmatmul.mubr.msk.bf16.gmra.mxu0 %vm819_vm4, %v3398_v54  ;;  %v6624_v35 = vpop.f32.mrf.mxu1  ;;  %v3776_v54 = vadd.f32 %v6602_v32, %v3775_v12 }
 0x2e2   : > { %5160 = vmatprep.mubr.msk.bf16.mxu0 %vm819_vm4, %v3399_v44  ;;  %v3845_v44 = vmax.f32 %v3749_v43, 0.0  ;;  %v3876_v4 = vpack.c.bf16 %v3854_v55, %v3853_v37  ;;  %v3797_v60 = vadd.f32 %v6624_v35, %v6602_v32  ;;  %v7125_v37 = vld [vmem:[#allocation22_spill] sm:$0xff] }
 0x2e3   : > { %v3788_v51 = vpop.f32.mrf.mxu1  ;;  %v3852_v40 = vmax.f32 %v3776_v54, 0.0  ;;  %v1030_v54 = vadd.f32 %v6685_v22, %v7120_v8  ;;  %v1039_v55 = vadd.f32 %v7125_v37, %v6685_v22  ;;  %v7139_v37 = vld [vmem:[#allocation42_spill] sm:$0xff] }
 0x2e4   : > { %v3872_v29 = vpack.c.bf16 %v3846_v36, %v3845_v44  ;;  %v3789_v9 = vadd.f32 %v6602_v32, %v3788_v51  ;;  %v3857_v58 = vmax.f32 %v3797_v60, 0.0  ;;  %v7119_v44 = vld [vmem:[#allocation14_spill] sm:$0xff] }
 0x2e5   : > { %v5193_v53 = vpop.f32.mrf.mxu1  ;;  %v3875_v31 = vpack.c.bf16 %v3852_v40, %v3851_v2  ;;  %v1032_v36 = vadd.f32 %v7119_v44, %v6685_v22 }
 0x2e6   : > { %v3855_v19 = vmax.f32 %v3789_v9, 0.0  ;;  %v3800_v52 = vadd.f32 %v5193_v53, %v6602_v32  ;;  %v7123_v9 = vld [vmem:[#allocation20_spill] sm:$0xff] }
 0x2e7   : > { %v3791_v33 = vpop.f32.mrf.mxu1 }
 0x2e8   : > { %v3792_v38 = vadd.f32 %v6602_v32, %v3791_v33  ;;  %v3858_v13 = vmax.f32 %v3800_v52, 0.0  ;;  %v7127_v52 = vld [vmem:[#allocation25_spill] sm:$0xff] }
 0x2e9   : > { %5161 = vmatmul.mubr.msk.bf16.gmra.mxu0 %vm819_vm4, %v3400_v39  ;;  %v5196_v5 = vpop.f32.mrf.mxu1  ;;  %v3874_v39 = vpack.c.bf16 %v3850_v3, %v3849_v42  ;;  %v7122_v42 = vld [vmem:[#allocation18_spill] sm:$0xff] }
 0x2ea   : > { %5164 = vmatprep.mubr.msk.bf16.mxu0 %vm819_vm4, %v3401_v1  ;;  %v3856_v14 = vmax.f32 %v3792_v38, 0.0  ;;  %v3878_v20 = vpack.c.bf16 %v3858_v13, %v3857_v58  ;;  %v3813_v35 = vadd.f32 %v5196_v5, %v6602_v32  ;;  %v1033_v3 = vadd.f32 %v6685_v22, %v7122_v42  ;;  %v7128_v58 = vld [vmem:[#allocation26_spill] sm:$0xff] }
 0x2eb   : > { %v3804_v63 = vpop.f32.mrf.mxu1  ;;  %v1036_v38 = vadd.f32 %v7123_v9, %v6685_v22  ;;  %v1038_v13 = vadd.f32 %v6685_v22, %v7128_v58 }
 0x2ec   : > { %v3877_v12 = vpack.c.bf16 %v3856_v14, %v3855_v19  ;;  %v3861_v34 = vmax.f32 %v3813_v35, 0.0 }
 0x2ed   : > { %v5197_v41 = vpop.f32.mrf.mxu1 }
 0x2ee   : > { %v3816_v10 = vadd.f32 %v5197_v41, %v6602_v32  ;;  %v1035_v41 = vadd.f32 %v7121_v45, %v6685_v22  ;;  %v7136_v45 = vld [vmem:[#allocation37_spill] sm:$0xff] }
 0x2ef   : > { %v3807_v1 = vpop.f32.mrf.mxu1 }
 0x2f0   : > { %v3808_v57 = vadd.f32 %v6602_v32, %v3807_v1  ;;  %v3862_v53 = vmax.f32 %v3816_v10, 0.0  ;;  %v7130_v10 = vld [vmem:[#allocation29_spill] sm:$0xff] }
 0x2f1   : > { %5165 = vmatmul.mubr.msk.bf16.gmra.mxu0 %vm819_vm4, %v3402_v17  ;;  %v5200_v49 = vpop.f32.mrf.mxu1 }
 0x2f2   : > { %5206 = vmatprep.mubr.msk.bf16.mxu0 %vm819_vm4, %v3867_v48  ;;  %v3805_v48 = vadd.f32 %v6602_v32, %v3804_v63  ;;  %v3860_v26 = vmax.f32 %v3808_v57, 0.0  ;;  %v3880_v30 = vpack.c.bf16 %v3862_v53, %v3861_v34  ;;  %v3829_v50 = vadd.f32 %v5200_v49, %v6602_v32  ;;  %v7131_v53 = vld [vmem:[#allocation31_spill] sm:$0xff] }
 0x2f3   : > { %v3820_v16 = vpop.f32.mrf.mxu1  ;;  %v1034_v49 = vadd.f32 %v6685_v22, %v7124_v18 }
 0x2f4   : > { %v3859_v46 = vmax.f32 %v3805_v48, 0.0  ;;  %v3821_v51 = vadd.f32 %v6602_v32, %v3820_v16  ;;  %v3865_v33 = vmax.f32 %v3829_v50, 0.0  ;;  %v7126_v48 = vld [vmem:[#allocation23_spill] sm:$0xff] }
 0x2f5   : > { %v5201_v17 = vpop.f32.mrf.mxu1  ;;  %v1037_v57 = vadd.f32 %v6685_v22, %v7126_v48 }
 0x2f6   : > { %v3879_v11 = vpack.c.bf16 %v3860_v26, %v3859_v46  ;;  %v3832_v6 = vadd.f32 %v5201_v17, %v6602_v32  ;;  %v1040_v17 = vadd.f32 %v7127_v52, %v6685_v22 }
 0x2f7   : > { %v3823_v15 = vpop.f32.mrf.mxu1 }
 0x2f9   : > { %5207 = vmatmul.mubr.msk.bf16.vlgmr.msra.gmra.mxu0 %vm819_vm4, %v3868_v56  ;;  %v3863_v56 = vmax.f32 %v3821_v51, 0.0  ;;  %v7129_v51 = vld [vmem:[#allocation28_spill] sm:$0xff] }
 0x2fa   : > { %5210 = vmatprep.mubr.msk.bf16.mxu0 %vm819_vm4, %v3869_v47  ;;  %v3824_v47 = vadd.f32 %v6602_v32, %v3823_v15  ;;  %v7118_v32 = vld [vmem:[#allocation12_spill] sm:$0xff] }
 0x2fb   : > { %v1029_v5 = vadd.f32 %v6685_v22, %v7118_v32 }
 0x2fc   : > { %v3864_v28 = vmax.f32 %v3824_v47, 0.0  ;;  %v1043_v47 = vadd.f32 %v7129_v51, %v6685_v22  ;;  %v7142_v51 = vld [vmem:[#allocation45_spill] sm:$0xff] }
 0x2fe   : > { %v3881_v25 = vpack.c.bf16 %v3864_v28, %v3863_v56  ;;  %v1041_v56 = vadd.f32 %v6685_v22, %v7130_v10 }
 0x301   : > { %5211 = vmatmul.mubr.msk.bf16.gmra.mxu0 %vm819_vm4, %v3870_v27  ;;  %v7117_v27 = vld [vmem:[#allocation11_spill] sm:$0xff] }
 0x302   : > { %5214 = vmatprep.mubr.msk.bf16.mxu0 %vm819_vm4, %v3871_v21  ;;  %v3866_v21 = vmax.f32 %v3832_v6, 0.0  ;;  %v1031_v43 = vadd.f32 %v7117_v27, %v6685_v22  ;;  %v7132_v6 = vld [vmem:[#allocation32_spill] sm:$0xff]  ;;  %v7133_v27 = vld [vmem:[#allocation33_spill] sm:$0xff] }
 0x304   : > { %v3882_v62 = vpack.c.bf16 %v3866_v21, %v3865_v33  ;;  %v1042_v33 = vadd.f32 %v6685_v22, %v7132_v6 }
 0x309   : > { %5215 = vmatmul.mubr.msk.bf16.gmra.mxu0 %vm819_vm4, %v3872_v29 }
 0x30a   : > { %5218 = vmatprep.mubr.msk.bf16.mxu0 %vm819_vm4, %v3873_v7 }
 0x311   : > { %5219 = vmatmul.mubr.msk.bf16.gmra.mxu0 %vm819_vm4, %v3874_v39 }
 0x312   : > { %5222 = vmatprep.mubr.msk.bf16.mxu0 %vm819_vm4, %v3875_v31 }
 0x319   : > { %5223 = vmatmul.mubr.msk.bf16.gmra.mxu0 %vm819_vm4, %v3876_v4 }
 0x31a   : > { %5226 = vmatprep.mubr.msk.bf16.mxu0 %vm819_vm4, %v3877_v12 }
 0x321   : > { %5227 = vmatmul.mubr.msk.bf16.gmra.mxu0 %vm819_vm4, %v3878_v20 }
 0x322   : > { %5230 = vmatprep.mubr.msk.bf16.mxu0 %vm819_vm4, %v3879_v11 }
 0x329   : > { %5231 = vmatmul.mubr.msk.bf16.gmra.mxu0 %vm819_vm4, %v3880_v30 }
 0x32a   : > { %5234 = vmatprep.mubr.msk.bf16.mxu0 %vm819_vm4, %v3881_v25  ;;  %v1044_v25 = vadd.f32 %v7131_v53, %v6685_v22 }
 0x331   : > { %5235 = vmatmul.mubr.msk.bf16.gmra.mxu0 %vm819_vm4, %v3882_v62 }
 0x339   : > { %v5068_v0 = vpop.f32.mrf.mxu0 }
 0x33a   : > { %v6691_v61 = vadd.f32 %v5068_v0, %v1031_v43  ;;  %v1047_v43 = vadd.f32 %v7133_v27, %v6685_v22  ;;  %v7145_v27 = vld [vmem:[#allocation48_spill] sm:$0xff] }
 0x33b   : > { %v3022_v24 = vpop.f32.mrf.mxu0 }
 0x33c   : > { %v6695_v63 = vadd.f32 %v3022_v24, %v1029_v5  ;;  %v7134_v5 = vld [vmem:[#allocation34_spill] sm:$0xff] }
 0x33d   : > { %v5069_v7 = vpop.f32.mrf.mxu0  ;;  %v1045_v24 = vadd.f32 %v6685_v22, %v7134_v5 }
 0x33e   : > { %v6699_v29 = vadd.f32 %v5069_v7, %v1032_v36  ;;  %v7135_v7 = vld [vmem:[#allocation36_spill] sm:$0xff] }
 0x33f   : > { %v3025_v23 = vpop.f32.mrf.mxu0  ;;  %v1048_v8 = vadd.f32 %v7135_v7, %v6685_v22 }
 0x340   : > { %v6703_v2 = vadd.f32 %v3025_v23, %v1030_v54 }
 0x341   : > { %v5072_v40 = vpop.f32.mrf.mxu0 }
 0x342   : > { %v6707_v1 = vadd.f32 %v5072_v40, %v1035_v41  ;;  %v1046_v41 = vadd.f32 %v6685_v22, %v7136_v45 }
 0x343   : > { %v3038_v31 = vpop.f32.mrf.mxu0 }
 0x344   : > { %v6711_v39 = vadd.f32 %v3038_v31, %v1033_v3  ;;  %v7137_v3 = vld [vmem:[#allocation39_spill] sm:$0xff] }
 0x345   : > { %v5073_v59 = vpop.f32.mrf.mxu0  ;;  %v1051_v31 = vadd.f32 %v7137_v3, %v6685_v22  ;;  %v7151_v3 = vld [vmem:[#allocation51_spill] sm:$0xff] }
 0x346   : > { %v6715_v19 = vadd.f32 %v5073_v59, %v1036_v38  ;;  %v7138_v59 = vld [vmem:[#allocation40_spill] sm:$0xff] }
 0x347   : > { %v3041_v14 = vpop.f32.mrf.mxu0  ;;  %v1049_v18 = vadd.f32 %v6685_v22, %v7138_v59 }
 0x348   : > { %v6719_v16 = vadd.f32 %v3041_v14, %v1034_v49 }
 0x349   : > { %v5076_v12 = vpop.f32.mrf.mxu0 }
 0x34a   : > { %v6723_v4 = vadd.f32 %v5076_v12, %v1039_v55  ;;  %v1052_v55 = vadd.f32 %v7139_v37, %v6685_v22 }
 0x34b   : > { %v3054_v60 = vpop.f32.mrf.mxu0 }
 0x34c   : > { %v6727_v46 = vadd.f32 %v3054_v60, %v1037_v57  ;;  %v7140_v57 = vld [vmem:[#allocation43_spill] sm:$0xff] }
 0x34d   : > { %v5077_v26 = vpop.f32.mrf.mxu0  ;;  %v1050_v60 = vadd.f32 %v6685_v22, %v7140_v57 }
 0x34e   : > { %v6731_v15 = vadd.f32 %v5077_v26, %v1040_v17  ;;  %v7141_v26 = vld [vmem:[#allocation44_spill] sm:$0xff] }
 0x34f   : > { %v3057_v11 = vpop.f32.mrf.mxu0  ;;  %v1055_v58 = vadd.f32 %v7141_v26, %v6685_v22 }
 0x350   : > { %v6735_v20 = vadd.f32 %v3057_v11, %v1038_v13 }
 0x351   : > { %v5080_v35 = vpop.f32.mrf.mxu0 }
 0x352   : > { %v6739_v28 = vadd.f32 %v5080_v35, %v1043_v47  ;;  %v1053_v47 = vadd.f32 %v6685_v22, %v7142_v51 }
 0x353   : > { %v3070_v34 = vpop.f32.mrf.mxu0 }
 0x354   : > { %v6743_v30 = vadd.f32 %v3070_v34, %v1041_v56  ;;  %v7143_v56 = vld [vmem:[#allocation46_spill] sm:$0xff] }
 0x355   : > { %v5081_v50 = vpop.f32.mrf.mxu0  ;;  %v1056_v34 = vadd.f32 %v7143_v56, %v6685_v22 }
 0x356   : > { %v6747_v21 = vadd.f32 %v5081_v50, %v1044_v25  ;;  %v7144_v50 = vld [vmem:[#allocation47_spill] sm:$0xff] }
 0x357   : > { %v3073_v62 = vpop.f32.mrf.mxu0  ;;  %v1054_v6 = vadd.f32 %v6685_v22, %v7144_v50 }
 0x358   : > { %v6751_v0 = vadd.f32 %v3073_v62, %v1042_v33 }
 0x359   : > { %v5084_v32 = vpop.f32.mrf.mxu0 }
 0x35a   : > { %v6755_v44 = vadd.f32 %v5084_v32, %v1047_v43  ;;  %v1059_v43 = vadd.f32 %v7145_v27, %v6685_v22 }
 0x35b   : > { %v3086_v36 = vpop.f32.mrf.mxu0 }
 0x35c   : > { %v6759_v54 = vadd.f32 %v3086_v36, %v1045_v24  ;;  %v7147_v24 = vld [vmem:[#allocation49_spill] sm:$0xff] }
 0x35d   : > { %v5085_v23 = vpop.f32.mrf.mxu0  ;;  %v1057_v36 = vadd.f32 %v6685_v22, %v7147_v24 }
 0x35e   : > { %v6763_v40 = vadd.f32 %v5085_v23, %v1048_v8  ;;  %v7149_v23 = vld [vmem:[#allocation50_spill] sm:$0xff] }
 0x35f   : > { %v3089_v42 = vpop.f32.mrf.mxu0  ;;  %v1060_v45 = vadd.f32 %v7149_v23, %v6685_v22 }
 0x360   : > { %v6767_v9 = vadd.f32 %v3089_v42, %v1046_v41 }
 0x361   : > { %v5088_v38 = vpop.f32.mrf.mxu0 }
 0x362   : > { %v6771_v49 = vadd.f32 %v5088_v38, %v1051_v31  ;;  %v1058_v31 = vadd.f32 %v6685_v22, %v7151_v3 }
 0x363   : > { %v3102_v14 = vpop.f32.mrf.mxu0 }
 0x364   : > { %v6775_v12 = vadd.f32 %v3102_v14, %v1049_v18 }
 0x365   : > { %v5089_v48 = vpop.f32.mrf.mxu0 }
 0x366   : > { %v6779_v52 = vadd.f32 %v5089_v48, %v1052_v55 }
 0x367   : > { %v3105_v17 = vpop.f32.mrf.mxu0 }
 0x368   : > { %v6783_v13 = vadd.f32 %v3105_v17, %v1050_v60 }
 0x369   : > { %v5092_v11 = vpop.f32.mrf.mxu0 }
 0x36a   : > { %v6787_v35 = vadd.f32 %v5092_v11, %v1055_v58 }
 0x36b   : > { %v3118_v10 = vpop.f32.mrf.mxu0 }
 0x36c   : > { %v6791_v53 = vadd.f32 %v3118_v10, %v1053_v47 }
 0x36d   : > { %v5093_v25 = vpop.f32.mrf.mxu0 }
 0x36e   : > { %v6795_v33 = vadd.f32 %v5093_v25, %v1056_v34 }
 0x36f   : > { %v3121_v62 = vpop.f32.mrf.mxu0 }
 0x370   : > { %v6799_v32 = vadd.f32 %v3121_v62, %v1054_v6 }
 0x371   : > { %v5096_v5 = vpop.f32.mrf.mxu0 }
 0x372   : > { %7146 = vst [vmem:[#allocation59_spill] sm:$0xff] %v6799_v32  ;;  %v6803_v7 = vadd.f32 %v5096_v5, %v1059_v43 }
 0x373   : > { %v3134_v8 = vpop.f32.mrf.mxu0 }
 0x374   : > { %7148 = vst [vmem:[#allocation4_spill] sm:$0xff] %v6803_v7  ;;  %v6807_v41 = vadd.f32 %v3134_v8, %v1057_v36 }
 0x375   : > { %v5097_v42 = vpop.f32.mrf.mxu0 }
 0x376   : > { %7150 = vst [vmem:[#allocation2_spill] sm:$0xff] %v6807_v41  ;;  %v6811_v38 = vadd.f32 %v5097_v42, %v1060_v45 }
 0x377   : > { %v3137_v59 = vpop.f32.mrf.mxu0 }
 0x378   : > { %7152 = vst [vmem:[#allocation64_spill] sm:$0xff] %v6811_v38  ;;  %v6813_v18 = vadd.f32 %v3137_v59, %v1058_v31 }
 0x379   : > { %v5138_v14 = vpop.f32.mrf.mxu0 }
 0x37a   : > { %7153 = vst [vmem:[#allocation8_spill] sm:$0xff] %v6813_v18  ;;  %v3631_v18 = vadd.f32 %v5138_v14, %v6691_v61 }
 0x37b   : > { %v3502_v37 = vpop.f32.mrf.mxu0 }
 0x37c   : > { %v3629_v41 = vadd.f32 %v3502_v37, %v6695_v63 }
 0x37d   : > { %v5139_v55 = vpop.f32.mrf.mxu0 }
 0x37f   : > { %v3505_v48 = vpop.f32.mrf.mxu0 }
 0x380   : > { %v3630_v61 = vadd.f32 %v3505_v48, %v6703_v2 }
 0x381   : > { %v5142_v57 = vpop.f32.mrf.mxu0 }
 0x382   : > { %v3635_v14 = vadd.f32 %v5142_v57, %v6707_v1 }
 0x383   : > { %v3518_v60 = vpop.f32.mrf.mxu0 }
 0x385   : > { %v5143_v17 = vpop.f32.mrf.mxu0 }
 0x387   : > { %v3521_v26 = vpop.f32.mrf.mxu0 }
 0x389   : > { %v5146_v58 = vpop.f32.mrf.mxu0 }
 0x38b   : > { %v6815_v11 = vpop.f32.mrf.mxu0 }
 0x38d   : > { %v6817_v51 = vpop.f32.mrf.mxu0 }
 0x38f   : > { %v6819_v47 = vpop.f32.mrf.mxu0 }
 0x391   : > { %v6821_v22 = vpop.f32.mrf.mxu0 }
 0x393   : > { %v6823_v10 = vpop.f32.mrf.mxu0 }
 0x395   : > { %v6825_v56 = vpop.f32.mrf.mxu0 }
 0x397   : > { %v6827_v34 = vpop.f32.mrf.mxu0 }
 0x399   : > { %v6829_v25 = vpop.f32.mrf.mxu0 }
 0x39b   : > { %v6831_v50 = vpop.f32.mrf.mxu0 }
 0x39d   : > { %v6833_v6 = vpop.f32.mrf.mxu0 }
 0x39f   : > { %v6835_v62 = vpop.f32.mrf.mxu0 }
 0x3a1   : > { %v6837_v27 = vpop.f32.mrf.mxu0 }
 0x3a3   : > { %v6839_v43 = vpop.f32.mrf.mxu0 }
 0x3a5   : > { %v6841_v5 = vpop.f32.mrf.mxu0 }
 0x3a7   : > { %v6843_v24 = vpop.f32.mrf.mxu0 }
 0x3a9   : > { %v6845_v36 = vpop.f32.mrf.mxu0 }
 0x3ab   : > { %v6847_v8 = vpop.f32.mrf.mxu0 }
 0x3ad   : > { %v6849_v23 = vpop.f32.mrf.mxu0 }
 0x3ae   : > { %7154 = vst [vmem:[#allocation60_spill] sm:$0xff] %v6849_v23 }
 0x3af   : > { %v6851_v45 = vpop.f32.mrf.mxu0 }
 0x3b0   : > { %7155 = vst [vmem:[#allocation5_spill] sm:$0xff] %v6851_v45 }
 0x3b1   : > { %v6853_v42 = vpop.f32.mrf.mxu0 }
 0x3b2   : > { %7156 = vst [vmem:[#allocation3_spill] sm:$0xff] %v6853_v42 }
 0x3b3   : > { %v6855_v3 = vpop.f32.mrf.mxu0 }
 0x3b4   : > { %7157 = vst [vmem:[#allocation66_spill] sm:$0xff] %v6855_v3 }
 0x3b5   : > { %v6857_v31 = vpop.f32.mrf.mxu0 }
 0x3b6   : > { %7158 = vst [vmem:[#allocation61_spill] sm:$0xff] %v6857_v31  ;;  %v3632_v31 = vadd.f32 %v5139_v55, %v6699_v29  ;;  %v3633_v29 = vadd.f32 %v3518_v60, %v6711_v39  ;;  %v3636_v55 = vadd.f32 %v5143_v17, %v6715_v19 }
 0x3b7   : > { %v6859_v59 = vpop.f32.mrf.mxu0 }
 0x3b8   : > { %7159 = vst [vmem:[#allocation9_spill] sm:$0xff] %v6859_v59 }
 0x3b9   : > { %v5208_v38 = vpop.f32.mrf.mxu0 }
 0x3ba   : > { %v4111_v7 = vadd.f32 %v5208_v38, %v3631_v18 }
 0x3bb   : > { %v3982_v42 = vpop.f32.mrf.mxu0 }
 0x3bc   : > { %v4143_v3 = vmax.f32 %v4111_v7, 0.0  ;;  %v4109_v59 = vadd.f32 %v3982_v42, %v3629_v41 }
 0x3bd   : > { %v5209_v45 = vpop.f32.mrf.mxu0 }
 0x3be   : > { %4175 = vst.msk [vmem:[%s6867_s13 + $0x10] sm:$0xff] %vm819_vm4, %v4143_v3  ;;  %v4141_v63 = vmax.f32 %v4109_v59, 0.0  ;;  %v4112_v38 = vadd.f32 %v5209_v45, %v3632_v31  ;;  %v3634_v45 = vadd.f32 %v3521_v26, %v6719_v16  ;;  %v3637_v3 = vadd.f32 %v6815_v11, %v6727_v46 }
 0x3bf   : > { %v3985_v18 = vpop.f32.mrf.mxu0  ;;  %v3640_v59 = vadd.f32 %v6817_v51, %v6731_v15 }
 0x3c0   : > { %4173 = vst.msk [vmem:[%s6867_s13] sm:$0xff] %vm819_vm4, %v4141_v63  ;;  %v4144_v37 = vmax.f32 %v4112_v38, 0.0  ;;  %v4110_v32 = vadd.f32 %v3985_v18, %v3630_v61  ;;  %v3638_v63 = vadd.f32 %v6819_v47, %v6735_v20  ;;  %v3643_v18 = vadd.f32 %v6821_v22, %v6739_v28 }
 0x3c1   : > { %v5212_v23 = vpop.f32.mrf.mxu0 }
 0x3c2   : > { %4176 = vst.msk [vmem:[%s6867_s13 + $0x18] sm:$0xff] %vm819_vm4, %v4144_v37  ;;  %v4142_v2 = vmax.f32 %v4110_v32, 0.0  ;;  %v4115_v7 = vadd.f32 %v5212_v23, %v3635_v14  ;;  %v3639_v32 = vadd.f32 %v5146_v58, %v6723_v4  ;;  %v3641_v37 = vadd.f32 %v6823_v10, %v6743_v30 }
 0x3c3   : > { %v3998_v41 = vpop.f32.mrf.mxu0 }
 0x3c4   : > { %4174 = vst.msk [vmem:[%s6867_s13 + $0x8] sm:$0xff] %vm819_vm4, %v4142_v2  ;;  %v4147_v1 = vmax.f32 %v4115_v7, 0.0  ;;  %v4113_v48 = vadd.f32 %v3998_v41, %v3633_v29  ;;  %v3644_v2 = vadd.f32 %v6825_v56, %v6747_v21  ;;  %v3642_v41 = vadd.f32 %v6827_v34, %v6751_v0 }
 0x3c5   : > { %v5213_v57 = vpop.f32.mrf.mxu0 }
 0x3c6   : > { %4179 = vst.msk [vmem:[%s6867_s13 + $0x30] sm:$0xff] %vm819_vm4, %v4147_v1  ;;  %v4145_v39 = vmax.f32 %v4113_v48, 0.0  ;;  %v4116_v60 = vadd.f32 %v5213_v57, %v3636_v55  ;;  %v3647_v1 = vadd.f32 %v6829_v25, %v6755_v44  ;;  %v3645_v57 = vadd.f32 %v6831_v50, %v6759_v54 }
 0x3c7   : > { %v4001_v42 = vpop.f32.mrf.mxu0 }
 0x3c8   : > { %4177 = vst.msk [vmem:[%s6867_s13 + $0x20] sm:$0xff] %vm819_vm4, %v4145_v39  ;;  %v4148_v19 = vmax.f32 %v4116_v60, 0.0  ;;  %v4114_v17 = vadd.f32 %v4001_v42, %v3634_v45  ;;  %v3648_v39 = vadd.f32 %v6833_v6, %v6763_v40  ;;  %v3646_v42 = vadd.f32 %v6835_v62, %v6767_v9 }
 0x3c9   : > { %v5216_v23 = vpop.f32.mrf.mxu0 }
 0x3ca   : > { %4180 = vst.msk [vmem:[%s6867_s13 + $0x38] sm:$0xff] %vm819_vm4, %v4148_v19  ;;  %v4146_v16 = vmax.f32 %v4114_v17, 0.0  ;;  %v4119_v26 = vadd.f32 %v5216_v23, %v3639_v32  ;;  %v3651_v19 = vadd.f32 %v6837_v27, %v6771_v49  ;;  %v3649_v23 = vadd.f32 %v6839_v43, %v6775_v12 }
 0x3cb   : > { %v4014_v31 = vpop.f32.mrf.mxu0 }
 0x3cc   : > { %4178 = vst.msk [vmem:[%s6867_s13 + $0x28] sm:$0xff] %vm819_vm4, %v4146_v16  ;;  %v4151_v4 = vmax.f32 %v4119_v26, 0.0  ;;  %v4117_v58 = vadd.f32 %v4014_v31, %v3637_v3  ;;  %v3652_v16 = vadd.f32 %v6841_v5, %v6779_v52  ;;  %v3650_v31 = vadd.f32 %v6843_v24, %v6783_v13 }
 0x3cd   : > { %v5217_v61 = vpop.f32.mrf.mxu0 }
 0x3ce   : > { %4183 = vst.msk [vmem:[%s6867_s13 + $0x50] sm:$0xff] %vm819_vm4, %v4151_v4  ;;  %v4149_v46 = vmax.f32 %v4117_v58, 0.0  ;;  %v4120_v11 = vadd.f32 %v5217_v61, %v3640_v59  ;;  %v3655_v4 = vadd.f32 %v6845_v36, %v6787_v35  ;;  %v3653_v61 = vadd.f32 %v6847_v8, %v6791_v53 }
 0x3cf   : > { %v4017_v38 = vpop.f32.mrf.mxu0 }
 0x3d0   : > { %4181 = vst.msk [vmem:[%s6867_s13 + $0x40] sm:$0xff] %vm819_vm4, %v4149_v46  ;;  %v4152_v15 = vmax.f32 %v4120_v11, 0.0  ;;  %v4118_v51 = vadd.f32 %v4017_v38, %v3638_v63  ;;  %v7160_v46 = vld [vmem:[#allocation60_spill] sm:$0xff] }
 0x3d1   : > { %v5220_v14 = vpop.f32.mrf.mxu0  ;;  %v3656_v11 = vadd.f32 %v7160_v46, %v6795_v33 }
 0x3d2   : > { %4184 = vst.msk [vmem:[%s6867_s13 + $0x58] sm:$0xff] %vm819_vm4, %v4152_v15  ;;  %v4150_v20 = vmax.f32 %v4118_v51, 0.0  ;;  %v4123_v47 = vadd.f32 %v5220_v14, %v3643_v18  ;;  %v7161_v18 = vld [vmem:[#allocation59_spill] sm:$0xff]  ;;  %v7162_v15 = vld [vmem:[#allocation5_spill] sm:$0xff] }
 0x3d3   : > { %v4030_v29 = vpop.f32.mrf.mxu0  ;;  %v3654_v51 = vadd.f32 %v7162_v15, %v7161_v18 }
 0x3d4   : > { %4182 = vst.msk [vmem:[%s6867_s13 + $0x48] sm:$0xff] %vm819_vm4, %v4150_v20  ;;  %v4155_v28 = vmax.f32 %v4123_v47, 0.0  ;;  %v4121_v22 = vadd.f32 %v4030_v29, %v3641_v37  ;;  %v7163_v37 = vld [vmem:[#allocation4_spill] sm:$0xff]  ;;  %v7164_v20 = vld [vmem:[#allocation3_spill] sm:$0xff] }
 0x3d5   : > { %v5221_v7 = vpop.f32.mrf.mxu0  ;;  %v3659_v47 = vadd.f32 %v7164_v20, %v7163_v37 }
 0x3d6   : > { %4187 = vst.msk [vmem:[%s6867_s13 + $0x70] sm:$0xff] %vm819_vm4, %v4155_v28  ;;  %v4153_v30 = vmax.f32 %v4121_v22, 0.0  ;;  %v4124_v10 = vadd.f32 %v5221_v7, %v3644_v2  ;;  %v7165_v28 = vld [vmem:[#allocation2_spill] sm:$0xff] }
 0x3d7   : > { %v4033_v55 = vpop.f32.mrf.mxu0  ;;  %v7166_v22 = vld [vmem:[#allocation66_spill] sm:$0xff] }
 0x3d8   : > { %4185 = vst.msk [vmem:[%s6867_s13 + $0x60] sm:$0xff] %vm819_vm4, %v4153_v30  ;;  %v4156_v21 = vmax.f32 %v4124_v10, 0.0  ;;  %v4122_v56 = vadd.f32 %v4033_v55, %v3642_v41  ;;  %v3657_v7 = vadd.f32 %v7166_v22, %v7165_v28  ;;  %v7167_v55 = vld [vmem:[#allocation64_spill] sm:$0xff] }
 0x3d9   : > { %v5224_v48 = vpop.f32.mrf.mxu0 }
 0x3da   : > { %4188 = vst.msk [vmem:[%s6867_s13 + $0x78] sm:$0xff] %vm819_vm4, %v4156_v21  ;;  %v4154_v0 = vmax.f32 %v4122_v56, 0.0  ;;  %v4127_v34 = vadd.f32 %v5224_v48, %v3647_v1  ;;  %v7168_v1 = vld [vmem:[#allocation61_spill] sm:$0xff] }
 0x3db   : > { %v4046_v45 = vpop.f32.mrf.mxu0  ;;  %v3660_v21 = vadd.f32 %v7168_v1, %v7167_v55 }
 0x3dc   : > { %4186 = vst.msk [vmem:[%s6867_s13 + $0x68] sm:$0xff] %vm819_vm4, %v4154_v0  ;;  %v4159_v44 = vmax.f32 %v4127_v34, 0.0  ;;  %v4125_v25 = vadd.f32 %v4046_v45, %v3645_v57  ;;  %v7169_v0 = vld [vmem:[#allocation8_spill] sm:$0xff]  ;;  %v7170_v34 = vld [vmem:[#allocation9_spill] sm:$0xff] }
 0x3dd   : > { %v5225_v60 = vpop.f32.mrf.mxu0  ;;  %v3658_v45 = vadd.f32 %v7170_v34, %v7169_v0 }
 0x3de   : > { %4191 = vst.msk [vmem:[%s6867_s13 + $0x90] sm:$0xff] %vm819_vm4, %v4159_v44  ;;  %v4157_v54 = vmax.f32 %v4125_v25, 0.0  ;;  %v4128_v50 = vadd.f32 %v5225_v60, %v3648_v39 }
 0x3df   : > { %v4049_v32 = vpop.f32.mrf.mxu0 }
 0x3e0   : > { %4189 = vst.msk [vmem:[%s6867_s13 + $0x80] sm:$0xff] %vm819_vm4, %v4157_v54  ;;  %v4160_v40 = vmax.f32 %v4128_v50, 0.0  ;;  %v4126_v6 = vadd.f32 %v4049_v32, %v3646_v42 }
 0x3e1   : > { %v5228_v17 = vpop.f32.mrf.mxu0 }
 0x3e2   : > { %4192 = vst.msk [vmem:[%s6867_s13 + $0x98] sm:$0xff] %vm819_vm4, %v4160_v40  ;;  %v4158_v9 = vmax.f32 %v4126_v6, 0.0  ;;  %v4131_v62 = vadd.f32 %v5228_v17, %v3651_v19 }
 0x3e3   : > { %v4062_v3 = vpop.f32.mrf.mxu0 }
 0x3e4   : > { %4190 = vst.msk [vmem:[%s6867_s13 + $0x88] sm:$0xff] %vm819_vm4, %v4158_v9  ;;  %v4163_v49 = vmax.f32 %v4131_v62, 0.0  ;;  %v4129_v27 = vadd.f32 %v4062_v3, %v3649_v23 }
 0x3e5   : > { %v5229_v26 = vpop.f32.mrf.mxu0 }
 0x3e6   : > { %4195 = vst.msk [vmem:[%s6867_s13 + $0xb0] sm:$0xff] %vm819_vm4, %v4163_v49  ;;  %v4161_v12 = vmax.f32 %v4129_v27, 0.0  ;;  %v4132_v43 = vadd.f32 %v5229_v26, %v3652_v16 }
 0x3e7   : > { %v4065_v59 = vpop.f32.mrf.mxu0 }
 0x3e8   : > { %4193 = vst.msk [vmem:[%s6867_s13 + $0xa0] sm:$0xff] %vm819_vm4, %v4161_v12  ;;  %v4164_v52 = vmax.f32 %v4132_v43, 0.0  ;;  %v4130_v5 = vadd.f32 %v4065_v59, %v3650_v31 }
 0x3e9   : > { %v5232_v58 = vpop.f32.mrf.mxu0 }
 0x3ea   : > { %4196 = vst.msk [vmem:[%s6867_s13 + $0xb8] sm:$0xff] %vm819_vm4, %v4164_v52  ;;  %v4162_v13 = vmax.f32 %v4130_v5, 0.0  ;;  %v4135_v24 = vadd.f32 %v5232_v58, %v3655_v4 }
 0x3eb   : > { %v4078_v63 = vpop.f32.mrf.mxu0 }
 0x3ec   : > { %4194 = vst.msk [vmem:[%s6867_s13 + $0xa8] sm:$0xff] %vm819_vm4, %v4162_v13  ;;  %v4167_v35 = vmax.f32 %v4135_v24, 0.0  ;;  %v4133_v36 = vadd.f32 %v4078_v63, %v3653_v61 }
 0x3ed   : > { %v5233_v38 = vpop.f32.mrf.mxu0 }
 0x3ee   : > { %4199 = vst.msk [vmem:[%s6867_s13 + $0xd0] sm:$0xff] %vm819_vm4, %v4167_v35  ;;  %v4165_v53 = vmax.f32 %v4133_v36, 0.0  ;;  %v4136_v8 = vadd.f32 %v5233_v38, %v3656_v11 }
 0x3ef   : > { %v4081_v14 = vpop.f32.mrf.mxu0 }
 0x3f0   : > { %4197 = vst.msk [vmem:[%s6867_s13 + $0xc0] sm:$0xff] %vm819_vm4, %v4165_v53  ;;  %v4168_v33 = vmax.f32 %v4136_v8, 0.0  ;;  %v4134_v29 = vadd.f32 %v4081_v14, %v3654_v51 }
 0x3f1   : > { %v5236_v2 = vpop.f32.mrf.mxu0 }
 0x3f2   : > { %4200 = vst.msk [vmem:[%s6867_s13 + $0xd8] sm:$0xff] %vm819_vm4, %v4168_v33  ;;  %v4166_v41 = vmax.f32 %v4134_v29, 0.0  ;;  %v4139_v30 = vadd.f32 %v5236_v2, %v3659_v47 }
 0x3f3   : > { %v4094_v10 = vpop.f32.mrf.mxu0 }
 0x3f4   : > { %4198 = vst.msk [vmem:[%s6867_s13 + $0xc8] sm:$0xff] %vm819_vm4, %v4166_v41  ;;  %v4171_v56 = vmax.f32 %v4139_v30, 0.0  ;;  %v4137_v48 = vadd.f32 %v4094_v10, %v3657_v7 }
 0x3f5   : > { %v5237_v57 = vpop.f32.mrf.mxu0 }
 0x3f6   : > { %4203 = vst.msk [vmem:[%s6867_s13 + $0xf0] sm:$0xff] %vm819_vm4, %v4171_v56  ;;  %v4169_v39 = vmax.f32 %v4137_v48, 0.0  ;;  %v4140_v44 = vadd.f32 %v5237_v57, %v3660_v21 }
 0x3f7   : > { %v4097_v25 = vpop.f32.mrf.mxu0 }
 0x3f8   : > { %4201 = vst.msk [vmem:[%s6867_s13 + $0xe0] sm:$0xff] %vm819_vm4, %v4169_v39  ;;  %v4172_v60 = vmax.f32 %v4140_v44, 0.0  ;;  %v4138_v42 = vadd.f32 %v4097_v25, %v3658_v45 }
 0x3fa   : > { %4204 = vst.msk [vmem:[%s6867_s13 + $0xf8] sm:$0xff] %vm819_vm4, %v4172_v60  ;;  %v4170_v54 = vmax.f32 %v4138_v42, 0.0 }
 0x3fc   : > { %4202 = vst.msk [vmem:[%s6867_s13 + $0xe8] sm:$0xff] %vm819_vm4, %v4170_v54 }
 0x3fd PF: > { %s16_s21 = sadd.s32 1, %s5324_s21  }
 0x3fe   : > { %p13_p4 = scmp.ge.s32.totalorder %s16_s21, 4  }
 0x400   :  { %15 = sbr.rel (!%p13_p4) target bundleno = 1 (0x1), region = 94 }

// kernel: tpu_custom_call.1
= control target key start
LH: loop header
LB: loop body
LE: loop exit
PB: predicated region body
PF: predicated region fallthrough
CT: control target
= control target key end

     0   :  { %s5361_s21 = smov 0   ;;  %s6989_s0 = inlined_call_operand.vmem [shape: bf16[2,16,40,4], index: 0, kind: input, shape index: {}]   ;;  %s6990_s1 = inlined_call_operand.vmem [shape: bf16[4,32], index: 1, kind: input, shape index: {}]   ;;  %s6991_s2 = inlined_call_operand.vmem [shape: bf16[3,9,4,32], index: 2, kind: input, shape index: {}]   ;;  %s6992_s3 = inlined_call_operand.vmem [shape: f32[4,1,32], index: 3, kind: input, shape index: {}]   ;;  %s6993_s4 = inlined_call_operand.vmem [shape: f32[2,1,32], index: 4, kind: input, shape index: {}]   ;;  %s6994_s5 = inlined_call_operand.vmem [shape: bf16[4,32,32], index: 5, kind: input, shape index: {}]   ;;  %s6995_s6 = inlined_call_operand.vmem [shape: f32[2,256,32], index: 6, kind: output, shape index: {}]  }
   0x1 LB: > { %s4269_s22 = sadd.s32 4294967295, %s5324_s21   ;;  %p4273_p0 = scmp.ge.s32.totalorder %s5324_s21, 1  ;;  %s5324_s21 = sphi %s5361_s21, %s16_s21  }
   0x2   : > { %p220_p1 = scmp.lt.s32.totalorder %s5324_s21, 3 }
   0x4   : > { %p221_p2 = pnand %p4273_p0, %p220_p1 }
   0x6   : > { %224 = sbr.rel (%p221_p2) target bundleno = 1021 (0x3fd), region = 44 }
   0xb   : > { %vm363_vm0 = vcmask 1041408   ;;  %v485_v0 = vld [vmem:[%s6990_s1] sm:$0x3]  ;;  %p253_p3 = scmp.lt.s32.totalorder %s4269_s22, 1  ;;  %vm364_vm1 = vcmask 1045508   ;;  %v5380_v2 = vld [vmem:[%s6994_s5 + $0x8] sm:$0xff]  }
   0xc   : > { %5240 = vmatprep.subr.msk.bf16.mxu0 %vm363_vm0, %v485_v0  ;;  %v592_v1 = vsel %vm363_vm0, %v485_v0, 0  ;;  %5241 = vmatprep.subr.msk.bf16.mxu1 %vm363_vm0, %v485_v0  ;;  %vm5383_vm2 = vmor %vm363_vm0, %vm364_vm1  ;;  %vm541_vm3 = vcmask 31744   ;;  %vm819_vm4 = vcmask 261120  }
   0xd   : > { %4831 = vmatpush3.bf16.msra.mxu0 %v592_v1  ;;  %s7172_s22 = smov (!%p253_p3, %s4269_s22), 1  ;;  %5239 = vmatpush3.bf16.msra.mxu1 %v592_v1 }
   0xe   : > { %s5253_s27 = smul.u32 320, %s7172_s22  ;;  %4864 = vmatprep.subr.bf16.mxu1 %v5380_v2  ;;  %s260_s10 = scalar_lea.vmem %s6993_s4, %s7172_s22 }
   0xf   : > { %s4625_s11 = sshll.u32 %s7172_s22, 8 }
  0x10   : > { %s5392_s30 = scalar_lea.vmem %s6989_s0, %s5253_s27  ;;  %s6867_s13 = scalar_lea.vmem %s6995_s6, %s4625_s11 }
  0x11   : > { %v267_v4 = vld [vmem:[%s5392_s30 + $0x4] sm:$0xc]  ;;  %v268_v5 = vld [vmem:[%s5392_s30 + $0x8] sm:$0xf]  ;;  %v269_v6 = vld [vmem:[%s5392_s30 + $0xc] sm:$0x3] }
  0x12   : > { %v4277_v7 = vrot.slane %v267_v4, 10  ;;  %v368_v8 = vrot.slane %v268_v5, 6  ;;  %v371_v9 = vrot.slane %v269_v6, 6  ;;  %v270_v10 = vld [vmem:[%s5392_s30 + $0x18] sm:$0xc] }
  0x13   : > { %v271_v11 = vld [vmem:[%s5392_s30 + $0x1c] sm:$0xf]  ;;  %v272_v12 = vld [vmem:[%s5392_s30 + $0x20] sm:$0x3]  ;;  %v4278_v13 = vrot.slane %v270_v10, 10 }
  0x14   : > { %v369_v14 = vsel %vm5383_vm2, %v4277_v7, %v368_v8  ;;  %v370_v15 = vrot.slane %v368_v8, 4  ;;  %v375_v16 = vrot.slane %v271_v11, 6  ;;  %v378_v17 = vrot.slane %v272_v12, 6  ;;  %v273_v18 = vld [vmem:[%s5392_s30 + $0x2c] sm:$0xc] }
  0x15   : > { %v274_v19 = vld [vmem:[%s5392_s30 + $0x30] sm:$0xf]  ;;  %v275_v20 = vld [vmem:[%s5392_s30 + $0x34] sm:$0x3]  ;;  %v4279_v21 = vrot.slane %v273_v18, 10 }
  0x16   : > { %v372_v22 = vsel %vm5383_vm2, %v370_v15, %v371_v9  ;;  %v376_v23 = vsel %vm5383_vm2, %v4278_v13, %v375_v16  ;;  %v377_v24 = vrot.slane %v375_v16, 4  ;;  %v382_v25 = vrot.slane %v274_v19, 6  ;;  %v276_v26 = vld [vmem:[%s5392_s30 + $0x40] sm:$0xc]  ;;  %v277_v27 = vld [vmem:[%s5392_s30 + $0x44] sm:$0xf] }
  0x17   : > { %v5411_v28 = vcombine.low %v369_v14, %v372_v22  ;;  %v385_v29 = vrot.slane %v275_v20, 6  ;;  %v278_v30 = vld [vmem:[%s5392_s30 + $0x48] sm:$0x3]  ;;  %v4280_v31 = vrot.slane %v276_v26, 10  ;;  %v389_v32 = vrot.slane %v277_v27, 6 }
  0x18   : > { %v379_v33 = vsel %vm5383_vm2, %v377_v24, %v378_v17  ;;  %v383_v34 = vsel %vm5383_vm2, %v4279_v21, %v382_v25  ;;  %v384_v35 = vrot.slane %v382_v25, 4  ;;  %v392_v36 = vrot.slane %v278_v30, 6  ;;  %v279_v37 = vld [vmem:[%s5392_s30 + $0x54] sm:$0xc]  ;;  %v280_v38 = vld [vmem:[%s5392_s30 + $0x58] sm:$0xf] }
  0x19   : > { %4832 = vmatprep.mubr.msk.bf16.mxu0 %vm541_vm3, %v5411_v28  ;;  %v5422_v39 = vcombine.low %v376_v23, %v379_v33  ;;  %v391_v40 = vrot.slane %v389_v32, 4  ;;  %v281_v41 = vld [vmem:[%s5392_s30 + $0x5c] sm:$0x3]  ;;  %v4281_v42 = vrot.slane %v279_v37, 10  ;;  %v282_v43 = vld [vmem:[%s5392_s30 + $0x68] sm:$0xc]  ;;  %v390_v54 = vsel %vm5383_vm2, %v4280_v31, %v389_v32 }
  0x1a   : > { %v386_v44 = vsel %vm5383_vm2, %v384_v35, %v385_v29  ;;  %v396_v45 = vrot.slane %v280_v38, 6  ;;  %v399_v46 = vrot.slane %v281_v41, 6  ;;  %v283_v47 = vld [vmem:[%s5392_s30 + $0x6c] sm:$0xf]  ;;  %v284_v48 = vld [vmem:[%s5392_s30 + $0x70] sm:$0x3] }
  0x1b   : > { %4833 = vmatmul.mubr.msk.bf16.vlgmr.msra.gmra.mxu0 %vm541_vm3, %v5422_v39  ;;  %v5432_v49 = vcombine.low %v383_v34, %v386_v44  ;;  %v4282_v50 = vrot.slane %v282_v43, 10  ;;  %v403_v51 = vrot.slane %v283_v47, 6  ;;  %v285_v52 = vld [vmem:[%s5392_s30 + $0x7c] sm:$0xc]  ;;  %v286_v53 = vld [vmem:[%s5392_s30 + $0x80] sm:$0xf]  ;;  %v393_v55 = vsel %vm5383_vm2, %v391_v40, %v392_v36 }
  0x1c   : > { %v398_v56 = vrot.slane %v396_v45, 4  ;;  %v406_v57 = vrot.slane %v284_v48, 6  ;;  %v287_v58 = vld [vmem:[%s5392_s30 + $0x84] sm:$0x3]  ;;  %v5442_v59 = vld [vmem:[%s5392_s30 + $0x90] sm:$0xc]  ;;  %v397_v60 = vsel %vm5383_vm2, %v4281_v42, %v396_v45  ;;  %v5457_v6 = vcombine.low %v390_v54, %v393_v55 }
  0x1d   : > { %4836 = vmatprep.mubr.msk.bf16.mxu0 %vm541_vm3, %v5432_v49  ;;  %v405_v61 = vrot.slane %v403_v51, 4  ;;  %v410_v62 = vrot.slane %v286_v53, 6  ;;  %v5449_v63 = vld [vmem:[%s5392_s30 + $0x94] sm:$0xf]  ;;  %v4283_v1 = vrot.slane %v285_v52, 10  ;;  %v404_v7 = vsel %vm5383_vm2, %v4282_v50, %v403_v51 }
  0x1e   : > { %v400_v0 = vsel %vm5383_vm2, %v398_v56, %v399_v46  ;;  %v5454_v4 = vld [vmem:[%s5392_s30 + $0x98] sm:$0x3]  ;;  %v417_v5 = vrot.slane %v5449_v63, 6  ;;  %v413_v8 = vrot.slane %v287_v58, 6  ;;  %v4284_v9 = vrot.slane %v5442_v59, 10  ;;  %v5263_v59 = vld [vmem:[%s6994_s5] sm:$0xff]  }
  0x1f   : > { %v291_v10 = vld [vmem:[%s5392_s30 + $0xa4] sm:$0xc]  ;;  %v292_v11 = vld [vmem:[%s5392_s30 + $0xa8] sm:$0xf]  ;;  %v5464_v12 = vcombine.low %v397_v60, %v400_v0  ;;  %v407_v13 = vsel %vm5383_vm2, %v405_v61, %v406_v57  ;;  %v412_v14 = vrot.slane %v410_v62, 4  ;;  %v420_v18 = vrot.slane %v5454_v4, 6 }
  0x20   : > { %v5468_v15 = vrot.slane %v417_v5, 4  ;;  %v293_v16 = vld [vmem:[%s5392_s30 + $0xac] sm:$0x3]  ;;  %v294_v17 = vld [vmem:[%s5392_s30 + $0xb8] sm:$0xc]  ;;  %v4285_v19 = vrot.slane %v291_v10, 10  ;;  %v411_v23 = vsel %vm5383_vm2, %v4283_v1, %v410_v62  ;;  %v5480_v29 = vcombine.low %v404_v7, %v407_v13 }
  0x21   : > { %v424_v20 = vrot.slane %v292_v11, 6  ;;  %v427_v21 = vrot.slane %v293_v16, 6  ;;  %v295_v22 = vld [vmem:[%s5392_s30 + $0xbc] sm:$0xf]  ;;  %v296_v24 = vld [vmem:[%s5392_s30 + $0xc0] sm:$0x3]  ;;  %v414_v41 = vsel %vm5383_vm2, %v412_v14, %v413_v8  ;;  %v418_v4 = vsel %vm5383_vm2, %v4284_v9, %v417_v5 }
  0x22   : > { %v4286_v25 = vrot.slane %v294_v17, 10  ;;  %v431_v26 = vrot.slane %v295_v22, 6  ;;  %v297_v27 = vld [vmem:[%s5392_s30 + $0xcc] sm:$0xc]  ;;  %v434_v32 = vrot.slane %v296_v24, 6  ;;  %v5511_v60 = vcombine.low %v411_v23, %v414_v41 }
  0x23   : > { %4837 = vmatmul.mubr.msk.bf16.gmra.mxu0 %vm541_vm3, %v5457_v6  ;;  %v425_v30 = vsel %vm5383_vm2, %v4285_v19, %v424_v20  ;;  %v426_v31 = vrot.slane %v424_v20, 4  ;;  %v298_v33 = vld [vmem:[%s5392_s30 + $0xd0] sm:$0xf]  ;;  %v299_v34 = vld [vmem:[%s5392_s30 + $0xd4] sm:$0x3]  ;;  %v4287_v37 = vrot.slane %v297_v27, 10  ;;  %v421_v9 = vsel %vm5383_vm2, %v5468_v15, %v420_v18 }
  0x24   : > { %4840 = vmatprep.mubr.msk.bf16.mxu0 %vm541_vm3, %v5464_v12  ;;  %v432_v35 = vsel %vm5383_vm2, %v4286_v25, %v431_v26  ;;  %v433_v36 = vrot.slane %v431_v26, 4  ;;  %v438_v38 = vrot.slane %v298_v33, 6  ;;  %v300_v40 = vld [vmem:[%s5392_s30 + $0xe0] sm:$0xc]  ;;  %v441_v43 = vrot.slane %v299_v34, 6 }
  0x25   : > { %v428_v42 = vsel %vm5383_vm2, %v426_v31, %v427_v21  ;;  %v301_v44 = vld [vmem:[%s5392_s30 + $0xe4] sm:$0xf]  ;;  %v302_v45 = vld [vmem:[%s5392_s30 + $0xe8] sm:$0x3]  ;;  %v4288_v46 = vrot.slane %v300_v40, 10 }
  0x26   : > { %v5497_v47 = vcombine.low %v425_v30, %v428_v42  ;;  %v435_v48 = vsel %vm5383_vm2, %v433_v36, %v434_v32  ;;  %v439_v50 = vsel %vm5383_vm2, %v4287_v37, %v438_v38  ;;  %v440_v51 = vrot.slane %v438_v38, 4  ;;  %v303_v52 = vld [vmem:[%s5392_s30 + $0xf4] sm:$0xc]  ;;  %v304_v53 = vld [vmem:[%s5392_s30 + $0xf8] sm:$0xf] }
  0x27   : > { %v5505_v54 = vcombine.low %v432_v35, %v435_v48  ;;  %v445_v55 = vrot.slane %v301_v44, 6  ;;  %v448_v56 = vrot.slane %v302_v45, 6  ;;  %v305_v57 = vld [vmem:[%s5392_s30 + $0xfc] sm:$0x3]  ;;  %v4289_v58 = vrot.slane %v303_v52, 10  ;;  %v5264_v52 = vld [vmem:[%s5392_s30] sm:$0xff]  }
  0x28   : > { %4848 = vmatprep.mubr.msk.bf16.mxu1 %vm541_vm3, %v5497_v47  ;;  %v442_v61 = vsel %vm5383_vm2, %v440_v51, %v441_v43  ;;  %v452_v62 = vrot.slane %v304_v53, 6  ;;  %v455_v63 = vrot.slane %v305_v57, 6  ;;  %v306_v0 = vld [vmem:[%s5392_s30 + $0x108] sm:$0xc]  ;;  %v307_v1 = vld [vmem:[%s5392_s30 + $0x10c] sm:$0xf]  ;;  %v5554_v35 = vcombine.low %v418_v4, %v421_v9 }
  0x29   : > { %4849 = vmatmul.mubr.msk.bf16.vlgmr.msra.gmra.mxu1 %vm541_vm3, %v5505_v54  ;;  %v5523_v7 = vcombine.low %v439_v50, %v442_v61  ;;  %v447_v8 = vrot.slane %v445_v55, 4  ;;  %v308_v10 = vld [vmem:[%s5392_s30 + $0x110] sm:$0x3]  ;;  %v309_v11 = vld [vmem:[%s5392_s30 + $0x11c] sm:$0xc]  ;;  %v446_v13 = vsel %vm5383_vm2, %v4288_v46, %v445_v55  ;;  %v459_v17 = vrot.slane %v307_v1, 6 }
  0x2a   : > { %v453_v14 = vsel %vm5383_vm2, %v4289_v58, %v452_v62  ;;  %v454_v16 = vrot.slane %v452_v62, 4  ;;  %v310_v5 = vld [vmem:[%s5392_s30 + $0x120] sm:$0xf]  ;;  %4865 = vmatpush3.bf16.msra.mxu1 %v5380_v2  ;;  %v4290_v20 = vrot.slane %v306_v0, 10  ;;  %v311_v21 = vld [vmem:[%s5392_s30 + $0x124] sm:$0x3] }
  0x2b   : > { %4841 = vmatmul.mubr.msk.bf16.gmra.mxu0 %vm541_vm3, %v5480_v29  ;;  %4852 = vmatprep.mubr.msk.bf16.mxu1 %vm541_vm3, %v5523_v7  ;;  %v449_v19 = vsel %vm5383_vm2, %v447_v8, %v448_v56  ;;  %v466_v22 = vrot.slane %v310_v5, 6  ;;  %v312_v23 = vld [vmem:[%s5392_s30 + $0x130] sm:$0xc]  ;;  %v461_v24 = vrot.slane %v459_v17, 4  ;;  %v462_v25 = vrot.slane %v308_v10, 6  ;;  %v5265_v53 = vld [vmem:[%s5392_s30 + $0x14] sm:$0xff]  }
  0x2c   : > { %4844 = vmatprep.mubr.msk.bf16.mxu0 %vm541_vm3, %v5511_v60  ;;  %v456_v2 = vsel %vm5383_vm2, %v454_v16, %v455_v63  ;;  %v4291_v15 = vrot.slane %v309_v11, 10  ;;  %v313_v18 = vld [vmem:[%s5392_s30 + $0x134] sm:$0xf]  ;;  %4866 = vmatprep.subr.bf16.mxu1 %v5263_v59  ;;  %v5549_v26 = vcombine.low %v446_v13, %v449_v19  ;;  %v314_v30 = vld [vmem:[%s5392_s30 + $0x138] sm:$0x3]  ;;  %v469_v32 = vrot.slane %v311_v21, 6 }
  0x2d   : > { %v5551_v27 = vcombine.low %v453_v14, %v456_v2  ;;  %v468_v31 = vrot.slane %v466_v22, 4  ;;  %v4292_v33 = vrot.slane %v312_v23, 10  ;;  %v473_v34 = vrot.slane %v313_v18, 6  ;;  %v1071_v50 = vld [vmem:[%s6991_s2] sm:$0x3]  ;;  %v5266_v56 = vld [vmem:[%s5392_s30 + $0x28] sm:$0xff]  }
  0x2e   : > { %4867 = vmatpush3.bf16.msra.mxu1 %v5263_v59  ;;  %v476_v37 = vrot.slane %v314_v30, 6  ;;  %v460_v38 = vsel %vm5383_vm2, %v4290_v20, %v459_v17  ;;  %v463_v40 = vsel %vm5383_vm2, %v461_v24, %v462_v25  ;;  %v467_v41 = vsel %vm5383_vm2, %v4291_v15, %v466_v22  ;;  %5242 = vmatprep.subr.msk.bf16.mxu0 %vm363_vm0, %v1071_v50  ;;  %v5596_v55 = vld [vmem:[%s6991_s2 + $0x8] sm:$0x3]  ;;  %v5267_v57 = vld [vmem:[%s5392_s30 + $0x3c] sm:$0xff]   ;;  %v1336_v62 = vld [vmem:[%s5392_s30 + $0x4] sm:$0xc] }
  0x2f   : > { %v475_v36 = vrot.slane %v473_v34, 4  ;;  %v470_v42 = vsel %vm5383_vm2, %v468_v31, %v469_v32  ;;  %v5570_v43 = vcombine.low %v460_v38, %v463_v40  ;;  %v474_v45 = vsel %vm5383_vm2, %v4292_v33, %v473_v34  ;;  %5243 = vmatprep.subr.msk.bf16.mxu1 %vm363_vm0, %v5596_v55  ;;  %v1337_v58 = vld [vmem:[%s5392_s30 + $0x8] sm:$0xf]  ;;  %v1340_v61 = vld [vmem:[%s5392_s30 + $0x1c] sm:$0xf] }
  0x30   : > { %v5572_v44 = vcombine.low %v467_v41, %v470_v42  ;;  %v1105_v51 = vsel %vm363_vm0, %v1071_v50, 0  ;;  %v1362_v59 = vrot.slane %v1337_v58, 6  ;;  %v1338_v63 = vld [vmem:[%s5392_s30 + $0xc] sm:$0x3]  ;;  %v1369_v0 = vrot.slane %v1340_v61, 6  ;;  %v5270_v58 = vld [vmem:[%s5392_s30 + $0x34] sm:$0xff]  }
  0x31   : > { %4853 = vmatmul.mubr.msk.bf16.gmra.mxu1 %vm541_vm3, %v5549_v26  ;;  %v477_v46 = vsel %vm5383_vm2, %v475_v36, %v476_v37  ;;  %4901 = vmatpush3.bf16.msra.mxu0 %v1105_v51  ;;  %v4370_v1 = vrot.slane %v1336_v62, 10  ;;  %v1365_v8 = vrot.slane %v1338_v63, 6  ;;  %v1339_v10 = vld [vmem:[%s5392_s30 + $0x18] sm:$0xc]  ;;  %v4374_v11 = vld [vmem:[%s6991_s2 + $0x2] sm:$0x3] }
  0x32   : > { %4856 = vmatprep.mubr.msk.bf16.mxu1 %vm541_vm3, %v5551_v27  ;;  %v5582_v48 = vcombine.low %v474_v45, %v477_v46  ;;  %v1364_v4 = vrot.slane %v1362_v59, 4  ;;  %v1341_v13 = vld [vmem:[%s5392_s30 + $0x20] sm:$0x3]  ;;  %v4371_v14 = vrot.slane %v1339_v10, 10  ;;  %v1371_v16 = vrot.slane %v1369_v0, 4  ;;  %5244 = vmatprep.subr.msk.bf16.mxu0 %vm363_vm0, %v4374_v11  ;;  %v5277_v10 = vld [vmem:[%s5392_s30 + $0x64] sm:$0xff]  }
  0x33   : > { %4845 = vmatmul.mubr.msk.bf16.gmra.mxu0 %vm541_vm3, %v5554_v35  ;;  %v1415_v17 = vsel %vm363_vm0, %v4374_v11, 0  ;;  %v1363_v5 = vsel %vm5383_vm2, %v4370_v1, %v1362_v59  ;;  %v1372_v19 = vrot.slane %v1341_v13, 6  ;;  %v1343_v2 = vld [vmem:[%s5392_s30 + $0x30] sm:$0xf]  ;;  %v1346_v25 = vld [vmem:[%s5392_s30 + $0x44] sm:$0xf] }
  0x34   : > { %4902 = vmatprep.mubr.msk.bf16.mxu0 %vm541_vm3, %v5264_v52  ;;  %v1366_v9 = vsel %vm5383_vm2, %v1364_v4, %v1365_v8  ;;  %v1370_v21 = vsel %vm5383_vm2, %v4371_v14, %v1369_v0  ;;  %v1376_v24 = vrot.slane %v1343_v2, 6  ;;  %v1342_v15 = vld [vmem:[%s5392_s30 + $0x2c] sm:$0xc]  ;;  %v1344_v18 = vld [vmem:[%s5392_s30 + $0x34] sm:$0x3]  ;;  %v1383_v30 = vrot.slane %v1346_v25, 6 }
  0x35   : > { %v4375_v20 = vcombine.low %v1363_v5, %v1366_v9  ;;  %v1373_v22 = vsel %vm5383_vm2, %v1371_v16, %v1372_v19  ;;  %v4372_v31 = vrot.slane %v1342_v15, 10  ;;  %v1379_v33 = vrot.slane %v1344_v18, 6  ;;  %v1345_v34 = vld [vmem:[%s5392_s30 + $0x40] sm:$0xc]  ;;  %v1347_v36 = vld [vmem:[%s5392_s30 + $0x48] sm:$0x3] }
  0x36   : > { %v4376_v23 = vcombine.low %v1370_v21, %v1373_v22  ;;  %v1378_v32 = vrot.slane %v1376_v24, 4  ;;  %v4373_v37 = vrot.slane %v1345_v34, 10  ;;  %v1385_v38 = vrot.slane %v1383_v30, 4  ;;  %v4383_v52 = vld [vmem:[%s6991_s2 + $0x4] sm:$0x3]  ;;  %v5271_v59 = vld [vmem:[%s5392_s30 + $0x48] sm:$0xff]  }
  0x37   : > { %v1377_v40 = vsel %vm5383_vm2, %v4372_v31, %v1376_v24  ;;  %v1386_v42 = vrot.slane %v1347_v36, 6  ;;  %v4392_v61 = vld [vmem:[%s6991_s2 + $0x6] sm:$0x3]  ;;  %v5273_v0 = vld [vmem:[%s5392_s30 + $0x14] sm:$0xff]   ;;  %v5274_v1 = vld [vmem:[%s5392_s30 + $0x28] sm:$0xff]  }
  0x38   : > { %v1380_v41 = vsel %vm5383_vm2, %v1378_v32, %v1379_v33  ;;  %v1384_v46 = vsel %vm5383_vm2, %v4373_v37, %v1383_v30  ;;  %v1819_v62 = vsel %vm363_vm0, %v4392_v61, 0  ;;  %v5272_v63 = vld [vmem:[%s5392_s30] sm:$0xff]   ;;  %v5276_v8 = vld [vmem:[%s5392_s30 + $0x50] sm:$0xff]   ;;  %v5278_v11 = vld [vmem:[%s5392_s30 + $0x78] sm:$0xff]  }
  0x39   : > { %4857 = vmatmul.mubr.msk.bf16.gmra.mxu1 %vm541_vm3, %v5570_v43  ;;  %v4377_v45 = vcombine.low %v1377_v40, %v1380_v41  ;;  %v1387_v50 = vsel %vm5383_vm2, %v1385_v38, %v1386_v42  ;;  %v5275_v4 = vld [vmem:[%s5392_s30 + $0x3c] sm:$0xff]   ;;  %v5279_v13 = vld [vmem:[%s5392_s30 + $0x8c] sm:$0xff]   ;;  %v5281_v16 = vld [vmem:[%s5392_s30 + $0xb4] sm:$0xff]  }
  0x3a   : > { %4860 = vmatprep.mubr.msk.bf16.mxu1 %vm541_vm3, %v5572_v44  ;;  %v4378_v51 = vcombine.low %v1384_v46, %v1387_v50  ;;  %v5280_v14 = vld [vmem:[%s5392_s30 + $0xa0] sm:$0xff]   ;;  %v5284_v9 = vld [vmem:[%s5392_s30 + $0xf0] sm:$0xff]   ;;  %v4466_v21 = vld [vmem:[%s6991_s2 + $0xc] sm:$0x3] }
  0x3b   : > { %4903 = vmatmul.mubr.msk.bf16.vlgmr.msra.gmra.mxu0 %vm541_vm3, %v5265_v53  ;;  %v1557_v53 = vsel %vm363_vm0, %v4383_v52, 0  ;;  %v5283_v5 = vld [vmem:[%s5392_s30 + $0xdc] sm:$0xff]   ;;  %v5285_v19 = vld [vmem:[%s5392_s30 + $0x104] sm:$0xff]   ;;  %v5287_v22 = vld [vmem:[%s5392_s30 + $0x12c] sm:$0xff]  }
  0x3c   : > { %4906 = vmatprep.mubr.msk.bf16.mxu0 %vm541_vm3, %v5266_v56  ;;  %4945 = vmatpush3.bf16.msra.mxu0 %v1415_v17  ;;  %v5268_v56 = vld [vmem:[%s5392_s30 + $0xc] sm:$0xff]   ;;  %v5289_v24 = vld [vmem:[%s5392_s30 + $0x104] sm:$0xff]   ;;  %v5704_v15 = vld [vmem:[%s6992_s3] ss:$0 sm:$0xff] }
  0x3d   : > { %5245 = vmatprep.subr.msk.bf16.mxu0 %vm363_vm0, %v4383_v52  ;;  %v5282_v17 = vld [vmem:[%s5392_s30 + $0xc8] sm:$0xff]   ;;  %v5288_v2 = vld [vmem:[%s5392_s30 + $0xf0] sm:$0xff]   ;;  %v5290_v36 = vld [vmem:[%s5392_s30 + $0x118] sm:$0xff]   ;;  %v1173_v52 = vsel %vm363_vm0, %v5596_v55, 0 }
  0x3e   : > { %v5291_v40 = vld [vmem:[%s5392_s30 + $0x12c] sm:$0xff]   ;;  %v4476_v50 = vld [vmem:[%s5392_s30 + $0xf8] sm:$0xf] }
  0x41   : > { %4861 = vmatmul.mubr.msk.bf16.gmra.mxu1 %vm541_vm3, %v5582_v48 }
  0x43   : > { %4907 = vmatmul.mubr.msk.bf16.gmra.mxu0 %vm541_vm3, %v5267_v57  ;;  %v5269_v57 = vld [vmem:[%s5392_s30 + $0x20] sm:$0xff]  }
  0x44   : > { %4946 = vmatprep.mubr.msk.bf16.mxu0 %vm541_vm3, %v4375_v20  ;;  %v5286_v20 = vld [vmem:[%s5392_s30 + $0x118] sm:$0xff]  }
  0x4b   : > { %4947 = vmatmul.mubr.msk.bf16.vlgmr.msra.gmra.mxu0 %vm541_vm3, %v4376_v23  ;;  %v2416_v23 = vsel %vm363_vm0, %v4466_v21, 0 }
  0x4c   : > { %4950 = vmatprep.mubr.msk.bf16.mxu0 %vm541_vm3, %v4377_v45  ;;  %4955 = vmatpush3.bf16.msra.mxu0 %v1557_v53  ;;  %v2541_v53 = vrot.slane %v4476_v50, 6  ;;  %v4485_v50 = vld [vmem:[%s5392_s30 + $0x134] sm:$0xf] }
  0x4d   : > { %5246 = vmatprep.subr.msk.bf16.mxu0 %vm363_vm0, %v4392_v61  ;;  %v4475_v61 = vld [vmem:[%s5392_s30 + $0xf4] sm:$0xc] }
  0x53   : > { %4951 = vmatmul.mubr.msk.bf16.gmra.mxu0 %vm541_vm3, %v4378_v51 }
  0x54   : > { %4956 = vmatprep.mubr.msk.bf16.mxu0 %vm541_vm3, %v5268_v56  ;;  %v4479_v56 = vld [vmem:[%s5392_s30 + $0x10c] sm:$0xf] }
  0x55   : > { %v2548_v55 = vrot.slane %v4479_v56, 6 }
  0x5b   : > { %4957 = vmatmul.mubr.msk.bf16.vlgmr.msra.gmra.mxu0 %vm541_vm3, %v5269_v57 }
  0x5c   : > { %4960 = vmatprep.mubr.msk.bf16.mxu0 %vm541_vm3, %v5270_v58  ;;  %4965 = vmatpush3.bf16.msra.mxu0 %v1819_v62  ;;  %v4477_v62 = vld [vmem:[%s5392_s30 + $0xfc] sm:$0x3] }
  0x5d   : > { %5248 = vmatprep.subr.msk.bf16.mxu0 %vm363_vm0, %v4466_v21 }
  0x63   : > { %4961 = vmatmul.mubr.msk.bf16.gmra.mxu0 %vm541_vm3, %v5271_v59  ;;  %v5721_v59 = vld [vmem:[%s6991_s2 + $0xa] sm:$0x3] }
  0x64   : > { %4966 = vmatprep.mubr.msk.bf16.mxu0 %vm541_vm3, %v5272_v63 }
  0x6b   : > { %4967 = vmatmul.mubr.msk.bf16.vlgmr.msra.gmra.mxu0 %vm541_vm3, %v5273_v0  ;;  %v4487_v0 = vrot.slane %v4475_v61, 10  ;;  %v4484_v61 = vld [vmem:[%s5392_s30 + $0x130] sm:$0xc] }
  0x6c   : > { %4970 = vmatprep.mubr.msk.bf16.mxu0 %vm541_vm3, %v5274_v1  ;;  %5033 = vmatpush3.bf16.msra.mxu0 %v2416_v23  ;;  %v2543_v1 = vrot.slane %v2541_v53, 4 }
  0x73   : > { %4971 = vmatmul.mubr.msk.bf16.gmra.mxu0 %vm541_vm3, %v5275_v4  ;;  %v2544_v4 = vrot.slane %v4477_v62, 6 }
  0x74   : > { %4974 = vmatprep.mubr.msk.bf16.mxu0 %vm541_vm3, %v5276_v8  ;;  %v4478_v8 = vld [vmem:[%s5392_s30 + $0x108] sm:$0xc] }
  0x75   : > { %v2545_v21 = vsel %vm5383_vm2, %v2543_v1, %v2544_v4 }
  0x7b   : > { %4975 = vmatmul.mubr.msk.bf16.gmra.mxu0 %vm541_vm3, %v5277_v10 }
  0x7c   : > { %4978 = vmatprep.mubr.msk.bf16.mxu0 %vm541_vm3, %v5278_v11 }
  0x83   : > { %4979 = vmatmul.mubr.msk.bf16.gmra.mxu0 %vm541_vm3, %v5279_v13  ;;  %v4491_v13 = vld [vmem:[%s6991_s2 + $0xe] sm:$0x3] }
  0x84   : > { %4982 = vmatprep.mubr.msk.bf16.mxu0 %vm541_vm3, %v5280_v14  ;;  %v4480_v14 = vld [vmem:[%s5392_s30 + $0x110] sm:$0x3]  ;;  %5249 = vmatprep.subr.msk.bf16.mxu0 %vm363_vm0, %v4491_v13 }
  0x8b   : > { %4983 = vmatmul.mubr.msk.bf16.gmra.mxu0 %vm541_vm3, %v5281_v16  ;;  %v4488_v16 = vrot.slane %v4478_v8, 10 }
  0x8c   : > { %4986 = vmatprep.mubr.msk.bf16.mxu0 %vm541_vm3, %v5282_v17 }
  0x93   : > { %4987 = vmatmul.mubr.msk.bf16.gmra.mxu0 %vm541_vm3, %v5283_v5 }
  0x94   : > { %4990 = vmatprep.mubr.msk.bf16.mxu0 %vm541_vm3, %v5284_v9 }
  0x9b   : > { %4991 = vmatmul.mubr.msk.bf16.gmra.mxu0 %vm541_vm3, %v5285_v19  ;;  %v2594_v19 = vsel %vm363_vm0, %v4491_v13, 0  ;;  %v4486_v13 = vld [vmem:[%s5392_s30 + $0x138] sm:$0x3] }
  0x9c   : > { %4994 = vmatprep.mubr.msk.bf16.mxu0 %vm541_vm3, %v5286_v20  ;;  %v2542_v20 = vsel %vm5383_vm2, %v4487_v0, %v2541_v53 }
  0x9d   : > { %v4492_v23 = vcombine.low %v2542_v20, %v2545_v21 }
  0xa3   : > { %4995 = vmatmul.mubr.msk.bf16.gmra.mxu0 %vm541_vm3, %v5287_v22 }
  0xa4   : > { %5034 = vmatprep.mubr.msk.bf16.mxu0 %vm541_vm3, %v5288_v2 }
  0xab   : > { %5035 = vmatmul.mubr.msk.bf16.vlgmr.msra.gmra.mxu0 %vm541_vm3, %v5289_v24 }
  0xac   : > { %5038 = vmatprep.mubr.msk.bf16.mxu0 %vm541_vm3, %v5290_v36  ;;  %5043 = vmatpush3.bf16.msra.mxu0 %v2594_v19 }
  0xb3   : > { %5039 = vmatmul.mubr.msk.bf16.gmra.mxu0 %vm541_vm3, %v5291_v40 }
  0xb4   : > { %5044 = vmatprep.mubr.msk.bf16.mxu0 %vm541_vm3, %v4492_v23 }
  0xdb   : > { %v4834_v25 = vpop.f32.mrf.mxu0 }
  0xdc   : > { %v637_v31 = vadd.f32 %v4834_v25, %v5704_v15 }
  0xdd   : > { %v628_v18 = vpop.f32.mrf.mxu0 }
  0xde   : > { %v629_v32 = vadd.f32 %v5704_v15, %v628_v18  ;;  %v757_v42 = vmax.f32 %v637_v31, 0.0  ;;  %v2550_v18 = vrot.slane %v2548_v55, 4 }
  0xdf   : > { %v4835_v30 = vpop.f32.mrf.mxu0 }
  0xe0   : > { %v640_v33 = vadd.f32 %v4835_v30, %v5704_v15  ;;  %v755_v45 = vmax.f32 %v629_v32, 0.0  ;;  %v2551_v30 = vrot.slane %v4480_v14, 6  ;;  %v4490_v14 = vrot.slane %v4484_v61, 10 }
  0xe1   : > { %v631_v34 = vpop.f32.mrf.mxu0 }
  0xe2   : > { %v758_v37 = vmax.f32 %v640_v33, 0.0  ;;  %v632_v38 = vadd.f32 %v5704_v15, %v631_v34  ;;  %v2549_v33 = vsel %vm5383_vm2, %v4488_v16, %v2548_v55  ;;  %v4482_v34 = vld [vmem:[%s5392_s30 + $0x120] sm:$0xf]  ;;  %v2552_v40 = vsel %vm5383_vm2, %v2550_v18, %v2551_v30 }
  0xe3   : > { %v4838_v41 = vpop.f32.mrf.mxu0  ;;  %v4493_v56 = vcombine.low %v2549_v33, %v2552_v40  ;;  %v2562_v55 = vrot.slane %v4485_v50, 6  ;;  %v2565_v30 = vrot.slane %v4486_v13, 6 }
  0xe4   : > { %v756_v46 = vmax.f32 %v632_v38, 0.0  ;;  %v788_v57 = vpack.c.bf16 %v758_v37, %v757_v42  ;;  %v653_v17 = vadd.f32 %v4838_v41, %v5704_v15  ;;  %v2555_v41 = vrot.slane %v4482_v34, 6 }
  0xe5   : > { %v644_v51 = vpop.f32.mrf.mxu0  ;;  %5045 = vmatmul.mubr.msk.bf16.vlgmr.msra.gmra.mxu0 %vm541_vm3, %v4493_v56  ;;  %v2564_v20 = vrot.slane %v2562_v55, 4  ;;  %v2563_v34 = vsel %vm5383_vm2, %v4490_v14, %v2562_v55 }
  0xe6   : > { %v787_v58 = vpack.c.bf16 %v756_v46, %v755_v45  ;;  %v645_v10 = vadd.f32 %v5704_v15, %v644_v51  ;;  %v761_v36 = vmax.f32 %v653_v17, 0.0  ;;  %v4481_v45 = vld [vmem:[%s5392_s30 + $0x11c] sm:$0xc]  ;;  %v4483_v46 = vld [vmem:[%s5392_s30 + $0x124] sm:$0x3] }
  0xe7   : > { %v4839_v63 = vpop.f32.mrf.mxu0  ;;  %v2558_v8 = vrot.slane %v4483_v46, 6 }
  0xe8   : > { %v656_v11 = vadd.f32 %v4839_v63, %v5704_v15  ;;  %4868 = vmatprep.mubr.msk.bf16.mxu1 %vm819_vm4, %v787_v58  ;;  %v759_v31 = vmax.f32 %v645_v10, 0.0  ;;  %v2557_v58 = vrot.slane %v2555_v41, 4 }
  0xe9   : > { %v647_v5 = vpop.f32.mrf.mxu0  ;;  %4869 = vmatmul.mubr.msk.bf16.vlgmr.msra.gmra.mxu1 %vm819_vm4, %v788_v57  ;;  %v5736_v9 = vpop.f32.mrf.mxu1  ;;  %v4489_v57 = vrot.slane %v4481_v45, 10 }
  0xea   : > { %v648_v22 = vadd.f32 %v5704_v15, %v647_v5  ;;  %4911 = vmatpush3.bf16.msra.mxu1 %v1173_v52  ;;  %v762_v2 = vmax.f32 %v656_v11, 0.0  ;;  %v2559_v19 = vsel %vm5383_vm2, %v2557_v58, %v2558_v8 }
  0xeb   : > { %v4842_v24 = vpop.f32.mrf.mxu0  ;;  %v692_v25 = vpop.f32.mrf.mxu1  ;;  %5247 = vmatprep.subr.msk.bf16.mxu1 %vm363_vm0, %v5721_v59  ;;  %v2556_v11 = vsel %vm5383_vm2, %v4489_v57, %v2555_v41  ;;  %v2566_v41 = vsel %vm5383_vm2, %v2564_v20, %v2565_v30 }
  0xec   : > { %v760_v32 = vmax.f32 %v648_v22, 0.0  ;;  %v790_v51 = vpack.c.bf16 %v762_v2, %v761_v36  ;;  %v669_v0 = vadd.f32 %v4842_v24, %v5704_v15  ;;  %v4494_v18 = vcombine.low %v2556_v11, %v2559_v19 }
  0xed   : > { %v660_v37 = vpop.f32.mrf.mxu0  ;;  %v5751_v38 = vpop.f32.mrf.mxu1 }
  0xee   : > { %v789_v42 = vpack.c.bf16 %v760_v32, %v759_v31  ;;  %v661_v62 = vadd.f32 %v5704_v15, %v660_v37  ;;  %v765_v23 = vmax.f32 %v669_v0, 0.0  ;;  %v693_v32 = vadd.f32 %v5704_v15, %v692_v25  ;;  %5048 = vmatprep.mubr.msk.bf16.mxu0 %vm541_vm3, %v4494_v18 }
  0xef   : > { %v4843_v52 = vpop.f32.mrf.mxu0  ;;  %v695_v53 = vpop.f32.mrf.mxu1  ;;  %v704_v13 = vadd.f32 %v5751_v38, %v5704_v15 }
  0xf0   : > { %v672_v63 = vadd.f32 %v4843_v52, %v5704_v15  ;;  %4872 = vmatprep.mubr.msk.bf16.mxu1 %vm819_vm4, %v789_v42  ;;  %v763_v21 = vmax.f32 %v661_v62, 0.0  ;;  %v696_v33 = vadd.f32 %v5704_v15, %v695_v53  ;;  %v771_v52 = vmax.f32 %v693_v32, 0.0 }
  0xf1   : > { %v663_v1 = vpop.f32.mrf.mxu0  ;;  %4873 = vmatmul.mubr.msk.bf16.gmra.mxu1 %vm819_vm4, %v790_v51  ;;  %v5764_v4 = vpop.f32.mrf.mxu1  ;;  %v4495_v51 = vcombine.low %v2563_v34, %v2566_v41  ;;  %v774_v20 = vmax.f32 %v704_v13, 0.0  ;;  %v4541_v13 = vld [vmem:[%s6991_s2 + $0x1a] sm:$0x3] }
  0xf2   : > { %v664_v10 = vadd.f32 %v5704_v15, %v663_v1  ;;  %v766_v16 = vmax.f32 %v672_v63, 0.0  ;;  %v772_v56 = vmax.f32 %v696_v33, 0.0  ;;  %v717_v38 = vadd.f32 %v5764_v4, %v5704_v15 }
  0xf3   : > { %v4846_v17 = vpop.f32.mrf.mxu0  ;;  %v708_v5 = vpop.f32.mrf.mxu1  ;;  %5049 = vmatmul.mubr.msk.bf16.gmra.mxu0 %vm541_vm3, %v4495_v51 }
  0xf4   : > { %v764_v22 = vmax.f32 %v664_v10, 0.0  ;;  %v792_v36 = vpack.c.bf16 %v766_v16, %v765_v23  ;;  %v685_v25 = vadd.f32 %v4846_v17, %v5704_v15  ;;  %v795_v1 = vpack.c.bf16 %v772_v56, %v771_v52 }
  0xf5   : > { %v676_v2 = vpop.f32.mrf.mxu0  ;;  %v4855_v24 = vpop.f32.mrf.mxu1  ;;  %v709_v8 = vadd.f32 %v5704_v15, %v708_v5  ;;  %v701_v10 = vadd.f32 %v5736_v9, %v5704_v15  ;;  %v777_v33 = vmax.f32 %v717_v38, 0.0 }
  0xf6   : > { %v791_v31 = vpack.c.bf16 %v764_v22, %v763_v21  ;;  %v677_v42 = vadd.f32 %v5704_v15, %v676_v2  ;;  %v769_v62 = vmax.f32 %v685_v25, 0.0  ;;  %v720_v18 = vadd.f32 %v4855_v24, %v5704_v15 }
  0xf7   : > { %v4847_v37 = vpop.f32.mrf.mxu0  ;;  %v711_v40 = vpop.f32.mrf.mxu1  ;;  %v775_v17 = vmax.f32 %v709_v8, 0.0  ;;  %v773_v5 = vmax.f32 %v701_v10, 0.0  ;;  %v5293_v8 = vld [vmem:[%s5392_s30 + $0x20] sm:$0xff]  }
  0xf8   : > { %v688_v45 = vadd.f32 %v4847_v37, %v5704_v15  ;;  %4876 = vmatprep.mubr.msk.bf16.mxu1 %vm819_vm4, %v791_v31  ;;  %v767_v58 = vmax.f32 %v677_v42, 0.0  ;;  %v712_v55 = vadd.f32 %v5704_v15, %v711_v40  ;;  %v778_v34 = vmax.f32 %v720_v18, 0.0 }
  0xf9   : > { %v679_v46 = vpop.f32.mrf.mxu0  ;;  %4877 = vmatmul.mubr.msk.bf16.gmra.mxu1 %vm819_vm4, %v792_v36  ;;  %v4858_v50 = vpop.f32.mrf.mxu1  ;;  %v796_v2 = vpack.c.bf16 %v774_v20, %v773_v5  ;;  %v5297_v20 = vld [vmem:[%s5392_s30 + $0x70] sm:$0xff]  }
  0xfa   : > { %v680_v53 = vadd.f32 %v5704_v15, %v679_v46  ;;  %v770_v57 = vmax.f32 %v688_v45, 0.0  ;;  %v776_v19 = vmax.f32 %v712_v55, 0.0  ;;  %v798_v42 = vpack.c.bf16 %v778_v34, %v777_v33  ;;  %v5294_v55 = vld [vmem:[%s5392_s30 + $0x34] sm:$0xff]   ;;  %v5303_v34 = vld [vmem:[%s5392_s30 + $0xe8] sm:$0xff]  }
  0xfb   : > { %v724_v3 = vpop.f32.mrf.mxu1  ;;  %v733_v4 = vadd.f32 %v4858_v50, %v5704_v15 }
  0xfc   : > { %v768_v61 = vmax.f32 %v680_v53, 0.0  ;;  %v794_v11 = vpack.c.bf16 %v770_v57, %v769_v62  ;;  %v797_v22 = vpack.c.bf16 %v776_v19, %v775_v17  ;;  %v725_v9 = vadd.f32 %v5704_v15, %v724_v3  ;;  %v4508_v62 = vld [vmem:[%s6991_s2 + $0x10] sm:$0x3]  ;;  %v5296_v17 = vld [vmem:[%s5392_s30 + $0x5c] sm:$0xff]  }
  0xfd   : > { %v4859_v63 = vpop.f32.mrf.mxu1  ;;  %v781_v46 = vmax.f32 %v733_v4, 0.0  ;;  %v2736_v10 = vsel %vm363_vm0, %v4508_v62, 0 }
  0xfe   : > { %v793_v0 = vpack.c.bf16 %v768_v61, %v767_v58  ;;  %v779_v31 = vmax.f32 %v725_v9, 0.0  ;;  %v736_v24 = vadd.f32 %v4859_v63, %v5704_v15  ;;  %v2177_v61 = vsel %vm363_vm0, %v5721_v59, 0  ;;  %v5292_v63 = vld [vmem:[%s5392_s30 + $0xc] sm:$0xff]  }
  0xff   : > { %v727_v14 = vpop.f32.mrf.mxu1 }
 0x100   : > { %4880 = vmatprep.mubr.msk.bf16.mxu1 %vm819_vm4, %v793_v0  ;;  %v728_v23 = vadd.f32 %v5704_v15, %v727_v14  ;;  %v782_v51 = vmax.f32 %v736_v24, 0.0 }
 0x101   : > { %4881 = vmatmul.mubr.msk.bf16.gmra.mxu1 %vm819_vm4, %v794_v11  ;;  %v4862_v16 = vpop.f32.mrf.mxu1 }
 0x102   : > { %4884 = vmatprep.mubr.msk.bf16.mxu1 %vm819_vm4, %v795_v1  ;;  %v780_v32 = vmax.f32 %v728_v23, 0.0  ;;  %v800_v53 = vpack.c.bf16 %v782_v51, %v781_v46  ;;  %v749_v56 = vadd.f32 %v4862_v16, %v5704_v15  ;;  %v5295_v16 = vld [vmem:[%s5392_s30 + $0x48] sm:$0xff]   ;;  %v5299_v23 = vld [vmem:[%s5392_s30 + $0x98] sm:$0xff]  }
 0x103   : > { %v740_v21 = vpop.f32.mrf.mxu1 }
 0x104   : > { %v799_v37 = vpack.c.bf16 %v780_v32, %v779_v31  ;;  %v741_v40 = vadd.f32 %v5704_v15, %v740_v21  ;;  %v785_v50 = vmax.f32 %v749_v56, 0.0  ;;  %v5298_v21 = vld [vmem:[%s5392_s30 + $0x84] sm:$0xff]   ;;  %v5302_v31 = vld [vmem:[%s5392_s30 + $0xd4] sm:$0xff]  }
 0x105   : > { %v4863_v30 = vpop.f32.mrf.mxu1 }
 0x106   : > { %v783_v45 = vmax.f32 %v741_v40, 0.0  ;;  %v752_v57 = vadd.f32 %v4863_v30, %v5704_v15  ;;  %v5301_v30 = vld [vmem:[%s5392_s30 + $0xc0] sm:$0xff]  }
 0x107   : > { %v743_v36 = vpop.f32.mrf.mxu1 }
 0x108   : > { %v744_v41 = vadd.f32 %v5704_v15, %v743_v36  ;;  %v786_v3 = vmax.f32 %v752_v57, 0.0  ;;  %v5846_v15 = vpop.f32.mrf.mxu0  ;;  %v5304_v36 = vld [vmem:[%s5392_s30 + $0xfc] sm:$0xff]   ;;  %v3192_v57 = vsel %vm363_vm0, %v4541_v13, 0 }
 0x109   : > { %4885 = vmatmul.mubr.msk.bf16.gmra.mxu1 %vm819_vm4, %v796_v2  ;;  %v5300_v2 = vld [vmem:[%s5392_s30 + $0xac] sm:$0xff]  }
 0x10a   : > { %4888 = vmatprep.mubr.msk.bf16.mxu1 %vm819_vm4, %v797_v22  ;;  %v784_v25 = vmax.f32 %v744_v41, 0.0  ;;  %v802_v58 = vpack.c.bf16 %v786_v3, %v785_v50  ;;  %v5852_v59 = vpop.f32.mrf.mxu0  ;;  %v5305_v41 = vld [vmem:[%s5392_s30 + $0x110] sm:$0xff]   ;;  %v4582_v50 = vld [vmem:[%s6991_s2 + $0x2c] sm:$0x3] }
 0x10c   : > { %v801_v52 = vpack.c.bf16 %v784_v25, %v783_v45  ;;  %v5855_v0 = vpop.f32.mrf.mxu0  ;;  %v5307_v45 = vld [vmem:[%s5392_s30 + $0x138] sm:$0xff]  }
 0x10d   : > { %v5308_v25 = vld [vmem:[%s5392_s30 + $0xfc] sm:$0xff]  }
 0x10e   : > { %v5860_v1 = vpop.f32.mrf.mxu0 }
 0x110   : > { %v5865_v11 = vpop.f32.mrf.mxu0 }
 0x111   : > { %4889 = vmatmul.mubr.msk.bf16.gmra.mxu1 %vm819_vm4, %v798_v42  ;;  %v5306_v42 = vld [vmem:[%s5392_s30 + $0x124] sm:$0xff]  }
 0x112   : > { %4892 = vmatprep.mubr.msk.bf16.mxu1 %vm819_vm4, %v799_v37  ;;  %v5872_v14 = vpop.f32.mrf.mxu0 }
 0x114   : > { %v5877_v19 = vpop.f32.mrf.mxu0 }
 0x115   : > { %6999 = vst [vmem:[#allocation2_spill] sm:$0xff] %v5877_v19 }
 0x116   : > { %v5881_v5 = vpop.f32.mrf.mxu0 }
 0x117   : > { %7000 = vst [vmem:[#allocation3_spill] sm:$0xff] %v5881_v5 }
 0x118   : > { %v5885_v22 = vpop.f32.mrf.mxu0 }
 0x119   : > { %4893 = vmatmul.mubr.msk.bf16.gmra.mxu1 %vm819_vm4, %v800_v53  ;;  %v5310_v53 = vld [vmem:[%s5392_s30 + $0x124] sm:$0xff]  }
 0x11a   : > { %4896 = vmatprep.mubr.msk.bf16.mxu1 %vm819_vm4, %v801_v52  ;;  %v5889_v9 = vpop.f32.mrf.mxu0  ;;  %v5309_v52 = vld [vmem:[%s5392_s30 + $0x110] sm:$0xff]  }
 0x11c   : > { %v5893_v38 = vpop.f32.mrf.mxu0 }
 0x11e   : > { %v5897_v18 = vpop.f32.mrf.mxu0 }
 0x120   : > { %v5901_v32 = vpop.f32.mrf.mxu0 }
 0x121   : > { %4897 = vmatmul.mubr.msk.bf16.gmra.mxu1 %vm819_vm4, %v802_v58  ;;  %7001 = vst [vmem:[#allocation4_spill] sm:$0xff] %v5901_v32 }
 0x122   : > { %4912 = vmatprep.mubr.msk.bf16.mxu1 %vm541_vm3, %v5411_v28  ;;  %v5905_v33 = vpop.f32.mrf.mxu0 }
 0x123   : > { %7002 = vst [vmem:[#allocation5_spill] sm:$0xff] %v5905_v33 }
 0x124   : > { %v5909_v37 = vpop.f32.mrf.mxu0 }
 0x125   : > { %7003 = vst [vmem:[#allocation6_spill] sm:$0xff] %v5909_v37 }
 0x126   : > { %v5913_v40 = vpop.f32.mrf.mxu0 }
 0x127   : > { %7004 = vst [vmem:[#allocation7_spill] sm:$0xff] %v5913_v40 }
 0x128   : > { %v5917_v4 = vpop.f32.mrf.mxu0 }
 0x129   : > { %4913 = vmatmul.mubr.msk.bf16.vlgmr.msra.gmra.mxu1 %vm541_vm3, %v5422_v39 }
 0x12a   : > { %4999 = vmatpush3.bf16.msra.mxu1 %v2177_v61  ;;  %4916 = vmatprep.mubr.msk.bf16.mxu1 %vm541_vm3, %v5432_v49  ;;  %v5921_v24 = vpop.f32.mrf.mxu0 }
 0x12b   : > { %5250 = vmatprep.subr.msk.bf16.mxu1 %vm363_vm0, %v4508_v62 }
 0x12c   : > { %v5925_v46 = vpop.f32.mrf.mxu0 }
 0x12d   : > { %7005 = vst [vmem:[#allocation8_spill] sm:$0xff] %v5925_v46 }
 0x12e   : > { %v5929_v51 = vpop.f32.mrf.mxu0 }
 0x12f   : > { %7006 = vst [vmem:[#allocation9_spill] sm:$0xff] %v5929_v51 }
 0x130   : > { %v5933_v56 = vpop.f32.mrf.mxu0 }
 0x131   : > { %4917 = vmatmul.mubr.msk.bf16.gmra.mxu1 %vm541_vm3, %v5457_v6  ;;  %7007 = vst [vmem:[#allocation10_spill] sm:$0xff] %v5933_v56 }
 0x132   : > { %4920 = vmatprep.mubr.msk.bf16.mxu1 %vm541_vm3, %v5464_v12  ;;  %v5945_v61 = vpop.f32.mrf.mxu0 }
 0x133   : > { %7010 = vst [vmem:[#allocation13_spill] sm:$0xff] %v5945_v61 }
 0x139   : > { %4921 = vmatmul.mubr.msk.bf16.gmra.mxu1 %vm541_vm3, %v5480_v29 }
 0x13a   : > { %4924 = vmatprep.mubr.msk.bf16.mxu1 %vm541_vm3, %v5511_v60 }
 0x141   : > { %4925 = vmatmul.mubr.msk.bf16.gmra.mxu1 %vm541_vm3, %v5554_v35 }
 0x142   : > { %4928 = vmatprep.mubr.msk.bf16.mxu1 %vm541_vm3, %v5497_v47 }
 0x149   : > { %4929 = vmatmul.mubr.msk.bf16.gmra.mxu1 %vm541_vm3, %v5505_v54 }
 0x14a   : > { %4932 = vmatprep.mubr.msk.bf16.mxu1 %vm541_vm3, %v5523_v7 }
 0x151   : > { %4933 = vmatmul.mubr.msk.bf16.gmra.mxu1 %vm541_vm3, %v5549_v26 }
 0x152   : > { %4936 = vmatprep.mubr.msk.bf16.mxu1 %vm541_vm3, %v5551_v27 }
 0x159   : > { %4937 = vmatmul.mubr.msk.bf16.gmra.mxu1 %vm541_vm3, %v5570_v43 }
 0x15a   : > { %4940 = vmatprep.mubr.msk.bf16.mxu1 %vm541_vm3, %v5572_v44 }
 0x161   : > { %4941 = vmatmul.mubr.msk.bf16.gmra.mxu1 %vm541_vm3, %v5582_v48 }
 0x162   : > { %5000 = vmatprep.mubr.msk.bf16.mxu1 %vm541_vm3, %v5292_v63  ;;  %v5311_v63 = vld [vmem:[%s5392_s30 + $0x138] sm:$0xff]  }
 0x169   : > { %5001 = vmatmul.mubr.msk.bf16.vlgmr.msra.gmra.mxu1 %vm541_vm3, %v5293_v8 }
 0x16a   : > { %5053 = vmatpush3.bf16.msra.mxu1 %v2736_v10  ;;  %5004 = vmatprep.mubr.msk.bf16.mxu1 %vm541_vm3, %v5294_v55  ;;  %v5953_v55 = vpop.f32.mrf.mxu0 }
 0x16b   : > { %5251 = vmatprep.subr.msk.bf16.mxu1 %vm363_vm0, %v4541_v13  ;;  %7013 = vst [vmem:[#allocation16_spill] sm:$0xff] %v5953_v55 }
 0x171   : > { %5005 = vmatmul.mubr.msk.bf16.gmra.mxu1 %vm541_vm3, %v5295_v16  ;;  %v5962_v16 = vpop.f32.mrf.mxu0 }
 0x172   : > { %5008 = vmatprep.mubr.msk.bf16.mxu1 %vm541_vm3, %v5296_v17  ;;  %7016 = vst [vmem:[#allocation19_spill] sm:$0xff] %v5962_v16 }
 0x179   : > { %5009 = vmatmul.mubr.msk.bf16.gmra.mxu1 %vm541_vm3, %v5297_v20 }
 0x17a   : > { %5012 = vmatprep.mubr.msk.bf16.mxu1 %vm541_vm3, %v5298_v21  ;;  %v5968_v21 = vpop.f32.mrf.mxu0 }
 0x181   : > { %5013 = vmatmul.mubr.msk.bf16.gmra.mxu1 %vm541_vm3, %v5299_v23  ;;  %v3672_v23 = vsel %vm363_vm0, %v4582_v50, 0 }
 0x182   : > { %5016 = vmatprep.mubr.msk.bf16.mxu1 %vm541_vm3, %v5300_v2 }
 0x189   : > { %5017 = vmatmul.mubr.msk.bf16.gmra.mxu1 %vm541_vm3, %v5301_v30 }
 0x18a   : > { %5020 = vmatprep.mubr.msk.bf16.mxu1 %vm541_vm3, %v5302_v31  ;;  %v5979_v31 = vpop.f32.mrf.mxu0 }
 0x18b   : > { %7021 = vst [vmem:[#allocation24_spill] sm:$0xff] %v5979_v31 }
 0x191   : > { %5021 = vmatmul.mubr.msk.bf16.gmra.mxu1 %vm541_vm3, %v5303_v34 }
 0x192   : > { %5024 = vmatprep.mubr.msk.bf16.mxu1 %vm541_vm3, %v5304_v36 }
 0x199   : > { %5025 = vmatmul.mubr.msk.bf16.gmra.mxu1 %vm541_vm3, %v5305_v41  ;;  %v5985_v41 = vpop.f32.mrf.mxu0 }
 0x19a   : > { %5028 = vmatprep.mubr.msk.bf16.mxu1 %vm541_vm3, %v5306_v42  ;;  %7024 = vst [vmem:[#allocation27_spill] sm:$0xff] %v5985_v41 }
 0x1a1   : > { %5029 = vmatmul.mubr.msk.bf16.gmra.mxu1 %vm541_vm3, %v5307_v45 }
 0x1a2   : > { %5054 = vmatprep.mubr.msk.bf16.mxu1 %vm541_vm3, %v5308_v25  ;;  %v5995_v25 = vpop.f32.mrf.mxu0 }
 0x1a3   : > { %7027 = vst [vmem:[#allocation30_spill] sm:$0xff] %v5995_v25 }
 0x1a9   : > { %v5939_v3 = vpop.f32.mrf.mxu1  ;;  %5055 = vmatmul.mubr.msk.bf16.vlgmr.msra.gmra.mxu1 %vm541_vm3, %v5309_v52 }
 0x1aa   : > { %7008 = vst [vmem:[#allocation11_spill] sm:$0xff] %v5939_v3  ;;  %5058 = vmatprep.mubr.msk.bf16.mxu1 %vm541_vm3, %v5310_v53  ;;  %5099 = vmatpush3.bf16.msra.mxu1 %v3192_v57  ;;  %v6001_v57 = vpop.f32.mrf.mxu0  ;;  %v5313_v3 = vld [vmem:[%s6994_s5 + $0x10] sm:$0xff]  }
 0x1ab   : > { %v5943_v58 = vpop.f32.mrf.mxu1  ;;  %5252 = vmatprep.subr.msk.bf16.mxu1 %vm363_vm0, %v4582_v50 }
 0x1ac   : > { %7009 = vst [vmem:[#allocation12_spill] sm:$0xff] %v5943_v58 }
 0x1ad   : > { %v5948_v62 = vpop.f32.mrf.mxu1 }
 0x1ae   : > { %7011 = vst [vmem:[#allocation14_spill] sm:$0xff] %v5948_v62 }
 0x1af   : > { %v5951_v8 = vpop.f32.mrf.mxu1 }
 0x1b0   : > { %7012 = vst [vmem:[#allocation15_spill] sm:$0xff] %v5951_v8 }
 0x1b1   : > { %v5955_v10 = vpop.f32.mrf.mxu1  ;;  %5059 = vmatmul.mubr.msk.bf16.gmra.mxu1 %vm541_vm3, %v5311_v63 }
 0x1b2   : > { %7014 = vst [vmem:[#allocation17_spill] sm:$0xff] %v5955_v10  ;;  %5100 = vmatprep.mubr.msk.bf16.mxu1 %vm541_vm3, %v5411_v28 }
 0x1b3   : > { %v5960_v13 = vpop.f32.mrf.mxu1 }
 0x1b4   : > { %7015 = vst [vmem:[#allocation18_spill] sm:$0xff] %v5960_v13 }
 0x1b5   : > { %v5964_v17 = vpop.f32.mrf.mxu1 }
 0x1b6   : > { %7017 = vst [vmem:[#allocation20_spill] sm:$0xff] %v5964_v17 }
 0x1b7   : > { %v5966_v20 = vpop.f32.mrf.mxu1 }
 0x1b8   : > { %7018 = vst [vmem:[#allocation21_spill] sm:$0xff] %v5966_v20 }
 0x1b9   : > { %v5971_v2 = vpop.f32.mrf.mxu1  ;;  %5101 = vmatmul.mubr.msk.bf16.vlgmr.msra.gmra.mxu1 %vm541_vm3, %v5422_v39 }
 0x1ba   : > { %7019 = vst [vmem:[#allocation22_spill] sm:$0xff] %v5971_v2  ;;  %5169 = vmatpush3.bf16.msra.mxu1 %v3672_v23  ;;  %5104 = vmatprep.mubr.msk.bf16.mxu1 %vm541_vm3, %v5432_v49  ;;  %v6011_v23 = vpop.f32.mrf.mxu0 }
 0x1bb   : > { %v5977_v30 = vpop.f32.mrf.mxu1  ;;  %7032 = vst [vmem:[#allocation35_spill] sm:$0xff] %v6011_v23 }
 0x1bc   : > { %7020 = vst [vmem:[#allocation23_spill] sm:$0xff] %v5977_v30 }
 0x1bd   : > { %v5981_v34 = vpop.f32.mrf.mxu1 }
 0x1be   : > { %7022 = vst [vmem:[#allocation25_spill] sm:$0xff] %v5981_v34 }
 0x1bf   : > { %v5983_v36 = vpop.f32.mrf.mxu1 }
 0x1c0   : > { %7023 = vst [vmem:[#allocation26_spill] sm:$0xff] %v5983_v36 }
 0x1c1   : > { %v5987_v42 = vpop.f32.mrf.mxu1  ;;  %5105 = vmatmul.mubr.msk.bf16.gmra.mxu1 %vm541_vm3, %v5457_v6 }
 0x1c2   : > { %7025 = vst [vmem:[#allocation28_spill] sm:$0xff] %v5987_v42  ;;  %5108 = vmatprep.mubr.msk.bf16.mxu1 %vm541_vm3, %v5464_v12 }
 0x1c3   : > { %v5993_v45 = vpop.f32.mrf.mxu1 }
 0x1c4   : > { %7026 = vst [vmem:[#allocation29_spill] sm:$0xff] %v5993_v45 }
 0x1c5   : > { %v5997_v52 = vpop.f32.mrf.mxu1 }
 0x1c6   : > { %7028 = vst [vmem:[#allocation31_spill] sm:$0xff] %v5997_v52  ;;  %v6017_v52 = vpop.f32.mrf.mxu0 }
 0x1c7   : > { %v5999_v53 = vpop.f32.mrf.mxu1  ;;  %7035 = vst [vmem:[#allocation38_spill] sm:$0xff] %v6017_v52 }
 0x1c8   : > { %7029 = vst [vmem:[#allocation32_spill] sm:$0xff] %v5999_v53  ;;  %v6027_v36 = vpop.f32.mrf.mxu0 }
 0x1c9   : > { %v6003_v50 = vpop.f32.mrf.mxu1  ;;  %5109 = vmatmul.mubr.msk.bf16.gmra.mxu1 %vm541_vm3, %v5480_v29  ;;  %7038 = vst [vmem:[#allocation41_spill] sm:$0xff] %v6027_v36 }
 0x1ca   : > { %7030 = vst [vmem:[#allocation33_spill] sm:$0xff] %v6003_v50  ;;  %5112 = vmatprep.mubr.msk.bf16.mxu1 %vm541_vm3, %v5511_v60 }
 0x1cb   : > { %v6009_v63 = vpop.f32.mrf.mxu1 }
 0x1cc   : > { %7031 = vst [vmem:[#allocation34_spill] sm:$0xff] %v6009_v63 }
 0x1cd   : > { %v6013_v45 = vpop.f32.mrf.mxu1 }
 0x1ce   : > { %7033 = vst [vmem:[#allocation36_spill] sm:$0xff] %v6013_v45  ;;  %v6033_v45 = vpop.f32.mrf.mxu0 }
 0x1cf   : > { %v6015_v42 = vpop.f32.mrf.mxu1 }
 0x1d0   : > { %7034 = vst [vmem:[#allocation37_spill] sm:$0xff] %v6015_v42  ;;  %v6043_v30 = vpop.f32.mrf.mxu0 }
 0x1d1   : > { %v6019_v53 = vpop.f32.mrf.mxu1  ;;  %5113 = vmatmul.mubr.msk.bf16.gmra.mxu1 %vm541_vm3, %v5554_v35 }
 0x1d2   : > { %7036 = vst [vmem:[#allocation39_spill] sm:$0xff] %v6019_v53  ;;  %5116 = vmatprep.mubr.msk.bf16.mxu1 %vm541_vm3, %v5497_v47 }
 0x1d3   : > { %v6025_v50 = vpop.f32.mrf.mxu1 }
 0x1d4   : > { %7037 = vst [vmem:[#allocation40_spill] sm:$0xff] %v6025_v50 }
 0x1d5   : > { %v6029_v63 = vpop.f32.mrf.mxu1 }
 0x1d6   : > { %7039 = vst [vmem:[#allocation42_spill] sm:$0xff] %v6029_v63  ;;  %v6049_v63 = vpop.f32.mrf.mxu0 }
 0x1d7   : > { %v6031_v34 = vpop.f32.mrf.mxu1 }
 0x1d8   : > { %7040 = vst [vmem:[#allocation43_spill] sm:$0xff] %v6031_v34  ;;  %v6059_v20 = vpop.f32.mrf.mxu0 }
 0x1d9   : > { %v6035_v42 = vpop.f32.mrf.mxu1  ;;  %5117 = vmatmul.mubr.msk.bf16.gmra.mxu1 %vm541_vm3, %v5505_v54 }
 0x1da   : > { %7041 = vst [vmem:[#allocation44_spill] sm:$0xff] %v6035_v42  ;;  %5120 = vmatprep.mubr.msk.bf16.mxu1 %vm541_vm3, %v5523_v7 }
 0x1db   : > { %v6041_v53 = vpop.f32.mrf.mxu1 }
 0x1dc   : > { %7042 = vst [vmem:[#allocation45_spill] sm:$0xff] %v6041_v53 }
 0x1dd   : > { %v6045_v50 = vpop.f32.mrf.mxu1 }
 0x1de   : > { %7043 = vst [vmem:[#allocation46_spill] sm:$0xff] %v6045_v50  ;;  %v6065_v50 = vpop.f32.mrf.mxu0 }
 0x1df   : > { %v6047_v2 = vpop.f32.mrf.mxu1 }
 0x1e0   : > { %7044 = vst [vmem:[#allocation47_spill] sm:$0xff] %v6047_v2  ;;  %v6075_v13 = vpop.f32.mrf.mxu0 }
 0x1e1   : > { %v6051_v34 = vpop.f32.mrf.mxu1  ;;  %5121 = vmatmul.mubr.msk.bf16.gmra.mxu1 %vm541_vm3, %v5549_v26 }
 0x1e2   : > { %7045 = vst [vmem:[#allocation48_spill] sm:$0xff] %v6051_v34  ;;  %5124 = vmatprep.mubr.msk.bf16.mxu1 %vm541_vm3, %v5551_v27  ;;  %v6084_v10 = vpop.f32.mrf.mxu0 }
 0x1e3   : > { %v6057_v42 = vpop.f32.mrf.mxu1 }
 0x1e4   : > { %7046 = vst [vmem:[#allocation49_spill] sm:$0xff] %v6057_v42  ;;  %v6094_v58 = vpop.f32.mrf.mxu0 }
 0x1e5   : > { %v6061_v53 = vpop.f32.mrf.mxu1 }
 0x1e6   : > { %7047 = vst [vmem:[#allocation50_spill] sm:$0xff] %v6061_v53  ;;  %v6103_v23 = vpop.f32.mrf.mxu0 }
 0x1e7   : > { %v6063_v17 = vpop.f32.mrf.mxu1 }
 0x1e8   : > { %7048 = vst [vmem:[#allocation51_spill] sm:$0xff] %v6063_v17  ;;  %v5312_v17 = vld [vmem:[%s6994_s5 + $0x18] sm:$0xff]  }
 0x1e9   : > { %v6067_v2 = vpop.f32.mrf.mxu1  ;;  %5125 = vmatmul.mubr.msk.bf16.gmra.mxu1 %vm541_vm3, %v5570_v43  ;;  %5062 = vmatprep.subr.bf16.mxu0 %v5312_v17 }
 0x1ea   : > { %5128 = vmatprep.mubr.msk.bf16.mxu1 %vm541_vm3, %v5572_v44  ;;  %5063 = vmatpush3.bf16.msra.mxu0 %v5312_v17 }
 0x1eb   : > { %v6073_v34 = vpop.f32.mrf.mxu1  ;;  %5064 = vmatprep.subr.bf16.mxu0 %v5313_v3 }
 0x1ec   : > { %7049 = vst [vmem:[#allocation52_spill] sm:$0xff] %v6073_v34 }
 0x1ed   : > { %v6077_v42 = vpop.f32.mrf.mxu1 }
 0x1ee   : > { %7050 = vst [vmem:[#allocation53_spill] sm:$0xff] %v6077_v42  ;;  %5065 = vmatpush3.bf16.msra.mxu0 %v5313_v3  ;;  %v6120_v3 = vld [vmem:[%s6994_s5 + $0x28] sm:$0xff]  }
 0x1ef   : > { %v6082_v53 = vpop.f32.mrf.mxu1  ;;  %7055 = vst [vmem:[#allocation58_spill] sm:$0xff] %v6120_v3  ;;  %5132 = vmatprep.subr.bf16.mxu0 %v6120_v3 }
 0x1f0   : > { %7051 = vst [vmem:[#allocation54_spill] sm:$0xff] %v6082_v53 }
 0x1f1   : > { %v6086_v8 = vpop.f32.mrf.mxu1  ;;  %5129 = vmatmul.mubr.msk.bf16.gmra.mxu1 %vm541_vm3, %v5582_v48 }
 0x1f2   : > { %5170 = vmatprep.mubr.msk.bf16.mxu1 %vm541_vm3, %v5411_v28 }
 0x1f3   : > { %v6092_v62 = vpop.f32.mrf.mxu1 }
 0x1f4   : > { %7052 = vst [vmem:[#allocation55_spill] sm:$0xff] %v6092_v62  ;;  %v6113_v62 = vpop.f32.mrf.mxu0 }
 0x1f5   : > { %v6099_v36 = vpop.f32.mrf.mxu1 }
 0x1f6   : > { %7053 = vst [vmem:[#allocation56_spill] sm:$0xff] %v6099_v36  ;;  %v6124_v36 = vpop.f32.mrf.mxu0 }
 0x1f7   : > { %v6101_v52 = vpop.f32.mrf.mxu1 }
 0x1f8   : > { %7054 = vst [vmem:[#allocation57_spill] sm:$0xff] %v6101_v52  ;;  %v6135_v53 = vpop.f32.mrf.mxu0 }
 0x1f9   : > { %v6105_v17 = vpop.f32.mrf.mxu1  ;;  %5171 = vmatmul.mubr.msk.bf16.vlgmr.msra.gmra.mxu1 %vm541_vm3, %v5422_v39 }
 0x1fa   : > { %5174 = vmatprep.mubr.msk.bf16.mxu1 %vm541_vm3, %v5432_v49  ;;  %v6139_v41 = vpop.f32.mrf.mxu0 }
 0x1fb   : > { %v6111_v28 = vpop.f32.mrf.mxu1 }
 0x1fd   : > { %v6115_v25 = vpop.f32.mrf.mxu1 }
 0x1ff   : > { %v6122_v52 = vpop.f32.mrf.mxu1 }
 0x201   : > { %v6127_v39 = vpop.f32.mrf.mxu1  ;;  %5175 = vmatmul.mubr.msk.bf16.gmra.mxu1 %vm541_vm3, %v5457_v6  ;;  %v6149_v6 = vpop.f32.mrf.mxu0 }
 0x202   : > { %5178 = vmatprep.mubr.msk.bf16.mxu1 %vm541_vm3, %v5464_v12 }
 0x203   : > { %v6133_v49 = vpop.f32.mrf.mxu1  ;;  %v6155_v31 = vpop.f32.mrf.mxu0 }
 0x205   : > { %v6137_v16 = vpop.f32.mrf.mxu1 }
 0x207   : > { %v6141_v42 = vpop.f32.mrf.mxu1 }
 0x209   : > { %v6143_v55 = vpop.f32.mrf.mxu1  ;;  %5179 = vmatmul.mubr.msk.bf16.gmra.mxu1 %vm541_vm3, %v5480_v29  ;;  %v6165_v29 = vpop.f32.mrf.mxu0 }
 0x20a   : > { %5182 = vmatprep.mubr.msk.bf16.mxu1 %vm541_vm3, %v5511_v60  ;;  %7056 = vst [vmem:[#allocation59_spill] sm:$0xff] %v6165_v29 }
 0x20b   : > { %v6151_v12 = vpop.f32.mrf.mxu1  ;;  %v6171_v56 = vpop.f32.mrf.mxu0 }
 0x20c   : > { %7057 = vst [vmem:[#allocation60_spill] sm:$0xff] %v6171_v56 }
 0x20d   : > { %v6153_v3 = vpop.f32.mrf.mxu1 }
 0x20f   : > { %v6157_v34 = vpop.f32.mrf.mxu1 }
 0x211   : > { %v6159_v61 = vpop.f32.mrf.mxu1  ;;  %5183 = vmatmul.mubr.msk.bf16.gmra.mxu1 %vm541_vm3, %v5554_v35  ;;  %v6181_v35 = vpop.f32.mrf.mxu0 }
 0x212   : > { %5186 = vmatprep.mubr.msk.bf16.mxu1 %vm541_vm3, %v5497_v47  ;;  %7058 = vst [vmem:[#allocation61_spill] sm:$0xff] %v6181_v35 }
 0x213   : > { %v6167_v60 = vpop.f32.mrf.mxu1  ;;  %v6187_v33 = vpop.f32.mrf.mxu0 }
 0x214   : > { %7059 = vst [vmem:[#allocation62_spill] sm:$0xff] %v6187_v33  ;;  %v1984_v33 = vadd.f32 %v5968_v21, %v6067_v2  ;;  %v1988_v21 = vadd.f32 %v6001_v57, %v6086_v8  ;;  %v1990_v57 = vadd.f32 %v6043_v30, %v6111_v28 }
 0x215   : > { %v6169_v40 = vpop.f32.mrf.mxu1 }
 0x217   : > { %v6173_v37 = vpop.f32.mrf.mxu1 }
 0x219   : > { %v6175_v51 = vpop.f32.mrf.mxu1  ;;  %5187 = vmatmul.mubr.msk.bf16.gmra.mxu1 %vm541_vm3, %v5505_v54  ;;  %v6197_v54 = vpop.f32.mrf.mxu0 }
 0x21a   : > { %5190 = vmatprep.mubr.msk.bf16.mxu1 %vm541_vm3, %v5523_v7  ;;  %7060 = vst [vmem:[#allocation63_spill] sm:$0xff] %v6197_v54 }
 0x21b   : > { %v6183_v47 = vpop.f32.mrf.mxu1  ;;  %v6203_v19 = vpop.f32.mrf.mxu0 }
 0x21c   : > { %7062 = vst [vmem:[#allocation65_spill] sm:$0xff] %v6203_v19 }
 0x21d   : > { %v6185_v5 = vpop.f32.mrf.mxu1 }
 0x21f   : > { %v6189_v46 = vpop.f32.mrf.mxu1 }
 0x221   : > { %v6191_v56 = vpop.f32.mrf.mxu1  ;;  %5191 = vmatmul.mubr.msk.bf16.gmra.mxu1 %vm541_vm3, %v5549_v26 }
 0x222   : > { %5194 = vmatprep.mubr.msk.bf16.mxu1 %vm541_vm3, %v5551_v27  ;;  %v6215_v27 = vpop.f32.mrf.mxu0 }
 0x223   : > { %v6199_v7 = vpop.f32.mrf.mxu1 }
 0x224   : > { %v6221_v19 = vpop.f32.mrf.mxu0 }
 0x225   : > { %v6201_v35 = vpop.f32.mrf.mxu1  ;;  %7065 = vst [vmem:[#allocation68_spill] sm:$0xff] %v6221_v19 }
 0x226   : > { %7061 = vst [vmem:[#allocation64_spill] sm:$0xff] %v6201_v35 }
 0x227   : > { %v6205_v32 = vpop.f32.mrf.mxu1 }
 0x228   : > { %7063 = vst [vmem:[#allocation66_spill] sm:$0xff] %v6205_v32 }
 0x229   : > { %v5002_v29 = vpop.f32.mrf.mxu1  ;;  %5195 = vmatmul.mubr.msk.bf16.gmra.mxu1 %vm541_vm3, %v5570_v43 }
 0x22a   : > { %v6211_v26 = vadd.f32 %v5002_v29, %v1984_v33  ;;  %5198 = vmatprep.mubr.msk.bf16.mxu1 %vm541_vm3, %v5572_v44  ;;  %v6231_v44 = vpop.f32.mrf.mxu0 }
 0x22b   : > { %v6217_v54 = vpop.f32.mrf.mxu1  ;;  %7068 = vst [vmem:[#allocation71_spill] sm:$0xff] %v6231_v44 }
 0x22c   : > { %7064 = vst [vmem:[#allocation67_spill] sm:$0xff] %v6211_v26  ;;  %v6237_v26 = vpop.f32.mrf.mxu0 }
 0x22d   : > { %v6219_v35 = vpop.f32.mrf.mxu1  ;;  %7071 = vst [vmem:[#allocation74_spill] sm:$0xff] %v6237_v26 }
 0x22f   : > { %v6223_v32 = vpop.f32.mrf.mxu1 }
 0x230   : > { %7066 = vst [vmem:[#allocation69_spill] sm:$0xff] %v6223_v32  ;;  %v1992_v32 = vadd.f32 %v6033_v45, %v6105_v17  ;;  %v1991_v45 = vadd.f32 %v6059_v20, %v6122_v52 }
 0x231   : > { %v5006_v2 = vpop.f32.mrf.mxu1  ;;  %5199 = vmatmul.mubr.msk.bf16.gmra.mxu1 %vm541_vm3, %v5582_v48 }
 0x232   : > { %v6229_v43 = vadd.f32 %v5006_v2, %v1988_v21  ;;  %v6245_v21 = vpop.f32.mrf.mxu0  ;;  %v6250_v2 = vld [vmem:[%s6992_s3 + $0x1] ss:$0 sm:$0xff] }
 0x233   : > { %v6233_v33 = vpop.f32.mrf.mxu1  ;;  %7073 = vst [vmem:[#allocation76_spill] sm:$0xff] %v6245_v21 }
 0x234   : > { %7067 = vst [vmem:[#allocation70_spill] sm:$0xff] %v6229_v43  ;;  %7069 = vst [vmem:[#allocation72_spill] sm:$0xff] %v6233_v33 }
 0x235   : > { %v6235_v29 = vpop.f32.mrf.mxu1 }
 0x236   : > { %7070 = vst [vmem:[#allocation73_spill] sm:$0xff] %v6235_v29  ;;  %v1993_v29 = vadd.f32 %v6049_v63, %v6115_v25  ;;  %v1994_v25 = vadd.f32 %v6075_v13, %v6133_v49  ;;  %v1995_v13 = vadd.f32 %v6094_v58, %v6141_v42 }
 0x237   : > { %v6239_v19 = vpop.f32.mrf.mxu1 }
 0x238   : > { %7072 = vst [vmem:[#allocation75_spill] sm:$0xff] %v6239_v19 }
 0x239   : > { %v5010_v8 = vpop.f32.mrf.mxu1 }
 0x23a   : > { %v2350_v48 = vadd.f32 %v5010_v8, %v1992_v32  ;;  %v6257_v32 = vpop.f32.mrf.mxu0  ;;  %v1996_v8 = vadd.f32 %v6065_v50, %v6127_v39 }
 0x23b   : > { %v2245_v43 = vpop.f32.mrf.mxu1 }
 0x23c   : > { %v2348_v19 = vadd.f32 %v2245_v43, %v1990_v57  ;;  %v2853_v17 = vadd.f32 %v6250_v2, %v2350_v48  ;;  %v6268_v57 = vpop.f32.mrf.mxu0 }
 0x23d   : > { %v5011_v33 = vpop.f32.mrf.mxu1 }
 0x23e   : > { %v2351_v30 = vadd.f32 %v5011_v33, %v1993_v29  ;;  %v2851_v44 = vadd.f32 %v6250_v2, %v2348_v19  ;;  %v2885_v43 = vmax.f32 %v2853_v17, 0.0  ;;  %v1997_v29 = vadd.f32 %v6084_v10, %v6137_v16  ;;  %v6277_v17 = vpop.f32.mrf.mxu0 }
 0x23f   : > { %v2248_v28 = vpop.f32.mrf.mxu1  ;;  %v2000_v16 = vadd.f32 %v6103_v23, %v6143_v55  ;;  %v1314_v55 = vadd.f32 %v6175_v51, %v5846_v15 }
 0x240   : > { %v2854_v21 = vadd.f32 %v6250_v2, %v2351_v30  ;;  %v2349_v26 = vadd.f32 %v2248_v28, %v1991_v45  ;;  %v2883_v39 = vmax.f32 %v2851_v44, 0.0  ;;  %v6290_v23 = vpop.f32.mrf.mxu0 }
 0x241   : > { %v5014_v63 = vpop.f32.mrf.mxu1  ;;  %v1508_v51 = vadd.f32 %v5885_v22, %v1314_v55  ;;  %v1309_v22 = vadd.f32 %v6189_v46, %v5860_v1  ;;  %v7076_v55 = vld [vmem:[#allocation2_spill] sm:$0xff] }
 0x242   : > { %v2886_v20 = vmax.f32 %v2854_v21, 0.0  ;;  %v2852_v52 = vadd.f32 %v6250_v2, %v2349_v26  ;;  %v2354_v33 = vadd.f32 %v5014_v63, %v1996_v8 }
 0x243   : > { %v2261_v50 = vpop.f32.mrf.mxu1 }
 0x244   : > { %v6270_v19 = vpack.c.bf16 %v2886_v20, %v2885_v43  ;;  %v2884_v48 = vmax.f32 %v2852_v52, 0.0  ;;  %v2352_v45 = vadd.f32 %v2261_v50, %v1994_v25  ;;  %v2857_v26 = vadd.f32 %v6250_v2, %v2354_v33 }
 0x245   : > { %v5015_v30 = vpop.f32.mrf.mxu1  ;;  %v1998_v25 = vadd.f32 %v6113_v62, %v6151_v12  ;;  %v2001_v52 = vadd.f32 %v6124_v36, %v6153_v3  ;;  %v1306_v12 = vadd.f32 %v6183_v47, %v5852_v59  ;;  %v1317_v3 = vadd.f32 %v6185_v5, %v5855_v0 }
 0x246   : > { %v6274_v49 = vpack.c.bf16 %v2884_v48, %v2883_v39  ;;  %v2355_v21 = vadd.f32 %v5015_v30, %v1997_v29  ;;  %v2855_v44 = vadd.f32 %v6250_v2, %v2352_v45  ;;  %v2889_v42 = vmax.f32 %v2857_v26, 0.0 }
 0x247   : > { %v2264_v10 = vpop.f32.mrf.mxu1  ;;  %v1999_v45 = vadd.f32 %v6135_v53, %v6157_v34  ;;  %v2004_v59 = vadd.f32 %v6139_v41, %v6159_v61  ;;  %v2005_v61 = vadd.f32 %v6155_v31, %v6169_v40  ;;  %v1509_v41 = vadd.f32 %v5893_v38, %v1317_v3 }
 0x248   : > { %v2858_v28 = vadd.f32 %v6250_v2, %v2355_v21  ;;  %v2353_v8 = vadd.f32 %v2264_v10, %v1995_v13  ;;  %v2887_v29 = vmax.f32 %v2855_v44, 0.0  ;;  %v6304_v13 = vpop.f32.mrf.mxu0  ;;  %v2002_v21 = vadd.f32 %v6149_v6, %v6167_v60 }
 0x249   : > { %v5018_v58 = vpop.f32.mrf.mxu1  ;;  %v1506_v10 = vadd.f32 %v5889_v9, %v1306_v12  ;;  %v1650_v60 = vadd.f32 %v5917_v4, %v1508_v51  ;;  %v1322_v40 = vadd.f32 %v6199_v7, %v5872_v14  ;;  %v7078_v14 = vld [vmem:[#allocation8_spill] sm:$0xff]  ;;  %v7082_v51 = vld [vmem:[#allocation66_spill] sm:$0xff] }
 0x24a   : > { %v2890_v63 = vmax.f32 %v2858_v28, 0.0  ;;  %v2856_v43 = vadd.f32 %v6250_v2, %v2353_v8  ;;  %v2358_v20 = vadd.f32 %v5018_v58, %v2000_v16  ;;  %v1330_v8 = vadd.f32 %v6191_v56, %v5865_v11  ;;  %v6321_v6 = vpop.f32.mrf.mxu0  ;;  %v7074_v11 = vld [vmem:[#allocation59_spill] sm:$0xff]  ;;  %v7079_v12 = vld [vmem:[#allocation60_spill] sm:$0xff] }
 0x24b   : > { %v2277_v33 = vpop.f32.mrf.mxu1  ;;  %v1648_v38 = vadd.f32 %v5921_v24, %v1506_v10  ;;  %v2003_v56 = vadd.f32 %v7074_v11, %v6173_v37  ;;  %v1651_v7 = vadd.f32 %v7078_v14, %v1509_v41 }
 0x24c   : > { %v6292_v50 = vpack.c.bf16 %v2890_v63, %v2889_v42  ;;  %v2888_v39 = vmax.f32 %v2856_v43, 0.0  ;;  %v2356_v62 = vadd.f32 %v2277_v33, %v1998_v25  ;;  %v2861_v36 = vadd.f32 %v6250_v2, %v2358_v20  ;;  %v7075_v20 = vld [vmem:[#allocation4_spill] sm:$0xff] }
 0x24d   : > { %v5019_v48 = vpop.f32.mrf.mxu1  ;;  %v1507_v42 = vadd.f32 %v5897_v18, %v1309_v22  ;;  %v7077_v33 = vld [vmem:[#allocation64_spill] sm:$0xff]  ;;  %v6338_v18 = vpop.f32.mrf.mxu0 }
 0x24e   : > { %v6298_v30 = vpack.c.bf16 %v2888_v39, %v2887_v29  ;;  %v2359_v15 = vadd.f32 %v5019_v48, %v2001_v52  ;;  %v2859_v47 = vadd.f32 %v6250_v2, %v2356_v62  ;;  %v2893_v5 = vmax.f32 %v2861_v36, 0.0 }
 0x24f   : > { %v2280_v26 = vpop.f32.mrf.mxu1  ;;  %v1512_v52 = vadd.f32 %v7075_v20, %v1330_v8  ;;  %v1333_v29 = vadd.f32 %v7077_v33, %v7076_v55  ;;  %v2008_v48 = vadd.f32 %v7079_v12, %v1650_v60  ;;  %v7087_v8 = vld [vmem:[#allocation10_spill] sm:$0xff]  ;;  %v7090_v20 = vld [vmem:[#allocation63_spill] sm:$0xff]  ;;  %v7091_v33 = vld [vmem:[#allocation52_spill] sm:$0xff] }
 0x250   : > { %v2862_v34 = vadd.f32 %v6250_v2, %v2359_v15  ;;  %v2357_v53 = vadd.f32 %v2280_v26, %v1999_v45  ;;  %v2891_v1 = vmax.f32 %v2859_v47, 0.0  ;;  %v7080_v45 = vld [vmem:[#allocation5_spill] sm:$0xff]  ;;  %v7081_v15 = vld [vmem:[#allocation3_spill] sm:$0xff] }
 0x251   : > { %v5022_v0 = vpop.f32.mrf.mxu1  ;;  %v1510_v36 = vadd.f32 %v7080_v45, %v1322_v40  ;;  %v1325_v3 = vadd.f32 %v7082_v51, %v7081_v15  ;;  %v7088_v40 = vld [vmem:[#allocation7_spill] sm:$0xff] }
 0x252   : > { %v2894_v16 = vmax.f32 %v2862_v34, 0.0  ;;  %v2860_v44 = vadd.f32 %v6250_v2, %v2357_v53  ;;  %v2362_v28 = vadd.f32 %v5022_v0, %v2004_v59  ;;  %v7083_v59 = vld [vmem:[#allocation61_spill] sm:$0xff]  ;;  %v7096_v15 = vld [vmem:[#allocation27_spill] sm:$0xff] }
 0x253   : > { %v2293_v9 = vpop.f32.mrf.mxu1  ;;  %v2006_v47 = vadd.f32 %v7083_v59, %v1648_v38  ;;  %v7084_v34 = vld [vmem:[#allocation9_spill] sm:$0xff] }
 0x254   : > { %v6324_v46 = vpack.c.bf16 %v2894_v16, %v2893_v5  ;;  %v2892_v25 = vmax.f32 %v2860_v44, 0.0  ;;  %v2360_v58 = vadd.f32 %v2293_v9, %v2002_v21  ;;  %v2865_v4 = vadd.f32 %v6250_v2, %v2362_v28  ;;  %v7085_v5 = vld [vmem:[#allocation6_spill] sm:$0xff]  ;;  %v2630_v44 = vpop.f32.mrf.mxu0  ;;  %v7089_v38 = vld [vmem:[#allocation13_spill] sm:$0xff] }
 0x255   : > { %v5023_v31 = vpop.f32.mrf.mxu1  ;;  %v1649_v53 = vadd.f32 %v7084_v34, %v1507_v42  ;;  %v1513_v16 = vadd.f32 %v7085_v5, %v1333_v29  ;;  %v1654_v9 = vadd.f32 %v7087_v8, %v1512_v52  ;;  %v1511_v42 = vadd.f32 %v7088_v40, %v1325_v3  ;;  %v7092_v29 = vld [vmem:[#allocation24_spill] sm:$0xff]  ;;  %v7099_v5 = vld [vmem:[#allocation30_spill] sm:$0xff] }
 0x256   : > { %v6332_v63 = vpack.c.bf16 %v2892_v25, %v2891_v1  ;;  %v2363_v43 = vadd.f32 %v5023_v31, %v2005_v61  ;;  %v2863_v24 = vadd.f32 %v6250_v2, %v2360_v58  ;;  %v2897_v21 = vmax.f32 %v2865_v4, 0.0  ;;  %v7086_v61 = vld [vmem:[#allocation62_spill] sm:$0xff] }
 0x257   : > { %v2296_v39 = vpop.f32.mrf.mxu1  ;;  %v2009_v41 = vadd.f32 %v7086_v61, %v1651_v7  ;;  %v1652_v11 = vadd.f32 %v7089_v38, %v1510_v36  ;;  %v2007_v55 = vadd.f32 %v7090_v20, %v1649_v53  ;;  %v1982_v52 = vadd.f32 %v7092_v29, %v7091_v33  ;;  %v7093_v7 = vld [vmem:[#allocation16_spill] sm:$0xff]  ;;  %v7095_v36 = vld [vmem:[#allocation53_spill] sm:$0xff]  ;;  %v7100_v61 = vld [vmem:[#allocation67_spill] sm:$0xff] }
 0x258   : > { %v2866_v62 = vadd.f32 %v6250_v2, %v2363_v43  ;;  %v2361_v37 = vadd.f32 %v2296_v39, %v2003_v56  ;;  %v2895_v60 = vmax.f32 %v2863_v24, 0.0  ;;  %v5047_v39 = vpop.f32.mrf.mxu0  ;;  %v1655_v24 = vadd.f32 %v7093_v7, %v1513_v16  ;;  %v7105_v33 = vld [vmem:[#allocation71_spill] sm:$0xff] }
 0x259   : > { %v5026_v26 = vpop.f32.mrf.mxu1  ;;  %v1985_v51 = vadd.f32 %v7096_v15, %v7095_v36  ;;  %v2340_v3 = vadd.f32 %v6217_v54, %v1982_v52  ;;  %v2010_v59 = vadd.f32 %v6215_v27, %v1652_v11  ;;  %v7104_v11 = vld [vmem:[#allocation76_spill] sm:$0xff]  ;;  %v7106_v52 = vld [vmem:[#allocation55_spill] sm:$0xff] }
 0x25a   : > { %v2898_v10 = vmax.f32 %v2866_v62, 0.0  ;;  %v2864_v22 = vadd.f32 %v6250_v2, %v2361_v37  ;;  %v2366_v0 = vadd.f32 %v5026_v26, %v2008_v48  ;;  %v7094_v48 = vld [vmem:[#allocation65_spill] sm:$0xff]  ;;  %v7108_v15 = vld [vmem:[#allocation56_spill] sm:$0xff] }
 0x25b   : > { %v2309_v28 = vpop.f32.mrf.mxu1  ;;  %v2012_v45 = vadd.f32 %v7094_v48, %v1654_v9  ;;  %v2633_v9 = vpop.f32.mrf.mxu0 }
 0x25c   : > { %v6353_v1 = vpack.c.bf16 %v2898_v10, %v2897_v21  ;;  %v2896_v25 = vmax.f32 %v2864_v22, 0.0  ;;  %v2364_v58 = vadd.f32 %v2309_v28, %v2006_v47  ;;  %v2869_v4 = vadd.f32 %v6250_v2, %v2366_v0  ;;  %v7097_v47 = vld [vmem:[#allocation19_spill] sm:$0xff]  ;;  %v7098_v0 = vld [vmem:[#allocation54_spill] sm:$0xff] }
 0x25d   : > { %v5027_v31 = vpop.f32.mrf.mxu1  ;;  %v1653_v34 = vadd.f32 %v7097_v47, %v1511_v42  ;;  %v1983_v16 = vadd.f32 %v7099_v5, %v7098_v0  ;;  %v2343_v28 = vadd.f32 %v6219_v35, %v1985_v51  ;;  %v7109_v51 = vld [vmem:[#allocation38_spill] sm:$0xff]  ;;  %v7112_v0 = vld [vmem:[#allocation41_spill] sm:$0xff] }
 0x25e   : > { %v6357_v56 = vpack.c.bf16 %v2896_v25, %v2895_v60  ;;  %v2367_v43 = vadd.f32 %v5027_v31, %v2009_v41  ;;  %v2867_v62 = vadd.f32 %v6250_v2, %v2364_v58  ;;  %v2901_v53 = vmax.f32 %v2869_v4, 0.0  ;;  %v7101_v41 = vld [vmem:[#allocation74_spill] sm:$0xff]  ;;  %v7102_v60 = vld [vmem:[#allocation68_spill] sm:$0xff]  ;;  %v7103_v31 = vld [vmem:[#allocation69_spill] sm:$0xff] }
 0x25f   : > { %v2312_v14 = vpop.f32.mrf.mxu1  ;;  %v2485_v8 = vadd.f32 %v7101_v41, %v7100_v61  ;;  %v2013_v25 = vadd.f32 %v7102_v60, %v1655_v24  ;;  %v2341_v38 = vadd.f32 %v7103_v31, %v1983_v16  ;;  %v2483_v4 = vadd.f32 %v7104_v11, %v2340_v3  ;;  %v7114_v41 = vld [vmem:[#allocation70_spill] sm:$0xff] }
 0x260   : > { %v2870_v37 = vadd.f32 %v6250_v2, %v2367_v43  ;;  %v2365_v12 = vadd.f32 %v2312_v14, %v2007_v55  ;;  %v2899_v27 = vmax.f32 %v2867_v62, 0.0  ;;  %v2011_v29 = vadd.f32 %v7105_v33, %v1653_v34  ;;  %v7107_v14 = vld [vmem:[#allocation35_spill] sm:$0xff]  ;;  %v5050_v62 = vpop.f32.mrf.mxu0 }
 0x261   : > { %v5030_v26 = vpop.f32.mrf.mxu1  ;;  %v1986_v7 = vadd.f32 %v7107_v14, %v7106_v52  ;;  %v2486_v24 = vadd.f32 %v6257_v32, %v2343_v28  ;;  %v1989_v3 = vadd.f32 %v7109_v51, %v7108_v15  ;;  %v2484_v34 = vadd.f32 %v6268_v57, %v2341_v38  ;;  %v7113_v28 = vld [vmem:[#allocation73_spill] sm:$0xff] }
 0x262   : > { %v2902_v21 = vmax.f32 %v2870_v37, 0.0  ;;  %v2868_v10 = vadd.f32 %v6250_v2, %v2365_v12  ;;  %v2370_v22 = vadd.f32 %v5030_v26, %v2012_v45  ;;  %v2663_v12 = vadd.f32 %v6338_v18, %v2485_v8  ;;  %v7111_v18 = vld [vmem:[#allocation57_spill] sm:$0xff] }
 0x263   : > { %v2325_v54 = vpop.f32.mrf.mxu1  ;;  %v2661_v26 = vadd.f32 %v2630_v44, %v2483_v4  ;;  %v1987_v5 = vadd.f32 %v7112_v0, %v7111_v18  ;;  %v2664_v16 = vadd.f32 %v5047_v39, %v2486_v24  ;;  %v2347_v61 = vadd.f32 %v7113_v28, %v1989_v3  ;;  %v2646_v44 = vpop.f32.mrf.mxu0  ;;  %v7116_v28 = vld [vmem:[#allocation58_spill] sm:$0xff] }
 0x264   : > { %v6379_v58 = vpack.c.bf16 %v2902_v21, %v2901_v53  ;;  %v2900_v40 = vmax.f32 %v2868_v10, 0.0  ;;  %v2368_v42 = vadd.f32 %v2325_v54, %v2010_v59  ;;  %v2873_v35 = vadd.f32 %v6250_v2, %v2370_v22  ;;  %v7110_v59 = vld [vmem:[#allocation72_spill] sm:$0xff] }
 0x265   : > { %v5031_v43 = vpop.f32.mrf.mxu1  ;;  %v2344_v47 = vadd.f32 %v7110_v59, %v1986_v7  ;;  %v2489_v8 = vadd.f32 %v6277_v17, %v7114_v41  ;;  %v2662_v11 = vadd.f32 %v2633_v9, %v2484_v34  ;;  %v2490_v17 = vadd.f32 %v6304_v13, %v2347_v61  ;;  %v6428_v41 = vld [vmem:[%s6994_s5 + $0x38] sm:$0xff]  }
 0x266   : > { %v6383_v20 = vpack.c.bf16 %v2900_v40, %v2899_v27  ;;  %v2371_v55 = vadd.f32 %v5031_v43, %v2013_v25  ;;  %v2871_v48 = vadd.f32 %v6250_v2, %v2368_v42  ;;  %v2905_v21 = vmax.f32 %v2873_v35, 0.0  ;;  %v7115_v40 = vld [vmem:[#allocation75_spill] sm:$0xff]  ;;  %v5051_v35 = vpop.f32.mrf.mxu0 }
 0x267   : > { %v2328_v37 = vpop.f32.mrf.mxu1  ;;  %v2345_v42 = vadd.f32 %v7115_v40, %v1987_v5  ;;  %v2487_v31 = vadd.f32 %v6290_v23, %v2344_v47  ;;  %v2667_v33 = vadd.f32 %v5050_v62, %v2489_v8 }
 0x268   : > { %v2874_v45 = vadd.f32 %v6250_v2, %v2371_v55  ;;  %v2369_v36 = vadd.f32 %v2328_v37, %v2011_v29  ;;  %v2903_v60 = vmax.f32 %v2871_v48, 0.0 }
 0x269   : > { %v5056_v53 = vpop.f32.mrf.mxu1  ;;  %v2665_v7 = vadd.f32 %v2646_v44, %v2487_v31  ;;  %v2488_v23 = vadd.f32 %v6321_v6, %v2345_v42 }
 0x26a   : > { %v2906_v32 = vmax.f32 %v2874_v45, 0.0  ;;  %v2872_v10 = vadd.f32 %v6250_v2, %v2369_v36  ;;  %v2805_v22 = vadd.f32 %v5056_v53, %v2663_v12  ;;  %v2668_v45 = vadd.f32 %v5051_v35, %v2490_v17  ;;  %v2649_v36 = vpop.f32.mrf.mxu0 }
 0x26b   : > { %v2772_v54 = vpop.f32.mrf.mxu1  ;;  %v2666_v59 = vadd.f32 %v2649_v36, %v2488_v23 }
 0x26c   : > { %v6403_v25 = vpack.c.bf16 %v2906_v32, %v2905_v21  ;;  %v2904_v57 = vmax.f32 %v2872_v10, 0.0  ;;  %v2803_v27 = vadd.f32 %v2772_v54, %v2661_v26  ;;  %v2845_v39 = vadd.f32 %v6250_v2, %v2805_v22  ;;  %v5315_v21 = vld [vmem:[%s6994_s5 + $0x20] sm:$0xff]  }
 0x26d   : > { %v5057_v38 = vpop.f32.mrf.mxu1 }
 0x26e   : > { %v6407_v4 = vpack.c.bf16 %v2904_v57, %v2903_v60  ;;  %v2806_v43 = vadd.f32 %v5057_v38, %v2664_v16  ;;  %v2843_v29 = vadd.f32 %v6250_v2, %v2803_v27  ;;  %v2877_v9 = vmax.f32 %v2845_v39, 0.0 }
 0x26f   : > { %v2775_v55 = vpop.f32.mrf.mxu1 }
 0x270   : > { %v2846_v52 = vadd.f32 %v6250_v2, %v2806_v43  ;;  %v2804_v14 = vadd.f32 %v2775_v55, %v2662_v11  ;;  %v2875_v15 = vmax.f32 %v2843_v29, 0.0 }
 0x271   : > { %v5060_v24 = vpop.f32.mrf.mxu1 }
 0x272   : > { %v2878_v37 = vmax.f32 %v2846_v52, 0.0  ;;  %v2844_v12 = vadd.f32 %v6250_v2, %v2804_v14  ;;  %v2809_v48 = vadd.f32 %v5060_v24, %v2667_v33 }
 0x273   : > { %v2788_v13 = vpop.f32.mrf.mxu1 }
 0x274   : > { %v2908_v51 = vpack.c.bf16 %v2878_v37, %v2877_v9  ;;  %v2876_v62 = vmax.f32 %v2844_v12, 0.0  ;;  %v2807_v3 = vadd.f32 %v2788_v13, %v2665_v7  ;;  %v2849_v34 = vadd.f32 %v6250_v2, %v2809_v48 }
 0x275   : > { %v5061_v26 = vpop.f32.mrf.mxu1 }
 0x276   : > { %v2907_v47 = vpack.c.bf16 %v2876_v62, %v2875_v15  ;;  %v2810_v53 = vadd.f32 %v5061_v26, %v2668_v45  ;;  %v2847_v32 = vadd.f32 %v6250_v2, %v2807_v3  ;;  %v2881_v0 = vmax.f32 %v2849_v34, 0.0 }
 0x277   : > { %v2791_v6 = vpop.f32.mrf.mxu1 }
 0x278   : > { %v2850_v10 = vadd.f32 %v6250_v2, %v2810_v53  ;;  %v2808_v22 = vadd.f32 %v2791_v6, %v2666_v59  ;;  %5066 = vmatprep.mubr.msk.bf16.mxu0 %vm819_vm4, %v2907_v47  ;;  %v2879_v8 = vmax.f32 %v2847_v32, 0.0 }
 0x279   : > { %5067 = vmatmul.mubr.msk.bf16.vlgmr.msra.gmra.mxu0 %vm819_vm4, %v2908_v51  ;;  %v5102_v18 = vpop.f32.mrf.mxu1 }
 0x27a   : > { %v2882_v5 = vmax.f32 %v2850_v10, 0.0  ;;  %v2848_v16 = vadd.f32 %v6250_v2, %v2808_v22  ;;  %5133 = vmatpush3.bf16.msra.mxu0 %v7116_v28 }
 0x27b   : > { %5134 = vmatprep.subr.bf16.mxu0 %v5315_v21  ;;  %v3228_v61 = vpop.f32.mrf.mxu1 }
 0x27c   : > { %v2910_v44 = vpack.c.bf16 %v2882_v5, %v2881_v0  ;;  %v2880_v54 = vmax.f32 %v2848_v16, 0.0 }
 0x27d   : > { %v5103_v60 = vpop.f32.mrf.mxu1 }
 0x27e   : > { %v2909_v57 = vpack.c.bf16 %v2880_v54, %v2879_v8  ;;  %5135 = vmatpush3.bf16.msra.mxu0 %v5315_v21  ;;  %v5317_v21 = vld [vmem:[%s6994_s5 + $0x30] sm:$0xff]  }
 0x27f   : > { %v3231_v27 = vpop.f32.mrf.mxu1  ;;  %5202 = vmatprep.subr.bf16.mxu0 %v6428_v41 }
 0x280   : > { %5070 = vmatprep.mubr.msk.bf16.mxu0 %vm819_vm4, %v2909_v57 }
 0x281   : > { %5071 = vmatmul.mubr.msk.bf16.gmra.mxu0 %vm819_vm4, %v2910_v44  ;;  %v5106_v2 = vpop.f32.mrf.mxu1 }
 0x282   : > { %5074 = vmatprep.mubr.msk.bf16.mxu0 %vm819_vm4, %v6274_v49 }
 0x283   : > { %v3244_v40 = vpop.f32.mrf.mxu1 }
 0x285   : > { %v5107_v42 = vpop.f32.mrf.mxu1 }
 0x287   : > { %v3247_v31 = vpop.f32.mrf.mxu1 }
 0x289   : > { %5075 = vmatmul.mubr.msk.bf16.gmra.mxu0 %vm819_vm4, %v6270_v19  ;;  %v6437_v38 = vpop.f32.mrf.mxu1 }
 0x28a   : > { %5078 = vmatprep.mubr.msk.bf16.mxu0 %vm819_vm4, %v6298_v30 }
 0x28b   : > { %v3260_v11 = vpop.f32.mrf.mxu1 }
 0x28d   : > { %v6441_v39 = vpop.f32.mrf.mxu1 }
 0x28f   : > { %v3263_v43 = vpop.f32.mrf.mxu1 }
 0x291   : > { %5079 = vmatmul.mubr.msk.bf16.gmra.mxu0 %vm819_vm4, %v6292_v50  ;;  %v6445_v17 = vpop.f32.mrf.mxu1 }
 0x292   : > { %5082 = vmatprep.mubr.msk.bf16.mxu0 %vm819_vm4, %v6332_v63 }
 0x293   : > { %v3276_v49 = vpop.f32.mrf.mxu1 }
 0x295   : > { %v6449_v35 = vpop.f32.mrf.mxu1 }
 0x297   : > { %v3279_v19 = vpop.f32.mrf.mxu1 }
 0x299   : > { %5083 = vmatmul.mubr.msk.bf16.gmra.mxu0 %vm819_vm4, %v6324_v46  ;;  %v6453_v30 = vpop.f32.mrf.mxu1  ;;  %v6472_v46 = vld [vmem:[%s6992_s3 + $0x2] ss:$0 sm:$0xff] }
 0x29a   : > { %5086 = vmatprep.mubr.msk.bf16.mxu0 %vm819_vm4, %v6357_v56  ;;  %v3229_v52 = vadd.f32 %v6472_v46, %v3228_v61  ;;  %v3232_v14 = vadd.f32 %v6472_v46, %v3231_v27  ;;  %v3245_v12 = vadd.f32 %v6472_v46, %v3244_v40  ;;  %v3248_v48 = vadd.f32 %v6472_v46, %v3247_v31 }
 0x29b   : > { %v6457_v55 = vpop.f32.mrf.mxu1  ;;  %v3237_v45 = vadd.f32 %v5102_v18, %v6472_v46  ;;  %v3261_v47 = vadd.f32 %v6472_v46, %v3260_v11  ;;  %v3264_v34 = vadd.f32 %v6472_v46, %v3263_v43  ;;  %v3256_v6 = vadd.f32 %v5107_v42, %v6472_v46 }
 0x29c   : > { %v3356_v23 = vmax.f32 %v3232_v14, 0.0  ;;  %v3359_v13 = vmax.f32 %v3245_v12, 0.0  ;;  %v3360_v15 = vmax.f32 %v3248_v48, 0.0  ;;  %v3277_v8 = vadd.f32 %v6472_v46, %v3276_v49 }
 0x29d   : > { %v6459_v50 = vpop.f32.mrf.mxu1  ;;  %v3357_v51 = vmax.f32 %v3237_v45, 0.0  ;;  %v3363_v22 = vmax.f32 %v3261_v47, 0.0  ;;  %v3364_v18 = vmax.f32 %v3264_v34, 0.0  ;;  %v3362_v5 = vmax.f32 %v3256_v6, 0.0 }
 0x29e   : > { %v3389_v59 = vpack.c.bf16 %v3360_v15, %v3359_v13  ;;  %v3280_v44 = vadd.f32 %v6472_v46, %v3279_v19  ;;  %v3288_v14 = vadd.f32 %v6449_v35, %v6472_v46  ;;  %v3301_v15 = vadd.f32 %v6453_v30, %v6472_v46 }
 0x29f   : > { %v6461_v33 = vpop.f32.mrf.mxu1  ;;  %v3391_v61 = vpack.c.bf16 %v3364_v18, %v3363_v22 }
 0x2a0   : > { %v3368_v40 = vmax.f32 %v3280_v44, 0.0  ;;  %v3296_v49 = vadd.f32 %v6472_v46, %v6461_v33  ;;  %v3370_v48 = vmax.f32 %v3288_v14, 0.0  ;;  %v3373_v34 = vmax.f32 %v3301_v15, 0.0 }
 0x2a1   : > { %5087 = vmatmul.mubr.msk.bf16.gmra.mxu0 %vm819_vm4, %v6353_v1  ;;  %v6465_v63 = vpop.f32.mrf.mxu1 }
 0x2a2   : > { %5090 = vmatprep.mubr.msk.bf16.mxu0 %vm819_vm4, %v6383_v20  ;;  %v3355_v20 = vmax.f32 %v3229_v52, 0.0  ;;  %v3285_v52 = vadd.f32 %v6445_v17, %v6472_v46 }
 0x2a3   : > { %v6474_v56 = vpop.f32.mrf.mxu1 }
 0x2a4   : > { %v3387_v37 = vpack.c.bf16 %v3356_v23, %v3355_v20  ;;  %v3369_v12 = vmax.f32 %v3285_v52, 0.0  ;;  %v3309_v35 = vadd.f32 %v6472_v46, %v6474_v56 }
 0x2a5   : > { %v6476_v29 = vpop.f32.mrf.mxu1 }
 0x2a6   : > { %v3394_v13 = vpack.c.bf16 %v3370_v48, %v3369_v12  ;;  %v3375_v47 = vmax.f32 %v3309_v35, 0.0  ;;  %v3320_v22 = vadd.f32 %v6476_v29, %v6472_v46 }
 0x2a7   : > { %v6480_v7 = vpop.f32.mrf.mxu1 }
 0x2a9   : > { %5091 = vmatmul.mubr.msk.bf16.gmra.mxu0 %vm819_vm4, %v6379_v58  ;;  %v6484_v1 = vpop.f32.mrf.mxu1  ;;  %v3240_v58 = vadd.f32 %v5103_v60, %v6472_v46  ;;  %v3272_v60 = vadd.f32 %v6441_v39, %v6472_v46  ;;  %v3293_v39 = vadd.f32 %v6472_v46, %v6457_v55  ;;  %v3372_v55 = vmax.f32 %v3296_v49, 0.0 }
 0x2aa   : > { %5094 = vmatprep.mubr.msk.bf16.mxu0 %vm819_vm4, %v6407_v4  ;;  %v3333_v29 = vadd.f32 %v6484_v1, %v6472_v46 }
 0x2ab   : > { %v6488_v24 = vpop.f32.mrf.mxu1  ;;  %v3358_v62 = vmax.f32 %v3240_v58, 0.0  ;;  %v3366_v31 = vmax.f32 %v3272_v60, 0.0  ;;  %v3312_v58 = vadd.f32 %v6472_v46, %v6480_v7 }
 0x2ac   : > { %v3325_v30 = vadd.f32 %v6472_v46, %v6488_v24  ;;  %v3378_v24 = vmax.f32 %v3320_v22, 0.0 }
 0x2ad   : > { %v6490_v9 = vpop.f32.mrf.mxu1  ;;  %v3388_v53 = vpack.c.bf16 %v3358_v62, %v3357_v51  ;;  %v3304_v51 = vadd.f32 %v6459_v50, %v6472_v46  ;;  %v3376_v56 = vmax.f32 %v3312_v58, 0.0 }
 0x2af   : > { %v6496_v36 = vpop.f32.mrf.mxu1 }
 0x2b0   : > { %v3328_v50 = vadd.f32 %v6472_v46, %v6496_v36 }
 0x2b1   : > { %5095 = vmatmul.mubr.msk.bf16.gmra.mxu0 %vm819_vm4, %v6403_v25  ;;  %v6500_v4 = vpop.f32.mrf.mxu1  ;;  %v3253_v25 = vadd.f32 %v5106_v2, %v6472_v46  ;;  %v3367_v2 = vmax.f32 %v3277_v8, 0.0 }
 0x2b2   : > { %5136 = vmatprep.mubr.msk.bf16.mxu0 %vm819_vm4, %v3387_v37  ;;  %v3371_v37 = vmax.f32 %v3293_v39, 0.0  ;;  %v3349_v49 = vadd.f32 %v6500_v4, %v6472_v46 }
 0x2b3   : > { %v6503_v3 = vpop.f32.mrf.mxu1  ;;  %v3361_v0 = vmax.f32 %v3253_v25, 0.0  ;;  %v3397_v25 = vpack.c.bf16 %v3376_v56, %v3375_v47 }
 0x2b4   : > { %v3395_v17 = vpack.c.bf16 %v3372_v55, %v3371_v37  ;;  %v3341_v36 = vadd.f32 %v6472_v46, %v6503_v3  ;;  %v3385_v55 = vmax.f32 %v3349_v49, 0.0 }
 0x2b5   : > { %v6505_v26 = vpop.f32.mrf.mxu1  ;;  %v3390_v54 = vpack.c.bf16 %v3362_v5, %v3361_v0  ;;  %v3379_v0 = vmax.f32 %v3325_v30, 0.0  ;;  %v3380_v5 = vmax.f32 %v3328_v50, 0.0 }
 0x2b7   : > { %v6514_v32 = vpop.f32.mrf.mxu1  ;;  %v3399_v44 = vpack.c.bf16 %v3380_v5, %v3379_v0 }
 0x2b9   : > { %5137 = vmatmul.mubr.msk.bf16.vlgmr.msra.gmra.mxu0 %vm819_vm4, %v3388_v53  ;;  %v6517_v10 = vpop.f32.mrf.mxu1  ;;  %v3374_v53 = vmax.f32 %v3304_v51, 0.0 }
 0x2ba   : > { %5203 = vmatpush3.bf16.msra.mxu0 %v6428_v41  ;;  %5140 = vmatprep.mubr.msk.bf16.mxu0 %vm819_vm4, %v3389_v59  ;;  %v3269_v41 = vadd.f32 %v6437_v38, %v6472_v46  ;;  %v3393_v38 = vpack.c.bf16 %v3368_v40, %v3367_v2  ;;  %v3383_v2 = vmax.f32 %v3341_v36, 0.0 }
 0x2bb   : > { %5204 = vmatprep.subr.bf16.mxu0 %v5317_v21  ;;  %v6521_v16 = vpop.f32.mrf.mxu1  ;;  %v3396_v6 = vpack.c.bf16 %v3374_v53, %v3373_v34 }
 0x2bc   : > { %v3365_v42 = vmax.f32 %v3269_v41, 0.0  ;;  %v3336_v41 = vadd.f32 %v6490_v9, %v6472_v46 }
 0x2bd   : > { %v6523_v28 = vpop.f32.mrf.mxu1 }
 0x2be   : > { %5205 = vmatpush3.bf16.msra.mxu0 %v5317_v21  ;;  %v3392_v19 = vpack.c.bf16 %v3366_v31, %v3365_v42  ;;  %v3317_v21 = vadd.f32 %v6465_v63, %v6472_v46  ;;  %v3344_v63 = vadd.f32 %v6472_v46, %v6514_v32  ;;  %v3381_v42 = vmax.f32 %v3333_v29, 0.0  ;;  %v6602_v32 = vld [vmem:[%s6992_s3 + $0x3] ss:$0 sm:$0xff] }
 0x2bf   : > { %v6531_v57 = vpop.f32.mrf.mxu1  ;;  %v3382_v3 = vmax.f32 %v3336_v41, 0.0  ;;  %v3709_v9 = vadd.f32 %v6602_v32, %v6521_v16 }
 0x2c0   : > { %v3384_v40 = vmax.f32 %v3344_v63, 0.0 }
 0x2c1   : > { %5141 = vmatmul.mubr.msk.bf16.gmra.mxu0 %vm819_vm4, %v3390_v54  ;;  %v6534_v27 = vpop.f32.mrf.mxu1  ;;  %v3400_v39 = vpack.c.bf16 %v3382_v3, %v3381_v42  ;;  %v3835_v14 = vmax.f32 %v3709_v9, 0.0 }
 0x2c2   : > { %5144 = vmatprep.mubr.msk.bf16.mxu0 %vm819_vm4, %v3391_v61  ;;  %v3377_v61 = vmax.f32 %v3317_v21, 0.0  ;;  %v3401_v1 = vpack.c.bf16 %v3384_v40, %v3383_v2 }
 0x2c3   : > { %v6537_v11 = vpop.f32.mrf.mxu1 }
 0x2c4   : > { %v3398_v54 = vpack.c.bf16 %v3378_v24, %v3377_v61 }
 0x2c5   : > { %v6539_v43 = vpop.f32.mrf.mxu1 }
 0x2c6   : > { %v3736_v34 = vadd.f32 %v6539_v43, %v6602_v32 }
 0x2c7   : > { %v6549_v20 = vpop.f32.mrf.mxu1 }
 0x2c8   : > { %v3728_v4 = vadd.f32 %v6602_v32, %v6549_v20 }
 0x2c9   : > { %5145 = vmatmul.mubr.msk.bf16.gmra.mxu0 %vm819_vm4, %v3392_v19  ;;  %v6552_v23 = vpop.f32.mrf.mxu1  ;;  %v3352_v19 = vadd.f32 %v6505_v26, %v6472_v46  ;;  %v3717_v46 = vadd.f32 %v6517_v10, %v6602_v32  ;;  %v3720_v26 = vadd.f32 %v6523_v28, %v6602_v32  ;;  %v3733_v28 = vadd.f32 %v6534_v27, %v6602_v32 }
 0x2ca   : > { %5148 = vmatprep.mubr.msk.bf16.mxu0 %vm819_vm4, %v3393_v38  ;;  %v3712_v38 = vadd.f32 %v6602_v32, %v6531_v57  ;;  %v3725_v57 = vadd.f32 %v6602_v32, %v6537_v11  ;;  %v3749_v43 = vadd.f32 %v6552_v23, %v6602_v32 }
 0x2cb   : > { %v6555_v33 = vpop.f32.mrf.mxu1  ;;  %v3386_v16 = vmax.f32 %v3352_v19, 0.0  ;;  %v3837_v15 = vmax.f32 %v3717_v46, 0.0  ;;  %v3838_v11 = vmax.f32 %v3720_v26, 0.0  ;;  %v3841_v50 = vmax.f32 %v3733_v28, 0.0 }
 0x2cc   : > { %v3836_v37 = vmax.f32 %v3712_v38, 0.0  ;;  %v3839_v58 = vmax.f32 %v3725_v57, 0.0  ;;  %v3741_v20 = vadd.f32 %v6602_v32, %v6555_v33 }
 0x2cd   : > { %v6557_v45 = vpop.f32.mrf.mxu1  ;;  %v3868_v56 = vpack.c.bf16 %v3838_v11, %v3837_v15 }
 0x2ce   : > { %v3867_v48 = vpack.c.bf16 %v3836_v37, %v3835_v14  ;;  %v3752_v0 = vadd.f32 %v6557_v45, %v6602_v32 }
 0x2cf   : > { %v6567_v62 = vpop.f32.mrf.mxu1 }
 0x2d0   : > { %v3744_v10 = vadd.f32 %v6602_v32, %v6567_v62  ;;  %v3846_v36 = vmax.f32 %v3752_v0, 0.0 }
 0x2d1   : > { %5149 = vmatmul.mubr.msk.bf16.gmra.mxu0 %vm819_vm4, %v3394_v13  ;;  %v6570_v59 = vpop.f32.mrf.mxu1  ;;  %v3840_v13 = vmax.f32 %v3728_v4, 0.0 }
 0x2d2   : > { %5152 = vmatprep.mubr.msk.bf16.mxu0 %vm819_vm4, %v3395_v17  ;;  %v3402_v17 = vpack.c.bf16 %v3386_v16, %v3385_v55  ;;  %v3844_v30 = vmax.f32 %v3744_v10, 0.0  ;;  %v3765_v23 = vadd.f32 %v6570_v59, %v6602_v32 }
 0x2d3   : > { %v6573_v7 = vpop.f32.mrf.mxu1  ;;  %v3869_v47 = vpack.c.bf16 %v3840_v13, %v3839_v58 }
 0x2d4   : > { %v3757_v62 = vadd.f32 %v6602_v32, %v6573_v7  ;;  %v3849_v42 = vmax.f32 %v3765_v23, 0.0 }
 0x2d5   : > { %v6583_v18 = vpop.f32.mrf.mxu1 }
 0x2d6   : > { %v3847_v61 = vmax.f32 %v3757_v62, 0.0  ;;  %v3768_v45 = vadd.f32 %v6583_v18, %v6602_v32 }
 0x2d7   : > { %v3759_v8 = vpop.f32.mrf.mxu1 }
 0x2d8   : > { %v3760_v22 = vadd.f32 %v6602_v32, %v3759_v8  ;;  %v3850_v3 = vmax.f32 %v3768_v45, 0.0  ;;  %v7121_v45 = vld [vmem:[#allocation17_spill] sm:$0xff] }
 0x2d9   : > { %5153 = vmatmul.mubr.msk.bf16.gmra.mxu0 %vm819_vm4, %v3396_v6  ;;  %v6595_v60 = vpop.f32.mrf.mxu1  ;;  %v3842_v6 = vmax.f32 %v3736_v34, 0.0 }
 0x2da   : > { %5156 = vmatprep.mubr.msk.bf16.mxu0 %vm819_vm4, %v3397_v25  ;;  %v3843_v25 = vmax.f32 %v3741_v20, 0.0  ;;  %v3848_v24 = vmax.f32 %v3760_v22, 0.0  ;;  %v3781_v59 = vadd.f32 %v6595_v60, %v6602_v32  ;;  %v6685_v22 = vld [vmem:[%s260_s10] ss:$0 sm:$0xff] }
 0x2db   : > { %v3772_v31 = vpop.f32.mrf.mxu1  ;;  %v3870_v27 = vpack.c.bf16 %v3842_v6, %v3841_v50 }
 0x2dc   : > { %v3871_v21 = vpack.c.bf16 %v3844_v30, %v3843_v25  ;;  %v3873_v7 = vpack.c.bf16 %v3848_v24, %v3847_v61  ;;  %v3773_v8 = vadd.f32 %v6602_v32, %v3772_v31  ;;  %v3853_v37 = vmax.f32 %v3781_v59, 0.0 }
 0x2dd   : > { %v6612_v52 = vpop.f32.mrf.mxu1 }
 0x2de   : > { %v3851_v2 = vmax.f32 %v3773_v8, 0.0  ;;  %v3784_v18 = vadd.f32 %v6612_v52, %v6602_v32  ;;  %v7120_v8 = vld [vmem:[#allocation15_spill] sm:$0xff] }
 0x2df   : > { %v3775_v12 = vpop.f32.mrf.mxu1 }
 0x2e0   : > { %v3854_v55 = vmax.f32 %v3784_v18, 0.0  ;;  %v7124_v18 = vld [vmem:[#allocation21_spill] sm:$0xff] }
 0x2e1   : > { %5157 = vmatmul.mubr.msk.bf16.gmra.mxu0 %vm819_vm4, %v3398_v54  ;;  %v6624_v35 = vpop.f32.mrf.mxu1  ;;  %v3776_v54 = vadd.f32 %v6602_v32, %v3775_v12 }
 0x2e2   : > { %5160 = vmatprep.mubr.msk.bf16.mxu0 %vm819_vm4, %v3399_v44  ;;  %v3845_v44 = vmax.f32 %v3749_v43, 0.0  ;;  %v3876_v4 = vpack.c.bf16 %v3854_v55, %v3853_v37  ;;  %v3797_v60 = vadd.f32 %v6624_v35, %v6602_v32  ;;  %v7125_v37 = vld [vmem:[#allocation22_spill] sm:$0xff] }
 0x2e3   : > { %v3788_v51 = vpop.f32.mrf.mxu1  ;;  %v3852_v40 = vmax.f32 %v3776_v54, 0.0  ;;  %v1030_v54 = vadd.f32 %v6685_v22, %v7120_v8  ;;  %v1039_v55 = vadd.f32 %v7125_v37, %v6685_v22  ;;  %v7139_v37 = vld [vmem:[#allocation42_spill] sm:$0xff] }
 0x2e4   : > { %v3872_v29 = vpack.c.bf16 %v3846_v36, %v3845_v44  ;;  %v3789_v9 = vadd.f32 %v6602_v32, %v3788_v51  ;;  %v3857_v58 = vmax.f32 %v3797_v60, 0.0  ;;  %v7119_v44 = vld [vmem:[#allocation14_spill] sm:$0xff] }
 0x2e5   : > { %v5193_v53 = vpop.f32.mrf.mxu1  ;;  %v3875_v31 = vpack.c.bf16 %v3852_v40, %v3851_v2  ;;  %v1032_v36 = vadd.f32 %v7119_v44, %v6685_v22 }
 0x2e6   : > { %v3855_v19 = vmax.f32 %v3789_v9, 0.0  ;;  %v3800_v52 = vadd.f32 %v5193_v53, %v6602_v32  ;;  %v7123_v9 = vld [vmem:[#allocation20_spill] sm:$0xff] }
 0x2e7   : > { %v3791_v33 = vpop.f32.mrf.mxu1 }
 0x2e8   : > { %v3792_v38 = vadd.f32 %v6602_v32, %v3791_v33  ;;  %v3858_v13 = vmax.f32 %v3800_v52, 0.0  ;;  %v7127_v52 = vld [vmem:[#allocation25_spill] sm:$0xff] }
 0x2e9   : > { %5161 = vmatmul.mubr.msk.bf16.gmra.mxu0 %vm819_vm4, %v3400_v39  ;;  %v5196_v5 = vpop.f32.mrf.mxu1  ;;  %v3874_v39 = vpack.c.bf16 %v3850_v3, %v3849_v42  ;;  %v7122_v42 = vld [vmem:[#allocation18_spill] sm:$0xff] }
 0x2ea   : > { %5164 = vmatprep.mubr.msk.bf16.mxu0 %vm819_vm4, %v3401_v1  ;;  %v3856_v14 = vmax.f32 %v3792_v38, 0.0  ;;  %v3878_v20 = vpack.c.bf16 %v3858_v13, %v3857_v58  ;;  %v3813_v35 = vadd.f32 %v5196_v5, %v6602_v32  ;;  %v1033_v3 = vadd.f32 %v6685_v22, %v7122_v42  ;;  %v7128_v58 = vld [vmem:[#allocation26_spill] sm:$0xff] }
 0x2eb   : > { %v3804_v63 = vpop.f32.mrf.mxu1  ;;  %v1036_v38 = vadd.f32 %v7123_v9, %v6685_v22  ;;  %v1038_v13 = vadd.f32 %v6685_v22, %v7128_v58 }
 0x2ec   : > { %v3877_v12 = vpack.c.bf16 %v3856_v14, %v3855_v19  ;;  %v3861_v34 = vmax.f32 %v3813_v35, 0.0 }
 0x2ed   : > { %v5197_v41 = vpop.f32.mrf.mxu1 }
 0x2ee   : > { %v3816_v10 = vadd.f32 %v5197_v41, %v6602_v32  ;;  %v1035_v41 = vadd.f32 %v7121_v45, %v6685_v22  ;;  %v7136_v45 = vld [vmem:[#allocation37_spill] sm:$0xff] }
 0x2ef   : > { %v3807_v1 = vpop.f32.mrf.mxu1 }
 0x2f0   : > { %v3808_v57 = vadd.f32 %v6602_v32, %v3807_v1  ;;  %v3862_v53 = vmax.f32 %v3816_v10, 0.0  ;;  %v7130_v10 = vld [vmem:[#allocation29_spill] sm:$0xff] }
 0x2f1   : > { %5165 = vmatmul.mubr.msk.bf16.gmra.mxu0 %vm819_vm4, %v3402_v17  ;;  %v5200_v49 = vpop.f32.mrf.mxu1 }
 0x2f2   : > { %5206 = vmatprep.mubr.msk.bf16.mxu0 %vm819_vm4, %v3867_v48  ;;  %v3805_v48 = vadd.f32 %v6602_v32, %v3804_v63  ;;  %v3860_v26 = vmax.f32 %v3808_v57, 0.0  ;;  %v3880_v30 = vpack.c.bf16 %v3862_v53, %v3861_v34  ;;  %v3829_v50 = vadd.f32 %v5200_v49, %v6602_v32  ;;  %v7131_v53 = vld [vmem:[#allocation31_spill] sm:$0xff] }
 0x2f3   : > { %v3820_v16 = vpop.f32.mrf.mxu1  ;;  %v1034_v49 = vadd.f32 %v6685_v22, %v7124_v18 }
 0x2f4   : > { %v3859_v46 = vmax.f32 %v3805_v48, 0.0  ;;  %v3821_v51 = vadd.f32 %v6602_v32, %v3820_v16  ;;  %v3865_v33 = vmax.f32 %v3829_v50, 0.0  ;;  %v7126_v48 = vld [vmem:[#allocation23_spill] sm:$0xff] }
 0x2f5   : > { %v5201_v17 = vpop.f32.mrf.mxu1  ;;  %v1037_v57 = vadd.f32 %v6685_v22, %v7126_v48 }
 0x2f6   : > { %v3879_v11 = vpack.c.bf16 %v3860_v26, %v3859_v46  ;;  %v3832_v6 = vadd.f32 %v5201_v17, %v6602_v32  ;;  %v1040_v17 = vadd.f32 %v7127_v52, %v6685_v22 }
 0x2f7   : > { %v3823_v15 = vpop.f32.mrf.mxu1 }
 0x2f9   : > { %5207 = vmatmul.mubr.msk.bf16.vlgmr.msra.gmra.mxu0 %vm819_vm4, %v3868_v56  ;;  %v3863_v56 = vmax.f32 %v3821_v51, 0.0  ;;  %v7129_v51 = vld [vmem:[#allocation28_spill] sm:$0xff] }
 0x2fa   : > { %5210 = vmatprep.mubr.msk.bf16.mxu0 %vm819_vm4, %v3869_v47  ;;  %v3824_v47 = vadd.f32 %v6602_v32, %v3823_v15  ;;  %v7118_v32 = vld [vmem:[#allocation12_spill] sm:$0xff] }
 0x2fb   : > { %v1029_v5 = vadd.f32 %v6685_v22, %v7118_v32 }
 0x2fc   : > { %v3864_v28 = vmax.f32 %v3824_v47, 0.0  ;;  %v1043_v47 = vadd.f32 %v7129_v51, %v6685_v22  ;;  %v7142_v51 = vld [vmem:[#allocation45_spill] sm:$0xff] }
 0x2fe   : > { %v3881_v25 = vpack.c.bf16 %v3864_v28, %v3863_v56  ;;  %v1041_v56 = vadd.f32 %v6685_v22, %v7130_v10 }
 0x301   : > { %5211 = vmatmul.mubr.msk.bf16.gmra.mxu0 %vm819_vm4, %v3870_v27  ;;  %v7117_v27 = vld [vmem:[#allocation11_spill] sm:$0xff] }
 0x302   : > { %5214 = vmatprep.mubr.msk.bf16.mxu0 %vm819_vm4, %v3871_v21  ;;  %v3866_v21 = vmax.f32 %v3832_v6, 0.0  ;;  %v1031_v43 = vadd.f32 %v7117_v27, %v6685_v22  ;;  %v7132_v6 = vld [vmem:[#allocation32_spill] sm:$0xff]  ;;  %v7133_v27 = vld [vmem:[#allocation33_spill] sm:$0xff] }
 0x304   : > { %v3882_v62 = vpack.c.bf16 %v3866_v21, %v3865_v33  ;;  %v1042_v33 = vadd.f32 %v6685_v22, %v7132_v6 }
 0x309   : > { %5215 = vmatmul.mubr.msk.bf16.gmra.mxu0 %vm819_vm4, %v3872_v29 }
 0x30a   : > { %5218 = vmatprep.mubr.msk.bf16.mxu0 %vm819_vm4, %v3873_v7 }
 0x311   : > { %5219 = vmatmul.mubr.msk.bf16.gmra.mxu0 %vm819_vm4, %v3874_v39 }
 0x312   : > { %5222 = vmatprep.mubr.msk.bf16.mxu0 %vm819_vm4, %v3875_v31 }
 0x319   : > { %5223 = vmatmul.mubr.msk.bf16.gmra.mxu0 %vm819_vm4, %v3876_v4 }
 0x31a   : > { %5226 = vmatprep.mubr.msk.bf16.mxu0 %vm819_vm4, %v3877_v12 }
 0x321   : > { %5227 = vmatmul.mubr.msk.bf16.gmra.mxu0 %vm819_vm4, %v3878_v20 }
 0x322   : > { %5230 = vmatprep.mubr.msk.bf16.mxu0 %vm819_vm4, %v3879_v11 }
 0x329   : > { %5231 = vmatmul.mubr.msk.bf16.gmra.mxu0 %vm819_vm4, %v3880_v30 }
 0x32a   : > { %5234 = vmatprep.mubr.msk.bf16.mxu0 %vm819_vm4, %v3881_v25  ;;  %v1044_v25 = vadd.f32 %v7131_v53, %v6685_v22 }
 0x331   : > { %5235 = vmatmul.mubr.msk.bf16.gmra.mxu0 %vm819_vm4, %v3882_v62 }
 0x339   : > { %v5068_v0 = vpop.f32.mrf.mxu0 }
 0x33a   : > { %v6691_v61 = vadd.f32 %v5068_v0, %v1031_v43  ;;  %v1047_v43 = vadd.f32 %v7133_v27, %v6685_v22  ;;  %v7145_v27 = vld [vmem:[#allocation48_spill] sm:$0xff] }
 0x33b   : > { %v3022_v24 = vpop.f32.mrf.mxu0 }
 0x33c   : > { %v6695_v63 = vadd.f32 %v3022_v24, %v1029_v5  ;;  %v7134_v5 = vld [vmem:[#allocation34_spill] sm:$0xff] }
 0x33d   : > { %v5069_v7 = vpop.f32.mrf.mxu0  ;;  %v1045_v24 = vadd.f32 %v6685_v22, %v7134_v5 }
 0x33e   : > { %v6699_v29 = vadd.f32 %v5069_v7, %v1032_v36  ;;  %v7135_v7 = vld [vmem:[#allocation36_spill] sm:$0xff] }
 0x33f   : > { %v3025_v23 = vpop.f32.mrf.mxu0  ;;  %v1048_v8 = vadd.f32 %v7135_v7, %v6685_v22 }
 0x340   : > { %v6703_v2 = vadd.f32 %v3025_v23, %v1030_v54 }
 0x341   : > { %v5072_v40 = vpop.f32.mrf.mxu0 }
 0x342   : > { %v6707_v1 = vadd.f32 %v5072_v40, %v1035_v41  ;;  %v1046_v41 = vadd.f32 %v6685_v22, %v7136_v45 }
 0x343   : > { %v3038_v31 = vpop.f32.mrf.mxu0 }
 0x344   : > { %v6711_v39 = vadd.f32 %v3038_v31, %v1033_v3  ;;  %v7137_v3 = vld [vmem:[#allocation39_spill] sm:$0xff] }
 0x345   : > { %v5073_v59 = vpop.f32.mrf.mxu0  ;;  %v1051_v31 = vadd.f32 %v7137_v3, %v6685_v22  ;;  %v7151_v3 = vld [vmem:[#allocation51_spill] sm:$0xff] }
 0x346   : > { %v6715_v19 = vadd.f32 %v5073_v59, %v1036_v38  ;;  %v7138_v59 = vld [vmem:[#allocation40_spill] sm:$0xff] }
 0x347   : > { %v3041_v14 = vpop.f32.mrf.mxu0  ;;  %v1049_v18 = vadd.f32 %v6685_v22, %v7138_v59 }
 0x348   : > { %v6719_v16 = vadd.f32 %v3041_v14, %v1034_v49 }
 0x349   : > { %v5076_v12 = vpop.f32.mrf.mxu0 }
 0x34a   : > { %v6723_v4 = vadd.f32 %v5076_v12, %v1039_v55  ;;  %v1052_v55 = vadd.f32 %v7139_v37, %v6685_v22 }
 0x34b   : > { %v3054_v60 = vpop.f32.mrf.mxu0 }
 0x34c   : > { %v6727_v46 = vadd.f32 %v3054_v60, %v1037_v57  ;;  %v7140_v57 = vld [vmem:[#allocation43_spill] sm:$0xff] }
 0x34d   : > { %v5077_v26 = vpop.f32.mrf.mxu0  ;;  %v1050_v60 = vadd.f32 %v6685_v22, %v7140_v57 }
 0x34e   : > { %v6731_v15 = vadd.f32 %v5077_v26, %v1040_v17  ;;  %v7141_v26 = vld [vmem:[#allocation44_spill] sm:$0xff] }
 0x34f   : > { %v3057_v11 = vpop.f32.mrf.mxu0  ;;  %v1055_v58 = vadd.f32 %v7141_v26, %v6685_v22 }
 0x350   : > { %v6735_v20 = vadd.f32 %v3057_v11, %v1038_v13 }
 0x351   : > { %v5080_v35 = vpop.f32.mrf.mxu0 }
 0x352   : > { %v6739_v28 = vadd.f32 %v5080_v35, %v1043_v47  ;;  %v1053_v47 = vadd.f32 %v6685_v22, %v7142_v51 }
 0x353   : > { %v3070_v34 = vpop.f32.mrf.mxu0 }
 0x354   : > { %v6743_v30 = vadd.f32 %v3070_v34, %v1041_v56  ;;  %v7143_v56 = vld [vmem:[#allocation46_spill] sm:$0xff] }
 0x355   : > { %v5081_v50 = vpop.f32.mrf.mxu0  ;;  %v1056_v34 = vadd.f32 %v7143_v56, %v6685_v22 }
 0x356   : > { %v6747_v21 = vadd.f32 %v5081_v50, %v1044_v25  ;;  %v7144_v50 = vld [vmem:[#allocation47_spill] sm:$0xff] }
 0x357   : > { %v3073_v62 = vpop.f32.mrf.mxu0  ;;  %v1054_v6 = vadd.f32 %v6685_v22, %v7144_v50 }
 0x358   : > { %v6751_v0 = vadd.f32 %v3073_v62, %v1042_v33 }
 0x359   : > { %v5084_v32 = vpop.f32.mrf.mxu0 }
 0x35a   : > { %v6755_v44 = vadd.f32 %v5084_v32, %v1047_v43  ;;  %v1059_v43 = vadd.f32 %v7145_v27, %v6685_v22 }
 0x35b   : > { %v3086_v36 = vpop.f32.mrf.mxu0 }
 0x35c   : > { %v6759_v54 = vadd.f32 %v3086_v36, %v1045_v24  ;;  %v7147_v24 = vld [vmem:[#allocation49_spill] sm:$0xff] }
 0x35d   : > { %v5085_v23 = vpop.f32.mrf.mxu0  ;;  %v1057_v36 = vadd.f32 %v6685_v22, %v7147_v24 }
 0x35e   : > { %v6763_v40 = vadd.f32 %v5085_v23, %v1048_v8  ;;  %v7149_v23 = vld [vmem:[#allocation50_spill] sm:$0xff] }
 0x35f   : > { %v3089_v42 = vpop.f32.mrf.mxu0  ;;  %v1060_v45 = vadd.f32 %v7149_v23, %v6685_v22 }
 0x360   : > { %v6767_v9 = vadd.f32 %v3089_v42, %v1046_v41 }
 0x361   : > { %v5088_v38 = vpop.f32.mrf.mxu0 }
 0x362   : > { %v6771_v49 = vadd.f32 %v5088_v38, %v1051_v31  ;;  %v1058_v31 = vadd.f32 %v6685_v22, %v7151_v3 }
 0x363   : > { %v3102_v14 = vpop.f32.mrf.mxu0 }
 0x364   : > { %v6775_v12 = vadd.f32 %v3102_v14, %v1049_v18 }
 0x365   : > { %v5089_v48 = vpop.f32.mrf.mxu0 }
 0x366   : > { %v6779_v52 = vadd.f32 %v5089_v48, %v1052_v55 }
 0x367   : > { %v3105_v17 = vpop.f32.mrf.mxu0 }
 0x368   : > { %v6783_v13 = vadd.f32 %v3105_v17, %v1050_v60 }
 0x369   : > { %v5092_v11 = vpop.f32.mrf.mxu0 }
 0x36a   : > { %v6787_v35 = vadd.f32 %v5092_v11, %v1055_v58 }
 0x36b   : > { %v3118_v10 = vpop.f32.mrf.mxu0 }
 0x36c   : > { %v6791_v53 = vadd.f32 %v3118_v10, %v1053_v47 }
 0x36d   : > { %v5093_v25 = vpop.f32.mrf.mxu0 }
 0x36e   : > { %v6795_v33 = vadd.f32 %v5093_v25, %v1056_v34 }
 0x36f   : > { %v3121_v62 = vpop.f32.mrf.mxu0 }
 0x370   : > { %v6799_v32 = vadd.f32 %v3121_v62, %v1054_v6 }
 0x371   : > { %v5096_v5 = vpop.f32.mrf.mxu0 }
 0x372   : > { %7146 = vst [vmem:[#allocation59_spill] sm:$0xff] %v6799_v32  ;;  %v6803_v7 = vadd.f32 %v5096_v5, %v1059_v43 }
 0x373   : > { %v3134_v8 = vpop.f32.mrf.mxu0 }
 0x374   : > { %7148 = vst [vmem:[#allocation4_spill] sm:$0xff] %v6803_v7  ;;  %v6807_v41 = vadd.f32 %v3134_v8, %v1057_v36 }
 0x375   : > { %v5097_v42 = vpop.f32.mrf.mxu0 }
 0x376   : > { %7150 = vst [vmem:[#allocation2_spill] sm:$0xff] %v6807_v41  ;;  %v6811_v38 = vadd.f32 %v5097_v42, %v1060_v45 }
 0x377   : > { %v3137_v59 = vpop.f32.mrf.mxu0 }
 0x378   : > { %7152 = vst [vmem:[#allocation64_spill] sm:$0xff] %v6811_v38  ;;  %v6813_v18 = vadd.f32 %v3137_v59, %v1058_v31 }
 0x379   : > { %v5138_v14 = vpop.f32.mrf.mxu0 }
 0x37a   : > { %7153 = vst [vmem:[#allocation8_spill] sm:$0xff] %v6813_v18  ;;  %v3631_v18 = vadd.f32 %v5138_v14, %v6691_v61 }
 0x37b   : > { %v3502_v37 = vpop.f32.mrf.mxu0 }
 0x37c   : > { %v3629_v41 = vadd.f32 %v3502_v37, %v6695_v63 }
 0x37d   : > { %v5139_v55 = vpop.f32.mrf.mxu0 }
 0x37f   : > { %v3505_v48 = vpop.f32.mrf.mxu0 }
 0x380   : > { %v3630_v61 = vadd.f32 %v3505_v48, %v6703_v2 }
 0x381   : > { %v5142_v57 = vpop.f32.mrf.mxu0 }
 0x382   : > { %v3635_v14 = vadd.f32 %v5142_v57, %v6707_v1 }
 0x383   : > { %v3518_v60 = vpop.f32.mrf.mxu0 }
 0x385   : > { %v5143_v17 = vpop.f32.mrf.mxu0 }
 0x387   : > { %v3521_v26 = vpop.f32.mrf.mxu0 }
 0x389   : > { %v5146_v58 = vpop.f32.mrf.mxu0 }
 0x38b   : > { %v6815_v11 = vpop.f32.mrf.mxu0 }
 0x38d   : > { %v6817_v51 = vpop.f32.mrf.mxu0 }
 0x38f   : > { %v6819_v47 = vpop.f32.mrf.mxu0 }
 0x391   : > { %v6821_v22 = vpop.f32.mrf.mxu0 }
 0x393   : > { %v6823_v10 = vpop.f32.mrf.mxu0 }
 0x395   : > { %v6825_v56 = vpop.f32.mrf.mxu0 }
 0x397   : > { %v6827_v34 = vpop.f32.mrf.mxu0 }
 0x399   : > { %v6829_v25 = vpop.f32.mrf.mxu0 }
 0x39b   : > { %v6831_v50 = vpop.f32.mrf.mxu0 }
 0x39d   : > { %v6833_v6 = vpop.f32.mrf.mxu0 }
 0x39f   : > { %v6835_v62 = vpop.f32.mrf.mxu0 }
 0x3a1   : > { %v6837_v27 = vpop.f32.mrf.mxu0 }
 0x3a3   : > { %v6839_v43 = vpop.f32.mrf.mxu0 }
 0x3a5   : > { %v6841_v5 = vpop.f32.mrf.mxu0 }
 0x3a7   : > { %v6843_v24 = vpop.f32.mrf.mxu0 }
 0x3a9   : > { %v6845_v36 = vpop.f32.mrf.mxu0 }
 0x3ab   : > { %v6847_v8 = vpop.f32.mrf.mxu0 }
 0x3ad   : > { %v6849_v23 = vpop.f32.mrf.mxu0 }
 0x3ae   : > { %7154 = vst [vmem:[#allocation60_spill] sm:$0xff] %v6849_v23 }
 0x3af   : > { %v6851_v45 = vpop.f32.mrf.mxu0 }
 0x3b0   : > { %7155 = vst [vmem:[#allocation5_spill] sm:$0xff] %v6851_v45 }
 0x3b1   : > { %v6853_v42 = vpop.f32.mrf.mxu0 }
 0x3b2   : > { %7156 = vst [vmem:[#allocation3_spill] sm:$0xff] %v6853_v42 }
 0x3b3   : > { %v6855_v3 = vpop.f32.mrf.mxu0 }
 0x3b4   : > { %7157 = vst [vmem:[#allocation66_spill] sm:$0xff] %v6855_v3 }
 0x3b5   : > { %v6857_v31 = vpop.f32.mrf.mxu0 }
 0x3b6   : > { %7158 = vst [vmem:[#allocation61_spill] sm:$0xff] %v6857_v31  ;;  %v3632_v31 = vadd.f32 %v5139_v55, %v6699_v29  ;;  %v3633_v29 = vadd.f32 %v3518_v60, %v6711_v39  ;;  %v3636_v55 = vadd.f32 %v5143_v17, %v6715_v19 }
 0x3b7   : > { %v6859_v59 = vpop.f32.mrf.mxu0 }
 0x3b8   : > { %7159 = vst [vmem:[#allocation9_spill] sm:$0xff] %v6859_v59 }
 0x3b9   : > { %v5208_v38 = vpop.f32.mrf.mxu0 }
 0x3ba   : > { %v4111_v7 = vadd.f32 %v5208_v38, %v3631_v18 }
 0x3bb   : > { %v3982_v42 = vpop.f32.mrf.mxu0 }
 0x3bc   : > { %v4143_v3 = vmax.f32 %v4111_v7, 0.0  ;;  %v4109_v59 = vadd.f32 %v3982_v42, %v3629_v41 }
 0x3bd   : > { %v5209_v45 = vpop.f32.mrf.mxu0 }
 0x3be   : > { %4175 = vst.msk [vmem:[%s6867_s13 + $0x10] sm:$0xff] %vm819_vm4, %v4143_v3  ;;  %v4141_v63 = vmax.f32 %v4109_v59, 0.0  ;;  %v4112_v38 = vadd.f32 %v5209_v45, %v3632_v31  ;;  %v3634_v45 = vadd.f32 %v3521_v26, %v6719_v16  ;;  %v3637_v3 = vadd.f32 %v6815_v11, %v6727_v46 }
 0x3bf   : > { %v3985_v18 = vpop.f32.mrf.mxu0  ;;  %v3640_v59 = vadd.f32 %v6817_v51, %v6731_v15 }
 0x3c0   : > { %4173 = vst.msk [vmem:[%s6867_s13] sm:$0xff] %vm819_vm4, %v4141_v63  ;;  %v4144_v37 = vmax.f32 %v4112_v38, 0.0  ;;  %v4110_v32 = vadd.f32 %v3985_v18, %v3630_v61  ;;  %v3638_v63 = vadd.f32 %v6819_v47, %v6735_v20  ;;  %v3643_v18 = vadd.f32 %v6821_v22, %v6739_v28 }
 0x3c1   : > { %v5212_v23 = vpop.f32.mrf.mxu0 }
 0x3c2   : > { %4176 = vst.msk [vmem:[%s6867_s13 + $0x18] sm:$0xff] %vm819_vm4, %v4144_v37  ;;  %v4142_v2 = vmax.f32 %v4110_v32, 0.0  ;;  %v4115_v7 = vadd.f32 %v5212_v23, %v3635_v14  ;;  %v3639_v32 = vadd.f32 %v5146_v58, %v6723_v4  ;;  %v3641_v37 = vadd.f32 %v6823_v10, %v6743_v30 }
 0x3c3   : > { %v3998_v41 = vpop.f32.mrf.mxu0 }
 0x3c4   : > { %4174 = vst.msk [vmem:[%s6867_s13 + $0x8] sm:$0xff] %vm819_vm4, %v4142_v2  ;;  %v4147_v1 = vmax.f32 %v4115_v7, 0.0  ;;  %v4113_v48 = vadd.f32 %v3998_v41, %v3633_v29  ;;  %v3644_v2 = vadd.f32 %v6825_v56, %v6747_v21  ;;  %v3642_v41 = vadd.f32 %v6827_v34, %v6751_v0 }
 0x3c5   : > { %v5213_v57 = vpop.f32.mrf.mxu0 }
 0x3c6   : > { %4179 = vst.msk [vmem:[%s6867_s13 + $0x30] sm:$0xff] %vm819_vm4, %v4147_v1  ;;  %v4145_v39 = vmax.f32 %v4113_v48, 0.0  ;;  %v4116_v60 = vadd.f32 %v5213_v57, %v3636_v55  ;;  %v3647_v1 = vadd.f32 %v6829_v25, %v6755_v44  ;;  %v3645_v57 = vadd.f32 %v6831_v50, %v6759_v54 }
 0x3c7   : > { %v4001_v42 = vpop.f32.mrf.mxu0 }
 0x3c8   : > { %4177 = vst.msk [vmem:[%s6867_s13 + $0x20] sm:$0xff] %vm819_vm4, %v4145_v39  ;;  %v4148_v19 = vmax.f32 %v4116_v60, 0.0  ;;  %v4114_v17 = vadd.f32 %v4001_v42, %v3634_v45  ;;  %v3648_v39 = vadd.f32 %v6833_v6, %v6763_v40  ;;  %v3646_v42 = vadd.f32 %v6835_v62, %v6767_v9 }
 0x3c9   : > { %v5216_v23 = vpop.f32.mrf.mxu0 }
 0x3ca   : > { %4180 = vst.msk [vmem:[%s6867_s13 + $0x38] sm:$0xff] %vm819_vm4, %v4148_v19  ;;  %v4146_v16 = vmax.f32 %v4114_v17, 0.0  ;;  %v4119_v26 = vadd.f32 %v5216_v23, %v3639_v32  ;;  %v3651_v19 = vadd.f32 %v6837_v27, %v6771_v49  ;;  %v3649_v23 = vadd.f32 %v6839_v43, %v6775_v12 }
 0x3cb   : > { %v4014_v31 = vpop.f32.mrf.mxu0 }
 0x3cc   : > { %4178 = vst.msk [vmem:[%s6867_s13 + $0x28] sm:$0xff] %vm819_vm4, %v4146_v16  ;;  %v4151_v4 = vmax.f32 %v4119_v26, 0.0  ;;  %v4117_v58 = vadd.f32 %v4014_v31, %v3637_v3  ;;  %v3652_v16 = vadd.f32 %v6841_v5, %v6779_v52  ;;  %v3650_v31 = vadd.f32 %v6843_v24, %v6783_v13 }
 0x3cd   : > { %v5217_v61 = vpop.f32.mrf.mxu0 }
 0x3ce   : > { %4183 = vst.msk [vmem:[%s6867_s13 + $0x50] sm:$0xff] %vm819_vm4, %v4151_v4  ;;  %v4149_v46 = vmax.f32 %v4117_v58, 0.0  ;;  %v4120_v11 = vadd.f32 %v5217_v61, %v3640_v59  ;;  %v3655_v4 = vadd.f32 %v6845_v36, %v6787_v35  ;;  %v3653_v61 = vadd.f32 %v6847_v8, %v6791_v53 }
 0x3cf   : > { %v4017_v38 = vpop.f32.mrf.mxu0 }
 0x3d0   : > { %4181 = vst.msk [vmem:[%s6867_s13 + $0x40] sm:$0xff] %vm819_vm4, %v4149_v46  ;;  %v4152_v15 = vmax.f32 %v4120_v11, 0.0  ;;  %v4118_v51 = vadd.f32 %v4017_v38, %v3638_v63  ;;  %v7160_v46 = vld [vmem:[#allocation60_spill] sm:$0xff] }
 0x3d1   : > { %v5220_v14 = vpop.f32.mrf.mxu0  ;;  %v3656_v11 = vadd.f32 %v7160_v46, %v6795_v33 }
 0x3d2   : > { %4184 = vst.msk [vmem:[%s6867_s13 + $0x58] sm:$0xff] %vm819_vm4, %v4152_v15  ;;  %v4150_v20 = vmax.f32 %v4118_v51, 0.0  ;;  %v4123_v47 = vadd.f32 %v5220_v14, %v3643_v18  ;;  %v7161_v18 = vld [vmem:[#allocation59_spill] sm:$0xff]  ;;  %v7162_v15 = vld [vmem:[#allocation5_spill] sm:$0xff] }
 0x3d3   : > { %v4030_v29 = vpop.f32.mrf.mxu0  ;;  %v3654_v51 = vadd.f32 %v7162_v15, %v7161_v18 }
 0x3d4   : > { %4182 = vst.msk [vmem:[%s6867_s13 + $0x48] sm:$0xff] %vm819_vm4, %v4150_v20  ;;  %v4155_v28 = vmax.f32 %v4123_v47, 0.0  ;;  %v4121_v22 = vadd.f32 %v4030_v29, %v3641_v37  ;;  %v7163_v37 = vld [vmem:[#allocation4_spill] sm:$0xff]  ;;  %v7164_v20 = vld [vmem:[#allocation3_spill] sm:$0xff] }
 0x3d5   : > { %v5221_v7 = vpop.f32.mrf.mxu0  ;;  %v3659_v47 = vadd.f32 %v7164_v20, %v7163_v37 }
 0x3d6   : > { %4187 = vst.msk [vmem:[%s6867_s13 + $0x70] sm:$0xff] %vm819_vm4, %v4155_v28  ;;  %v4153_v30 = vmax.f32 %v4121_v22, 0.0  ;;  %v4124_v10 = vadd.f32 %v5221_v7, %v3644_v2  ;;  %v7165_v28 = vld [vmem:[#allocation2_spill] sm:$0xff] }
 0x3d7   : > { %v4033_v55 = vpop.f32.mrf.mxu0  ;;  %v7166_v22 = vld [vmem:[#allocation66_spill] sm:$0xff] }
 0x3d8   : > { %4185 = vst.msk [vmem:[%s6867_s13 + $0x60] sm:$0xff] %vm819_vm4, %v4153_v30  ;;  %v4156_v21 = vmax.f32 %v4124_v10, 0.0  ;;  %v4122_v56 = vadd.f32 %v4033_v55, %v3642_v41  ;;  %v3657_v7 = vadd.f32 %v7166_v22, %v7165_v28  ;;  %v7167_v55 = vld [vmem:[#allocation64_spill] sm:$0xff] }
 0x3d9   : > { %v5224_v48 = vpop.f32.mrf.mxu0 }
 0x3da   : > { %4188 = vst.msk [vmem:[%s6867_s13 + $0x78] sm:$0xff] %vm819_vm4, %v4156_v21  ;;  %v4154_v0 = vmax.f32 %v4122_v56, 0.0  ;;  %v4127_v34 = vadd.f32 %v5224_v48, %v3647_v1  ;;  %v7168_v1 = vld [vmem:[#allocation61_spill] sm:$0xff] }
 0x3db   : > { %v4046_v45 = vpop.f32.mrf.mxu0  ;;  %v3660_v21 = vadd.f32 %v7168_v1, %v7167_v55 }
 0x3dc   : > { %4186 = vst.msk [vmem:[%s6867_s13 + $0x68] sm:$0xff] %vm819_vm4, %v4154_v0  ;;  %v4159_v44 = vmax.f32 %v4127_v34, 0.0  ;;  %v4125_v25 = vadd.f32 %v4046_v45, %v3645_v57  ;;  %v7169_v0 = vld [vmem:[#allocation8_spill] sm:$0xff]  ;;  %v7170_v34 = vld [vmem:[#allocation9_spill] sm:$0xff] }
 0x3dd   : > { %v5225_v60 = vpop.f32.mrf.mxu0  ;;  %v3658_v45 = vadd.f32 %v7170_v34, %v7169_v0 }
 0x3de   : > { %4191 = vst.msk [vmem:[%s6867_s13 + $0x90] sm:$0xff] %vm819_vm4, %v4159_v44  ;;  %v4157_v54 = vmax.f32 %v4125_v25, 0.0  ;;  %v4128_v50 = vadd.f32 %v5225_v60, %v3648_v39 }
 0x3df   : > { %v4049_v32 = vpop.f32.mrf.mxu0 }
 0x3e0   : > { %4189 = vst.msk [vmem:[%s6867_s13 + $0x80] sm:$0xff] %vm819_vm4, %v4157_v54  ;;  %v4160_v40 = vmax.f32 %v4128_v50, 0.0  ;;  %v4126_v6 = vadd.f32 %v4049_v32, %v3646_v42 }
 0x3e1   : > { %v5228_v17 = vpop.f32.mrf.mxu0 }
 0x3e2   : > { %4192 = vst.msk [vmem:[%s6867_s13 + $0x98] sm:$0xff] %vm819_vm4, %v4160_v40  ;;  %v4158_v9 = vmax.f32 %v4126_v6, 0.0  ;;  %v4131_v62 = vadd.f32 %v5228_v17, %v3651_v19 }
 0x3e3   : > { %v4062_v3 = vpop.f32.mrf.mxu0 }
 0x3e4   : > { %4190 = vst.msk [vmem:[%s6867_s13 + $0x88] sm:$0xff] %vm819_vm4, %v4158_v9  ;;  %v4163_v49 = vmax.f32 %v4131_v62, 0.0  ;;  %v4129_v27 = vadd.f32 %v4062_v3, %v3649_v23 }
 0x3e5   : > { %v5229_v26 = vpop.f32.mrf.mxu0 }
 0x3e6   : > { %4195 = vst.msk [vmem:[%s6867_s13 + $0xb0] sm:$0xff] %vm819_vm4, %v4163_v49  ;;  %v4161_v12 = vmax.f32 %v4129_v27, 0.0  ;;  %v4132_v43 = vadd.f32 %v5229_v26, %v3652_v16 }
 0x3e7   : > { %v4065_v59 = vpop.f32.mrf.mxu0 }
 0x3e8   : > { %4193 = vst.msk [vmem:[%s6867_s13 + $0xa0] sm:$0xff] %vm819_vm4, %v4161_v12  ;;  %v4164_v52 = vmax.f32 %v4132_v43, 0.0  ;;  %v4130_v5 = vadd.f32 %v4065_v59, %v3650_v31 }
 0x3e9   : > { %v5232_v58 = vpop.f32.mrf.mxu0 }
 0x3ea   : > { %4196 = vst.msk [vmem:[%s6867_s13 + $0xb8] sm:$0xff] %vm819_vm4, %v4164_v52  ;;  %v4162_v13 = vmax.f32 %v4130_v5, 0.0  ;;  %v4135_v24 = vadd.f32 %v5232_v58, %v3655_v4 }
 0x3eb   : > { %v4078_v63 = vpop.f32.mrf.mxu0 }
 0x3ec   : > { %4194 = vst.msk [vmem:[%s6867_s13 + $0xa8] sm:$0xff] %vm819_vm4, %v4162_v13  ;;  %v4167_v35 = vmax.f32 %v4135_v24, 0.0  ;;  %v4133_v36 = vadd.f32 %v4078_v63, %v3653_v61 }
 0x3ed   : > { %v5233_v38 = vpop.f32.mrf.mxu0 }
 0x3ee   : > { %4199 = vst.msk [vmem:[%s6867_s13 + $0xd0] sm:$0xff] %vm819_vm4, %v4167_v35  ;;  %v4165_v53 = vmax.f32 %v4133_v36, 0.0  ;;  %v4136_v8 = vadd.f32 %v5233_v38, %v3656_v11 }
 0x3ef   : > { %v4081_v14 = vpop.f32.mrf.mxu0 }
 0x3f0   : > { %4197 = vst.msk [vmem:[%s6867_s13 + $0xc0] sm:$0xff] %vm819_vm4, %v4165_v53  ;;  %v4168_v33 = vmax.f32 %v4136_v8, 0.0  ;;  %v4134_v29 = vadd.f32 %v4081_v14, %v3654_v51 }
 0x3f1   : > { %v5236_v2 = vpop.f32.mrf.mxu0 }
 0x3f2   : > { %4200 = vst.msk [vmem:[%s6867_s13 + $0xd8] sm:$0xff] %vm819_vm4, %v4168_v33  ;;  %v4166_v41 = vmax.f32 %v4134_v29, 0.0  ;;  %v4139_v30 = vadd.f32 %v5236_v2, %v3659_v47 }
 0x3f3   : > { %v4094_v10 = vpop.f32.mrf.mxu0 }
 0x3f4   : > { %4198 = vst.msk [vmem:[%s6867_s13 + $0xc8] sm:$0xff] %vm819_vm4, %v4166_v41  ;;  %v4171_v56 = vmax.f32 %v4139_v30, 0.0  ;;  %v4137_v48 = vadd.f32 %v4094_v10, %v3657_v7 }
 0x3f5   : > { %v5237_v57 = vpop.f32.mrf.mxu0 }
 0x3f6   : > { %4203 = vst.msk [vmem:[%s6867_s13 + $0xf0] sm:$0xff] %vm819_vm4, %v4171_v56  ;;  %v4169_v39 = vmax.f32 %v4137_v48, 0.0  ;;  %v4140_v44 = vadd.f32 %v5237_v57, %v3660_v21 }
 0x3f7   : > { %v4097_v25 = vpop.f32.mrf.mxu0 }
 0x3f8   : > { %4201 = vst.msk [vmem:[%s6867_s13 + $0xe0] sm:$0xff] %vm819_vm4, %v4169_v39  ;;  %v4172_v60 = vmax.f32 %v4140_v44, 0.0  ;;  %v4138_v42 = vadd.f32 %v4097_v25, %v3658_v45 }
 0x3fa   : > { %4204 = vst.msk [vmem:[%s6867_s13 + $0xf8] sm:$0xff] %vm819_vm4, %v4172_v60  ;;  %v4170_v54 = vmax.f32 %v4138_v42, 0.0 }
 0x3fc   : > { %4202 = vst.msk [vmem:[%s6867_s13 + $0xe8] sm:$0xff] %vm819_vm4, %v4170_v54 }
 0x3fd PF: > { %s16_s21 = sadd.s32 1, %s5324_s21  }
 0x3fe   : > { %p13_p4 = scmp.ge.s32.totalorder %s16_s21, 4  }
 0x400   :  { %15 = sbr.rel (!%p13_p4) target bundleno = 1 (0x1), region = 94 }

</bundles_post_ra>
